<compile_context>
chip_gen: v6e
topology: v6e:2x2x1
jax: 0.10.0
libtpu: 0.0.40
codegen_flags: <defaults>
</compile_context>

<pallas_src>
import jax
import jax.numpy as jnp
from jax.experimental import pallas as pl
from jax.experimental.pallas import tpu as pltpu


C_MID = 64       # conv1 / conv2 output channels
C_OUT = 27       # conv3 output channels (3 * r * r, r = 3)
C_OUT_PAD = 32   # conv3 channels padded for lane-aligned MXU output
K_COL = 32       # conv1 im2col contraction (3*3*3 = 27 taps, padded to 32)
R = 3            # pixel-shuffle upscale factor


def _make_fused_kernel(H, W):
    """Fused conv1->relu->conv2->relu->conv3->relu for one batch element,
    operating in flat padded-pixel space."""
    Hp, Wp = H + 2, W + 2
    P = Hp * Wp                 # number of padded-domain pixels
    G = Wp + 1                  # guard rows at each end (max |tap offset|)
    # flat offset of tap (ky, kx) relative to the output pixel
    offs = [(ky - 1) * Wp + (kx - 1) for ky in range(3) for kx in range(3)]

    def kernel(mask_ref, xcol_ref, w1_ref, b1_ref, w2_ref, b2_ref,
               w3_ref, b3_ref, o_ref, a1_ref, a2_ref):
        # mask_ref: (P, 1)       1.0 on interior pixels, 0.0 on the padding ring
        # xcol_ref: (1, P, 32)   im2col'd input over the padded domain
        # w1_ref:   (32, 64)     conv1 weights, im2col layout (zero-padded rows)
        # b1_ref:   (1, 64)
        # w2_ref:   (9, 64, 64)  conv2 weights, one (Cin, Cout) slab per tap
        # b2_ref:   (1, 64)
        # w3_ref:   (9, 64, 32)  conv3 weights, Cout padded 27 -> 32
        # b3_ref:   (1, 32)
        # o_ref:    (1, P, 32)   flat padded-domain output block
        # a1_ref, a2_ref: (P + 2G, 64) f32 VMEM activations (guard rows never
        #                 written; any garbage they hold is masked out below)

        interior = mask_ref[...] != 0.0          # (P, 1) bool

        # ---------- conv1: one (P, 32) x (32, 64) MXU matmul + bias + ReLU ----
        y1 = jnp.dot(xcol_ref[0], w1_ref[...],
                     preferred_element_type=jnp.float32)
        y1 = jnp.maximum(y1 + b1_ref[...], 0.0)
        # Border-ring rows forced to exact zero (they are conv2's 'same' halo).
        a1_ref[G:G + P, :] = jnp.where(interior, y1, 0.0)

        # ---------- conv2: 9 contiguous shifted slices, value accumulation ----
        acc2 = None
        for t, off in enumerate(offs):
            c = jnp.dot(a1_ref[G + off:G + off + P, :], w2_ref[t],
                        preferred_element_type=jnp.float32)
            acc2 = c if acc2 is None else acc2 + c
        y2 = jnp.maximum(acc2 + b2_ref[...], 0.0)
        a2_ref[G:G + P, :] = jnp.where(interior, y2, 0.0)

        # ---------- conv3: same pattern, writes the VMEM-resident output -----
        acc3 = None
        for t, off in enumerate(offs):
            c = jnp.dot(a2_ref[G + off:G + off + P, :], w3_ref[t],
                        preferred_element_type=jnp.float32)
            acc3 = c if acc3 is None else acc3 + c
        # ReLU after conv3 matches the PyTorch module (relu(conv3(x)) -> PS).
        y3 = jnp.maximum(acc3 + b3_ref[...], 0.0)
        o_ref[0] = jnp.where(interior, y3, 0.0)

    return kernel, P, G


def _im2col_3x3_padded_domain(x_nhwc):
    """(N, H, W, C) -> (N, (H+2)*(W+2), 9*C): im2col of conv1 evaluated over
    the *padded* output domain (border rows are masked inside the kernel).
    Tap order (ky, kx, cin) matches w.reshape(9*C, Cout) of an HWIO weight."""
    N, H, W, C = x_nhwc.shape
    Hp, Wp = H + 2, W + 2
    xp = jnp.pad(x_nhwc, ((0, 0), (2, 2), (2, 2), (0, 0)))
    cols = [xp[:, ky:ky + Hp, kx:kx + Wp, :]
            for ky in range(3) for kx in range(3)]
    return jnp.concatenate(cols, axis=-1).reshape(N, Hp * Wp, 9 * C)


def _pixel_shuffle_to_nchw(y_nhwc):
    """(N, H, W, 27) conv3 output -> PixelShuffle(3) in NCHW (N, 3, 3H, 3W)."""
    N, H, W, _ = y_nhwc.shape
    y = y_nhwc.reshape(N, H, W, 3, R, R)          # (N, H, W, c, ry, rx)
    y = jnp.transpose(y, (0, 3, 1, 4, 2, 5))      # (N, c, H, ry, W, rx)
    return y.reshape(N, 3, H * R, W * R)


def super_resolution_fused(x_nhwc, params):
    N, H, W, _ = x_nhwc.shape
    Hp, Wp = H + 2, W + 2
    kernel, P, G = _make_fused_kernel(H, W)

    # conv1 im2col (tiny input tensor; one-time XLA layout op).
    xcol = _im2col_3x3_padded_domain(x_nhwc)                     # (N, P, 27)
    xcol = jnp.pad(xcol, ((0, 0), (0, 0), (0, K_COL - 27)))      # (N, P, 32)

    # Interior mask over the padded pixel grid.
    yy = jnp.arange(Hp)[:, None]
    xx = jnp.arange(Wp)[None, :]
    interior = (yy >= 1) & (yy <= H) & (xx >= 1) & (xx <= W)
    mask = interior.astype(jnp.float32).reshape(P, 1)

    # Weight / bias re-layouts (pure plumbing, fused by XLA).
    w1 = jnp.pad(params["w1"].reshape(27, C_MID), ((0, K_COL - 27), (0, 0)))
    b1 = params["b1"].reshape(1, C_MID)
    w2 = params["w2"].reshape(9, C_MID, C_MID)
    b2 = params["b2"].reshape(1, C_MID)
    w3 = jnp.pad(params["w3"], ((0, 0), (0, 0), (0, 0), (0, C_OUT_PAD - C_OUT)))
    w3 = w3.reshape(9, C_MID, C_OUT_PAD)
    b3 = jnp.pad(params["b3"], (0, C_OUT_PAD - C_OUT)).reshape(1, C_OUT_PAD)

    out_flat = pl.pallas_call(
        kernel,
        out_shape=jax.ShapeDtypeStruct((N, P, C_OUT_PAD), jnp.float32),
        grid=(N,),
        in_specs=[
            pl.BlockSpec((P, 1), lambda n: (0, 0)),               # mask
            pl.BlockSpec((1, P, K_COL), lambda n: (n, 0, 0)),     # xcol
            pl.BlockSpec((K_COL, C_MID), lambda n: (0, 0)),       # w1
            pl.BlockSpec((1, C_MID), lambda n: (0, 0)),           # b1
            pl.BlockSpec((9, C_MID, C_MID), lambda n: (0, 0, 0)), # w2
            pl.BlockSpec((1, C_MID), lambda n: (0, 0)),           # b2
            pl.BlockSpec((9, C_MID, C_OUT_PAD), lambda n: (0, 0, 0)),  # w3
            pl.BlockSpec((1, C_OUT_PAD), lambda n: (0, 0)),       # b3
        ],
        out_specs=pl.BlockSpec((1, P, C_OUT_PAD), lambda n: (n, 0, 0)),
        scratch_shapes=[
            pltpu.VMEM((P + 2 * G, C_MID), jnp.float32),   # a1 (flat, guarded)
            pltpu.VMEM((P + 2 * G, C_MID), jnp.float32),   # a2 (flat, guarded)
        ],
        compiler_params=pltpu.CompilerParams(
            dimension_semantics=("parallel",)),
    )(mask, xcol, w1, b1, w2, b2, w3, b3)

    # Extract interior pixels, drop channel padding, pixel-shuffle to NCHW.
    y = out_flat.reshape(N, Hp, Wp, C_OUT_PAD)[:, 1:H + 1, 1:W + 1, :C_OUT]
    return _pixel_shuffle_to_nchw(y)


@jax.jit
def super_resolution_forward(x_nchw, params):
    x = jnp.transpose(x_nchw, (0, 2, 3, 1))     # NCHW -> NHWC
    return super_resolution_fused(x, params)    # NCHW out (N, 3, 3H, 3W)


def init_params(key):
    """Deterministic synthetic parameters with PyTorch-equivalent shapes,
    stored in HWIO layout (3, 3, Cin, Cout)."""
    def conv_init(k, cin, cout):
        kw, kb = jax.random.split(k)
        fan_in = cin * 9
        bound = 1.0 / jnp.sqrt(fan_in)
        w = jax.random.uniform(kw, (3, 3, cin, cout), jnp.float32, -bound, bound)
        b = jax.random.uniform(kb, (cout,), jnp.float32, -bound, bound)
        return w, b

    k1, k2, k3 = jax.random.split(key, 3)
    w1, b1 = conv_init(k1, 3, C_MID)
    w2, b2 = conv_init(k2, C_MID, C_MID)
    w3, b3 = conv_init(k3, C_MID, C_OUT)
    return dict(w1=w1, b1=b1, w2=w2, b2=b2, w3=w3, b3=b3)


def _reference_forward(x_nchw, params):
    """Pure-JAX reference (lax conv) matching the PyTorch module."""
    x = jnp.transpose(x_nchw, (0, 2, 3, 1))
    dn = ("NHWC", "HWIO", "NHWC")
    for wk, bk in (("w1", "b1"), ("w2", "b2"), ("w3", "b3")):
        x = jax.lax.conv_general_dilated(
            x, params[wk], window_strides=(1, 1), padding="SAME",
            dimension_numbers=dn)
        x = jnp.maximum(x + params[bk], 0.0)
    return _pixel_shuffle_to_nchw(x)


if __name__ == "__main__":
    key = jax.random.PRNGKey(0)
    k_params, k_x = jax.random.split(key)
    params = init_params(k_params)

    # Small input consistent with the module: batch=2, C=3, H=W=16.
    x = jax.random.normal(k_x, (2, 3, 16, 16), jnp.float32)

    out = jax.block_until_ready(super_resolution_forward(x, params))
    assert out.shape == (2, 3, 48, 48), out.shape

    ref = jax.block_until_ready(_reference_forward(x, params))
    assert jnp.max(jnp.abs(out - ref)) < 2e-4

    print("KERNEL_OK")
</pallas_src>

<mosaic_0001>
module attributes {stable_mosaic.version = 11 : i64} {
  func.func @kernel(%arg0: i32, %arg1: memref<324x1xf32, #tpu.memory_space<vmem>>, %arg2: memref<1x324x32xf32, #tpu.memory_space<vmem>>, %arg3: memref<32x64xf32, #tpu.memory_space<vmem>>, %arg4: memref<1x64xf32, #tpu.memory_space<vmem>>, %arg5: memref<9x64x64xf32, #tpu.memory_space<vmem>>, %arg6: memref<1x64xf32, #tpu.memory_space<vmem>>, %arg7: memref<9x64x32xf32, #tpu.memory_space<vmem>>, %arg8: memref<1x32xf32, #tpu.memory_space<vmem>>, %arg9: memref<1x324x32xf32, #tpu.memory_space<vmem>>, %arg10: memref<362x64xf32, #tpu.memory_space<vmem>>, %arg11: memref<362x64xf32, #tpu.memory_space<vmem>>) attributes {dimension_semantics = [#tpu.dimension_semantics<parallel>], iteration_bounds = array<i64: 2>, scalar_prefetch = 0 : i64, scratch_operands = 2 : i64, tpu.core_type = #tpu.core_type<tc>, window_params = [{pipeline_mode = #tpu.pipeline_mode<synchronous>, transform_indices = @transform_0, window_bounds = array<i64: 324, 1>}, {transform_indices = @transform_1, window_bounds = array<i64: 1, 324, 32>}, {pipeline_mode = #tpu.pipeline_mode<synchronous>, transform_indices = @transform_2, window_bounds = array<i64: 32, 64>}, {pipeline_mode = #tpu.pipeline_mode<synchronous>, transform_indices = @transform_3, window_bounds = array<i64: 1, 64>}, {pipeline_mode = #tpu.pipeline_mode<synchronous>, transform_indices = @transform_4, window_bounds = array<i64: 9, 64, 64>}, {pipeline_mode = #tpu.pipeline_mode<synchronous>, transform_indices = @transform_5, window_bounds = array<i64: 1, 64>}, {pipeline_mode = #tpu.pipeline_mode<synchronous>, transform_indices = @transform_6, window_bounds = array<i64: 9, 64, 32>}, {pipeline_mode = #tpu.pipeline_mode<synchronous>, transform_indices = @transform_7, window_bounds = array<i64: 1, 32>}, {transform_indices = @transform_8, window_bounds = array<i64: 1, 324, 32>}]} {
    %c0 = arith.constant 0 : index
    %c0_0 = arith.constant 0 : index
    %0 = vector.load %arg1[%c0, %c0_0] : memref<324x1xf32, #tpu.memory_space<vmem>>, vector<324x1xf32>
    %cst = arith.constant 0.000000e+00 : f32
    %1 = vector.broadcast %cst : f32 to vector<324x1xf32>
    %2 = arith.cmpf one, %0, %1 : vector<324x1xf32>
    %c0_1 = arith.constant 0 : index
    %c0_2 = arith.constant 0 : index
    %c0_3 = arith.constant 0 : index
    %3 = vector.load %arg2[%c0_1, %c0_2, %c0_3] : memref<1x324x32xf32, #tpu.memory_space<vmem>>, vector<1x324x32xf32>
    %4 = vector.shape_cast %3 : vector<1x324x32xf32> to vector<324x32xf32>
    %c0_4 = arith.constant 0 : index
    %c0_5 = arith.constant 0 : index
    %5 = vector.load %arg3[%c0_4, %c0_5] : memref<32x64xf32, #tpu.memory_space<vmem>>, vector<32x64xf32>
    %cst_6 = arith.constant dense<0.000000e+00> : vector<324x64xf32>
    %6 = tpu.matmul %4, %5, %cst_6 {dimension_numbers = #tpu.dot_dimension_numbers<[1], [0], [0], [1], [0, 0, 1, 1], [], []>} : vector<324x32xf32>, vector<32x64xf32>, vector<324x64xf32> -> vector<324x64xf32>
    %c0_7 = arith.constant 0 : index
    %c0_8 = arith.constant 0 : index
    %7 = vector.load %arg4[%c0_7, %c0_8] : memref<1x64xf32, #tpu.memory_space<vmem>>, vector<1x64xf32>
    %8 = vector.broadcast %7 : vector<1x64xf32> to vector<324x64xf32>
    %9 = arith.addf %6, %8 : vector<324x64xf32>
    %cst_9 = arith.constant 0.000000e+00 : f32
    %10 = vector.broadcast %cst_9 : f32 to vector<324x64xf32>
    %11 = arith.maximumf %9, %10 : vector<324x64xf32>
    %cst_10 = arith.constant 0.000000e+00 : f32
    %12 = vector.shape_cast %2 : vector<324x1xi1> to vector<324x1xi1>
    %13 = vector.broadcast %12 : vector<324x1xi1> to vector<324x64xi1>
    %14 = vector.broadcast %cst_10 : f32 to vector<324x64xf32>
    %15 = arith.select %13, %11, %14 : vector<324x64xi1>, vector<324x64xf32>
    %c19 = arith.constant 19 : index
    %c0_11 = arith.constant 0 : index
    %16 = vector.load %arg10[%c19, %c0_11] : memref<362x64xf32, #tpu.memory_space<vmem>>, vector<324x64xf32>
    tpu.vector_store %arg10[%c19, %c0_11], %15 {strides = array<i32>} : memref<362x64xf32, #tpu.memory_space<vmem>>, vector<324x64xf32>,
    %c0_12 = arith.constant 0 : index
    %c0_13 = arith.constant 0 : index
    %17 = vector.load %arg10[%c0_12, %c0_13] : memref<362x64xf32, #tpu.memory_space<vmem>>, vector<324x64xf32>
    %c0_14 = arith.constant 0 : index
    %c0_15 = arith.constant 0 : index
    %c0_16 = arith.constant 0 : index
    %18 = vector.load %arg5[%c0_14, %c0_15, %c0_16] : memref<9x64x64xf32, #tpu.memory_space<vmem>>, vector<1x64x64xf32>
    %19 = vector.shape_cast %18 : vector<1x64x64xf32> to vector<64x64xf32>
    %cst_17 = arith.constant dense<0.000000e+00> : vector<324x64xf32>
    %20 = tpu.matmul %17, %19, %cst_17 {dimension_numbers = #tpu.dot_dimension_numbers<[1], [0], [0], [1], [0, 0, 1, 1], [], []>} : vector<324x64xf32>, vector<64x64xf32>, vector<324x64xf32> -> vector<324x64xf32>
    %c1 = arith.constant 1 : index
    %c0_18 = arith.constant 0 : index
    %21 = vector.load %arg10[%c1, %c0_18] : memref<362x64xf32, #tpu.memory_space<vmem>>, vector<324x64xf32>
    %c1_19 = arith.constant 1 : index
    %c0_20 = arith.constant 0 : index
    %c0_21 = arith.constant 0 : index
    %22 = vector.load %arg5[%c1_19, %c0_20, %c0_21] : memref<9x64x64xf32, #tpu.memory_space<vmem>>, vector<1x64x64xf32>
    %23 = vector.shape_cast %22 : vector<1x64x64xf32> to vector<64x64xf32>
    %cst_22 = arith.constant dense<0.000000e+00> : vector<324x64xf32>
    %24 = tpu.matmul %21, %23, %cst_22 {dimension_numbers = #tpu.dot_dimension_numbers<[1], [0], [0], [1], [0, 0, 1, 1], [], []>} : vector<324x64xf32>, vector<64x64xf32>, vector<324x64xf32> -> vector<324x64xf32>
    %25 = arith.addf %20, %24 : vector<324x64xf32>
    %c2 = arith.constant 2 : index
    %c0_23 = arith.constant 0 : index
    %26 = vector.load %arg10[%c2, %c0_23] : memref<362x64xf32, #tpu.memory_space<vmem>>, vector<324x64xf32>
    %c2_24 = arith.constant 2 : index
    %c0_25 = arith.constant 0 : index
    %c0_26 = arith.constant 0 : index
    %27 = vector.load %arg5[%c2_24, %c0_25, %c0_26] : memref<9x64x64xf32, #tpu.memory_space<vmem>>, vector<1x64x64xf32>
    %28 = vector.shape_cast %27 : vector<1x64x64xf32> to vector<64x64xf32>
    %cst_27 = arith.constant dense<0.000000e+00> : vector<324x64xf32>
    %29 = tpu.matmul %26, %28, %cst_27 {dimension_numbers = #tpu.dot_dimension_numbers<[1], [0], [0], [1], [0, 0, 1, 1], [], []>} : vector<324x64xf32>, vector<64x64xf32>, vector<324x64xf32> -> vector<324x64xf32>
    %30 = arith.addf %25, %29 : vector<324x64xf32>
    %c18 = arith.constant 18 : index
    %c0_28 = arith.constant 0 : index
    %31 = vector.load %arg10[%c18, %c0_28] : memref<362x64xf32, #tpu.memory_space<vmem>>, vector<324x64xf32>
    %c3 = arith.constant 3 : index
    %c0_29 = arith.constant 0 : index
    %c0_30 = arith.constant 0 : index
    %32 = vector.load %arg5[%c3, %c0_29, %c0_30] : memref<9x64x64xf32, #tpu.memory_space<vmem>>, vector<1x64x64xf32>
    %33 = vector.shape_cast %32 : vector<1x64x64xf32> to vector<64x64xf32>
    %cst_31 = arith.constant dense<0.000000e+00> : vector<324x64xf32>
    %34 = tpu.matmul %31, %33, %cst_31 {dimension_numbers = #tpu.dot_dimension_numbers<[1], [0], [0], [1], [0, 0, 1, 1], [], []>} : vector<324x64xf32>, vector<64x64xf32>, vector<324x64xf32> -> vector<324x64xf32>
    %35 = arith.addf %30, %34 : vector<324x64xf32>
    %c19_32 = arith.constant 19 : index
    %c0_33 = arith.constant 0 : index
    %36 = vector.load %arg10[%c19_32, %c0_33] : memref<362x64xf32, #tpu.memory_space<vmem>>, vector<324x64xf32>
    %c4 = arith.constant 4 : index
    %c0_34 = arith.constant 0 : index
    %c0_35 = arith.constant 0 : index
    %37 = vector.load %arg5[%c4, %c0_34, %c0_35] : memref<9x64x64xf32, #tpu.memory_space<vmem>>, vector<1x64x64xf32>
    %38 = vector.shape_cast %37 : vector<1x64x64xf32> to vector<64x64xf32>
    %cst_36 = arith.constant dense<0.000000e+00> : vector<324x64xf32>
    %39 = tpu.matmul %36, %38, %cst_36 {dimension_numbers = #tpu.dot_dimension_numbers<[1], [0], [0], [1], [0, 0, 1, 1], [], []>} : vector<324x64xf32>, vector<64x64xf32>, vector<324x64xf32> -> vector<324x64xf32>
    %40 = arith.addf %35, %39 : vector<324x64xf32>
    %c20 = arith.constant 20 : index
    %c0_37 = arith.constant 0 : index
    %41 = vector.load %arg10[%c20, %c0_37] : memref<362x64xf32, #tpu.memory_space<vmem>>, vector<324x64xf32>
    %c5 = arith.constant 5 : index
    %c0_38 = arith.constant 0 : index
    %c0_39 = arith.constant 0 : index
    %42 = vector.load %arg5[%c5, %c0_38, %c0_39] : memref<9x64x64xf32, #tpu.memory_space<vmem>>, vector<1x64x64xf32>
    %43 = vector.shape_cast %42 : vector<1x64x64xf32> to vector<64x64xf32>
    %cst_40 = arith.constant dense<0.000000e+00> : vector<324x64xf32>
    %44 = tpu.matmul %41, %43, %cst_40 {dimension_numbers = #tpu.dot_dimension_numbers<[1], [0], [0], [1], [0, 0, 1, 1], [], []>} : vector<324x64xf32>, vector<64x64xf32>, vector<324x64xf32> -> vector<324x64xf32>
    %45 = arith.addf %40, %44 : vector<324x64xf32>
    %c36 = arith.constant 36 : index
    %c0_41 = arith.constant 0 : index
    %46 = vector.load %arg10[%c36, %c0_41] : memref<362x64xf32, #tpu.memory_space<vmem>>, vector<324x64xf32>
    %c6 = arith.constant 6 : index
    %c0_42 = arith.constant 0 : index
    %c0_43 = arith.constant 0 : index
    %47 = vector.load %arg5[%c6, %c0_42, %c0_43] : memref<9x64x64xf32, #tpu.memory_space<vmem>>, vector<1x64x64xf32>
    %48 = vector.shape_cast %47 : vector<1x64x64xf32> to vector<64x64xf32>
    %cst_44 = arith.constant dense<0.000000e+00> : vector<324x64xf32>
    %49 = tpu.matmul %46, %48, %cst_44 {dimension_numbers = #tpu.dot_dimension_numbers<[1], [0], [0], [1], [0, 0, 1, 1], [], []>} : vector<324x64xf32>, vector<64x64xf32>, vector<324x64xf32> -> vector<324x64xf32>
    %50 = arith.addf %45, %49 : vector<324x64xf32>
    %c37 = arith.constant 37 : index
    %c0_45 = arith.constant 0 : index
    %51 = vector.load %arg10[%c37, %c0_45] : memref<362x64xf32, #tpu.memory_space<vmem>>, vector<324x64xf32>
    %c7 = arith.constant 7 : index
    %c0_46 = arith.constant 0 : index
    %c0_47 = arith.constant 0 : index
    %52 = vector.load %arg5[%c7, %c0_46, %c0_47] : memref<9x64x64xf32, #tpu.memory_space<vmem>>, vector<1x64x64xf32>
    %53 = vector.shape_cast %52 : vector<1x64x64xf32> to vector<64x64xf32>
    %cst_48 = arith.constant dense<0.000000e+00> : vector<324x64xf32>
    %54 = tpu.matmul %51, %53, %cst_48 {dimension_numbers = #tpu.dot_dimension_numbers<[1], [0], [0], [1], [0, 0, 1, 1], [], []>} : vector<324x64xf32>, vector<64x64xf32>, vector<324x64xf32> -> vector<324x64xf32>
    %55 = arith.addf %50, %54 : vector<324x64xf32>
    %c38 = arith.constant 38 : index
    %c0_49 = arith.constant 0 : index
    %56 = vector.load %arg10[%c38, %c0_49] : memref<362x64xf32, #tpu.memory_space<vmem>>, vector<324x64xf32>
    %c8 = arith.constant 8 : index
    %c0_50 = arith.constant 0 : index
    %c0_51 = arith.constant 0 : index
    %57 = vector.load %arg5[%c8, %c0_50, %c0_51] : memref<9x64x64xf32, #tpu.memory_space<vmem>>, vector<1x64x64xf32>
    %58 = vector.shape_cast %57 : vector<1x64x64xf32> to vector<64x64xf32>
    %cst_52 = arith.constant dense<0.000000e+00> : vector<324x64xf32>
    %59 = tpu.matmul %56, %58, %cst_52 {dimension_numbers = #tpu.dot_dimension_numbers<[1], [0], [0], [1], [0, 0, 1, 1], [], []>} : vector<324x64xf32>, vector<64x64xf32>, vector<324x64xf32> -> vector<324x64xf32>
    %60 = arith.addf %55, %59 : vector<324x64xf32>
    %c0_53 = arith.constant 0 : index
    %c0_54 = arith.constant 0 : index
    %61 = vector.load %arg6[%c0_53, %c0_54] : memref<1x64xf32, #tpu.memory_space<vmem>>, vector<1x64xf32>
    %62 = vector.broadcast %61 : vector<1x64xf32> to vector<324x64xf32>
    %63 = arith.addf %60, %62 : vector<324x64xf32>
    %cst_55 = arith.constant 0.000000e+00 : f32
    %64 = vector.broadcast %cst_55 : f32 to vector<324x64xf32>
    %65 = arith.maximumf %63, %64 : vector<324x64xf32>
    %cst_56 = arith.constant 0.000000e+00 : f32
    %66 = vector.shape_cast %2 : vector<324x1xi1> to vector<324x1xi1>
    %67 = vector.broadcast %66 : vector<324x1xi1> to vector<324x64xi1>
    %68 = vector.broadcast %cst_56 : f32 to vector<324x64xf32>
    %69 = arith.select %67, %65, %68 : vector<324x64xi1>, vector<324x64xf32>
    %c19_57 = arith.constant 19 : index
    %c0_58 = arith.constant 0 : index
    %70 = vector.load %arg11[%c19_57, %c0_58] : memref<362x64xf32, #tpu.memory_space<vmem>>, vector<324x64xf32>
    tpu.vector_store %arg11[%c19_57, %c0_58], %69 {strides = array<i32>} : memref<362x64xf32, #tpu.memory_space<vmem>>, vector<324x64xf32>,
    %c0_59 = arith.constant 0 : index
    %c0_60 = arith.constant 0 : index
    %71 = vector.load %arg11[%c0_59, %c0_60] : memref<362x64xf32, #tpu.memory_space<vmem>>, vector<324x64xf32>
    %c0_61 = arith.constant 0 : index
    %c0_62 = arith.constant 0 : index
    %c0_63 = arith.constant 0 : index
    %72 = vector.load %arg7[%c0_61, %c0_62, %c0_63] : memref<9x64x32xf32, #tpu.memory_space<vmem>>, vector<1x64x32xf32>
    %73 = vector.shape_cast %72 : vector<1x64x32xf32> to vector<64x32xf32>
    %cst_64 = arith.constant dense<0.000000e+00> : vector<324x32xf32>
    %74 = tpu.matmul %71, %73, %cst_64 {dimension_numbers = #tpu.dot_dimension_numbers<[1], [0], [0], [1], [0, 0, 1, 1], [], []>} : vector<324x64xf32>, vector<64x32xf32>, vector<324x32xf32> -> vector<324x32xf32>
    %c1_65 = arith.constant 1 : index
    %c0_66 = arith.constant 0 : index
    %75 = vector.load %arg11[%c1_65, %c0_66] : memref<362x64xf32, #tpu.memory_space<vmem>>, vector<324x64xf32>
    %c1_67 = arith.constant 1 : index
    %c0_68 = arith.constant 0 : index
    %c0_69 = arith.constant 0 : index
    %76 = vector.load %arg7[%c1_67, %c0_68, %c0_69] : memref<9x64x32xf32, #tpu.memory_space<vmem>>, vector<1x64x32xf32>
    %77 = vector.shape_cast %76 : vector<1x64x32xf32> to vector<64x32xf32>
    %cst_70 = arith.constant dense<0.000000e+00> : vector<324x32xf32>
    %78 = tpu.matmul %75, %77, %cst_70 {dimension_numbers = #tpu.dot_dimension_numbers<[1], [0], [0], [1], [0, 0, 1, 1], [], []>} : vector<324x64xf32>, vector<64x32xf32>, vector<324x32xf32> -> vector<324x32xf32>
    %79 = arith.addf %74, %78 : vector<324x32xf32>
    %c2_71 = arith.constant 2 : index
    %c0_72 = arith.constant 0 : index
    %80 = vector.load %arg11[%c2_71, %c0_72] : memref<362x64xf32, #tpu.memory_space<vmem>>, vector<324x64xf32>
    %c2_73 = arith.constant 2 : index
    %c0_74 = arith.constant 0 : index
    %c0_75 = arith.constant 0 : index
    %81 = vector.load %arg7[%c2_73, %c0_74, %c0_75] : memref<9x64x32xf32, #tpu.memory_space<vmem>>, vector<1x64x32xf32>
    %82 = vector.shape_cast %81 : vector<1x64x32xf32> to vector<64x32xf32>
    %cst_76 = arith.constant dense<0.000000e+00> : vector<324x32xf32>
    %83 = tpu.matmul %80, %82, %cst_76 {dimension_numbers = #tpu.dot_dimension_numbers<[1], [0], [0], [1], [0, 0, 1, 1], [], []>} : vector<324x64xf32>, vector<64x32xf32>, vector<324x32xf32> -> vector<324x32xf32>
    %84 = arith.addf %79, %83 : vector<324x32xf32>
    %c18_77 = arith.constant 18 : index
    %c0_78 = arith.constant 0 : index
    %85 = vector.load %arg11[%c18_77, %c0_78] : memref<362x64xf32, #tpu.memory_space<vmem>>, vector<324x64xf32>
    %c3_79 = arith.constant 3 : index
    %c0_80 = arith.constant 0 : index
    %c0_81 = arith.constant 0 : index
    %86 = vector.load %arg7[%c3_79, %c0_80, %c0_81] : memref<9x64x32xf32, #tpu.memory_space<vmem>>, vector<1x64x32xf32>
    %87 = vector.shape_cast %86 : vector<1x64x32xf32> to vector<64x32xf32>
    %cst_82 = arith.constant dense<0.000000e+00> : vector<324x32xf32>
    %88 = tpu.matmul %85, %87, %cst_82 {dimension_numbers = #tpu.dot_dimension_numbers<[1], [0], [0], [1], [0, 0, 1, 1], [], []>} : vector<324x64xf32>, vector<64x32xf32>, vector<324x32xf32> -> vector<324x32xf32>
    %89 = arith.addf %84, %88 : vector<324x32xf32>
    %c19_83 = arith.constant 19 : index
    %c0_84 = arith.constant 0 : index
    %90 = vector.load %arg11[%c19_83, %c0_84] : memref<362x64xf32, #tpu.memory_space<vmem>>, vector<324x64xf32>
    %c4_85 = arith.constant 4 : index
    %c0_86 = arith.constant 0 : index
    %c0_87 = arith.constant 0 : index
    %91 = vector.load %arg7[%c4_85, %c0_86, %c0_87] : memref<9x64x32xf32, #tpu.memory_space<vmem>>, vector<1x64x32xf32>
    %92 = vector.shape_cast %91 : vector<1x64x32xf32> to vector<64x32xf32>
    %cst_88 = arith.constant dense<0.000000e+00> : vector<324x32xf32>
    %93 = tpu.matmul %90, %92, %cst_88 {dimension_numbers = #tpu.dot_dimension_numbers<[1], [0], [0], [1], [0, 0, 1, 1], [], []>} : vector<324x64xf32>, vector<64x32xf32>, vector<324x32xf32> -> vector<324x32xf32>
    %94 = arith.addf %89, %93 : vector<324x32xf32>
    %c20_89 = arith.constant 20 : index
    %c0_90 = arith.constant 0 : index
    %95 = vector.load %arg11[%c20_89, %c0_90] : memref<362x64xf32, #tpu.memory_space<vmem>>, vector<324x64xf32>
    %c5_91 = arith.constant 5 : index
    %c0_92 = arith.constant 0 : index
    %c0_93 = arith.constant 0 : index
    %96 = vector.load %arg7[%c5_91, %c0_92, %c0_93] : memref<9x64x32xf32, #tpu.memory_space<vmem>>, vector<1x64x32xf32>
    %97 = vector.shape_cast %96 : vector<1x64x32xf32> to vector<64x32xf32>
    %cst_94 = arith.constant dense<0.000000e+00> : vector<324x32xf32>
    %98 = tpu.matmul %95, %97, %cst_94 {dimension_numbers = #tpu.dot_dimension_numbers<[1], [0], [0], [1], [0, 0, 1, 1], [], []>} : vector<324x64xf32>, vector<64x32xf32>, vector<324x32xf32> -> vector<324x32xf32>
    %99 = arith.addf %94, %98 : vector<324x32xf32>
    %c36_95 = arith.constant 36 : index
    %c0_96 = arith.constant 0 : index
    %100 = vector.load %arg11[%c36_95, %c0_96] : memref<362x64xf32, #tpu.memory_space<vmem>>, vector<324x64xf32>
    %c6_97 = arith.constant 6 : index
    %c0_98 = arith.constant 0 : index
    %c0_99 = arith.constant 0 : index
    %101 = vector.load %arg7[%c6_97, %c0_98, %c0_99] : memref<9x64x32xf32, #tpu.memory_space<vmem>>, vector<1x64x32xf32>
    %102 = vector.shape_cast %101 : vector<1x64x32xf32> to vector<64x32xf32>
    %cst_100 = arith.constant dense<0.000000e+00> : vector<324x32xf32>
    %103 = tpu.matmul %100, %102, %cst_100 {dimension_numbers = #tpu.dot_dimension_numbers<[1], [0], [0], [1], [0, 0, 1, 1], [], []>} : vector<324x64xf32>, vector<64x32xf32>, vector<324x32xf32> -> vector<324x32xf32>
    %104 = arith.addf %99, %103 : vector<324x32xf32>
    %c37_101 = arith.constant 37 : index
    %c0_102 = arith.constant 0 : index
    %105 = vector.load %arg11[%c37_101, %c0_102] : memref<362x64xf32, #tpu.memory_space<vmem>>, vector<324x64xf32>
    %c7_103 = arith.constant 7 : index
    %c0_104 = arith.constant 0 : index
    %c0_105 = arith.constant 0 : index
    %106 = vector.load %arg7[%c7_103, %c0_104, %c0_105] : memref<9x64x32xf32, #tpu.memory_space<vmem>>, vector<1x64x32xf32>
    %107 = vector.shape_cast %106 : vector<1x64x32xf32> to vector<64x32xf32>
    %cst_106 = arith.constant dense<0.000000e+00> : vector<324x32xf32>
    %108 = tpu.matmul %105, %107, %cst_106 {dimension_numbers = #tpu.dot_dimension_numbers<[1], [0], [0], [1], [0, 0, 1, 1], [], []>} : vector<324x64xf32>, vector<64x32xf32>, vector<324x32xf32> -> vector<324x32xf32>
    %109 = arith.addf %104, %108 : vector<324x32xf32>
    %c38_107 = arith.constant 38 : index
    %c0_108 = arith.constant 0 : index
    %110 = vector.load %arg11[%c38_107, %c0_108] : memref<362x64xf32, #tpu.memory_space<vmem>>, vector<324x64xf32>
    %c8_109 = arith.constant 8 : index
    %c0_110 = arith.constant 0 : index
    %c0_111 = arith.constant 0 : index
    %111 = vector.load %arg7[%c8_109, %c0_110, %c0_111] : memref<9x64x32xf32, #tpu.memory_space<vmem>>, vector<1x64x32xf32>
    %112 = vector.shape_cast %111 : vector<1x64x32xf32> to vector<64x32xf32>
    %cst_112 = arith.constant dense<0.000000e+00> : vector<324x32xf32>
    %113 = tpu.matmul %110, %112, %cst_112 {dimension_numbers = #tpu.dot_dimension_numbers<[1], [0], [0], [1], [0, 0, 1, 1], [], []>} : vector<324x64xf32>, vector<64x32xf32>, vector<324x32xf32> -> vector<324x32xf32>
    %114 = arith.addf %109, %113 : vector<324x32xf32>
    %c0_113 = arith.constant 0 : index
    %c0_114 = arith.constant 0 : index
    %115 = vector.load %arg8[%c0_113, %c0_114] : memref<1x32xf32, #tpu.memory_space<vmem>>, vector<1x32xf32>
    %116 = vector.broadcast %115 : vector<1x32xf32> to vector<324x32xf32>
    %117 = arith.addf %114, %116 : vector<324x32xf32>
    %cst_115 = arith.constant 0.000000e+00 : f32
    %118 = vector.broadcast %cst_115 : f32 to vector<324x32xf32>
    %119 = arith.maximumf %117, %118 : vector<324x32xf32>
    %cst_116 = arith.constant 0.000000e+00 : f32
    %120 = vector.shape_cast %2 : vector<324x1xi1> to vector<324x1xi1>
    %121 = vector.broadcast %120 : vector<324x1xi1> to vector<324x32xi1>
    %122 = vector.broadcast %cst_116 : f32 to vector<324x32xf32>
    %123 = arith.select %121, %119, %122 : vector<324x32xi1>, vector<324x32xf32>
    %c0_117 = arith.constant 0 : index
    %c0_118 = arith.constant 0 : index
    %c0_119 = arith.constant 0 : index
    %124 = vector.load %arg9[%c0_117, %c0_118, %c0_119] : memref<1x324x32xf32, #tpu.memory_space<vmem>>, vector<1x324x32xf32>
    %125 = vector.shape_cast %124 : vector<1x324x32xf32> to vector<324x32xf32>
    %126 = vector.shape_cast %123 : vector<324x32xf32> to vector<1x324x32xf32>
    tpu.vector_store %arg9[%c0_117, %c0_118, %c0_119], %126 {strides = array<i32>} : memref<1x324x32xf32, #tpu.memory_space<vmem>>, vector<1x324x32xf32>,
    return
  }
  func.func @transform_0(%arg0: i32) -> (i32, i32) {
    %c0_i32 = arith.constant 0 : i32
    %c0_i32_0 = arith.constant 0 : i32
    %c0_i32_1 = arith.constant 0 : i32
    return %c0_i32, %c0_i32_0 : i32, i32
  }
  func.func @transform_1(%arg0: i32) -> (i32, i32, i32) {
    %c0_i32 = arith.constant 0 : i32
    %c0_i32_0 = arith.constant 0 : i32
    %c0_i32_1 = arith.constant 0 : i32
    return %arg0, %c0_i32, %c0_i32_0 : i32, i32, i32
  }
  func.func @transform_2(%arg0: i32) -> (i32, i32) {
    %c0_i32 = arith.constant 0 : i32
    %c0_i32_0 = arith.constant 0 : i32
    %c0_i32_1 = arith.constant 0 : i32
    return %c0_i32, %c0_i32_0 : i32, i32
  }
  func.func @transform_3(%arg0: i32) -> (i32, i32) {
    %c0_i32 = arith.constant 0 : i32
    %c0_i32_0 = arith.constant 0 : i32
    %c0_i32_1 = arith.constant 0 : i32
    return %c0_i32, %c0_i32_0 : i32, i32
  }
  func.func @transform_4(%arg0: i32) -> (i32, i32, i32) {
    %c0_i32 = arith.constant 0 : i32
    %c0_i32_0 = arith.constant 0 : i32
    %c0_i32_1 = arith.constant 0 : i32
    %c0_i32_2 = arith.constant 0 : i32
    return %c0_i32, %c0_i32_0, %c0_i32_1 : i32, i32, i32
  }
  func.func @transform_5(%arg0: i32) -> (i32, i32) {
    %c0_i32 = arith.constant 0 : i32
    %c0_i32_0 = arith.constant 0 : i32
    %c0_i32_1 = arith.constant 0 : i32
    return %c0_i32, %c0_i32_0 : i32, i32
  }
  func.func @transform_6(%arg0: i32) -> (i32, i32, i32) {
    %c0_i32 = arith.constant 0 : i32
    %c0_i32_0 = arith.constant 0 : i32
    %c0_i32_1 = arith.constant 0 : i32
    %c0_i32_2 = arith.constant 0 : i32
    return %c0_i32, %c0_i32_0, %c0_i32_1 : i32, i32, i32
  }
  func.func @transform_7(%arg0: i32) -> (i32, i32) {
    %c0_i32 = arith.constant 0 : i32
    %c0_i32_0 = arith.constant 0 : i32
    %c0_i32_1 = arith.constant 0 : i32
    return %c0_i32, %c0_i32_0 : i32, i32
  }
  func.func @transform_8(%arg0: i32) -> (i32, i32, i32) {
    %c0_i32 = arith.constant 0 : i32
    %c0_i32_0 = arith.constant 0 : i32
    %c0_i32_1 = arith.constant 0 : i32
    return %arg0, %c0_i32, %c0_i32_0 : i32, i32, i32
  }
}

</mosaic_0001>

<bundles_post_ra>
// kernel: super_resolution_forward.1
= control target key start
LH: loop header
LB: loop body
LE: loop exit
PB: predicated region body
PF: predicated region fallthrough
CT: control target
= control target key end

     0   :  { %s14666_s27 = smov 0   ;;  %s19638_s0 = inlined_call_operand.vmem [shape: f32[324,1], index: 0, kind: input, shape index: {}]   ;;  %s19639_s1 = inlined_call_operand.vmem [shape: f32[2,324,32], index: 1, kind: input, shape index: {}]   ;;  %s19640_s2 = inlined_call_operand.vmem [shape: f32[32,64], index: 2, kind: input, shape index: {}]   ;;  %s19641_s3 = inlined_call_operand.vmem [shape: f32[1,64], index: 3, kind: input, shape index: {}]   ;;  %s19642_s4 = inlined_call_operand.vmem [shape: f32[9,64,64], index: 4, kind: input, shape index: {}]   ;;  %s19643_s5 = inlined_call_operand.vmem [shape: f32[1,64], index: 5, kind: input, shape index: {}]   ;;  %s19644_s6 = inlined_call_operand.vmem [shape: f32[9,64,32], index: 6, kind: input, shape index: {}]   ;;  %s19645_s7 = inlined_call_operand.vmem [shape: f32[1,32], index: 7, kind: input, shape index: {}]   ;;  %s19646_s8 = inlined_call_operand.vmem [shape: f32[2,324,32], index: 8, kind: output, shape index: {}]  }
   0x1 LB: > { %s10108_s28 = sadd.s32 4294967295, %s14616_s27   ;;  %p10112_p0 = scmp.ge.s32.totalorder %s14616_s27, 1  ;;  %s14616_s27 = sphi %s14666_s27, %s18_s27  }
   0x2   : > { %p262_p1 = scmp.lt.s32.totalorder %s14616_s27, 3 }
   0x4   : > { %p263_p2 = pnand %p10112_p0, %p262_p1 }
   0x6   : > { %266 = sbr.rel (%p263_p2) target bundleno = 2095 (0x82f), region = 52 }
   0xb   : > { %v432_v0 = vld [vmem:[%s19640_s2 + $0x18] sm:$0xff]  ;;  %v306_v1 = vld [vmem:[%s19638_s0] sm:$0xff]  ;;  %v14618_v2 = vmov 0.0   ;;  %v307_v3 = vld [vmem:[%s19638_s0 + $0x8] sm:$0xff]  ;;  %p296_p3 = scmp.lt.s32.totalorder %s10108_s28, 1  ;;  %v14619_v4 = vmov 0  }
   0xc   : > { %11954 = vmatprep.subr.mxu0 %v14618_v2  ;;  %14587 = vmatprep.subr.mxu1 %v14618_v2  ;;  %vm347_vm0 = vcmp.ne.f32.partialorder %v306_v1, 0.0  ;;  %v431_v6 = vld [vmem:[%s19640_s2 + $0x10] sm:$0xff]  ;;  %vm348_vm1 = vcmp.ne.f32.partialorder %v307_v3, 0.0  ;;  %v430_v7 = vld [vmem:[%s19640_s2 + $0x8] sm:$0xff]  ;;  %v310_v8 = vld [vmem:[%s19638_s0 + $0x20] sm:$0xff]  ;;  %vm19647_vm3 = vcmask 261120  }
   0xd   : > { %14607 = vset.pattern.permute.xlu0 %v14619_v4  ;;  %11955 = vmatpush3.msra.mxu0 %v432_v0  ;;  %v875_v5 = vsel %vm347_vm0, 1, %v14619_v4  ;;  %s20007_s28 = smov (!%p296_p3, %s10108_s28), 1  ;;  %v308_v9 = vld [vmem:[%s19638_s0 + $0x10] sm:$0xff]  ;;  %v876_v10 = vsel %vm348_vm1, 1, %v14619_v4  ;;  %v429_v11 = vld [vmem:[%s19640_s2] sm:$0xff]  ;;  %vm351_vm2 = vcmp.ne.f32.partialorder %v310_v8, 0.0 }
   0xe   : > { %14591 = vmatpush3.msra.mxu1 %v432_v0  ;;  %11956 = vmatprep.subr.mxu0 %v14618_v2  ;;  %s14595_s19 = smul.u32 328, %s20007_s28  ;;  %vm349_vm4 = vcmp.ne.f32.partialorder %v308_v9, 0.0  ;;  %v312_v13 = vld [vmem:[%s19638_s0 + $0x30] sm:$0xff]  ;;  %v309_v15 = vld [vmem:[%s19638_s0 + $0x18] sm:$0xff]  ;;  %vm14620_vm5 = vmmov 0   ;;  %v879_v16 = vsel %vm351_vm2, 1, %v14619_v4 }
   0xf   : > { %14588 = vmatprep.subr.mxu1 %v14618_v2  ;;  %917 = vperm.xlu0 %14607, %v875_v5   ;;  %v877_v17 = vsel %vm349_vm4, 1, %v14619_v4  ;;  %vm353_vm6 = vcmp.ne.f32.partialorder %v312_v13, 0.0  ;;  %vm350_vm7 = vcmp.ne.f32.partialorder %v309_v15, 0.0  ;;  %v314_v19 = vld [vmem:[%s19638_s0 + $0x40] sm:$0xff]  ;;  %v311_v21 = vld [vmem:[%s19638_s0 + $0x28] sm:$0xff]  ;;  %v316_v25 = vld [vmem:[%s19638_s0 + $0x50] sm:$0xff] }
  0x10   : > { %11957 = vmatpush3.msra.mxu0 %v431_v6  ;;  %14592 = vmatpush3.msra.mxu1 %v431_v6  ;;  %s14715_s26 = scalar_lea.vmem %s19639_s1, %s14595_s19  ;;  %v881_v22 = vsel %vm353_vm6, 1, %v14619_v4  ;;  %v878_v23 = vsel %vm350_vm7, 1, %v14619_v4  ;;  %vm355_vm8 = vcmp.ne.f32.partialorder %v314_v19, 0.0  ;;  %vm352_vm9 = vcmp.ne.f32.partialorder %v311_v21, 0.0  ;;  %v313_v27 = vld [vmem:[%s19638_s0 + $0x38] sm:$0xff]  ;;  %v318_v31 = vld [vmem:[%s19638_s0 + $0x60] sm:$0xff]  ;;  %s19390_s23 = scalar_lea.vmem %s19646_s8, %s14595_s19 }
  0x11   : > { %11958 = vmatprep.subr.mxu0 %v14618_v2  ;;  %14589 = vmatprep.subr.mxu1 %v14618_v2  ;;  %v388_v12 = vld [vmem:[%s14715_s26] sm:$0xff]  ;;  %v409_v14 = vld [vmem:[%s14715_s26 + $0xa8] sm:$0xff]  ;;  %v410_v20 = vld [vmem:[%s14715_s26 + $0xb0] sm:$0xff]  ;;  %v883_v28 = vsel %vm355_vm8, 1, %v14619_v4  ;;  %v880_v29 = vsel %vm352_vm9, 1, %v14619_v4  ;;  %vm357_vm10 = vcmp.ne.f32.partialorder %v316_v25, 0.0 }
  0x12   : > { %11959 = vmatpush3.msra.mxu0 %v430_v7  ;;  %14593 = vmatpush3.msra.mxu1 %v430_v7  ;;  %v389_v18 = vld [vmem:[%s14715_s26 + $0x8] sm:$0xff]  ;;  %v390_v24 = vld [vmem:[%s14715_s26 + $0x10] sm:$0xff]  ;;  %v411_v26 = vld [vmem:[%s14715_s26 + $0xb8] sm:$0xff]  ;;  %vm354_vm11 = vcmp.ne.f32.partialorder %v313_v27, 0.0  ;;  %v885_v34 = vsel %vm357_vm10, 1, %v14619_v4  ;;  %vm359_vm12 = vcmp.ne.f32.partialorder %v318_v31, 0.0 }
  0x13   : > { %11960 = vmatprep.subr.mxu0 %v14618_v2  ;;  %14590 = vmatprep.subr.mxu1 %v14618_v2  ;;  %v391_v30 = vld [vmem:[%s14715_s26 + $0x18] sm:$0xff]  ;;  %v412_v32 = vld [vmem:[%s14715_s26 + $0xc0] sm:$0xff]  ;;  %v315_v33 = vld [vmem:[%s19638_s0 + $0x48] sm:$0xff]  ;;  %v882_v35 = vsel %vm354_vm11, 1, %v14619_v4  ;;  %v887_v40 = vsel %vm359_vm12, 1, %v14619_v4 }
  0x14   : > { %920 = vperm.xlu0 %14607, %v876_v10   ;;  %11961 = vmatpush3.msra.mxu0 %v429_v11  ;;  %v392_v36 = vld [vmem:[%s14715_s26 + $0x20] sm:$0xff]  ;;  %vm356_vm13 = vcmp.ne.f32.partialorder %v315_v33, 0.0  ;;  %v320_v37 = vld [vmem:[%s19638_s0 + $0x70] sm:$0xff]  ;;  %v413_v38 = vld [vmem:[%s14715_s26 + $0xc8] sm:$0xff] }
  0x15   : > { %14594 = vmatpush3.msra.mxu1 %v429_v11  ;;  %11962 = vmatprep.mubr.msk.f32.mxu0 %vm14620_vm5, %v14618_v2  ;;  %v317_v39 = vld [vmem:[%s19638_s0 + $0x58] sm:$0xff]  ;;  %v884_v41 = vsel %vm356_vm13, 1, %v14619_v4  ;;  %vm361_vm14 = vcmp.ne.f32.partialorder %v320_v37, 0.0  ;;  %v393_v42 = vld [vmem:[%s14715_s26 + $0x28] sm:$0xff]  ;;  %v322_v43 = vld [vmem:[%s19638_s0 + $0x80] sm:$0xff] }
  0x16   : > { %12025 = vmatprep.mubr.msk.f32.mxu1 %vm14620_vm5, %v14618_v2  ;;  %11963 = vmatmul.mubr.msk.f32.vlgmr.msra.gmra.mxu0 %vm19647_vm3, %v388_v12  ;;  %vm358_vm15 = vcmp.ne.f32.partialorder %v317_v39, 0.0  ;;  %v414_v44 = vld [vmem:[%s14715_s26 + $0xd0] sm:$0xff]  ;;  %v319_v45 = vld [vmem:[%s19638_s0 + $0x68] sm:$0xff]  ;;  %v889_v46 = vsel %vm361_vm14, 1, %v14619_v4  ;;  %vm363_vm0 = vcmp.ne.f32.partialorder %v322_v43, 0.0  ;;  %v415_v50 = vld [vmem:[%s14715_s26 + $0xd8] sm:$0xff] }
  0x17   : > { %12026 = vmatmul.mubr.msk.f32.vlgmr.msra.gmra.mxu1 %vm19647_vm3, %v409_v14  ;;  %14608 = vset.pattern.permute.xlu1 %v14619_v4  ;;  %v886_v47 = vsel %vm358_vm15, 1, %v14619_v4  ;;  %v394_v48 = vld [vmem:[%s14715_s26 + $0x30] sm:$0xff]  ;;  %vm360_vm1 = vcmp.ne.f32.partialorder %v319_v45, 0.0  ;;  %v321_v51 = vld [vmem:[%s19638_s0 + $0x78] sm:$0xff]  ;;  %v891_v53 = vsel %vm363_vm0, 1, %v14619_v4  ;;  %v326_v57 = vld [vmem:[%s19638_s0 + $0xa0] sm:$0xff] }
  0x18   : > { %929 = vperm.xlu0 %14607, %v879_v16   ;;  %11965 = vmatprep.mubr.msk.f32.mxu0 %vm14620_vm5, %v14618_v2  ;;  %v324_v49 = vld [vmem:[%s19638_s0 + $0x90] sm:$0xff]  ;;  %v10164_v52 = vld [vmem:[%s19642_s4 + $0x78] sm:$0xff]  ;;  %v888_v54 = vsel %vm360_vm1, 1, %v14619_v4  ;;  %vm362_vm4 = vcmp.ne.f32.partialorder %v321_v51, 0.0  ;;  %v416_v58 = vld [vmem:[%s14715_s26 + $0xe0] sm:$0xff]  ;;  %vm367_vm6 = vcmp.ne.f32.partialorder %v326_v57, 0.0 }
  0x19   : > { %12028 = vmatprep.mubr.msk.f32.mxu1 %vm14620_vm5, %v14618_v2  ;;  %923 = vperm.xlu1 %14608, %v877_v17   ;;  %vm365_vm2 = vcmp.ne.f32.partialorder %v324_v49, 0.0  ;;  %v10163_v55 = vld [vmem:[%s19642_s4 + $0x70] sm:$0xff]  ;;  %v395_v56 = vld [vmem:[%s14715_s26 + $0x38] sm:$0xff]  ;;  %v323_v59 = vld [vmem:[%s19638_s0 + $0x88] sm:$0xff]  ;;  %v890_v61 = vsel %vm362_vm4, 1, %v14619_v4  ;;  %v895_v5 = vsel %vm367_vm6, 1, %v14619_v4 }
  0x1a   : > { %11966 = vmatmul.mubr.msk.f32.gmra.mxu0 %vm19647_vm3, %v389_v18  ;;  %12085 = vmatprep.subr.mxu1 %v14618_v2  ;;  %v893_v60 = vsel %vm365_vm2, 1, %v14619_v4  ;;  %v10162_v62 = vld [vmem:[%s19642_s4 + $0x68] sm:$0xff]  ;;  %v396_v63 = vld [vmem:[%s14715_s26 + $0x40] sm:$0xff]  ;;  %vm364_vm7 = vcmp.ne.f32.partialorder %v323_v59, 0.0  ;;  %v328_v0 = vld [vmem:[%s19638_s0 + $0xb0] sm:$0xff] }
  0x1b   : > { %12029 = vmatmul.mubr.msk.f32.gmra.mxu1 %vm19647_vm3, %v410_v20  ;;  %11968 = vmatprep.mubr.msk.f32.mxu0 %vm14620_vm5, %v14618_v2  ;;  %v417_v1 = vld [vmem:[%s14715_s26 + $0xe8] sm:$0xff]  ;;  %v325_v3 = vld [vmem:[%s19638_s0 + $0x98] sm:$0xff]  ;;  %v892_v6 = vsel %vm364_vm7, 1, %v14619_v4  ;;  %vm369_vm8 = vcmp.ne.f32.partialorder %v328_v0, 0.0  ;;  %v10161_v7 = vld [vmem:[%s19642_s4 + $0x60] sm:$0xff] }
  0x1c   : > { %935 = vperm.xlu0 %14607, %v881_v22   ;;  %12031 = vmatprep.mubr.msk.f32.mxu1 %vm14620_vm5, %v14618_v2  ;;  %v397_v8 = vld [vmem:[%s14715_s26 + $0x48] sm:$0xff]  ;;  %vm366_vm9 = vcmp.ne.f32.partialorder %v325_v3, 0.0  ;;  %v330_v9 = vld [vmem:[%s19638_s0 + $0xc0] sm:$0xff]  ;;  %v418_v10 = vld [vmem:[%s14715_s26 + $0xf0] sm:$0xff]  ;;  %v897_v12 = vsel %vm369_vm8, 1, %v14619_v4 }
  0x1d   : > { %926 = vperm.xlu1 %14608, %v878_v23   ;;  %12224 = vmatprep.subr.mxu0 %v14618_v2  ;;  %v327_v11 = vld [vmem:[%s19638_s0 + $0xa8] sm:$0xff]  ;;  %v894_v13 = vsel %vm366_vm9, 1, %v14619_v4  ;;  %vm371_vm10 = vcmp.ne.f32.partialorder %v330_v9, 0.0  ;;  %v10160_v14 = vld [vmem:[%s19642_s4 + $0x58] sm:$0xff]  ;;  %v398_v15 = vld [vmem:[%s14715_s26 + $0x50] sm:$0xff] }
  0x1e   : > { %11969 = vmatmul.mubr.msk.f32.gmra.mxu0 %vm19647_vm3, %v390_v24  ;;  %12086 = vmatpush3.msra.mxu1 %v10164_v52  ;;  %vm368_vm11 = vcmp.ne.f32.partialorder %v327_v11, 0.0  ;;  %v332_v16 = vld [vmem:[%s19638_s0 + $0xd0] sm:$0xff]  ;;  %v419_v17 = vld [vmem:[%s14715_s26 + $0xf8] sm:$0xff]  ;;  %v899_v19 = vsel %vm371_vm10, 1, %v14619_v4  ;;  %v334_v23 = vld [vmem:[%s19638_s0 + $0xe0] sm:$0xff] }
  0x1f   : > { %12032 = vmatmul.mubr.msk.f32.gmra.mxu1 %vm19647_vm3, %v411_v26  ;;  %11971 = vmatprep.mubr.msk.f32.mxu0 %vm14620_vm5, %v14618_v2  ;;  %v329_v18 = vld [vmem:[%s19638_s0 + $0xb8] sm:$0xff]  ;;  %v896_v20 = vsel %vm368_vm11, 1, %v14619_v4  ;;  %vm373_vm12 = vcmp.ne.f32.partialorder %v332_v16, 0.0  ;;  %v10159_v21 = vld [vmem:[%s19642_s4 + $0x50] sm:$0xff]  ;;  %v420_v24 = vld [vmem:[%s14715_s26 + $0x100] sm:$0xff]  ;;  %vm375_vm14 = vcmp.ne.f32.partialorder %v334_v23, 0.0 }
  0x20   : > { %941 = vperm.xlu0 %14607, %v883_v28   ;;  %12034 = vmatprep.mubr.msk.f32.mxu1 %vm14620_vm5, %v14618_v2  ;;  %v399_v22 = vld [vmem:[%s14715_s26 + $0x58] sm:$0xff]  ;;  %vm370_vm13 = vcmp.ne.f32.partialorder %v329_v18, 0.0  ;;  %v331_v25 = vld [vmem:[%s19638_s0 + $0xc8] sm:$0xff]  ;;  %v901_v26 = vsel %vm373_vm12, 1, %v14619_v4  ;;  %v400_v28 = vld [vmem:[%s14715_s26 + $0x60] sm:$0xff] }
  0x21   : > { %932 = vperm.xlu1 %14608, %v880_v29   ;;  %12087 = vmatprep.subr.mxu1 %v14618_v2  ;;  %v898_v27 = vsel %vm370_vm13, 1, %v14619_v4  ;;  %vm372_vm15 = vcmp.ne.f32.partialorder %v331_v25, 0.0  ;;  %v336_v29 = vld [vmem:[%s19638_s0 + $0xf0] sm:$0xff]  ;;  %v333_v31 = vld [vmem:[%s19638_s0 + $0xd8] sm:$0xff]  ;;  %v335_v37 = vld [vmem:[%s19638_s0 + $0xe8] sm:$0xff] }
  0x22   : > { %11972 = vmatmul.mubr.msk.f32.gmra.mxu0 %vm19647_vm3, %v391_v30  ;;  %12088 = vmatpush3.msra.mxu1 %v10163_v55  ;;  %v421_v30 = vld [vmem:[%s14715_s26 + $0x108] sm:$0xff]  ;;  %v900_v33 = vsel %vm372_vm15, 1, %v14619_v4  ;;  %vm377_vm0 = vcmp.ne.f32.partialorder %v336_v29, 0.0  ;;  %vm374_vm1 = vcmp.ne.f32.partialorder %v333_v31, 0.0  ;;  %vm376_vm4 = vcmp.ne.f32.partialorder %v335_v37, 0.0  ;;  %v423_v43 = vld [vmem:[%s14715_s26 + $0x118] sm:$0xff] }
  0x23   : > { %12035 = vmatmul.mubr.msk.f32.gmra.mxu1 %vm19647_vm3, %v412_v32  ;;  %11974 = vmatprep.mubr.msk.f32.mxu0 %vm14620_vm5, %v14618_v2  ;;  %v903_v32 = vsel %vm375_vm14, 1, %v14619_v4  ;;  %v905_v39 = vsel %vm377_vm0, 1, %v14619_v4  ;;  %v342_v49 = vld [vmem:[%s19638_s0 + $0x120] sm:$0xff]  ;;  %v339_v51 = vld [vmem:[%s19638_s0 + $0x108] sm:$0xff]  ;;  %v345_v9 = vld [vmem:[%s19638_s0 + $0x138] sm:$0xff]  ;;  %vm1121_vm15 = vcmask 523264  }
  0x24   : > { %947 = vperm.xlu0 %14607, %v885_v34   ;;  %12037 = vmatprep.mubr.msk.f32.mxu1 %vm14620_vm5, %v14618_v2  ;;  %v401_v34 = vld [vmem:[%s14715_s26 + $0x68] sm:$0xff]  ;;  %vm383_vm8 = vcmp.ne.f32.partialorder %v342_v49, 0.0  ;;  %v404_v55 = vld [vmem:[%s14715_s26 + $0x80] sm:$0xff]  ;;  %vm380_vm9 = vcmp.ne.f32.partialorder %v339_v51, 0.0  ;;  %vm386_vm14 = vcmp.ne.f32.partialorder %v345_v9, 0.0  ;;  %v1207_v18 = vld [vmem:[%s19642_s4 + $0x10] sm:$0xff] }
  0x25   : > { %938 = vperm.xlu1 %14608, %v882_v35   ;;  %12089 = vmatprep.subr.mxu1 %v14618_v2  ;;  %v338_v35 = vld [vmem:[%s19638_s0 + $0x100] sm:$0xff]  ;;  %v425_v57 = vld [vmem:[%s14715_s26 + $0x128] sm:$0xff]  ;;  %v911_v59 = vsel %vm383_vm8, 1, %v14619_v4  ;;  %v914_v16 = vsel %vm386_vm14, 1, %v14619_v4  ;;  %v10253_v25 = vld [vmem:[%s19642_s4 + $0xb0] sm:$0xff] }
  0x26   : > { %11975 = vmatmul.mubr.msk.f32.gmra.mxu0 %vm19647_vm3, %v392_v36  ;;  %12090 = vmatpush3.msra.mxu1 %v10162_v62  ;;  %v422_v36 = vld [vmem:[%s14715_s26 + $0x110] sm:$0xff]  ;;  %vm379_vm2 = vcmp.ne.f32.partialorder %v338_v35, 0.0  ;;  %v405_v62 = vld [vmem:[%s14715_s26 + $0x88] sm:$0xff]  ;;  %v10157_v0 = vld [vmem:[%s19642_s4 + $0x40] sm:$0xff] }
  0x27   : > { %12038 = vmatmul.mubr.msk.f32.gmra.mxu1 %vm19647_vm3, %v413_v38  ;;  %11977 = vmatprep.mubr.msk.f32.mxu0 %vm14620_vm5, %v14618_v2  ;;  %v10158_v38 = vld [vmem:[%s19642_s4 + $0x48] sm:$0xff]  ;;  %v907_v45 = vsel %vm379_vm2, 1, %v14619_v4  ;;  %v1164_v23 = vld [vmem:[#allocation2] sm:$0xff] }
  0x28   : > { %953 = vperm.xlu0 %14607, %v887_v40   ;;  %12040 = vmatprep.mubr.msk.f32.mxu1 %vm14620_vm5, %v14618_v2  ;;  %v902_v40 = vsel %vm374_vm1, 1, %v14619_v4  ;;  %v343_v3 = vld [vmem:[%s19638_s0 + $0x128] sm:$0xff] }
  0x29   : > { %944 = vperm.xlu1 %14608, %v884_v41   ;;  %12091 = vmatprep.subr.mxu1 %v14618_v2  ;;  %v402_v41 = vld [vmem:[%s14715_s26 + $0x70] sm:$0xff]  ;;  %vm384_vm13 = vcmp.ne.f32.partialorder %v343_v3, 0.0  ;;  %v10248_v51 = vld [vmem:[%s19642_s4 + $0x88] sm:$0xff] }
  0x2a   : > { %11978 = vmatmul.mubr.msk.f32.gmra.mxu0 %vm19647_vm3, %v393_v42  ;;  %12092 = vmatpush3.msra.mxu1 %v10161_v7  ;;  %v340_v42 = vld [vmem:[%s19638_s0 + $0x110] sm:$0xff]  ;;  %v912_v11 = vsel %vm384_vm13, 1, %v14619_v4 }
  0x2b   : > { %12041 = vmatmul.mubr.msk.f32.gmra.mxu1 %vm19647_vm3, %v414_v44  ;;  %11980 = vmatprep.mubr.msk.f32.mxu0 %vm14620_vm5, %v14618_v2  ;;  %v337_v44 = vld [vmem:[%s19638_s0 + $0xf8] sm:$0xff]  ;;  %vm381_vm6 = vcmp.ne.f32.partialorder %v340_v42, 0.0  ;;  %v406_v7 = vld [vmem:[%s14715_s26 + $0x90] sm:$0xff] }
  0x2c   : > { %959 = vperm.xlu0 %14607, %v889_v46   ;;  %12043 = vmatprep.mubr.msk.f32.mxu1 %vm14620_vm5, %v14618_v2  ;;  %v904_v46 = vsel %vm376_vm4, 1, %v14619_v4  ;;  %vm378_vm7 = vcmp.ne.f32.partialorder %v337_v44, 0.0  ;;  %v909_v52 = vsel %vm381_vm6, 1, %v14619_v4 }
  0x2d   : > { %950 = vperm.xlu1 %14608, %v886_v47   ;;  %12093 = vmatprep.subr.mxu1 %v14618_v2  ;;  %v1212_v47 = vld [vmem:[%s19642_s4 + $0x38] sm:$0xff] }
  0x2e   : > { %11981 = vmatmul.mubr.msk.f32.gmra.mxu0 %vm19647_vm3, %v394_v48  ;;  %12094 = vmatpush3.msra.mxu1 %v10160_v14  ;;  %v403_v48 = vld [vmem:[%s14715_s26 + $0x78] sm:$0xff]  ;;  %v428_v14 = vld [vmem:[%s14715_s26 + $0x140] sm:$0xf] }
  0x2f   : > { %12044 = vmatmul.mubr.msk.f32.gmra.mxu1 %vm19647_vm3, %v415_v50  ;;  %11983 = vmatprep.mubr.msk.f32.mxu0 %vm14620_vm5, %v14618_v2  ;;  %v424_v50 = vld [vmem:[%s14715_s26 + $0x120] sm:$0xff] }
  0x30   : > { %965 = vperm.xlu0 %14607, %v891_v53   ;;  %12046 = vmatprep.mubr.msk.f32.mxu1 %vm14620_vm5, %v14618_v2  ;;  %v906_v53 = vsel %vm378_vm7, 1, %v14619_v4 }
  0x31   : > { %956 = vperm.xlu1 %14608, %v888_v54   ;;  %12095 = vmatprep.subr.mxu1 %v14618_v2  ;;  %v1211_v54 = vld [vmem:[%s19642_s4 + $0x30] sm:$0xff] }
  0x32   : > { %11984 = vmatmul.mubr.msk.f32.gmra.mxu0 %vm19647_vm3, %v395_v56  ;;  %12096 = vmatpush3.msra.mxu1 %v10159_v21  ;;  %v344_v56 = vld [vmem:[%s19638_s0 + $0x130] sm:$0xff]  ;;  %v1205_v21 = vld [vmem:[%s19642_s4] sm:$0xff] }
  0x33   : > { %12047 = vmatmul.mubr.msk.f32.gmra.mxu1 %vm19647_vm3, %v416_v58  ;;  %11986 = vmatprep.mubr.msk.f32.mxu0 %vm14620_vm5, %v14618_v2  ;;  %v341_v58 = vld [vmem:[%s19638_s0 + $0x118] sm:$0xff]  ;;  %vm385_vm10 = vcmp.ne.f32.partialorder %v344_v56, 0.0 }
  0x34   : > { %971 = vperm.xlu0 %14607, %v893_v60   ;;  %12049 = vmatprep.mubr.msk.f32.mxu1 %vm14620_vm5, %v14618_v2  ;;  %v908_v60 = vsel %vm380_vm9, 1, %v14619_v4  ;;  %vm382_vm11 = vcmp.ne.f32.partialorder %v341_v58, 0.0 }
  0x35   : > { %962 = vperm.xlu1 %14608, %v890_v61   ;;  %12097 = vmatprep.subr.mxu1 %v14618_v2  ;;  %v1210_v61 = vld [vmem:[%s19642_s4 + $0x28] sm:$0xff] }
  0x36   : > { %11987 = vmatmul.mubr.msk.f32.gmra.mxu0 %vm19647_vm3, %v396_v63  ;;  %12098 = vmatpush3.msra.mxu1 %v10158_v38  ;;  %v346_v63 = vld [vmem:[%s19638_s0 + $0x140] sm:$0xf] }
  0x37   : > { %12050 = vmatmul.mubr.msk.f32.gmra.mxu1 %vm19647_vm3, %v417_v1  ;;  %11989 = vmatprep.mubr.msk.f32.mxu0 %vm14620_vm5, %v14618_v2  ;;  %v426_v1 = vld [vmem:[%s14715_s26 + $0x130] sm:$0xff]  ;;  %vm387_vm12 = vcmp.ne.f32.partialorder %v346_v63, 0.0 }
  0x38   : > { %977 = vperm.xlu0 %14607, %v895_v5   ;;  %12052 = vmatprep.mubr.msk.f32.mxu1 %vm14620_vm5, %v14618_v2  ;;  %v913_v5 = vsel %vm385_vm10, 1, %v14619_v4 }
  0x39   : > { %968 = vperm.xlu1 %14608, %v892_v6   ;;  %12099 = vmatprep.subr.mxu1 %v14618_v2  ;;  %v910_v6 = vsel %vm382_vm11, 1, %v14619_v4 }
  0x3a   : > { %11990 = vmatmul.mubr.msk.f32.gmra.mxu0 %vm19647_vm3, %v397_v8  ;;  %12100 = vmatpush3.msra.mxu1 %v10157_v0  ;;  %v427_v8 = vld [vmem:[%s14715_s26 + $0x138] sm:$0xff] }
  0x3b   : > { %12053 = vmatmul.mubr.msk.f32.gmra.mxu1 %vm19647_vm3, %v418_v10  ;;  %11992 = vmatprep.mubr.msk.f32.mxu0 %vm14620_vm5, %v14618_v2  ;;  %v915_v10 = vsel %vm387_vm12, 1, %v14619_v4  ;;  %v1206_v4 = vld [vmem:[%s19642_s4 + $0x8] sm:$0xff] }
  0x3c   : > { %983 = vperm.xlu0 %14607, %v897_v12   ;;  %12055 = vmatprep.mubr.msk.f32.mxu1 %vm14620_vm5, %v14618_v2  ;;  %v1209_v12 = vld [vmem:[%s19642_s4 + $0x20] sm:$0xff] }
  0x3d   : > { %974 = vperm.xlu1 %14608, %v894_v13   ;;  %12225 = vmatpush3.msra.mxu0 %v1212_v47  ;;  %v407_v13 = vld [vmem:[%s14715_s26 + $0x98] sm:$0xff] }
  0x3e   : > { %11993 = vmatmul.mubr.msk.f32.gmra.mxu0 %vm19647_vm3, %v398_v15  ;;  %12226 = vmatprep.subr.mxu0 %v14618_v2  ;;  %v1208_v15 = vld [vmem:[%s19642_s4 + $0x18] sm:$0xff] }
  0x3f   : > { %12056 = vmatmul.mubr.msk.f32.gmra.mxu1 %vm19647_vm3, %v419_v17  ;;  %11995 = vmatprep.mubr.msk.f32.mxu0 %vm14620_vm5, %v14618_v2  ;;  %v408_v17 = vld [vmem:[%s14715_s26 + $0xa0] sm:$0xff] }
  0x40   : > { %989 = vperm.xlu0 %14607, %v899_v19   ;;  %12058 = vmatprep.mubr.msk.f32.mxu1 %vm14620_vm5, %v14618_v2  ;;  %v1213_v19 = vld [vmem:[#allocation2 + $0x1] sm:$0xff] }
  0x41   : > { %980 = vperm.xlu1 %14608, %v896_v20   ;;  %12227 = vmatpush3.msra.mxu0 %v1211_v54  ;;  %v10254_v20 = vld [vmem:[%s19642_s4 + $0xb8] sm:$0xff] }
  0x42   : > { %11996 = vmatmul.mubr.msk.f32.gmra.mxu0 %vm19647_vm3, %v399_v22  ;;  %12228 = vmatprep.subr.mxu0 %v14618_v2  ;;  %v1214_v22 = vld [vmem:[#allocation2 + $0x9] sm:$0xff] }
  0x43   : > { %12059 = vmatmul.mubr.msk.f32.gmra.mxu1 %vm19647_vm3, %v420_v24  ;;  %11998 = vmatprep.mubr.msk.f32.mxu0 %vm14620_vm5, %v14618_v2  ;;  %v1165_v24 = vld [vmem:[#allocation2 + $0x8] sm:$0xff] }
  0x44   : > { %995 = vperm.xlu0 %14607, %v901_v26   ;;  %12061 = vmatprep.mubr.msk.f32.mxu1 %vm14620_vm5, %v14618_v2  ;;  %v10252_v26 = vld [vmem:[%s19642_s4 + $0xa8] sm:$0xff] }
  0x45   : > { %986 = vperm.xlu1 %14608, %v898_v27   ;;  %12229 = vmatpush3.msra.mxu0 %v1210_v61 }
  0x46   : > { %11999 = vmatmul.mubr.msk.f32.gmra.mxu0 %vm19647_vm3, %v400_v28  ;;  %12230 = vmatprep.subr.mxu0 %v14618_v2 }
  0x47   : > { %12062 = vmatmul.mubr.msk.f32.gmra.mxu1 %vm19647_vm3, %v421_v30  ;;  %12001 = vmatprep.mubr.msk.f32.mxu0 %vm14620_vm5, %v14618_v2  ;;  %v10251_v30 = vld [vmem:[%s19642_s4 + $0xa0] sm:$0xff] }
  0x48   : > { %1001 = vperm.xlu0 %14607, %v903_v32   ;;  %12064 = vmatprep.mubr.msk.f32.mxu1 %vm14620_vm5, %v14618_v2 }
  0x49   : > { %992 = vperm.xlu1 %14608, %v900_v33   ;;  %12363 = vmatprep.subr.mxu1 %v14618_v2 }
  0x4a   : > { %12002 = vmatmul.mubr.msk.f32.gmra.mxu0 %vm19647_vm3, %v401_v34  ;;  %v10250_v34 = vld [vmem:[%s19642_s4 + $0x98] sm:$0xff] }
  0x4b   : > { %12065 = vmatmul.mubr.msk.f32.gmra.mxu1 %vm19647_vm3, %v422_v36  ;;  %12004 = vmatprep.mubr.msk.f32.mxu0 %vm14620_vm5, %v14618_v2 }
  0x4c   : > { %1007 = vperm.xlu0 %14607, %v905_v39   ;;  %12067 = vmatprep.mubr.msk.f32.mxu1 %vm14620_vm5, %v14618_v2 }
  0x4d   : > { %998 = vperm.xlu1 %14608, %v902_v40   ;;  %12231 = vmatpush3.msra.mxu0 %v1209_v12 }
  0x4e   : > { %12005 = vmatmul.mubr.msk.f32.gmra.mxu0 %vm19647_vm3, %v402_v41  ;;  %12232 = vmatprep.subr.mxu0 %v14618_v2 }
  0x4f   : > { %12068 = vmatmul.mubr.msk.f32.gmra.mxu1 %vm19647_vm3, %v423_v43  ;;  %12007 = vmatprep.mubr.msk.f32.mxu0 %vm14620_vm5, %v14618_v2  ;;  %v10249_v43 = vld [vmem:[%s19642_s4 + $0x90] sm:$0xff] }
  0x50   : > { %1013 = vperm.xlu0 %14607, %v907_v45   ;;  %12070 = vmatprep.mubr.msk.f32.mxu1 %vm14620_vm5, %v14618_v2 }
  0x51   : > { %1004 = vperm.xlu1 %14608, %v904_v46   ;;  %12233 = vmatpush3.msra.mxu0 %v1208_v15 }
  0x52   : > { %12008 = vmatmul.mubr.msk.f32.gmra.mxu0 %vm19647_vm3, %v403_v48  ;;  %12234 = vmatprep.subr.mxu0 %v14618_v2 }
  0x53   : > { %12071 = vmatmul.mubr.msk.f32.gmra.mxu1 %vm19647_vm3, %v424_v50  ;;  %12010 = vmatprep.mubr.msk.f32.mxu0 %vm14620_vm5, %v14618_v2  ;;  %v15183_v50 = vld [vmem:[%s19641_s3] ss:$0 sm:$0xff] }
  0x54   : > { %1019 = vperm.xlu0 %14607, %v909_v52   ;;  %12073 = vmatprep.mubr.msk.f32.mxu1 %vm14620_vm5, %v14618_v2 }
  0x55   : > { %1010 = vperm.xlu1 %14608, %v906_v53   ;;  %12235 = vmatpush3.msra.mxu0 %v1207_v18 }
  0x56   : > { %12011 = vmatmul.mubr.msk.f32.gmra.mxu0 %vm19647_vm3, %v404_v55  ;;  %12236 = vmatprep.subr.mxu0 %v14618_v2 }
  0x57   : > { %12074 = vmatmul.mubr.msk.f32.gmra.mxu1 %vm19647_vm3, %v425_v57  ;;  %12013 = vmatprep.mubr.msk.f32.mxu0 %vm14620_vm5, %v14618_v2 }
  0x58   : > { %1025 = vperm.xlu0 %14607, %v911_v59   ;;  %12076 = vmatprep.mubr.msk.f32.mxu1 %vm14620_vm5, %v14618_v2 }
  0x59   : > { %1016 = vperm.xlu1 %14608, %v908_v60   ;;  %12237 = vmatpush3.msra.mxu0 %v1206_v4 }
  0x5a   : > { %12014 = vmatmul.mubr.msk.f32.gmra.mxu0 %vm19647_vm3, %v405_v62  ;;  %12238 = vmatprep.subr.mxu0 %v14618_v2 }
  0x5b   : > { %12077 = vmatmul.mubr.msk.f32.gmra.mxu1 %vm19647_vm3, %v426_v1  ;;  %12016 = vmatprep.mubr.msk.f32.mxu0 %vm14620_vm5, %v14618_v2 }
  0x5c   : > { %1031 = vperm.xlu0 %14607, %v913_v5   ;;  %12079 = vmatprep.mubr.msk.f32.mxu1 %vm14620_vm5, %v14618_v2 }
  0x5d   : > { %1022 = vperm.xlu1 %14608, %v910_v6   ;;  %12239 = vmatpush3.msra.mxu0 %v1205_v21 }
  0x5e   : > { %12017 = vmatmul.mubr.msk.f32.gmra.mxu0 %vm19647_vm3, %v406_v7  ;;  %12502 = vmatprep.subr.mxu0 %v14618_v2 }
  0x5f   : > { %12080 = vmatmul.mubr.msk.f32.gmra.mxu1 %vm19647_vm3, %v427_v8  ;;  %12019 = vmatprep.mubr.msk.f32.mxu0 %vm14620_vm5, %v14618_v2 }
  0x60   : > { %1037 = vperm.xlu0 %14607, %v915_v10   ;;  %12082 = vmatprep.mubr.msk.f32.mxu1 %vm14620_vm5, %v14618_v2 }
  0x61   : > { %1028 = vperm.xlu1 %14608, %v912_v11  }
  0x62   : > { %12020 = vmatmul.mubr.msk.f32.gmra.mxu0 %vm19647_vm3, %v407_v13 }
  0x63   : > { %12083 = vmatmul.mubr.msk.f32.gmra.mxu1 %vm19647_vm3, %v428_v14  ;;  %12022 = vmatprep.mubr.msk.f32.mxu0 %vm14620_vm5, %v14618_v2 }
  0x64   : > { %12101 = vmatprep.mubr.msk.f32.mxu1 %vm14620_vm5, %v14618_v2 }
  0x65   : > { %1034 = vperm.xlu1 %14608, %v914_v16  }
  0x66   : > { %12023 = vmatmul.mubr.msk.f32.gmra.mxu0 %vm19647_vm3, %v408_v17 }
  0x67   : > { %12102 = vmatmul.mubr.msk.f32.vlgmr.msra.gmra.mxu1 %vm1121_vm15, %v1213_v19  ;;  %12240 = vmatprep.mubr.msk.f32.mxu0 %vm14620_vm5, %v14618_v2 }
  0x68   : > { %12364 = vmatpush3.msra.mxu1 %v10254_v20  ;;  %12104 = vmatprep.mubr.msk.f32.mxu1 %vm14620_vm5, %v14618_v2 }
  0x69   : > { %12365 = vmatprep.subr.mxu1 %v14618_v2 }
  0x6a   : > { %12241 = vmatmul.mubr.msk.f32.vlgmr.msra.gmra.mxu0 %vm1121_vm15, %v1164_v23  ;;  %12366 = vmatpush3.msra.mxu1 %v10253_v25 }
  0x6b   : > { %12105 = vmatmul.mubr.msk.f32.gmra.mxu1 %vm1121_vm15, %v1214_v22  ;;  %12243 = vmatprep.mubr.msk.f32.mxu0 %vm14620_vm5, %v14618_v2 }
  0x6c   : > { %12107 = vmatprep.mubr.msk.f32.mxu1 %vm14620_vm5, %v14618_v2  ;;  %12367 = vmatprep.subr.mxu1 %v14618_v2 }
  0x6d   : > { %12368 = vmatpush3.msra.mxu1 %v10252_v26 }
  0x6e   : > { %12244 = vmatmul.mubr.msk.f32.gmra.mxu0 %vm1121_vm15, %v1165_v24  ;;  %12369 = vmatprep.subr.mxu1 %v14618_v2 }
  0x6f   : > { %12246 = vmatprep.mubr.msk.f32.mxu0 %vm14620_vm5, %v14618_v2  ;;  %12370 = vmatpush3.msra.mxu1 %v10251_v30 }
  0x70   : > { %12371 = vmatprep.subr.mxu1 %v14618_v2 }
  0x71   : > { %12372 = vmatpush3.msra.mxu1 %v10250_v34 }
  0x72   : > { %12373 = vmatprep.subr.mxu1 %v14618_v2 }
  0x73   : > { %12374 = vmatpush3.msra.mxu1 %v10249_v43 }
  0x74   : > { %12375 = vmatprep.subr.mxu1 %v14618_v2 }
  0x75   : > { %12376 = vmatpush3.msra.mxu1 %v10248_v51 }
  0x76   : > { %12377 = vmatprep.subr.mxu1 %v14618_v2 }
  0x8a   : > { %v15128_v27 = vpop.permute.xlu0 %917 }
  0x8b   : > { %19759 = vst [vmem:[#allocation4_spill] sm:$0xff] %v15128_v27  ;;  %vm1039_vm0 = vcmp.eq.s32.totalorder %v15128_v27, 1 }
  0x8f   : > { %v15132_v29 = vpop.permute.xlu0 %920 }
  0x90   : > { %19761 = vst [vmem:[#allocation6_spill] sm:$0xff] %v15132_v29  ;;  %vm1040_vm2 = vcmp.eq.s32.totalorder %v15132_v29, 1 }
  0x93   : > { %v15140_v32 = vpop.permute.xlu0 %929 }
  0x94   : > { %v15130_v28 = vpop.permute.xlu1 %923  ;;  %19763 = vst [vmem:[#allocation8_spill] sm:$0xff] %v15140_v32  ;;  %vm1043_vm10 = vcmp.eq.s32.totalorder %v15140_v32, 1 }
  0x95   : > { %19760 = vst [vmem:[#allocation5_spill] sm:$0xff] %v15130_v28  ;;  %vm1041_vm6 = vcmp.eq.s32.totalorder %v15130_v28, 1 }
  0x97   : > { %v15147_v35 = vpop.permute.xlu0 %935 }
  0x98   : > { %v15137_v31 = vpop.permute.xlu1 %926  ;;  %19765 = vst [vmem:[#allocation10_spill] sm:$0xff] %v15147_v35  ;;  %vm1045_vm14 = vcmp.eq.s32.totalorder %v15147_v35, 1 }
  0x99   : > { %19762 = vst [vmem:[#allocation7_spill] sm:$0xff] %v15137_v31  ;;  %vm1042_vm8 = vcmp.eq.s32.totalorder %v15137_v31, 1 }
  0x9b   : > { %v15152_v37 = vpop.permute.xlu0 %941 }
  0x9c   : > { %v15142_v33 = vpop.permute.xlu1 %932  ;;  %19767 = vst [vmem:[#allocation12_spill] sm:$0xff] %v15152_v37 }
  0x9d   : > { %19764 = vst [vmem:[#allocation9_spill] sm:$0xff] %v15142_v33  ;;  %vm1044_vm12 = vcmp.eq.s32.totalorder %v15142_v33, 1 }
  0x9f   : > { %v15156_v39 = vpop.permute.xlu0 %947 }
  0xa0   : > { %v15149_v36 = vpop.permute.xlu1 %938  ;;  %19769 = vst [vmem:[#allocation14_spill] sm:$0xff] %v15156_v39 }
  0xa1   : > { %19766 = vst [vmem:[#allocation11_spill] sm:$0xff] %v15149_v36 }
  0xa3   : > { %v15160_v41 = vpop.permute.xlu0 %953 }
  0xa4   : > { %v15154_v38 = vpop.permute.xlu1 %944  ;;  %19771 = vst [vmem:[#allocation16_spill] sm:$0xff] %v15160_v41 }
  0xa5   : > { %19768 = vst [vmem:[#allocation13_spill] sm:$0xff] %v15154_v38 }
  0xa7   : > { %v15168_v44 = vpop.permute.xlu0 %959 }
  0xa8   : > { %v15158_v40 = vpop.permute.xlu1 %950  ;;  %19773 = vst [vmem:[#allocation18_spill] sm:$0xff] %v15168_v44 }
  0xa9   : > { %19770 = vst [vmem:[#allocation15_spill] sm:$0xff] %v15158_v40 }
  0xab   : > { %v15172_v46 = vpop.permute.xlu0 %965 }
  0xac   : > { %v15162_v42 = vpop.permute.xlu1 %956  ;;  %19775 = vst [vmem:[#allocation20_spill] sm:$0xff] %v15172_v46 }
  0xad   : > { %19772 = vst [vmem:[#allocation17_spill] sm:$0xff] %v15162_v42 }
  0xaf   : > { %v15176_v48 = vpop.permute.xlu0 %971 }
  0xb0   : > { %v15170_v45 = vpop.permute.xlu1 %962  ;;  %19777 = vst [vmem:[#allocation22_spill] sm:$0xff] %v15176_v48 }
  0xb1   : > { %19774 = vst [vmem:[#allocation19_spill] sm:$0xff] %v15170_v45 }
  0xb3   : > { %v15188_v53 = vpop.permute.xlu0 %977 }
  0xb4   : > { %v15174_v47 = vpop.permute.xlu1 %968  ;;  %19779 = vst [vmem:[#allocation24_spill] sm:$0xff] %v15188_v53 }
  0xb5   : > { %19776 = vst [vmem:[#allocation21_spill] sm:$0xff] %v15174_v47 }
  0xb7   : > { %v15206_v9 = vpop.permute.xlu0 %983 }
  0xb8   : > { %v15178_v49 = vpop.permute.xlu1 %974  ;;  %19781 = vst [vmem:[#allocation26_spill] sm:$0xff] %v15206_v9  ;;  %vm19656_vm4 = vcmp.eq.s32.totalorder %v15206_v9, 1 }
  0xb9   : > { %19778 = vst [vmem:[#allocation23_spill] sm:$0xff] %v15178_v49 }
  0xbc   : > { %v15193_v56 = vpop.permute.xlu1 %980 }
  0xbd   : > { %19780 = vst [vmem:[#allocation25_spill] sm:$0xff] %v15193_v56  ;;  %vm19658_vm1 = vcmp.eq.s32.totalorder %v15193_v56, 1 }
  0xc0   : > { %v15213_v15 = vpop.permute.xlu1 %986 }
  0xc1   : > { %19782 = vst [vmem:[#allocation27_spill] sm:$0xff] %v15213_v15  ;;  %vm19654_vm7 = vcmp.eq.s32.totalorder %v15213_v15, 1 }
  0xd6   : > { %v630_v52 = vpop.f32.mrf.mxu0 }
  0xd7   : > { %v631_v54 = vadd.f32 %v15183_v50, %v630_v52  ;;  %v735_v55 = vpop.f32.mrf.mxu1 }
  0xd8   : > { %v736_v57 = vadd.f32 %v15183_v50, %v735_v55  ;;  %v11964_v58 = vpop.f32.mrf.mxu0 }
  0xd9   : > { %v834_v59 = vmax.f32 %v631_v54, 0.0  ;;  %v12027_v60 = vpop.f32.mrf.mxu1  ;;  %v15236_v54 = vpop.permute.xlu0 %989 }
  0xda   : > { %v855_v61 = vmax.f32 %v736_v57, 0.0  ;;  %v635_v62 = vpop.f32.mrf.mxu0  ;;  %19783 = vst [vmem:[#allocation28_spill] sm:$0xff] %v15236_v54  ;;  %vm19652_vm9 = vcmp.eq.s32.totalorder %v15236_v54, 1 }
  0xdb   : > { %v1080_v63 = vsel %vm1039_vm0, %v834_v59, 0.0  ;;  %v636_v0 = vadd.f32 %v15183_v50, %v635_v62  ;;  %v740_v1 = vpop.f32.mrf.mxu1 }
  0xdc   : > { %1122 = vst.msk [vmem:[#allocation2 + $0x13] sm:$0xff] %vm1121_vm15, %v1080_v63  ;;  %v1101_v3 = vsel %vm19658_vm1, %v855_v61, 0.0  ;;  %v741_v5 = vadd.f32 %v15183_v50, %v740_v1  ;;  %v11967_v6 = vpop.f32.mrf.mxu0  ;;  %vm19660_vm1 = vcmp.eq.s32.totalorder %v15160_v41, 1 }
  0xdd   : > { %1143 = vst.msk [vmem:[#allocation2 + $0xbb] sm:$0xff] %vm1121_vm15, %v1101_v3  ;;  %v835_v7 = vmax.f32 %v636_v0, 0.0  ;;  %v12030_v8 = vpop.f32.mrf.mxu1  ;;  %v15254_v6 = vpop.permute.xlu1 %992 }
  0xde   : > { %v856_v10 = vmax.f32 %v741_v5, 0.0  ;;  %v640_v11 = vpop.f32.mrf.mxu0  ;;  %19784 = vst [vmem:[#allocation29_spill] sm:$0xff] %v15254_v6  ;;  %vm19650_vm11 = vcmp.eq.s32.totalorder %v15254_v6, 1 }
  0xdf   : > { %v1081_v12 = vsel %vm1040_vm2, %v835_v7, 0.0  ;;  %v641_v13 = vadd.f32 %v15183_v50, %v640_v11  ;;  %v745_v14 = vpop.f32.mrf.mxu1 }
  0xe0   : > { %1123 = vst.msk [vmem:[#allocation2 + $0x1b] sm:$0xff] %vm1121_vm15, %v1081_v12  ;;  %v1102_v16 = vsel %vm19656_vm4, %v856_v10, 0.0  ;;  %v746_v17 = vadd.f32 %v15183_v50, %v745_v14  ;;  %v11970_v18 = vpop.f32.mrf.mxu0  ;;  %vm19674_vm4 = vcmp.eq.s32.totalorder %v15158_v40, 1 }
  0xe1   : > { %1144 = vst.msk [vmem:[#allocation2 + $0xc3] sm:$0xff] %vm1121_vm15, %v1102_v16  ;;  %v836_v19 = vmax.f32 %v641_v13, 0.0  ;;  %v12033_v4 = vpop.f32.mrf.mxu1 }
  0xe2   : > { %v857_v20 = vmax.f32 %v746_v17, 0.0  ;;  %v645_v21 = vpop.f32.mrf.mxu0 }
  0xe3   : > { %v1082_v22 = vsel %vm1041_vm6, %v836_v19, 0.0  ;;  %v646_v23 = vadd.f32 %v15183_v50, %v645_v21  ;;  %v750_v24 = vpop.f32.mrf.mxu1  ;;  %v1215_v25 = vld [vmem:[#allocation2 + $0x11] sm:$0xff]  ;;  %v10247_v19 = vld [vmem:[%s19642_s4 + $0x80] sm:$0xff]  ;;  %v15275_v21 = vpop.permute.xlu0 %995 }
  0xe4   : > { %v1166_v26 = vld [vmem:[#allocation2 + $0x10] sm:$0xff]  ;;  %1124 = vst.msk [vmem:[#allocation2 + $0x23] sm:$0xff] %vm1121_vm15, %v1082_v22  ;;  %v1103_v30 = vsel %vm19654_vm7, %v857_v20, 0.0  ;;  %v751_v34 = vadd.f32 %v15183_v50, %v750_v24  ;;  %v11973_v43 = vpop.f32.mrf.mxu0  ;;  %12108 = vmatmul.mubr.msk.f32.gmra.mxu1 %vm1121_vm15, %v1215_v25  ;;  %19785 = vst [vmem:[#allocation30_spill] sm:$0xff] %v15275_v21  ;;  %vm19648_vm13 = vcmp.eq.s32.totalorder %v15275_v21, 1  ;;  %vm19758_vm7 = vcmp.eq.s32.totalorder %v15156_v39, 1 }
  0xe5   : > { %12247 = vmatmul.mubr.msk.f32.gmra.mxu0 %vm1121_vm15, %v1166_v26  ;;  %1145 = vst.msk [vmem:[#allocation2 + $0xcb] sm:$0xff] %vm1121_vm15, %v1103_v30  ;;  %v837_v51 = vmax.f32 %v646_v23, 0.0  ;;  %v12036_v52 = vpop.f32.mrf.mxu1  ;;  %12110 = vmatprep.mubr.msk.f32.mxu1 %vm14620_vm5, %v14618_v2 }
  0xe6   : > { %12249 = vmatprep.mubr.msk.f32.mxu0 %vm14620_vm5, %v14618_v2  ;;  %v858_v55 = vmax.f32 %v751_v34, 0.0  ;;  %v650_v57 = vpop.f32.mrf.mxu0  ;;  %12378 = vmatpush3.msra.mxu1 %v10247_v19 }
  0xe7   : > { %v1083_v58 = vsel %vm1042_vm8, %v837_v51, 0.0  ;;  %v651_v59 = vadd.f32 %v15183_v50, %v650_v57  ;;  %v755_v60 = vpop.f32.mrf.mxu1  ;;  %v1216_v61 = vld [vmem:[#allocation2 + $0x19] sm:$0xff]  ;;  %12641 = vmatprep.subr.mxu1 %v14618_v2 }
  0xe8   : > { %v1167_v62 = vld [vmem:[#allocation2 + $0x18] sm:$0xff]  ;;  %1125 = vst.msk [vmem:[#allocation2 + $0x2b] sm:$0xff] %vm1121_vm15, %v1083_v58  ;;  %v1104_v63 = vsel %vm19652_vm9, %v858_v55, 0.0  ;;  %v756_v0 = vadd.f32 %v15183_v50, %v755_v60  ;;  %v11976_v1 = vpop.f32.mrf.mxu0  ;;  %12111 = vmatmul.mubr.msk.f32.gmra.mxu1 %vm1121_vm15, %v1216_v61  ;;  %vm1048_vm9 = vcmp.eq.s32.totalorder %v15154_v38, 1 }
  0xe9   : > { %12250 = vmatmul.mubr.msk.f32.gmra.mxu0 %vm1121_vm15, %v1167_v62  ;;  %1146 = vst.msk [vmem:[#allocation2 + $0xd3] sm:$0xff] %vm1121_vm15, %v1104_v63  ;;  %v838_v3 = vmax.f32 %v651_v59, 0.0  ;;  %v12039_v5 = vpop.f32.mrf.mxu1  ;;  %12113 = vmatprep.mubr.msk.f32.mxu1 %vm14620_vm5, %v14618_v2  ;;  %v10303_v55 = vld [vmem:[%s19642_s4 + $0xf8] sm:$0xff]  ;;  %v15297_v59 = vpop.permute.xlu1 %998 }
  0xea   : > { %12252 = vmatprep.mubr.msk.f32.mxu0 %vm14620_vm5, %v14618_v2  ;;  %v859_v7 = vmax.f32 %v756_v0, 0.0  ;;  %v655_v8 = vpop.f32.mrf.mxu0  ;;  %19786 = vst [vmem:[#allocation31_spill] sm:$0xff] %v15297_v59  ;;  %12503 = vmatpush3.msra.mxu0 %v10303_v55  ;;  %vm19649_vm3 = vcmp.eq.s32.totalorder %v15297_v59, 1  ;;  %v10302_v5 = vld [vmem:[%s19642_s4 + $0xf0] sm:$0xff] }
  0xeb   : > { %v1084_v10 = vsel %vm1043_vm10, %v838_v3, 0.0  ;;  %v656_v11 = vadd.f32 %v15183_v50, %v655_v8  ;;  %v760_v12 = vpop.f32.mrf.mxu1  ;;  %v1217_v13 = vld [vmem:[#allocation2 + $0x21] sm:$0xff]  ;;  %12504 = vmatprep.subr.mxu0 %v14618_v2 }
  0xec   : > { %v1168_v14 = vld [vmem:[#allocation2 + $0x20] sm:$0xff]  ;;  %1126 = vst.msk [vmem:[#allocation2 + $0x33] sm:$0xff] %vm1121_vm15, %v1084_v10  ;;  %v1105_v16 = vsel %vm19650_vm11, %v859_v7, 0.0  ;;  %v761_v17 = vadd.f32 %v15183_v50, %v760_v12  ;;  %v11979_v18 = vpop.f32.mrf.mxu0  ;;  %12114 = vmatmul.mubr.msk.f32.gmra.mxu1 %vm1121_vm15, %v1217_v13  ;;  %v15319_v13 = vpop.permute.xlu0 %1001  ;;  %12505 = vmatpush3.msra.mxu0 %v10302_v5  ;;  %vm1047_vm11 = vcmp.eq.s32.totalorder %v15152_v37, 1 }
  0xed   : > { %12253 = vmatmul.mubr.msk.f32.gmra.mxu0 %vm1121_vm15, %v1168_v14  ;;  %1147 = vst.msk [vmem:[#allocation2 + $0xdb] sm:$0xff] %vm1121_vm15, %v1105_v16  ;;  %v839_v4 = vmax.f32 %v656_v11, 0.0  ;;  %v12042_v20 = vpop.f32.mrf.mxu1  ;;  %12116 = vmatprep.mubr.msk.f32.mxu1 %vm14620_vm5, %v14618_v2  ;;  %19787 = vst [vmem:[#allocation32_spill] sm:$0xff] %v15319_v13 }
  0xee   : > { %12255 = vmatprep.mubr.msk.f32.mxu0 %vm14620_vm5, %v14618_v2  ;;  %v860_v22 = vmax.f32 %v761_v17, 0.0  ;;  %v660_v23 = vpop.f32.mrf.mxu0  ;;  %12506 = vmatprep.subr.mxu0 %v14618_v2 }
  0xef   : > { %v1085_v24 = vsel %vm1044_vm12, %v839_v4, 0.0  ;;  %v661_v25 = vadd.f32 %v15183_v50, %v660_v23  ;;  %v765_v26 = vpop.f32.mrf.mxu1  ;;  %v1218_v30 = vld [vmem:[#allocation2 + $0x29] sm:$0xff] }
  0xf0   : > { %v1169_v34 = vld [vmem:[#allocation2 + $0x28] sm:$0xff]  ;;  %1127 = vst.msk [vmem:[#allocation2 + $0x3b] sm:$0xff] %vm1121_vm15, %v1085_v24  ;;  %v1106_v43 = vsel %vm19648_vm13, %v860_v22, 0.0  ;;  %v766_v51 = vadd.f32 %v15183_v50, %v765_v26  ;;  %v11982_v52 = vpop.f32.mrf.mxu0  ;;  %12117 = vmatmul.mubr.msk.f32.gmra.mxu1 %vm1121_vm15, %v1218_v30  ;;  %vm1046_vm13 = vcmp.eq.s32.totalorder %v15149_v36, 1  ;;  %v15363_v5 = vpop.permute.xlu0 %1007 }
  0xf1   : > { %12256 = vmatmul.mubr.msk.f32.gmra.mxu0 %vm1121_vm15, %v1169_v34  ;;  %1148 = vst.msk [vmem:[#allocation2 + $0xe3] sm:$0xff] %vm1121_vm15, %v1106_v43  ;;  %v840_v57 = vmax.f32 %v661_v25, 0.0  ;;  %v12045_v58 = vpop.f32.mrf.mxu1  ;;  %12119 = vmatprep.mubr.msk.f32.mxu1 %vm14620_vm5, %v14618_v2  ;;  %v10301_v22 = vld [vmem:[%s19642_s4 + $0xe8] sm:$0xff]  ;;  %v15341_v34 = vpop.permute.xlu1 %1004  ;;  %19789 = vst [vmem:[#allocation34_spill] sm:$0xff] %v15363_v5 }
  0xf2   : > { %12258 = vmatprep.mubr.msk.f32.mxu0 %vm14620_vm5, %v14618_v2  ;;  %v861_v60 = vmax.f32 %v766_v51, 0.0  ;;  %v665_v61 = vpop.f32.mrf.mxu0  ;;  %19788 = vst [vmem:[#allocation33_spill] sm:$0xff] %v15341_v34  ;;  %12507 = vmatpush3.msra.mxu0 %v10301_v22 }
  0xf3   : > { %v1086_v62 = vsel %vm1045_vm14, %v840_v57, 0.0  ;;  %v666_v63 = vadd.f32 %v15183_v50, %v665_v61  ;;  %v770_v0 = vpop.f32.mrf.mxu1  ;;  %v1219_v1 = vld [vmem:[#allocation2 + $0x31] sm:$0xff]  ;;  %12508 = vmatprep.subr.mxu0 %v14618_v2  ;;  %v10300_v61 = vld [vmem:[%s19642_s4 + $0xe0] sm:$0xff] }
  0xf4   : > { %v1170_v3 = vld [vmem:[#allocation2 + $0x30] sm:$0xff]  ;;  %1128 = vst.msk [vmem:[#allocation2 + $0x43] sm:$0xff] %vm1121_vm15, %v1086_v62  ;;  %v1107_v7 = vsel %vm19649_vm3, %v861_v60, 0.0  ;;  %v771_v8 = vadd.f32 %v15183_v50, %v770_v0  ;;  %v11985_v10 = vpop.f32.mrf.mxu0  ;;  %12120 = vmatmul.mubr.msk.f32.gmra.mxu1 %vm1121_vm15, %v1219_v1  ;;  %vm19651_vm3 = vcmp.eq.s32.totalorder %v15319_v13, 1  ;;  %12509 = vmatpush3.msra.mxu0 %v10300_v61 }
  0xf5   : > { %12259 = vmatmul.mubr.msk.f32.gmra.mxu0 %vm1121_vm15, %v1170_v3  ;;  %1149 = vst.msk [vmem:[#allocation2 + $0xeb] sm:$0xff] %vm1121_vm15, %v1107_v7  ;;  %v841_v11 = vmax.f32 %v666_v63, 0.0  ;;  %v12048_v12 = vpop.f32.mrf.mxu1  ;;  %12122 = vmatprep.mubr.msk.f32.mxu1 %vm14620_vm5, %v14618_v2 }
  0xf6   : > { %12261 = vmatprep.mubr.msk.f32.mxu0 %vm14620_vm5, %v14618_v2  ;;  %v862_v14 = vmax.f32 %v771_v8, 0.0  ;;  %v670_v16 = vpop.f32.mrf.mxu0  ;;  %12510 = vmatprep.subr.mxu0 %v14618_v2 }
  0xf7   : > { %v1087_v17 = vsel %vm1046_vm13, %v841_v11, 0.0  ;;  %v671_v18 = vadd.f32 %v15183_v50, %v670_v16  ;;  %v775_v19 = vpop.f32.mrf.mxu1  ;;  %v1220_v4 = vld [vmem:[#allocation2 + $0x39] sm:$0xff] }
  0xf8   : > { %v1171_v20 = vld [vmem:[#allocation2 + $0x38] sm:$0xff]  ;;  %1129 = vst.msk [vmem:[#allocation2 + $0x4b] sm:$0xff] %vm1121_vm15, %v1087_v17  ;;  %v1108_v23 = vsel %vm19651_vm3, %v862_v14, 0.0  ;;  %v776_v24 = vadd.f32 %v15183_v50, %v775_v19  ;;  %v11988_v25 = vpop.f32.mrf.mxu0  ;;  %12123 = vmatmul.mubr.msk.f32.gmra.mxu1 %vm1121_vm15, %v1220_v4  ;;  %vm19653_vm3 = vcmp.eq.s32.totalorder %v15341_v34, 1 }
  0xf9   : > { %12262 = vmatmul.mubr.msk.f32.gmra.mxu0 %vm1121_vm15, %v1171_v20  ;;  %1150 = vst.msk [vmem:[#allocation2 + $0xf3] sm:$0xff] %vm1121_vm15, %v1108_v23  ;;  %v842_v26 = vmax.f32 %v671_v18, 0.0  ;;  %v12051_v30 = vpop.f32.mrf.mxu1  ;;  %12125 = vmatprep.mubr.msk.f32.mxu1 %vm14620_vm5, %v14618_v2  ;;  %v10299_v17 = vld [vmem:[%s19642_s4 + $0xd8] sm:$0xff]  ;;  %v15385_v23 = vpop.permute.xlu1 %1010 }
  0xfa   : > { %12264 = vmatprep.mubr.msk.f32.mxu0 %vm14620_vm5, %v14618_v2  ;;  %v863_v43 = vmax.f32 %v776_v24, 0.0  ;;  %v675_v51 = vpop.f32.mrf.mxu0  ;;  %19790 = vst [vmem:[#allocation35_spill] sm:$0xff] %v15385_v23  ;;  %12511 = vmatpush3.msra.mxu0 %v10299_v17 }
  0xfb   : > { %v1088_v52 = vsel %vm1047_vm11, %v842_v26, 0.0  ;;  %v676_v55 = vadd.f32 %v15183_v50, %v675_v51  ;;  %v780_v57 = vpop.f32.mrf.mxu1  ;;  %v1221_v58 = vld [vmem:[#allocation2 + $0x41] sm:$0xff]  ;;  %12512 = vmatprep.subr.mxu0 %v14618_v2 }
  0xfc   : > { %v1172_v60 = vld [vmem:[#allocation2 + $0x40] sm:$0xff]  ;;  %1130 = vst.msk [vmem:[#allocation2 + $0x53] sm:$0xff] %vm1121_vm15, %v1088_v52  ;;  %v1109_v62 = vsel %vm19653_vm3, %v863_v43, 0.0  ;;  %v781_v63 = vadd.f32 %v15183_v50, %v780_v57  ;;  %v11991_v0 = vpop.f32.mrf.mxu0  ;;  %12126 = vmatmul.mubr.msk.f32.gmra.mxu1 %vm1121_vm15, %v1221_v58  ;;  %vm19655_vm3 = vcmp.eq.s32.totalorder %v15363_v5, 1 }
  0xfd   : > { %12265 = vmatmul.mubr.msk.f32.gmra.mxu0 %vm1121_vm15, %v1172_v60  ;;  %1151 = vst.msk [vmem:[#allocation2 + $0xfb] sm:$0xff] %vm1121_vm15, %v1109_v62  ;;  %v843_v1 = vmax.f32 %v676_v55, 0.0  ;;  %v12054_v3 = vpop.f32.mrf.mxu1  ;;  %12128 = vmatprep.mubr.msk.f32.mxu1 %vm14620_vm5, %v14618_v2  ;;  %v10298_v55 = vld [vmem:[%s19642_s4 + $0xd0] sm:$0xff] }
  0xfe   : > { %12267 = vmatprep.mubr.msk.f32.mxu0 %vm14620_vm5, %v14618_v2  ;;  %v864_v7 = vmax.f32 %v781_v63, 0.0  ;;  %v680_v8 = vpop.f32.mrf.mxu0  ;;  %v15407_v63 = vpop.permute.xlu0 %1013  ;;  %12513 = vmatpush3.msra.mxu0 %v10298_v55 }
  0xff   : > { %v1089_v10 = vsel %vm1048_vm9, %v843_v1, 0.0  ;;  %v681_v11 = vadd.f32 %v15183_v50, %v680_v8  ;;  %v785_v12 = vpop.f32.mrf.mxu1  ;;  %v1222_v14 = vld [vmem:[#allocation2 + $0x49] sm:$0xff]  ;;  %19791 = vst [vmem:[#allocation36_spill] sm:$0xff] %v15407_v63  ;;  %12514 = vmatprep.subr.mxu0 %v14618_v2 }
 0x100   : > { %v1173_v16 = vld [vmem:[#allocation2 + $0x48] sm:$0xff]  ;;  %1131 = vst.msk [vmem:[#allocation2 + $0x5b] sm:$0xff] %vm1121_vm15, %v1089_v10  ;;  %v1110_v18 = vsel %vm19655_vm3, %v864_v7, 0.0  ;;  %v786_v19 = vadd.f32 %v15183_v50, %v785_v12  ;;  %v11994_v4 = vpop.f32.mrf.mxu0  ;;  %12129 = vmatmul.mubr.msk.f32.gmra.mxu1 %vm1121_vm15, %v1222_v14  ;;  %vm19657_vm3 = vcmp.eq.s32.totalorder %v15385_v23, 1 }
 0x101   : > { %12268 = vmatmul.mubr.msk.f32.gmra.mxu0 %vm1121_vm15, %v1173_v16  ;;  %1152 = vst.msk [vmem:[#allocation2 + $0x103] sm:$0xff] %vm1121_vm15, %v1110_v18  ;;  %v844_v20 = vmax.f32 %v681_v11, 0.0  ;;  %v12057_v22 = vpop.f32.mrf.mxu1  ;;  %12131 = vmatprep.mubr.msk.f32.mxu1 %vm14620_vm5, %v14618_v2  ;;  %v10297_v12 = vld [vmem:[%s19642_s4 + $0xc8] sm:$0xff]  ;;  %v15429_v4 = vpop.permute.xlu1 %1016 }
 0x102   : > { %12270 = vmatprep.mubr.msk.f32.mxu0 %vm14620_vm5, %v14618_v2  ;;  %v865_v24 = vmax.f32 %v786_v19, 0.0  ;;  %v685_v25 = vpop.f32.mrf.mxu0  ;;  %19792 = vst [vmem:[#allocation37_spill] sm:$0xff] %v15429_v4  ;;  %12515 = vmatpush3.msra.mxu0 %v10297_v12 }
 0x103   : > { %v1090_v26 = vsel %vm19758_vm7, %v844_v20, 0.0  ;;  %v686_v30 = vadd.f32 %v15183_v50, %v685_v25  ;;  %v790_v43 = vpop.f32.mrf.mxu1  ;;  %v1223_v51 = vld [vmem:[#allocation2 + $0x51] sm:$0xff]  ;;  %12516 = vmatprep.subr.mxu0 %v14618_v2 }
 0x104   : > { %v1174_v52 = vld [vmem:[#allocation2 + $0x50] sm:$0xff]  ;;  %1132 = vst.msk [vmem:[#allocation2 + $0x63] sm:$0xff] %vm1121_vm15, %v1090_v26  ;;  %v1111_v57 = vsel %vm19657_vm3, %v865_v24, 0.0  ;;  %v791_v58 = vadd.f32 %v15183_v50, %v790_v43  ;;  %v11997_v60 = vpop.f32.mrf.mxu0  ;;  %12132 = vmatmul.mubr.msk.f32.gmra.mxu1 %vm1121_vm15, %v1223_v51  ;;  %vm19659_vm3 = vcmp.eq.s32.totalorder %v15407_v63, 1  ;;  %v10296_v51 = vld [vmem:[%s19642_s4 + $0xc0] sm:$0xff] }
 0x105   : > { %12271 = vmatmul.mubr.msk.f32.gmra.mxu0 %vm1121_vm15, %v1174_v52  ;;  %1153 = vst.msk [vmem:[#allocation2 + $0x10b] sm:$0xff] %vm1121_vm15, %v1111_v57  ;;  %v845_v61 = vmax.f32 %v686_v30, 0.0  ;;  %v12060_v62 = vpop.f32.mrf.mxu1  ;;  %12134 = vmatprep.mubr.msk.f32.mxu1 %vm14620_vm5, %v14618_v2  ;;  %v2561_v63 = vld [vmem:[#allocation2 + $0xf2] sm:$0xff]  ;;  %v2562_v23 = vld [vmem:[#allocation2 + $0xfa] sm:$0xff] }
 0x106   : > { %12273 = vmatprep.mubr.msk.f32.mxu0 %vm14620_vm5, %v14618_v2  ;;  %v866_v0 = vmax.f32 %v791_v58, 0.0  ;;  %v690_v1 = vpop.f32.mrf.mxu0  ;;  %12517 = vmatpush3.msra.mxu0 %v10296_v51  ;;  %v16186_v39 = vld [vmem:[#allocation2 + $0x4c] sm:$0xff] }
 0x107   : > { %v1091_v3 = vsel %vm19674_vm4, %v845_v61, 0.0  ;;  %v691_v7 = vadd.f32 %v15183_v50, %v690_v1  ;;  %v795_v8 = vpop.f32.mrf.mxu1  ;;  %v1224_v10 = vld [vmem:[#allocation2 + $0x59] sm:$0xff]  ;;  %v15451_v61 = vpop.permute.xlu0 %1019  ;;  %12780 = vmatprep.subr.mxu0 %v14618_v2 }
 0x108   : > { %v1175_v11 = vld [vmem:[#allocation2 + $0x58] sm:$0xff]  ;;  %1133 = vst.msk [vmem:[#allocation2 + $0x6b] sm:$0xff] %vm1121_vm15, %v1091_v3  ;;  %v1112_v14 = vsel %vm19659_vm3, %v866_v0, 0.0  ;;  %v796_v16 = vadd.f32 %v15183_v50, %v795_v8  ;;  %v12000_v17 = vpop.f32.mrf.mxu0  ;;  %12135 = vmatmul.mubr.msk.f32.gmra.mxu1 %vm1121_vm15, %v1224_v10  ;;  %vm19661_vm3 = vcmp.eq.s32.totalorder %v15429_v4, 1  ;;  %19793 = vst [vmem:[#allocation38_spill] sm:$0xff] %v15451_v61  ;;  %v2560_v4 = vld [vmem:[#allocation2 + $0xea] sm:$0xff] }
 0x109   : > { %12274 = vmatmul.mubr.msk.f32.gmra.mxu0 %vm1121_vm15, %v1175_v11  ;;  %1154 = vst.msk [vmem:[#allocation2 + $0x113] sm:$0xff] %vm1121_vm15, %v1112_v14  ;;  %v846_v18 = vmax.f32 %v691_v7, 0.0  ;;  %v12063_v19 = vpop.f32.mrf.mxu1  ;;  %12137 = vmatprep.mubr.msk.f32.mxu1 %vm14620_vm5, %v14618_v2  ;;  %v2563_v5 = vld [vmem:[#allocation2 + $0x102] sm:$0xff]  ;;  %v3025_v37 = vld [vmem:[#allocation2 + $0x53] sm:$0xff] }
 0x10a   : > { %12276 = vmatprep.mubr.msk.f32.mxu0 %vm14620_vm5, %v14618_v2  ;;  %v867_v20 = vmax.f32 %v796_v16, 0.0  ;;  %v695_v22 = vpop.f32.mrf.mxu0 }
 0x10b   : > { %v1092_v24 = vsel %vm19660_vm1, %v846_v18, 0.0  ;;  %v696_v25 = vadd.f32 %v15183_v50, %v695_v22  ;;  %v800_v26 = vpop.f32.mrf.mxu1  ;;  %v1225_v30 = vld [vmem:[#allocation2 + $0x61] sm:$0xff]  ;;  %vm19662_vm1 = vcmp.eq.s32.totalorder %v15162_v42, 1  ;;  %v15470_v18 = vpop.permute.xlu1 %1022 }
 0x10c   : > { %v1176_v43 = vld [vmem:[#allocation2 + $0x60] sm:$0xff]  ;;  %1134 = vst.msk [vmem:[#allocation2 + $0x73] sm:$0xff] %vm1121_vm15, %v1092_v24  ;;  %v1113_v52 = vsel %vm19661_vm3, %v867_v20, 0.0  ;;  %v801_v55 = vadd.f32 %v15183_v50, %v800_v26  ;;  %v12003_v57 = vpop.f32.mrf.mxu0  ;;  %12138 = vmatmul.mubr.msk.f32.gmra.mxu1 %vm1121_vm15, %v1225_v30  ;;  %vm19663_vm3 = vcmp.eq.s32.totalorder %v15451_v61, 1  ;;  %19794 = vst [vmem:[#allocation39_spill] sm:$0xff] %v15470_v18  ;;  %v2564_v34 = vld [vmem:[#allocation2 + $0x10a] sm:$0xff] }
 0x10d   : > { %12277 = vmatmul.mubr.msk.f32.gmra.mxu0 %vm1121_vm15, %v1176_v43  ;;  %1155 = vst.msk [vmem:[#allocation2 + $0x11b] sm:$0xff] %vm1121_vm15, %v1113_v52  ;;  %v847_v58 = vmax.f32 %v696_v25, 0.0  ;;  %v12066_v60 = vpop.f32.mrf.mxu1  ;;  %12140 = vmatprep.mubr.msk.f32.mxu1 %vm14620_vm5, %v14618_v2  ;;  %v2559_v61 = vld [vmem:[#allocation2 + $0xe2] sm:$0xff] }
 0x10e   : > { %12279 = vmatprep.mubr.msk.f32.mxu0 %vm14620_vm5, %v14618_v2  ;;  %v868_v62 = vmax.f32 %v801_v55, 0.0  ;;  %v700_v0 = vpop.f32.mrf.mxu0  ;;  %v3510_v35 = vld [vmem:[#allocation2 + $0x5c] sm:$0xff] }
 0x10f   : > { %v1093_v1 = vsel %vm19662_vm1, %v847_v58, 0.0  ;;  %v701_v3 = vadd.f32 %v15183_v50, %v700_v0  ;;  %v805_v7 = vpop.f32.mrf.mxu1  ;;  %v1226_v8 = vld [vmem:[#allocation2 + $0x69] sm:$0xff]  ;;  %vm19664_vm1 = vcmp.eq.s32.totalorder %v15168_v44, 1  ;;  %v15488_v58 = vpop.permute.xlu0 %1025 }
 0x110   : > { %v1177_v10 = vld [vmem:[#allocation2 + $0x68] sm:$0xff]  ;;  %1135 = vst.msk [vmem:[#allocation2 + $0x7b] sm:$0xff] %vm1121_vm15, %v1093_v1  ;;  %v1114_v11 = vsel %vm19663_vm3, %v868_v62, 0.0  ;;  %v806_v12 = vadd.f32 %v15183_v50, %v805_v7  ;;  %v12006_v14 = vpop.f32.mrf.mxu0  ;;  %12141 = vmatmul.mubr.msk.f32.gmra.mxu1 %vm1121_vm15, %v1226_v8  ;;  %vm19665_vm3 = vcmp.eq.s32.totalorder %v15470_v18, 1  ;;  %19795 = vst [vmem:[#allocation40_spill] sm:$0xff] %v15488_v58  ;;  %v2558_v18 = vld [vmem:[#allocation2 + $0xda] sm:$0xff] }
 0x111   : > { %12280 = vmatmul.mubr.msk.f32.gmra.mxu0 %vm1121_vm15, %v1177_v10  ;;  %1156 = vst.msk [vmem:[#allocation2 + $0x123] sm:$0xff] %vm1121_vm15, %v1114_v11  ;;  %v848_v16 = vmax.f32 %v701_v3, 0.0  ;;  %v12069_v17 = vpop.f32.mrf.mxu1  ;;  %12143 = vmatprep.mubr.msk.f32.mxu1 %vm14620_vm5, %v14618_v2  ;;  %v2565_v13 = vld [vmem:[#allocation2 + $0x112] sm:$0xff] }
 0x112   : > { %12282 = vmatprep.mubr.msk.f32.mxu0 %vm14620_vm5, %v14618_v2  ;;  %v869_v19 = vmax.f32 %v806_v12, 0.0  ;;  %v705_v20 = vpop.f32.mrf.mxu0  ;;  %v15506_v17 = vpop.permute.xlu1 %1028 }
 0x113   : > { %v1094_v22 = vsel %vm19664_vm1, %v848_v16, 0.0  ;;  %v706_v24 = vadd.f32 %v15183_v50, %v705_v20  ;;  %v810_v25 = vpop.f32.mrf.mxu1  ;;  %v1227_v26 = vld [vmem:[#allocation2 + $0x71] sm:$0xff]  ;;  %vm19666_vm1 = vcmp.eq.s32.totalorder %v15170_v45, 1  ;;  %19796 = vst [vmem:[#allocation41_spill] sm:$0xff] %v15506_v17 }
 0x114   : > { %v1178_v30 = vld [vmem:[#allocation2 + $0x70] sm:$0xff]  ;;  %1136 = vst.msk [vmem:[#allocation2 + $0x83] sm:$0xff] %vm1121_vm15, %v1094_v22  ;;  %v1115_v43 = vsel %vm19665_vm3, %v869_v19, 0.0  ;;  %v811_v51 = vadd.f32 %v15183_v50, %v810_v25  ;;  %v12009_v52 = vpop.f32.mrf.mxu0  ;;  %12144 = vmatmul.mubr.msk.f32.gmra.mxu1 %vm1121_vm15, %v1227_v26  ;;  %vm19667_vm3 = vcmp.eq.s32.totalorder %v15488_v58, 1  ;;  %v2566_v59 = vld [vmem:[#allocation2 + $0x11a] sm:$0xff] }
 0x115   : > { %12283 = vmatmul.mubr.msk.f32.gmra.mxu0 %vm1121_vm15, %v1178_v30  ;;  %1157 = vst.msk [vmem:[#allocation2 + $0x12b] sm:$0xff] %vm1121_vm15, %v1115_v43  ;;  %v849_v55 = vmax.f32 %v706_v24, 0.0  ;;  %v12072_v57 = vpop.f32.mrf.mxu1  ;;  %12146 = vmatprep.mubr.msk.f32.mxu1 %vm14620_vm5, %v14618_v2  ;;  %v2557_v58 = vld [vmem:[#allocation2 + $0xd2] sm:$0xff] }
 0x116   : > { %12285 = vmatprep.mubr.msk.f32.mxu0 %vm14620_vm5, %v14618_v2  ;;  %v870_v60 = vmax.f32 %v811_v51, 0.0  ;;  %v710_v62 = vpop.f32.mrf.mxu0 }
 0x117   : > { %v1095_v0 = vsel %vm19666_vm1, %v849_v55, 0.0  ;;  %v711_v1 = vadd.f32 %v15183_v50, %v710_v62  ;;  %v815_v3 = vpop.f32.mrf.mxu1  ;;  %v1228_v7 = vld [vmem:[#allocation2 + $0x79] sm:$0xff]  ;;  %vm19668_vm1 = vcmp.eq.s32.totalorder %v15172_v46, 1 }
 0x118   : > { %v1179_v8 = vld [vmem:[#allocation2 + $0x78] sm:$0xff]  ;;  %1137 = vst.msk [vmem:[#allocation2 + $0x8b] sm:$0xff] %vm1121_vm15, %v1095_v0  ;;  %v1116_v10 = vsel %vm19667_vm3, %v870_v60, 0.0  ;;  %v816_v11 = vadd.f32 %v15183_v50, %v815_v3  ;;  %v12012_v12 = vpop.f32.mrf.mxu0  ;;  %12147 = vmatmul.mubr.msk.f32.gmra.mxu1 %vm1121_vm15, %v1228_v7  ;;  %vm19669_vm3 = vcmp.eq.s32.totalorder %v15506_v17, 1  ;;  %v15524_v60 = vpop.permute.xlu0 %1031  ;;  %v2556_v17 = vld [vmem:[#allocation2 + $0xca] sm:$0xff]  ;;  %v2567_v21 = vld [vmem:[#allocation2 + $0x122] sm:$0xff] }
 0x119   : > { %12286 = vmatmul.mubr.msk.f32.gmra.mxu0 %vm1121_vm15, %v1179_v8  ;;  %1158 = vst.msk [vmem:[#allocation2 + $0x133] sm:$0xff] %vm1121_vm15, %v1116_v10  ;;  %v850_v14 = vmax.f32 %v711_v1, 0.0  ;;  %v12075_v16 = vpop.f32.mrf.mxu1  ;;  %12149 = vmatprep.mubr.msk.f32.mxu1 %vm14620_vm5, %v14618_v2  ;;  %19797 = vst [vmem:[#allocation42_spill] sm:$0xff] %v15524_v60 }
 0x11a   : > { %12288 = vmatprep.mubr.msk.f32.mxu0 %vm14620_vm5, %v14618_v2  ;;  %v871_v19 = vmax.f32 %v816_v11, 0.0  ;;  %v715_v20 = vpop.f32.mrf.mxu0  ;;  %v15530_v11 = vpop.permute.xlu1 %1034 }
 0x11b   : > { %v1096_v22 = vsel %vm19668_vm1, %v850_v14, 0.0  ;;  %v716_v24 = vadd.f32 %v15183_v50, %v715_v20  ;;  %v820_v25 = vpop.f32.mrf.mxu1  ;;  %v1229_v26 = vld [vmem:[#allocation2 + $0x81] sm:$0xff]  ;;  %vm19670_vm1 = vcmp.eq.s32.totalorder %v15174_v47, 1  ;;  %19798 = vst [vmem:[#allocation43_spill] sm:$0xff] %v15530_v11 }
 0x11c   : > { %v1180_v30 = vld [vmem:[#allocation2 + $0x80] sm:$0xff]  ;;  %1138 = vst.msk [vmem:[#allocation2 + $0x93] sm:$0xff] %vm1121_vm15, %v1096_v22  ;;  %v1117_v43 = vsel %vm19669_vm3, %v871_v19, 0.0  ;;  %v821_v51 = vadd.f32 %v15183_v50, %v820_v25  ;;  %v12015_v52 = vpop.f32.mrf.mxu0  ;;  %12150 = vmatmul.mubr.msk.f32.gmra.mxu1 %vm1121_vm15, %v1229_v26  ;;  %vm19671_vm3 = vcmp.eq.s32.totalorder %v15524_v60, 1  ;;  %v2568_v6 = vld [vmem:[#allocation2 + $0x12a] sm:$0xff] }
 0x11d   : > { %12289 = vmatmul.mubr.msk.f32.gmra.mxu0 %vm1121_vm15, %v1180_v30  ;;  %1159 = vst.msk [vmem:[#allocation2 + $0x13b] sm:$0xff] %vm1121_vm15, %v1117_v43  ;;  %v851_v55 = vmax.f32 %v716_v24, 0.0  ;;  %v12078_v57 = vpop.f32.mrf.mxu1  ;;  %12152 = vmatprep.mubr.msk.f32.mxu1 %vm14620_vm5, %v14618_v2  ;;  %v15548_v52 = vpop.permute.xlu0 %1037  ;;  %v2555_v60 = vld [vmem:[#allocation2 + $0xc2] sm:$0xff] }
 0x11e   : > { %12291 = vmatprep.mubr.msk.f32.mxu0 %vm14620_vm5, %v14618_v2  ;;  %v872_v62 = vmax.f32 %v821_v51, 0.0  ;;  %v720_v0 = vpop.f32.mrf.mxu0  ;;  %19799 = vst [vmem:[#allocation44_spill] sm:$0xff] %v15548_v52  ;;  %vm1079_vm4 = vcmp.eq.s32.totalorder %v15548_v52, 1  ;;  %v3514_v33 = vld [vmem:[#allocation2 + $0x7c] sm:$0xff] }
 0x11f   : > { %v1097_v1 = vsel %vm19670_vm1, %v851_v55, 0.0  ;;  %v721_v3 = vadd.f32 %v15183_v50, %v720_v0  ;;  %v825_v7 = vpop.f32.mrf.mxu1  ;;  %v1230_v8 = vld [vmem:[#allocation2 + $0x89] sm:$0xff]  ;;  %vm19672_vm1 = vcmp.eq.s32.totalorder %v15176_v48, 1 }
 0x120   : > { %v1181_v10 = vld [vmem:[#allocation2 + $0x88] sm:$0xff]  ;;  %1139 = vst.msk [vmem:[#allocation2 + $0x9b] sm:$0xff] %vm1121_vm15, %v1097_v1  ;;  %v1118_v12 = vsel %vm19671_vm3, %v872_v62, 0.0  ;;  %v826_v14 = vadd.f32 %v15183_v50, %v825_v7  ;;  %v12018_v16 = vpop.f32.mrf.mxu0  ;;  %12153 = vmatmul.mubr.msk.f32.gmra.mxu1 %vm1121_vm15, %v1230_v8  ;;  %vm19673_vm3 = vcmp.eq.s32.totalorder %v15530_v11, 1  ;;  %v2569_v54 = vld [vmem:[#allocation2 + $0x132] sm:$0xff] }
 0x121   : > { %12292 = vmatmul.mubr.msk.f32.gmra.mxu0 %vm1121_vm15, %v1181_v10  ;;  %1160 = vst.msk [vmem:[#allocation2 + $0x143] sm:$0xff] %vm1121_vm15, %v1118_v12  ;;  %v852_v19 = vmax.f32 %v721_v3, 0.0  ;;  %v12081_v20 = vpop.f32.mrf.mxu1  ;;  %12155 = vmatprep.mubr.msk.f32.mxu1 %vm14620_vm5, %v14618_v2  ;;  %v3515_v32 = vld [vmem:[#allocation2 + $0x84] sm:$0xff] }
 0x122   : > { %12294 = vmatprep.mubr.msk.f32.mxu0 %vm14620_vm5, %v14618_v2  ;;  %v873_v22 = vmax.f32 %v826_v14, 0.0  ;;  %v725_v24 = vpop.f32.mrf.mxu0 }
 0x123   : > { %v1098_v25 = vsel %vm19672_vm1, %v852_v19, 0.0  ;;  %v726_v26 = vadd.f32 %v15183_v50, %v725_v24  ;;  %v830_v30 = vpop.f32.mrf.mxu1  ;;  %v1231_v43 = vld [vmem:[#allocation2 + $0x91] sm:$0xff]  ;;  %vm19675_vm1 = vcmp.eq.s32.totalorder %v15178_v49, 1 }
 0x124   : > { %v1182_v51 = vld [vmem:[#allocation2 + $0x90] sm:$0xff]  ;;  %1140 = vst.msk [vmem:[#allocation2 + $0xa3] sm:$0xff] %vm1121_vm15, %v1098_v25  ;;  %v1119_v55 = vsel %vm19673_vm3, %v873_v22, 0.0  ;;  %v831_v57 = vadd.f32 %v15183_v50, %v830_v30  ;;  %v12021_v62 = vpop.f32.mrf.mxu0  ;;  %12156 = vmatmul.mubr.msk.f32.gmra.mxu1 %vm1121_vm15, %v1231_v43  ;;  %vm1162_vm3 = vcmask 519168   ;;  %v2570_v15 = vld [vmem:[#allocation2 + $0x13a] sm:$0xff] }
 0x125   : > { %12295 = vmatmul.mubr.msk.f32.gmra.mxu0 %vm1121_vm15, %v1182_v51  ;;  %1161 = vst.msk [vmem:[#allocation2 + $0x14b] sm:$0xff] %vm1121_vm15, %v1119_v55  ;;  %v853_v0 = vmax.f32 %v726_v26, 0.0  ;;  %12158 = vmatprep.mubr.msk.f32.mxu1 %vm14620_vm5, %v14618_v2  ;;  %v12084_v1 = vpop.f32.mrf.mxu1 }
 0x126   : > { %12297 = vmatprep.mubr.msk.f32.mxu0 %vm14620_vm5, %v14618_v2  ;;  %v874_v3 = vmax.f32 %v831_v57, 0.0  ;;  %v730_v7 = vpop.f32.mrf.mxu0 }
 0x127   : > { %v1099_v8 = vsel %vm19675_vm1, %v853_v0, 0.0  ;;  %v731_v10 = vadd.f32 %v15183_v50, %v730_v7  ;;  %v1232_v12 = vld [vmem:[#allocation2 + $0x99] sm:$0xff]  ;;  %v1452_v16 = vpop.f32.mrf.mxu1  ;;  %vm1059_vm1 = vcmp.eq.s32.totalorder %v15188_v53, 1 }
 0x128   : > { %v1183_v14 = vld [vmem:[#allocation2 + $0x98] sm:$0xff]  ;;  %1141 = vst.msk [vmem:[#allocation2 + $0xab] sm:$0xff] %vm1121_vm15, %v1099_v8  ;;  %v1120_v19 = vsel %vm1079_vm4, %v874_v3, 0.0  ;;  %v12024_v20 = vpop.f32.mrf.mxu0  ;;  %12159 = vmatmul.mubr.msk.f32.gmra.mxu1 %vm1121_vm15, %v1232_v12  ;;  %v2571_v9 = vld [vmem:[#allocation2 + $0x142] sm:$0xff] }
 0x129   : > { %12298 = vmatmul.mubr.msk.f32.gmra.mxu0 %vm1121_vm15, %v1183_v14  ;;  %1163 = vst.msk [vmem:[#allocation2 + $0x153] sm:$0xf] %vm1162_vm3, %v1120_v19  ;;  %v854_v22 = vmax.f32 %v731_v10, 0.0  ;;  %12161 = vmatprep.mubr.msk.f32.mxu1 %vm14620_vm5, %v14618_v2  ;;  %v12103_v50 = vpop.f32.mrf.mxu1  ;;  %v1188_v19 = vld [vmem:[#allocation2 + $0xc0] sm:$0xff]  ;;  %v1238_v20 = vld [vmem:[#allocation2 + $0xc9] sm:$0xff] }
 0x12a   : > { %12300 = vmatprep.mubr.msk.f32.mxu0 %vm14620_vm5, %v14618_v2  ;;  %v1845_v43 = vpop.f32.mrf.mxu0  ;;  %v1239_v50 = vld [vmem:[#allocation2 + $0xd1] sm:$0xff] }
 0x12b   : > { %v1100_v24 = vsel %vm1059_vm1, %v854_v22, 0.0  ;;  %v1233_v25 = vld [vmem:[#allocation2 + $0xa1] sm:$0xff]  ;;  %v1457_v30 = vpop.f32.mrf.mxu1  ;;  %v15586_v51 = vadd.f32 %v1845_v43, %v1452_v16 }
 0x12c   : > { %v1184_v26 = vld [vmem:[#allocation2 + $0xa0] sm:$0xff]  ;;  %1142 = vst.msk [vmem:[#allocation2 + $0xb3] sm:$0xff] %vm1121_vm15, %v1100_v24  ;;  %12162 = vmatmul.mubr.msk.f32.gmra.mxu1 %vm1121_vm15, %v1233_v25  ;;  %v12242_v57 = vpop.f32.mrf.mxu0  ;;  %v1189_v22 = vld [vmem:[#allocation2 + $0xc8] sm:$0xff]  ;;  %v1190_v24 = vld [vmem:[#allocation2 + $0xd0] sm:$0xff] }
 0x12d   : > { %12301 = vmatmul.mubr.msk.f32.gmra.mxu0 %vm1121_vm15, %v1184_v26  ;;  %12164 = vmatprep.mubr.msk.f32.mxu1 %vm14620_vm5, %v14618_v2  ;;  %v12106_v55 = vpop.f32.mrf.mxu1  ;;  %v1237_v16 = vld [vmem:[#allocation2 + $0xc1] sm:$0xff]  ;;  %v1240_v25 = vld [vmem:[#allocation2 + $0xd9] sm:$0xff]  ;;  %v2572_v56 = vld [vmem:[#allocation2 + $0x14a] sm:$0xff] }
 0x12e   : > { %12303 = vmatprep.mubr.msk.f32.mxu0 %vm14620_vm5, %v14618_v2  ;;  %v1850_v1 = vpop.f32.mrf.mxu0  ;;  %v1191_v26 = vld [vmem:[#allocation2 + $0xd8] sm:$0xff]  ;;  %v1192_v43 = vld [vmem:[#allocation2 + $0xe0] sm:$0xff]  ;;  %v1242_v55 = vld [vmem:[#allocation2 + $0xe9] sm:$0xff] }
 0x12f   : > { %v1234_v62 = vld [vmem:[#allocation2 + $0xa9] sm:$0xff]  ;;  %v15594_v3 = vadd.f32 %v1850_v1, %v1457_v30  ;;  %v1241_v30 = vld [vmem:[#allocation2 + $0xe1] sm:$0xff]  ;;  %v1244_v1 = vld [vmem:[#allocation2 + $0xf9] sm:$0xff] }
 0x130   : > { %v1185_v0 = vld [vmem:[#allocation2 + $0xa8] sm:$0xff]  ;;  %12165 = vmatmul.mubr.msk.f32.gmra.mxu1 %vm1121_vm15, %v1234_v62  ;;  %v12245_v7 = vpop.f32.mrf.mxu0  ;;  %v1243_v62 = vld [vmem:[#allocation2 + $0xf1] sm:$0xff] }
 0x131   : > { %12304 = vmatmul.mubr.msk.f32.gmra.mxu0 %vm1121_vm15, %v1185_v0  ;;  %12167 = vmatprep.mubr.msk.f32.mxu1 %vm14620_vm5, %v14618_v2  ;;  %v1193_v57 = vld [vmem:[#allocation2 + $0xe8] sm:$0xff]  ;;  %v1194_v0 = vld [vmem:[#allocation2 + $0xf0] sm:$0xff]  ;;  %v1195_v7 = vld [vmem:[#allocation2 + $0xf8] sm:$0xff] }
 0x132   : > { %12306 = vmatprep.mubr.msk.f32.mxu0 %vm14620_vm5, %v14618_v2 }
 0x133   : > { %v1235_v8 = vld [vmem:[#allocation2 + $0xb1] sm:$0xff]  ;;  %v1236_v12 = vld [vmem:[#allocation2 + $0xb9] sm:$0xff] }
 0x134   : > { %v1186_v10 = vld [vmem:[#allocation2 + $0xb0] sm:$0xff]  ;;  %12168 = vmatmul.mubr.msk.f32.gmra.mxu1 %vm1121_vm15, %v1235_v8  ;;  %v1187_v14 = vld [vmem:[#allocation2 + $0xb8] sm:$0xff]  ;;  %v1245_v8 = vld [vmem:[#allocation2 + $0x101] sm:$0xff] }
 0x135   : > { %12307 = vmatmul.mubr.msk.f32.gmra.mxu0 %vm1121_vm15, %v1186_v10  ;;  %12170 = vmatprep.mubr.msk.f32.mxu1 %vm14620_vm5, %v14618_v2  ;;  %v1196_v10 = vld [vmem:[#allocation2 + $0x100] sm:$0xff]  ;;  %v2553_v52 = vld [vmem:[#allocation2 + $0xb2] sm:$0xff] }
 0x136   : > { %12309 = vmatprep.mubr.msk.f32.mxu0 %vm14620_vm5, %v14618_v2  ;;  %v2554_v11 = vld [vmem:[#allocation2 + $0xba] sm:$0xff] }
 0x138   : > { %12171 = vmatmul.mubr.msk.f32.gmra.mxu1 %vm1121_vm15, %v1236_v12  ;;  %v1246_v12 = vld [vmem:[#allocation2 + $0x109] sm:$0xff] }
 0x139   : > { %12310 = vmatmul.mubr.msk.f32.gmra.mxu0 %vm1121_vm15, %v1187_v14  ;;  %12173 = vmatprep.mubr.msk.f32.mxu1 %vm14620_vm5, %v14618_v2  ;;  %v1197_v14 = vld [vmem:[#allocation2 + $0x108] sm:$0xff] }
 0x13a   : > { %12312 = vmatprep.mubr.msk.f32.mxu0 %vm14620_vm5, %v14618_v2 }
 0x13c   : > { %12174 = vmatmul.mubr.msk.f32.gmra.mxu1 %vm1121_vm15, %v1237_v16  ;;  %v1247_v16 = vld [vmem:[#allocation2 + $0x111] sm:$0xff] }
 0x13d   : > { %12313 = vmatmul.mubr.msk.f32.gmra.mxu0 %vm1121_vm15, %v1188_v19  ;;  %12176 = vmatprep.mubr.msk.f32.mxu1 %vm14620_vm5, %v14618_v2  ;;  %v1198_v19 = vld [vmem:[#allocation2 + $0x110] sm:$0xff] }
 0x13e   : > { %12315 = vmatprep.mubr.msk.f32.mxu0 %vm14620_vm5, %v14618_v2 }
 0x140   : > { %12177 = vmatmul.mubr.msk.f32.gmra.mxu1 %vm1121_vm15, %v1238_v20  ;;  %v1248_v20 = vld [vmem:[#allocation2 + $0x119] sm:$0xff] }
 0x141   : > { %12316 = vmatmul.mubr.msk.f32.gmra.mxu0 %vm1121_vm15, %v1189_v22  ;;  %12179 = vmatprep.mubr.msk.f32.mxu1 %vm14620_vm5, %v14618_v2  ;;  %v1199_v22 = vld [vmem:[#allocation2 + $0x118] sm:$0xff] }
 0x142   : > { %12318 = vmatprep.mubr.msk.f32.mxu0 %vm14620_vm5, %v14618_v2 }
 0x144   : > { %12180 = vmatmul.mubr.msk.f32.gmra.mxu1 %vm1121_vm15, %v1239_v50  ;;  %v1249_v50 = vld [vmem:[#allocation2 + $0x121] sm:$0xff] }
 0x145   : > { %12319 = vmatmul.mubr.msk.f32.gmra.mxu0 %vm1121_vm15, %v1190_v24  ;;  %12182 = vmatprep.mubr.msk.f32.mxu1 %vm14620_vm5, %v14618_v2  ;;  %v1200_v24 = vld [vmem:[#allocation2 + $0x120] sm:$0xff] }
 0x146   : > { %12321 = vmatprep.mubr.msk.f32.mxu0 %vm14620_vm5, %v14618_v2 }
 0x148   : > { %12183 = vmatmul.mubr.msk.f32.gmra.mxu1 %vm1121_vm15, %v1240_v25  ;;  %v1250_v25 = vld [vmem:[#allocation2 + $0x129] sm:$0xff] }
 0x149   : > { %12322 = vmatmul.mubr.msk.f32.gmra.mxu0 %vm1121_vm15, %v1191_v26  ;;  %12185 = vmatprep.mubr.msk.f32.mxu1 %vm14620_vm5, %v14618_v2  ;;  %v1201_v26 = vld [vmem:[#allocation2 + $0x128] sm:$0xff] }
 0x14a   : > { %12324 = vmatprep.mubr.msk.f32.mxu0 %vm14620_vm5, %v14618_v2 }
 0x14c   : > { %12186 = vmatmul.mubr.msk.f32.gmra.mxu1 %vm1121_vm15, %v1241_v30  ;;  %v1251_v30 = vld [vmem:[#allocation2 + $0x131] sm:$0xff] }
 0x14d   : > { %12325 = vmatmul.mubr.msk.f32.gmra.mxu0 %vm1121_vm15, %v1192_v43  ;;  %12188 = vmatprep.mubr.msk.f32.mxu1 %vm14620_vm5, %v14618_v2  ;;  %v1202_v43 = vld [vmem:[#allocation2 + $0x130] sm:$0xff] }
 0x14e   : > { %12327 = vmatprep.mubr.msk.f32.mxu0 %vm14620_vm5, %v14618_v2 }
 0x150   : > { %12189 = vmatmul.mubr.msk.f32.gmra.mxu1 %vm1121_vm15, %v1242_v55  ;;  %v1252_v55 = vld [vmem:[#allocation2 + $0x139] sm:$0xff] }
 0x151   : > { %12328 = vmatmul.mubr.msk.f32.gmra.mxu0 %vm1121_vm15, %v1193_v57  ;;  %12191 = vmatprep.mubr.msk.f32.mxu1 %vm14620_vm5, %v14618_v2  ;;  %v1203_v57 = vld [vmem:[#allocation2 + $0x138] sm:$0xff] }
 0x152   : > { %12330 = vmatprep.mubr.msk.f32.mxu0 %vm14620_vm5, %v14618_v2 }
 0x154   : > { %12192 = vmatmul.mubr.msk.f32.gmra.mxu1 %vm1121_vm15, %v1243_v62  ;;  %v1253_v62 = vld [vmem:[#allocation2 + $0x141] sm:$0xf] }
 0x155   : > { %12331 = vmatmul.mubr.msk.f32.gmra.mxu0 %vm1121_vm15, %v1194_v0  ;;  %12194 = vmatprep.mubr.msk.f32.mxu1 %vm14620_vm5, %v14618_v2  ;;  %v1204_v0 = vld [vmem:[#allocation2 + $0x140] sm:$0xf] }
 0x156   : > { %12333 = vmatprep.mubr.msk.f32.mxu0 %vm14620_vm5, %v14618_v2 }
 0x158   : > { %12195 = vmatmul.mubr.msk.f32.gmra.mxu1 %vm1121_vm15, %v1244_v1  ;;  %v2049_v1 = vld [vmem:[#allocation2 + $0x2] sm:$0xff] }
 0x159   : > { %12334 = vmatmul.mubr.msk.f32.gmra.mxu0 %vm1121_vm15, %v1195_v7  ;;  %12197 = vmatprep.mubr.msk.f32.mxu1 %vm14620_vm5, %v14618_v2  ;;  %v10352_v7 = vld [vmem:[%s19642_s4 + $0x138] sm:$0xff] }
 0x15a   : > { %12336 = vmatprep.mubr.msk.f32.mxu0 %vm14620_vm5, %v14618_v2 }
 0x15c   : > { %12198 = vmatmul.mubr.msk.f32.gmra.mxu1 %vm1121_vm15, %v1245_v8  ;;  %v2533_v8 = vld [vmem:[#allocation2 + $0x12] sm:$0xff] }
 0x15d   : > { %12337 = vmatmul.mubr.msk.f32.gmra.mxu0 %vm1121_vm15, %v1196_v10  ;;  %12200 = vmatprep.mubr.msk.f32.mxu1 %vm14620_vm5, %v14618_v2  ;;  %v10351_v10 = vld [vmem:[%s19642_s4 + $0x130] sm:$0xff] }
 0x15e   : > { %12339 = vmatprep.mubr.msk.f32.mxu0 %vm14620_vm5, %v14618_v2 }
 0x160   : > { %12201 = vmatmul.mubr.msk.f32.gmra.mxu1 %vm1121_vm15, %v1246_v12  ;;  %v2050_v12 = vld [vmem:[#allocation2 + $0xa] sm:$0xff] }
 0x161   : > { %12340 = vmatmul.mubr.msk.f32.gmra.mxu0 %vm1121_vm15, %v1197_v14  ;;  %12203 = vmatprep.mubr.msk.f32.mxu1 %vm14620_vm5, %v14618_v2  ;;  %v2534_v14 = vld [vmem:[#allocation2 + $0x1a] sm:$0xff] }
 0x162   : > { %12342 = vmatprep.mubr.msk.f32.mxu0 %vm14620_vm5, %v14618_v2 }
 0x164   : > { %12204 = vmatmul.mubr.msk.f32.gmra.mxu1 %vm1121_vm15, %v1247_v16  ;;  %v10350_v16 = vld [vmem:[%s19642_s4 + $0x128] sm:$0xff] }
 0x165   : > { %12343 = vmatmul.mubr.msk.f32.gmra.mxu0 %vm1121_vm15, %v1198_v19  ;;  %12206 = vmatprep.mubr.msk.f32.mxu1 %vm14620_vm5, %v14618_v2  ;;  %v2535_v19 = vld [vmem:[#allocation2 + $0x22] sm:$0xff] }
 0x166   : > { %12345 = vmatprep.mubr.msk.f32.mxu0 %vm14620_vm5, %v14618_v2 }
 0x168   : > { %12207 = vmatmul.mubr.msk.f32.gmra.mxu1 %vm1121_vm15, %v1248_v20  ;;  %v10349_v20 = vld [vmem:[%s19642_s4 + $0x120] sm:$0xff] }
 0x169   : > { %12346 = vmatmul.mubr.msk.f32.gmra.mxu0 %vm1121_vm15, %v1199_v22  ;;  %12209 = vmatprep.mubr.msk.f32.mxu1 %vm14620_vm5, %v14618_v2  ;;  %v2536_v22 = vld [vmem:[#allocation2 + $0x2a] sm:$0xff] }
 0x16a   : > { %12348 = vmatprep.mubr.msk.f32.mxu0 %vm14620_vm5, %v14618_v2 }
 0x16c   : > { %12210 = vmatmul.mubr.msk.f32.gmra.mxu1 %vm1121_vm15, %v1249_v50  ;;  %v10348_v50 = vld [vmem:[%s19642_s4 + $0x118] sm:$0xff] }
 0x16d   : > { %12349 = vmatmul.mubr.msk.f32.gmra.mxu0 %vm1121_vm15, %v1200_v24  ;;  %12212 = vmatprep.mubr.msk.f32.mxu1 %vm14620_vm5, %v14618_v2  ;;  %v2537_v24 = vld [vmem:[#allocation2 + $0x32] sm:$0xff] }
 0x16e   : > { %12351 = vmatprep.mubr.msk.f32.mxu0 %vm14620_vm5, %v14618_v2 }
 0x170   : > { %12213 = vmatmul.mubr.msk.f32.gmra.mxu1 %vm1121_vm15, %v1250_v25  ;;  %v10347_v25 = vld [vmem:[%s19642_s4 + $0x110] sm:$0xff] }
 0x171   : > { %12352 = vmatmul.mubr.msk.f32.gmra.mxu0 %vm1121_vm15, %v1201_v26  ;;  %12215 = vmatprep.mubr.msk.f32.mxu1 %vm14620_vm5, %v14618_v2  ;;  %v2538_v26 = vld [vmem:[#allocation2 + $0x3a] sm:$0xff] }
 0x172   : > { %12354 = vmatprep.mubr.msk.f32.mxu0 %vm14620_vm5, %v14618_v2 }
 0x174   : > { %12216 = vmatmul.mubr.msk.f32.gmra.mxu1 %vm1121_vm15, %v1251_v30  ;;  %v10346_v30 = vld [vmem:[%s19642_s4 + $0x108] sm:$0xff] }
 0x175   : > { %12355 = vmatmul.mubr.msk.f32.gmra.mxu0 %vm1121_vm15, %v1202_v43  ;;  %12218 = vmatprep.mubr.msk.f32.mxu1 %vm14620_vm5, %v14618_v2  ;;  %v10401_v43 = vld [vmem:[%s19642_s4 + $0x178] sm:$0xff] }
 0x176   : > { %12357 = vmatprep.mubr.msk.f32.mxu0 %vm14620_vm5, %v14618_v2 }
 0x178   : > { %12219 = vmatmul.mubr.msk.f32.gmra.mxu1 %vm1121_vm15, %v1252_v55  ;;  %v2539_v55 = vld [vmem:[#allocation2 + $0x42] sm:$0xff] }
 0x179   : > { %12358 = vmatmul.mubr.msk.f32.gmra.mxu0 %vm1121_vm15, %v1203_v57  ;;  %12221 = vmatprep.mubr.msk.f32.mxu1 %vm14620_vm5, %v14618_v2  ;;  %v10400_v57 = vld [vmem:[%s19642_s4 + $0x170] sm:$0xff] }
 0x17a   : > { %12360 = vmatprep.mubr.msk.f32.mxu0 %vm14620_vm5, %v14618_v2 }
 0x17c   : > { %12222 = vmatmul.mubr.msk.f32.gmra.mxu1 %vm1121_vm15, %v1253_v62  ;;  %v10345_v62 = vld [vmem:[%s19642_s4 + $0x100] sm:$0xff] }
 0x17d   : > { %12361 = vmatmul.mubr.msk.f32.gmra.mxu0 %vm1121_vm15, %v1204_v0  ;;  %12379 = vmatprep.mubr.msk.f32.mxu1 %vm14620_vm5, %v14618_v2  ;;  %v2540_v0 = vld [vmem:[#allocation2 + $0x4a] sm:$0xff] }
 0x17e   : > { %12518 = vmatprep.mubr.msk.f32.mxu0 %vm14620_vm5, %v14618_v2 }
 0x180   : > { %12380 = vmatmul.mubr.msk.f32.vlgmr.msra.gmra.mxu1 %vm1121_vm15, %v2049_v1  ;;  %v10399_v1 = vld [vmem:[%s19642_s4 + $0x168] sm:$0xff] }
 0x181   : > { %12519 = vmatmul.mubr.msk.f32.vlgmr.msra.gmra.mxu0 %vm1121_vm15, %v2533_v8  ;;  %12642 = vmatpush3.msra.mxu1 %v10352_v7  ;;  %v2541_v7 = vld [vmem:[#allocation2 + $0x52] sm:$0xff] }
 0x182   : > { %12382 = vmatprep.mubr.msk.f32.mxu1 %vm14620_vm5, %v14618_v2  ;;  %12521 = vmatprep.mubr.msk.f32.mxu0 %vm14620_vm5, %v14618_v2 }
 0x183   : > { %12643 = vmatprep.subr.mxu1 %v14618_v2  ;;  %12781 = vmatpush3.msra.mxu0 %v10401_v43 }
 0x184   : > { %12644 = vmatpush3.msra.mxu1 %v10351_v10  ;;  %12782 = vmatprep.subr.mxu0 %v14618_v2  ;;  %v2542_v10 = vld [vmem:[#allocation2 + $0x5a] sm:$0xff] }
 0x185   : > { %12383 = vmatmul.mubr.msk.f32.gmra.mxu1 %vm1121_vm15, %v2050_v12  ;;  %12522 = vmatmul.mubr.msk.f32.gmra.mxu0 %vm1121_vm15, %v2534_v14  ;;  %v10397_v12 = vld [vmem:[%s19642_s4 + $0x158] sm:$0xff] }
 0x186   : > { %12385 = vmatprep.mubr.msk.f32.mxu1 %vm14620_vm5, %v14618_v2  ;;  %12524 = vmatprep.mubr.msk.f32.mxu0 %vm14620_vm5, %v14618_v2 }
 0x187   : > { %12645 = vmatprep.subr.mxu1 %v14618_v2  ;;  %12783 = vmatpush3.msra.mxu0 %v10400_v57  ;;  %v2544_v57 = vld [vmem:[#allocation2 + $0x6a] sm:$0xff] }
 0x188   : > { %12646 = vmatpush3.msra.mxu1 %v10350_v16  ;;  %12784 = vmatprep.subr.mxu0 %v14618_v2 }
 0x189   : > { %12386 = vmatmul.mubr.msk.f32.gmra.mxu1 %vm1121_vm15, %v2533_v8  ;;  %12525 = vmatmul.mubr.msk.f32.gmra.mxu0 %vm1121_vm15, %v2535_v19  ;;  %v10398_v8 = vld [vmem:[%s19642_s4 + $0x160] sm:$0xff] }
 0x18a   : > { %12388 = vmatprep.mubr.msk.f32.mxu1 %vm14620_vm5, %v14618_v2  ;;  %12527 = vmatprep.mubr.msk.f32.mxu0 %vm14620_vm5, %v14618_v2 }
 0x18b   : > { %12647 = vmatprep.subr.mxu1 %v14618_v2  ;;  %12785 = vmatpush3.msra.mxu0 %v10399_v1 }
 0x18c   : > { %12648 = vmatpush3.msra.mxu1 %v10349_v20  ;;  %12786 = vmatprep.subr.mxu0 %v14618_v2 }
 0x18d   : > { %12389 = vmatmul.mubr.msk.f32.gmra.mxu1 %vm1121_vm15, %v2534_v14  ;;  %12528 = vmatmul.mubr.msk.f32.gmra.mxu0 %vm1121_vm15, %v2536_v22 }
 0x18e   : > { %12391 = vmatprep.mubr.msk.f32.mxu1 %vm14620_vm5, %v14618_v2  ;;  %12530 = vmatprep.mubr.msk.f32.mxu0 %vm14620_vm5, %v14618_v2 }
 0x18f   : > { %12649 = vmatprep.subr.mxu1 %v14618_v2  ;;  %12787 = vmatpush3.msra.mxu0 %v10398_v8 }
 0x190   : > { %12650 = vmatpush3.msra.mxu1 %v10348_v50  ;;  %12788 = vmatprep.subr.mxu0 %v14618_v2  ;;  %v2543_v50 = vld [vmem:[#allocation2 + $0x62] sm:$0xff] }
 0x191   : > { %12392 = vmatmul.mubr.msk.f32.gmra.mxu1 %vm1121_vm15, %v2535_v19  ;;  %12531 = vmatmul.mubr.msk.f32.gmra.mxu0 %vm1121_vm15, %v2537_v24 }
 0x192   : > { %12394 = vmatprep.mubr.msk.f32.mxu1 %vm14620_vm5, %v14618_v2  ;;  %12533 = vmatprep.mubr.msk.f32.mxu0 %vm14620_vm5, %v14618_v2 }
 0x193   : > { %12651 = vmatprep.subr.mxu1 %v14618_v2  ;;  %12789 = vmatpush3.msra.mxu0 %v10397_v12 }
 0x194   : > { %12652 = vmatpush3.msra.mxu1 %v10347_v25  ;;  %12790 = vmatprep.subr.mxu0 %v14618_v2 }
 0x195   : > { %12395 = vmatmul.mubr.msk.f32.gmra.mxu1 %vm1121_vm15, %v2536_v22  ;;  %12534 = vmatmul.mubr.msk.f32.gmra.mxu0 %vm1121_vm15, %v2538_v26 }
 0x196   : > { %12397 = vmatprep.mubr.msk.f32.mxu1 %vm14620_vm5, %v14618_v2  ;;  %12536 = vmatprep.mubr.msk.f32.mxu0 %vm14620_vm5, %v14618_v2 }
 0x197   : > { %12653 = vmatprep.subr.mxu1 %v14618_v2 }
 0x198   : > { %12654 = vmatpush3.msra.mxu1 %v10346_v30 }
 0x199   : > { %12398 = vmatmul.mubr.msk.f32.gmra.mxu1 %vm1121_vm15, %v2537_v24  ;;  %12537 = vmatmul.mubr.msk.f32.gmra.mxu0 %vm1121_vm15, %v2539_v55  ;;  %v10396_v24 = vld [vmem:[%s19642_s4 + $0x150] sm:$0xff] }
 0x19a   : > { %12400 = vmatprep.mubr.msk.f32.mxu1 %vm14620_vm5, %v14618_v2  ;;  %12539 = vmatprep.mubr.msk.f32.mxu0 %vm14620_vm5, %v14618_v2 }
 0x19b   : > { %12655 = vmatprep.subr.mxu1 %v14618_v2  ;;  %12791 = vmatpush3.msra.mxu0 %v10396_v24 }
 0x19c   : > { %12656 = vmatpush3.msra.mxu1 %v10345_v62  ;;  %12792 = vmatprep.subr.mxu0 %v14618_v2  ;;  %v10395_v62 = vld [vmem:[%s19642_s4 + $0x148] sm:$0xff] }
 0x19d   : > { %12401 = vmatmul.mubr.msk.f32.gmra.mxu1 %vm1121_vm15, %v2538_v26  ;;  %12540 = vmatmul.mubr.msk.f32.gmra.mxu0 %vm1121_vm15, %v2540_v0 }
 0x19e   : > { %12403 = vmatprep.mubr.msk.f32.mxu1 %vm14620_vm5, %v14618_v2  ;;  %12542 = vmatprep.mubr.msk.f32.mxu0 %vm14620_vm5, %v14618_v2 }
 0x19f   : > { %12919 = vmatprep.subr.mxu1 %v14618_v2  ;;  %12793 = vmatpush3.msra.mxu0 %v10395_v62 }
 0x1a0   : > { %12794 = vmatprep.subr.mxu0 %v14618_v2 }
 0x1a1   : > { %12404 = vmatmul.mubr.msk.f32.gmra.mxu1 %vm1121_vm15, %v2539_v55  ;;  %12543 = vmatmul.mubr.msk.f32.gmra.mxu0 %vm1121_vm15, %v2541_v7 }
 0x1a2   : > { %12406 = vmatprep.mubr.msk.f32.mxu1 %vm14620_vm5, %v14618_v2  ;;  %12545 = vmatprep.mubr.msk.f32.mxu0 %vm14620_vm5, %v14618_v2 }
 0x1a4   : > { %v1462_v14 = vpop.f32.mrf.mxu1 }
 0x1a5   : > { %v1855_v16 = vpop.f32.mrf.mxu0  ;;  %12407 = vmatmul.mubr.msk.f32.gmra.mxu1 %vm1121_vm15, %v2540_v0  ;;  %12546 = vmatmul.mubr.msk.f32.gmra.mxu0 %vm1121_vm15, %v2542_v10 }
 0x1a6   : > { %v15817_v19 = vadd.f32 %v1855_v16, %v1462_v14  ;;  %12409 = vmatprep.mubr.msk.f32.mxu1 %vm14620_vm5, %v14618_v2  ;;  %12548 = vmatprep.mubr.msk.f32.mxu0 %vm14620_vm5, %v14618_v2  ;;  %v12109_v20 = vpop.f32.mrf.mxu1  ;;  %v2545_v14 = vld [vmem:[#allocation2 + $0x72] sm:$0xff] }
 0x1a7   : > { %v12248_v22 = vpop.f32.mrf.mxu0 }
 0x1a8   : > { %v1467_v25 = vpop.f32.mrf.mxu1 }
 0x1a9   : > { %v1860_v26 = vpop.f32.mrf.mxu0  ;;  %12410 = vmatmul.mubr.msk.f32.gmra.mxu1 %vm1121_vm15, %v2541_v7  ;;  %12549 = vmatmul.mubr.msk.f32.gmra.mxu0 %vm1121_vm15, %v2543_v50 }
 0x1aa   : > { %v15829_v30 = vadd.f32 %v1860_v26, %v1467_v25  ;;  %12412 = vmatprep.mubr.msk.f32.mxu1 %vm14620_vm5, %v14618_v2  ;;  %12551 = vmatprep.mubr.msk.f32.mxu0 %vm14620_vm5, %v14618_v2  ;;  %v12112_v43 = vpop.f32.mrf.mxu1  ;;  %v2546_v26 = vld [vmem:[#allocation2 + $0x7a] sm:$0xff] }
 0x1ab   : > { %v12251_v55 = vpop.f32.mrf.mxu0 }
 0x1ac   : > { %v1472_v0 = vpop.f32.mrf.mxu1 }
 0x1ad   : > { %v1865_v1 = vpop.f32.mrf.mxu0  ;;  %12413 = vmatmul.mubr.msk.f32.gmra.mxu1 %vm1121_vm15, %v2542_v10  ;;  %12552 = vmatmul.mubr.msk.f32.gmra.mxu0 %vm1121_vm15, %v2544_v57  ;;  %v10394_v10 = vld [vmem:[%s19642_s4 + $0x140] sm:$0xff] }
 0x1ae   : > { %v15841_v7 = vadd.f32 %v1865_v1, %v1472_v0  ;;  %12415 = vmatprep.mubr.msk.f32.mxu1 %vm14620_vm5, %v14618_v2  ;;  %12554 = vmatprep.mubr.msk.f32.mxu0 %vm14620_vm5, %v14618_v2  ;;  %v12115_v8 = vpop.f32.mrf.mxu1  ;;  %v2547_v1 = vld [vmem:[#allocation2 + $0x82] sm:$0xff] }
 0x1af   : > { %v12254_v12 = vpop.f32.mrf.mxu0  ;;  %12795 = vmatpush3.msra.mxu0 %v10394_v10 }
 0x1b0   : > { %v1477_v16 = vpop.f32.mrf.mxu1  ;;  %13058 = vmatprep.subr.mxu0 %v14618_v2 }
 0x1b1   : > { %v1870_v20 = vpop.f32.mrf.mxu0  ;;  %12416 = vmatmul.mubr.msk.f32.gmra.mxu1 %vm1121_vm15, %v2543_v50  ;;  %12555 = vmatmul.mubr.msk.f32.gmra.mxu0 %vm1121_vm15, %v2545_v14 }
 0x1b2   : > { %v15853_v22 = vadd.f32 %v1870_v20, %v1477_v16  ;;  %12418 = vmatprep.mubr.msk.f32.mxu1 %vm14620_vm5, %v14618_v2  ;;  %12557 = vmatprep.mubr.msk.f32.mxu0 %vm14620_vm5, %v14618_v2  ;;  %v12118_v24 = vpop.f32.mrf.mxu1  ;;  %v2548_v20 = vld [vmem:[#allocation2 + $0x8a] sm:$0xff] }
 0x1b3   : > { %v12257_v25 = vpop.f32.mrf.mxu0 }
 0x1b4   : > { %v1482_v43 = vpop.f32.mrf.mxu1 }
 0x1b5   : > { %v1875_v55 = vpop.f32.mrf.mxu0  ;;  %12419 = vmatmul.mubr.msk.f32.gmra.mxu1 %vm1121_vm15, %v2544_v57  ;;  %12558 = vmatmul.mubr.msk.f32.gmra.mxu0 %vm1121_vm15, %v2546_v26 }
 0x1b6   : > { %v15862_v50 = vadd.f32 %v1875_v55, %v1482_v43  ;;  %12421 = vmatprep.mubr.msk.f32.mxu1 %vm14620_vm5, %v14618_v2  ;;  %12560 = vmatprep.mubr.msk.f32.mxu0 %vm14620_vm5, %v14618_v2  ;;  %v12121_v62 = vpop.f32.mrf.mxu1 }
 0x1b7   : > { %v12260_v0 = vpop.f32.mrf.mxu0  ;;  %v2549_v62 = vld [vmem:[#allocation2 + $0x92] sm:$0xff] }
 0x1b8   : > { %v1487_v8 = vpop.f32.mrf.mxu1 }
 0x1b9   : > { %v1880_v12 = vpop.f32.mrf.mxu0  ;;  %12422 = vmatmul.mubr.msk.f32.gmra.mxu1 %vm1121_vm15, %v2545_v14  ;;  %12561 = vmatmul.mubr.msk.f32.gmra.mxu0 %vm1121_vm15, %v2547_v1 }
 0x1ba   : > { %v15870_v57 = vadd.f32 %v1880_v12, %v1487_v8  ;;  %12424 = vmatprep.mubr.msk.f32.mxu1 %vm14620_vm5, %v14618_v2  ;;  %12563 = vmatprep.mubr.msk.f32.mxu0 %vm14620_vm5, %v14618_v2  ;;  %v12124_v10 = vpop.f32.mrf.mxu1 }
 0x1bb   : > { %v12263_v16 = vpop.f32.mrf.mxu0 }
 0x1bc   : > { %v1492_v24 = vpop.f32.mrf.mxu1  ;;  %v2550_v16 = vld [vmem:[#allocation2 + $0x9a] sm:$0xff] }
 0x1bd   : > { %v1885_v25 = vpop.f32.mrf.mxu0  ;;  %12425 = vmatmul.mubr.msk.f32.gmra.mxu1 %vm1121_vm15, %v2546_v26  ;;  %12564 = vmatmul.mubr.msk.f32.gmra.mxu0 %vm1121_vm15, %v2548_v20 }
 0x1be   : > { %v15878_v14 = vadd.f32 %v1885_v25, %v1492_v24  ;;  %12427 = vmatprep.mubr.msk.f32.mxu1 %vm14620_vm5, %v14618_v2  ;;  %12566 = vmatprep.mubr.msk.f32.mxu0 %vm14620_vm5, %v14618_v2  ;;  %v12127_v43 = vpop.f32.mrf.mxu1 }
 0x1bf   : > { %v12266_v55 = vpop.f32.mrf.mxu0 }
 0x1c0   : > { %v1497_v0 = vpop.f32.mrf.mxu1 }
 0x1c1   : > { %v1890_v8 = vpop.f32.mrf.mxu0  ;;  %12428 = vmatmul.mubr.msk.f32.gmra.mxu1 %vm1121_vm15, %v2547_v1  ;;  %12567 = vmatmul.mubr.msk.f32.gmra.mxu0 %vm1121_vm15, %v2549_v62 }
 0x1c2   : > { %v15886_v26 = vadd.f32 %v1890_v8, %v1497_v0  ;;  %12430 = vmatprep.mubr.msk.f32.mxu1 %vm14620_vm5, %v14618_v2  ;;  %12569 = vmatprep.mubr.msk.f32.mxu0 %vm14620_vm5, %v14618_v2  ;;  %v12130_v12 = vpop.f32.mrf.mxu1  ;;  %v2551_v0 = vld [vmem:[#allocation2 + $0xa2] sm:$0xff] }
 0x1c3   : > { %v12269_v10 = vpop.f32.mrf.mxu0 }
 0x1c4   : > { %v1502_v24 = vpop.f32.mrf.mxu1 }
 0x1c5   : > { %v1895_v25 = vpop.f32.mrf.mxu0  ;;  %12431 = vmatmul.mubr.msk.f32.gmra.mxu1 %vm1121_vm15, %v2548_v20  ;;  %12570 = vmatmul.mubr.msk.f32.gmra.mxu0 %vm1121_vm15, %v2550_v16 }
 0x1c6   : > { %v15894_v1 = vadd.f32 %v1895_v25, %v1502_v24  ;;  %12433 = vmatprep.mubr.msk.f32.mxu1 %vm14620_vm5, %v14618_v2  ;;  %12572 = vmatprep.mubr.msk.f32.mxu0 %vm14620_vm5, %v14618_v2  ;;  %v12133_v43 = vpop.f32.mrf.mxu1  ;;  %v2552_v25 = vld [vmem:[#allocation2 + $0xaa] sm:$0xff] }
 0x1c7   : > { %v12272_v55 = vpop.f32.mrf.mxu0 }
 0x1c8   : > { %v1507_v8 = vpop.f32.mrf.mxu1 }
 0x1c9   : > { %v1900_v12 = vpop.f32.mrf.mxu0  ;;  %12434 = vmatmul.mubr.msk.f32.gmra.mxu1 %vm1121_vm15, %v2549_v62  ;;  %12573 = vmatmul.mubr.msk.f32.gmra.mxu0 %vm1121_vm15, %v2551_v0 }
 0x1ca   : > { %v15902_v20 = vadd.f32 %v1900_v12, %v1507_v8  ;;  %12436 = vmatprep.mubr.msk.f32.mxu1 %vm14620_vm5, %v14618_v2  ;;  %12575 = vmatprep.mubr.msk.f32.mxu0 %vm14620_vm5, %v14618_v2  ;;  %v12136_v10 = vpop.f32.mrf.mxu1 }
 0x1cb   : > { %v12275_v24 = vpop.f32.mrf.mxu0 }
 0x1cc   : > { %v1512_v43 = vpop.f32.mrf.mxu1 }
 0x1cd   : > { %v1905_v55 = vpop.f32.mrf.mxu0  ;;  %12437 = vmatmul.mubr.msk.f32.gmra.mxu1 %vm1121_vm15, %v2550_v16  ;;  %12576 = vmatmul.mubr.msk.f32.gmra.mxu0 %vm1121_vm15, %v2552_v25 }
 0x1ce   : > { %v15910_v62 = vadd.f32 %v1905_v55, %v1512_v43  ;;  %12439 = vmatprep.mubr.msk.f32.mxu1 %vm14620_vm5, %v14618_v2  ;;  %12578 = vmatprep.mubr.msk.f32.mxu0 %vm14620_vm5, %v14618_v2  ;;  %v12139_v8 = vpop.f32.mrf.mxu1 }
 0x1cf   : > { %v12278_v12 = vpop.f32.mrf.mxu0 }
 0x1d0   : > { %v1517_v10 = vpop.f32.mrf.mxu1 }
 0x1d1   : > { %v1910_v24 = vpop.f32.mrf.mxu0  ;;  %12440 = vmatmul.mubr.msk.f32.gmra.mxu1 %vm1121_vm15, %v2551_v0  ;;  %12579 = vmatmul.mubr.msk.f32.gmra.mxu0 %vm1121_vm15, %v2553_v52 }
 0x1d2   : > { %v15918_v16 = vadd.f32 %v1910_v24, %v1517_v10  ;;  %12442 = vmatprep.mubr.msk.f32.mxu1 %vm14620_vm5, %v14618_v2  ;;  %12581 = vmatprep.mubr.msk.f32.mxu0 %vm14620_vm5, %v14618_v2  ;;  %v12142_v43 = vpop.f32.mrf.mxu1 }
 0x1d3   : > { %v12281_v55 = vpop.f32.mrf.mxu0 }
 0x1d4   : > { %v1522_v8 = vpop.f32.mrf.mxu1 }
 0x1d5   : > { %v1915_v12 = vpop.f32.mrf.mxu0  ;;  %12443 = vmatmul.mubr.msk.f32.gmra.mxu1 %vm1121_vm15, %v2552_v25  ;;  %12582 = vmatmul.mubr.msk.f32.gmra.mxu0 %vm1121_vm15, %v2554_v11 }
 0x1d6   : > { %v15926_v0 = vadd.f32 %v1915_v12, %v1522_v8  ;;  %12445 = vmatprep.mubr.msk.f32.mxu1 %vm14620_vm5, %v14618_v2  ;;  %12584 = vmatprep.mubr.msk.f32.mxu0 %vm14620_vm5, %v14618_v2  ;;  %v12145_v10 = vpop.f32.mrf.mxu1 }
 0x1d7   : > { %v12284_v24 = vpop.f32.mrf.mxu0 }
 0x1d8   : > { %v1527_v43 = vpop.f32.mrf.mxu1 }
 0x1d9   : > { %v1920_v55 = vpop.f32.mrf.mxu0  ;;  %12446 = vmatmul.mubr.msk.f32.gmra.mxu1 %vm1121_vm15, %v2553_v52  ;;  %12585 = vmatmul.mubr.msk.f32.gmra.mxu0 %vm1121_vm15, %v2555_v60 }
 0x1da   : > { %v15934_v25 = vadd.f32 %v1920_v55, %v1527_v43  ;;  %12448 = vmatprep.mubr.msk.f32.mxu1 %vm14620_vm5, %v14618_v2  ;;  %12587 = vmatprep.mubr.msk.f32.mxu0 %vm14620_vm5, %v14618_v2  ;;  %v12148_v8 = vpop.f32.mrf.mxu1 }
 0x1db   : > { %v12287_v12 = vpop.f32.mrf.mxu0 }
 0x1dc   : > { %v1532_v10 = vpop.f32.mrf.mxu1 }
 0x1dd   : > { %v1925_v24 = vpop.f32.mrf.mxu0  ;;  %12449 = vmatmul.mubr.msk.f32.gmra.mxu1 %vm1121_vm15, %v2554_v11  ;;  %12588 = vmatmul.mubr.msk.f32.gmra.mxu0 %vm1121_vm15, %v2556_v17 }
 0x1de   : > { %v15942_v52 = vadd.f32 %v1925_v24, %v1532_v10  ;;  %12451 = vmatprep.mubr.msk.f32.mxu1 %vm14620_vm5, %v14618_v2  ;;  %12590 = vmatprep.mubr.msk.f32.mxu0 %vm14620_vm5, %v14618_v2  ;;  %v12151_v43 = vpop.f32.mrf.mxu1 }
 0x1df   : > { %v12290_v55 = vpop.f32.mrf.mxu0 }
 0x1e0   : > { %v1537_v8 = vpop.f32.mrf.mxu1 }
 0x1e1   : > { %v1930_v12 = vpop.f32.mrf.mxu0  ;;  %12452 = vmatmul.mubr.msk.f32.gmra.mxu1 %vm1121_vm15, %v2555_v60  ;;  %12591 = vmatmul.mubr.msk.f32.gmra.mxu0 %vm1121_vm15, %v2557_v58 }
 0x1e2   : > { %v15950_v11 = vadd.f32 %v1930_v12, %v1537_v8  ;;  %12454 = vmatprep.mubr.msk.f32.mxu1 %vm14620_vm5, %v14618_v2  ;;  %12593 = vmatprep.mubr.msk.f32.mxu0 %vm14620_vm5, %v14618_v2  ;;  %v12154_v10 = vpop.f32.mrf.mxu1 }
 0x1e3   : > { %v12293_v24 = vpop.f32.mrf.mxu0 }
 0x1e4   : > { %v1542_v43 = vpop.f32.mrf.mxu1 }
 0x1e5   : > { %v1935_v55 = vpop.f32.mrf.mxu0  ;;  %12455 = vmatmul.mubr.msk.f32.gmra.mxu1 %vm1121_vm15, %v2556_v17  ;;  %12594 = vmatmul.mubr.msk.f32.gmra.mxu0 %vm1121_vm15, %v2558_v18 }
 0x1e6   : > { %v15958_v60 = vadd.f32 %v1935_v55, %v1542_v43  ;;  %12457 = vmatprep.mubr.msk.f32.mxu1 %vm14620_vm5, %v14618_v2  ;;  %12596 = vmatprep.mubr.msk.f32.mxu0 %vm14620_vm5, %v14618_v2  ;;  %v12157_v8 = vpop.f32.mrf.mxu1 }
 0x1e7   : > { %v12296_v12 = vpop.f32.mrf.mxu0 }
 0x1e8   : > { %v1547_v10 = vpop.f32.mrf.mxu1 }
 0x1e9   : > { %v1940_v24 = vpop.f32.mrf.mxu0  ;;  %12458 = vmatmul.mubr.msk.f32.gmra.mxu1 %vm1121_vm15, %v2557_v58  ;;  %12597 = vmatmul.mubr.msk.f32.gmra.mxu0 %vm1121_vm15, %v2559_v61 }
 0x1ea   : > { %v15966_v17 = vadd.f32 %v1940_v24, %v1547_v10  ;;  %12460 = vmatprep.mubr.msk.f32.mxu1 %vm14620_vm5, %v14618_v2  ;;  %12599 = vmatprep.mubr.msk.f32.mxu0 %vm14620_vm5, %v14618_v2  ;;  %v12160_v43 = vpop.f32.mrf.mxu1 }
 0x1eb   : > { %v12299_v55 = vpop.f32.mrf.mxu0 }
 0x1ec   : > { %v1552_v8 = vpop.f32.mrf.mxu1 }
 0x1ed   : > { %v1945_v12 = vpop.f32.mrf.mxu0  ;;  %12461 = vmatmul.mubr.msk.f32.gmra.mxu1 %vm1121_vm15, %v2558_v18  ;;  %12600 = vmatmul.mubr.msk.f32.gmra.mxu0 %vm1121_vm15, %v2560_v4 }
 0x1ee   : > { %v15974_v58 = vadd.f32 %v1945_v12, %v1552_v8  ;;  %12463 = vmatprep.mubr.msk.f32.mxu1 %vm14620_vm5, %v14618_v2  ;;  %12602 = vmatprep.mubr.msk.f32.mxu0 %vm14620_vm5, %v14618_v2  ;;  %v12163_v10 = vpop.f32.mrf.mxu1 }
 0x1ef   : > { %v12302_v24 = vpop.f32.mrf.mxu0 }
 0x1f0   : > { %v1557_v43 = vpop.f32.mrf.mxu1 }
 0x1f1   : > { %v1950_v55 = vpop.f32.mrf.mxu0  ;;  %12464 = vmatmul.mubr.msk.f32.gmra.mxu1 %vm1121_vm15, %v2559_v61  ;;  %12603 = vmatmul.mubr.msk.f32.gmra.mxu0 %vm1121_vm15, %v2561_v63 }
 0x1f2   : > { %v15982_v18 = vadd.f32 %v1950_v55, %v1557_v43  ;;  %12466 = vmatprep.mubr.msk.f32.mxu1 %vm14620_vm5, %v14618_v2  ;;  %12605 = vmatprep.mubr.msk.f32.mxu0 %vm14620_vm5, %v14618_v2  ;;  %v12166_v8 = vpop.f32.mrf.mxu1 }
 0x1f3   : > { %v12305_v12 = vpop.f32.mrf.mxu0 }
 0x1f4   : > { %v1562_v10 = vpop.f32.mrf.mxu1 }
 0x1f5   : > { %v1955_v24 = vpop.f32.mrf.mxu0  ;;  %12467 = vmatmul.mubr.msk.f32.gmra.mxu1 %vm1121_vm15, %v2560_v4  ;;  %12606 = vmatmul.mubr.msk.f32.gmra.mxu0 %vm1121_vm15, %v2562_v23 }
 0x1f6   : > { %v15990_v61 = vadd.f32 %v1955_v24, %v1562_v10  ;;  %12469 = vmatprep.mubr.msk.f32.mxu1 %vm14620_vm5, %v14618_v2  ;;  %12608 = vmatprep.mubr.msk.f32.mxu0 %vm14620_vm5, %v14618_v2  ;;  %v12169_v43 = vpop.f32.mrf.mxu1 }
 0x1f7   : > { %v12308_v55 = vpop.f32.mrf.mxu0 }
 0x1f8   : > { %v1567_v8 = vpop.f32.mrf.mxu1 }
 0x1f9   : > { %v1960_v12 = vpop.f32.mrf.mxu0  ;;  %12470 = vmatmul.mubr.msk.f32.gmra.mxu1 %vm1121_vm15, %v2561_v63  ;;  %12609 = vmatmul.mubr.msk.f32.gmra.mxu0 %vm1121_vm15, %v2563_v5 }
 0x1fa   : > { %v15998_v4 = vadd.f32 %v1960_v12, %v1567_v8  ;;  %12472 = vmatprep.mubr.msk.f32.mxu1 %vm14620_vm5, %v14618_v2  ;;  %12611 = vmatprep.mubr.msk.f32.mxu0 %vm14620_vm5, %v14618_v2  ;;  %v12172_v10 = vpop.f32.mrf.mxu1 }
 0x1fb   : > { %v12311_v24 = vpop.f32.mrf.mxu0 }
 0x1fc   : > { %v1572_v43 = vpop.f32.mrf.mxu1 }
 0x1fd   : > { %v1965_v55 = vpop.f32.mrf.mxu0  ;;  %12473 = vmatmul.mubr.msk.f32.gmra.mxu1 %vm1121_vm15, %v2562_v23  ;;  %12612 = vmatmul.mubr.msk.f32.gmra.mxu0 %vm1121_vm15, %v2564_v34 }
 0x1fe   : > { %v16006_v63 = vadd.f32 %v1965_v55, %v1572_v43  ;;  %12475 = vmatprep.mubr.msk.f32.mxu1 %vm14620_vm5, %v14618_v2  ;;  %12614 = vmatprep.mubr.msk.f32.mxu0 %vm14620_vm5, %v14618_v2  ;;  %v12175_v8 = vpop.f32.mrf.mxu1 }
 0x1ff   : > { %v12314_v12 = vpop.f32.mrf.mxu0 }
 0x200   : > { %v1577_v10 = vpop.f32.mrf.mxu1 }
 0x201   : > { %v1970_v24 = vpop.f32.mrf.mxu0  ;;  %12476 = vmatmul.mubr.msk.f32.gmra.mxu1 %vm1121_vm15, %v2563_v5  ;;  %12615 = vmatmul.mubr.msk.f32.gmra.mxu0 %vm1121_vm15, %v2565_v13 }
 0x202   : > { %v16014_v23 = vadd.f32 %v1970_v24, %v1577_v10  ;;  %12478 = vmatprep.mubr.msk.f32.mxu1 %vm14620_vm5, %v14618_v2  ;;  %12617 = vmatprep.mubr.msk.f32.mxu0 %vm14620_vm5, %v14618_v2  ;;  %v12178_v43 = vpop.f32.mrf.mxu1 }
 0x203   : > { %v12317_v55 = vpop.f32.mrf.mxu0 }
 0x204   : > { %v1582_v8 = vpop.f32.mrf.mxu1 }
 0x205   : > { %v1975_v12 = vpop.f32.mrf.mxu0  ;;  %12479 = vmatmul.mubr.msk.f32.gmra.mxu1 %vm1121_vm15, %v2564_v34  ;;  %12618 = vmatmul.mubr.msk.f32.gmra.mxu0 %vm1121_vm15, %v2566_v59 }
 0x206   : > { %v16022_v5 = vadd.f32 %v1975_v12, %v1582_v8  ;;  %12481 = vmatprep.mubr.msk.f32.mxu1 %vm14620_vm5, %v14618_v2  ;;  %12620 = vmatprep.mubr.msk.f32.mxu0 %vm14620_vm5, %v14618_v2  ;;  %v12181_v10 = vpop.f32.mrf.mxu1 }
 0x207   : > { %v12320_v24 = vpop.f32.mrf.mxu0 }
 0x208   : > { %v1587_v43 = vpop.f32.mrf.mxu1 }
 0x209   : > { %v1980_v55 = vpop.f32.mrf.mxu0  ;;  %12482 = vmatmul.mubr.msk.f32.gmra.mxu1 %vm1121_vm15, %v2565_v13  ;;  %12621 = vmatmul.mubr.msk.f32.gmra.mxu0 %vm1121_vm15, %v2567_v21 }
 0x20a   : > { %v16030_v34 = vadd.f32 %v1980_v55, %v1587_v43  ;;  %12484 = vmatprep.mubr.msk.f32.mxu1 %vm14620_vm5, %v14618_v2  ;;  %12623 = vmatprep.mubr.msk.f32.mxu0 %vm14620_vm5, %v14618_v2  ;;  %v12184_v8 = vpop.f32.mrf.mxu1 }
 0x20b   : > { %v12323_v12 = vpop.f32.mrf.mxu0 }
 0x20c   : > { %v1592_v10 = vpop.f32.mrf.mxu1 }
 0x20d   : > { %v1985_v24 = vpop.f32.mrf.mxu0  ;;  %12485 = vmatmul.mubr.msk.f32.gmra.mxu1 %vm1121_vm15, %v2566_v59  ;;  %12624 = vmatmul.mubr.msk.f32.gmra.mxu0 %vm1121_vm15, %v2568_v6 }
 0x20e   : > { %v16038_v13 = vadd.f32 %v1985_v24, %v1592_v10  ;;  %12487 = vmatprep.mubr.msk.f32.mxu1 %vm14620_vm5, %v14618_v2  ;;  %12626 = vmatprep.mubr.msk.f32.mxu0 %vm14620_vm5, %v14618_v2  ;;  %v12187_v43 = vpop.f32.mrf.mxu1 }
 0x20f   : > { %v12326_v55 = vpop.f32.mrf.mxu0 }
 0x210   : > { %v1597_v8 = vpop.f32.mrf.mxu1 }
 0x211   : > { %v1990_v12 = vpop.f32.mrf.mxu0  ;;  %12488 = vmatmul.mubr.msk.f32.gmra.mxu1 %vm1121_vm15, %v2567_v21  ;;  %12627 = vmatmul.mubr.msk.f32.gmra.mxu0 %vm1121_vm15, %v2569_v54 }
 0x212   : > { %v16046_v59 = vadd.f32 %v1990_v12, %v1597_v8  ;;  %12490 = vmatprep.mubr.msk.f32.mxu1 %vm14620_vm5, %v14618_v2  ;;  %12629 = vmatprep.mubr.msk.f32.mxu0 %vm14620_vm5, %v14618_v2  ;;  %v12190_v10 = vpop.f32.mrf.mxu1 }
 0x213   : > { %v12329_v24 = vpop.f32.mrf.mxu0 }
 0x214   : > { %v1602_v43 = vpop.f32.mrf.mxu1 }
 0x215   : > { %v1995_v55 = vpop.f32.mrf.mxu0  ;;  %12491 = vmatmul.mubr.msk.f32.gmra.mxu1 %vm1121_vm15, %v2568_v6  ;;  %12630 = vmatmul.mubr.msk.f32.gmra.mxu0 %vm1121_vm15, %v2570_v15 }
 0x216   : > { %v16054_v21 = vadd.f32 %v1995_v55, %v1602_v43  ;;  %12493 = vmatprep.mubr.msk.f32.mxu1 %vm14620_vm5, %v14618_v2  ;;  %12632 = vmatprep.mubr.msk.f32.mxu0 %vm14620_vm5, %v14618_v2  ;;  %v12193_v8 = vpop.f32.mrf.mxu1 }
 0x217   : > { %v12332_v12 = vpop.f32.mrf.mxu0 }
 0x218   : > { %v1607_v10 = vpop.f32.mrf.mxu1 }
 0x219   : > { %v2000_v24 = vpop.f32.mrf.mxu0  ;;  %12494 = vmatmul.mubr.msk.f32.gmra.mxu1 %vm1121_vm15, %v2569_v54  ;;  %12633 = vmatmul.mubr.msk.f32.gmra.mxu0 %vm1121_vm15, %v2571_v9 }
 0x21a   : > { %v16062_v6 = vadd.f32 %v2000_v24, %v1607_v10  ;;  %12496 = vmatprep.mubr.msk.f32.mxu1 %vm14620_vm5, %v14618_v2  ;;  %12635 = vmatprep.mubr.msk.f32.mxu0 %vm14620_vm5, %v14618_v2  ;;  %v12196_v43 = vpop.f32.mrf.mxu1  ;;  %v2089_v24 = vld [vmem:[#allocation2 + $0x142] sm:$0xf] }
 0x21b   : > { %v12335_v55 = vpop.f32.mrf.mxu0  ;;  %v2573_v43 = vld [vmem:[#allocation2 + $0x152] sm:$0xf] }
 0x21c   : > { %v1612_v8 = vpop.f32.mrf.mxu1 }
 0x21d   : > { %v2005_v12 = vpop.f32.mrf.mxu0  ;;  %12497 = vmatmul.mubr.msk.f32.gmra.mxu1 %vm1121_vm15, %v2570_v15  ;;  %12636 = vmatmul.mubr.msk.f32.gmra.mxu0 %vm1121_vm15, %v2572_v56 }
 0x21e   : > { %v16070_v54 = vadd.f32 %v2005_v12, %v1612_v8  ;;  %12499 = vmatprep.mubr.msk.f32.mxu1 %vm14620_vm5, %v14618_v2  ;;  %12638 = vmatprep.mubr.msk.f32.mxu0 %vm14620_vm5, %v14618_v2  ;;  %v12199_v9 = vpop.f32.mrf.mxu1  ;;  %v10450_v12 = vld [vmem:[%s19642_s4 + $0x1b8] sm:$0xff] }
 0x21f   : > { %v12338_v10 = vpop.f32.mrf.mxu0  ;;  %v3017_v9 = vld [vmem:[#allocation2 + $0x13] sm:$0xff] }
 0x220   : > { %v1617_v55 = vpop.f32.mrf.mxu1  ;;  %v3501_v10 = vld [vmem:[#allocation2 + $0x14] sm:$0xff] }
 0x221   : > { %v2010_v53 = vpop.f32.mrf.mxu0  ;;  %12500 = vmatmul.mubr.msk.f32.gmra.mxu1 %vm1121_vm15, %v2089_v24  ;;  %12639 = vmatmul.mubr.msk.f32.gmra.mxu0 %vm1121_vm15, %v2573_v43 }
 0x222   : > { %v16078_v15 = vadd.f32 %v2010_v53, %v1617_v55  ;;  %12657 = vmatprep.mubr.msk.f32.mxu1 %vm14620_vm5, %v14618_v2  ;;  %12796 = vmatprep.mubr.msk.f32.mxu0 %vm14620_vm5, %v14618_v2  ;;  %v12202_v56 = vpop.f32.mrf.mxu1  ;;  %v10449_v53 = vld [vmem:[%s19642_s4 + $0x1b0] sm:$0xff] }
 0x223   : > { %v12341_v8 = vpop.f32.mrf.mxu0 }
 0x224   : > { %v1622_v49 = vpop.f32.mrf.mxu1  ;;  %v3018_v8 = vld [vmem:[#allocation2 + $0x1b] sm:$0xff] }
 0x225   : > { %v2015_v24 = vpop.f32.mrf.mxu0  ;;  %12658 = vmatmul.mubr.msk.f32.vlgmr.msra.gmra.mxu1 %vm1121_vm15, %v3017_v9  ;;  %12797 = vmatmul.mubr.msk.f32.vlgmr.msra.gmra.mxu0 %vm1121_vm15, %v3501_v10  ;;  %v3502_v9 = vld [vmem:[#allocation2 + $0x1c] sm:$0xff] }
 0x226   : > { %v16092_v43 = vadd.f32 %v2015_v24, %v1622_v49  ;;  %12920 = vmatpush3.msra.mxu1 %v10450_v12  ;;  %12660 = vmatprep.mubr.msk.f32.mxu1 %vm14620_vm5, %v14618_v2  ;;  %v12205_v55 = vpop.f32.mrf.mxu1  ;;  %v10448_v49 = vld [vmem:[%s19642_s4 + $0x1a8] sm:$0xff] }
 0x227   : > { %v12344_v56 = vpop.f32.mrf.mxu0  ;;  %12799 = vmatprep.mubr.msk.f32.mxu0 %vm14620_vm5, %v14618_v2  ;;  %12921 = vmatprep.subr.mxu1 %v14618_v2  ;;  %v3019_v55 = vld [vmem:[#allocation2 + $0x23] sm:$0xff] }
 0x228   : > { %12922 = vmatpush3.msra.mxu1 %v10449_v53  ;;  %v1627_v10 = vpop.f32.mrf.mxu1  ;;  %v16111_v56 = vld [vmem:[#allocation2 + $0x24] sm:$0xff] }
 0x229   : > { %v2020_v48 = vpop.f32.mrf.mxu0  ;;  %12661 = vmatmul.mubr.msk.f32.gmra.mxu1 %vm1121_vm15, %v3018_v8  ;;  %12800 = vmatmul.mubr.msk.f32.gmra.mxu0 %vm1121_vm15, %v3502_v9 }
 0x22a   : > { %v16104_v12 = vadd.f32 %v2020_v48, %v1627_v10  ;;  %12663 = vmatprep.mubr.msk.f32.mxu1 %vm14620_vm5, %v14618_v2  ;;  %12802 = vmatprep.mubr.msk.f32.mxu0 %vm14620_vm5, %v14618_v2  ;;  %v12208_v24 = vpop.f32.mrf.mxu1  ;;  %v10447_v48 = vld [vmem:[%s19642_s4 + $0x1a0] sm:$0xff] }
 0x22b   : > { %v12347_v53 = vpop.f32.mrf.mxu0  ;;  %12923 = vmatprep.subr.mxu1 %v14618_v2 }
 0x22c   : > { %12924 = vmatpush3.msra.mxu1 %v10448_v49  ;;  %v1632_v8 = vpop.f32.mrf.mxu1  ;;  %v3020_v53 = vld [vmem:[#allocation2 + $0x2b] sm:$0xff] }
 0x22d   : > { %v2025_v9 = vpop.f32.mrf.mxu0  ;;  %12664 = vmatmul.mubr.msk.f32.gmra.mxu1 %vm1121_vm15, %v3019_v55  ;;  %12803 = vmatmul.mubr.msk.f32.gmra.mxu0 %vm1121_vm15, %v16111_v56  ;;  %v16126_v55 = vld [vmem:[#allocation2 + $0x2c] sm:$0xff] }
 0x22e   : > { %v16119_v10 = vadd.f32 %v2025_v9, %v1632_v8  ;;  %12666 = vmatprep.mubr.msk.f32.mxu1 %vm14620_vm5, %v14618_v2  ;;  %12805 = vmatprep.mubr.msk.f32.mxu0 %vm14620_vm5, %v14618_v2  ;;  %v12211_v49 = vpop.f32.mrf.mxu1  ;;  %v10446_v8 = vld [vmem:[%s19642_s4 + $0x198] sm:$0xff] }
 0x22f   : > { %v12350_v24 = vpop.f32.mrf.mxu0  ;;  %12925 = vmatprep.subr.mxu1 %v14618_v2 }
 0x230   : > { %12926 = vmatpush3.msra.mxu1 %v10447_v48  ;;  %v1637_v47 = vpop.f32.mrf.mxu1  ;;  %v3021_v24 = vld [vmem:[#allocation2 + $0x33] sm:$0xff] }
 0x231   : > { %v2030_v46 = vpop.f32.mrf.mxu0  ;;  %12667 = vmatmul.mubr.msk.f32.gmra.mxu1 %vm1121_vm15, %v3020_v53  ;;  %12806 = vmatmul.mubr.msk.f32.gmra.mxu0 %vm1121_vm15, %v16126_v55  ;;  %v16141_v53 = vld [vmem:[#allocation2 + $0x34] sm:$0xff] }
 0x232   : > { %v16134_v9 = vadd.f32 %v2030_v46, %v1637_v47  ;;  %12669 = vmatprep.mubr.msk.f32.mxu1 %vm14620_vm5, %v14618_v2  ;;  %12808 = vmatprep.mubr.msk.f32.mxu0 %vm14620_vm5, %v14618_v2  ;;  %v12214_v48 = vpop.f32.mrf.mxu1  ;;  %v10445_v46 = vld [vmem:[%s19642_s4 + $0x190] sm:$0xff] }
 0x233   : > { %v12353_v49 = vpop.f32.mrf.mxu0  ;;  %12927 = vmatprep.subr.mxu1 %v14618_v2 }
 0x234   : > { %12928 = vmatpush3.msra.mxu1 %v10446_v8  ;;  %v1642_v45 = vpop.f32.mrf.mxu1  ;;  %v3022_v49 = vld [vmem:[#allocation2 + $0x3b] sm:$0xff] }
 0x235   : > { %v2035_v44 = vpop.f32.mrf.mxu0  ;;  %12670 = vmatmul.mubr.msk.f32.gmra.mxu1 %vm1121_vm15, %v3021_v24  ;;  %12809 = vmatmul.mubr.msk.f32.gmra.mxu0 %vm1121_vm15, %v16141_v53  ;;  %v3506_v24 = vld [vmem:[#allocation2 + $0x3c] sm:$0xff] }
 0x236   : > { %v16149_v47 = vadd.f32 %v2035_v44, %v1642_v45  ;;  %12672 = vmatprep.mubr.msk.f32.mxu1 %vm14620_vm5, %v14618_v2  ;;  %12811 = vmatprep.mubr.msk.f32.mxu0 %vm14620_vm5, %v14618_v2  ;;  %v12217_v8 = vpop.f32.mrf.mxu1  ;;  %v10444_v44 = vld [vmem:[%s19642_s4 + $0x188] sm:$0xff] }
 0x237   : > { %v12356_v48 = vpop.f32.mrf.mxu0  ;;  %12929 = vmatprep.subr.mxu1 %v14618_v2 }
 0x238   : > { %12930 = vmatpush3.msra.mxu1 %v10445_v46  ;;  %v1647_v42 = vpop.f32.mrf.mxu1  ;;  %v3023_v48 = vld [vmem:[#allocation2 + $0x43] sm:$0xff] }
 0x239   : > { %v2040_v41 = vpop.f32.mrf.mxu0  ;;  %12673 = vmatmul.mubr.msk.f32.gmra.mxu1 %vm1121_vm15, %v3022_v49  ;;  %12812 = vmatmul.mubr.msk.f32.gmra.mxu0 %vm1121_vm15, %v3506_v24  ;;  %v16168_v49 = vld [vmem:[#allocation2 + $0x44] sm:$0xff]  ;;  %v10499_v24 = vld [vmem:[%s19642_s4 + $0x1f8] sm:$0xff] }
 0x23a   : > { %v16161_v45 = vadd.f32 %v2040_v41, %v1647_v42  ;;  %12675 = vmatprep.mubr.msk.f32.mxu1 %vm14620_vm5, %v14618_v2  ;;  %12814 = vmatprep.mubr.msk.f32.mxu0 %vm14620_vm5, %v14618_v2  ;;  %v12220_v8 = vpop.f32.mrf.mxu1 }
 0x23b   : > { %v12359_v46 = vpop.f32.mrf.mxu0  ;;  %12931 = vmatprep.subr.mxu1 %v14618_v2  ;;  %v10443_v8 = vld [vmem:[%s19642_s4 + $0x180] sm:$0xff]  ;;  %13059 = vmatpush3.msra.mxu0 %v10499_v24 }
 0x23c   : > { %12932 = vmatpush3.msra.mxu1 %v10444_v44  ;;  %v1652_v41 = vpop.f32.mrf.mxu1  ;;  %13060 = vmatprep.subr.mxu0 %v14618_v2 }
 0x23d   : > { %v2045_v42 = vpop.f32.mrf.mxu0  ;;  %12676 = vmatmul.mubr.msk.f32.gmra.mxu1 %vm1121_vm15, %v3023_v48  ;;  %12815 = vmatmul.mubr.msk.f32.gmra.mxu0 %vm1121_vm15, %v16168_v49  ;;  %v3024_v48 = vld [vmem:[#allocation2 + $0x4b] sm:$0xff] }
 0x23e   : > { %v16179_v46 = vadd.f32 %v2045_v42, %v1652_v41  ;;  %12678 = vmatprep.mubr.msk.f32.mxu1 %vm14620_vm5, %v14618_v2  ;;  %12817 = vmatprep.mubr.msk.f32.mxu0 %vm14620_vm5, %v14618_v2  ;;  %v12223_v44 = vpop.f32.mrf.mxu1  ;;  %v10498_v41 = vld [vmem:[%s19642_s4 + $0x1f0] sm:$0xff] }
 0x23f   : > { %v12362_v40 = vpop.f32.mrf.mxu0  ;;  %12933 = vmatprep.subr.mxu1 %v14618_v2  ;;  %13061 = vmatpush3.msra.mxu0 %v10498_v41 }
 0x240   : > { %12934 = vmatpush3.msra.mxu1 %v10443_v8  ;;  %v2288_v42 = vpop.f32.mrf.mxu1  ;;  %13062 = vmatprep.subr.mxu0 %v14618_v2 }
 0x241   : > { %v2772_v38 = vpop.f32.mrf.mxu0  ;;  %12679 = vmatmul.mubr.msk.f32.gmra.mxu1 %vm1121_vm15, %v3024_v48  ;;  %12818 = vmatmul.mubr.msk.f32.gmra.mxu0 %vm1121_vm15, %v16186_v39  ;;  %v2492_v40 = vadd.f32 %v2288_v42, %v15586_v51  ;;  %v3509_v48 = vld [vmem:[#allocation2 + $0x54] sm:$0xff]  ;;  %v10497_v51 = vld [vmem:[%s19642_s4 + $0x1e8] sm:$0xff] }
 0x242   : > { %12681 = vmatprep.mubr.msk.f32.mxu1 %vm14620_vm5, %v14618_v2  ;;  %12820 = vmatprep.mubr.msk.f32.mxu0 %vm14620_vm5, %v14618_v2  ;;  %v12381_v24 = vpop.f32.mrf.mxu1 }
 0x243   : > { %v12520_v8 = vpop.f32.mrf.mxu0  ;;  %13197 = vmatprep.subr.mxu1 %v14618_v2  ;;  %v16201_v44 = vadd.f32 %v2772_v38, %v2492_v40  ;;  %13063 = vmatpush3.msra.mxu0 %v10497_v51 }
 0x244   : > { %v3026_v8 = vld [vmem:[#allocation2 + $0x5b] sm:$0xff]  ;;  %13064 = vmatprep.subr.mxu0 %v14618_v2 }
 0x245   : > { %v2293_v42 = vpop.f32.mrf.mxu1  ;;  %v2777_v36 = vpop.f32.mrf.mxu0  ;;  %12682 = vmatmul.mubr.msk.f32.gmra.mxu1 %vm1121_vm15, %v3025_v37  ;;  %12821 = vmatmul.mubr.msk.f32.gmra.mxu0 %vm1121_vm15, %v3509_v48  ;;  %v10496_v37 = vld [vmem:[%s19642_s4 + $0x1e0] sm:$0xff] }
 0x246   : > { %v2493_v41 = vadd.f32 %v2293_v42, %v15594_v3  ;;  %12684 = vmatprep.mubr.msk.f32.mxu1 %vm14620_vm5, %v14618_v2  ;;  %12823 = vmatprep.mubr.msk.f32.mxu0 %vm14620_vm5, %v14618_v2 }
 0x247   : > { %v12384_v38 = vpop.f32.mrf.mxu1  ;;  %v12523_v40 = vpop.f32.mrf.mxu0  ;;  %13065 = vmatpush3.msra.mxu0 %v10496_v37 }
 0x248   : > { %v16214_v24 = vadd.f32 %v2777_v36, %v2493_v41  ;;  %v3027_v38 = vld [vmem:[#allocation2 + $0x63] sm:$0xff]  ;;  %13066 = vmatprep.subr.mxu0 %v14618_v2 }
 0x249   : > { %v2298_v3 = vpop.f32.mrf.mxu1  ;;  %v2782_v48 = vpop.f32.mrf.mxu0  ;;  %12685 = vmatmul.mubr.msk.f32.gmra.mxu1 %vm1121_vm15, %v3026_v8  ;;  %12824 = vmatmul.mubr.msk.f32.gmra.mxu0 %vm1121_vm15, %v3510_v35  ;;  %v3511_v40 = vld [vmem:[#allocation2 + $0x64] sm:$0xff]  ;;  %v10495_v35 = vld [vmem:[%s19642_s4 + $0x1d8] sm:$0xff] }
 0x24a   : > { %v2494_v42 = vadd.f32 %v2298_v3, %v15817_v19  ;;  %12687 = vmatprep.mubr.msk.f32.mxu1 %vm14620_vm5, %v14618_v2  ;;  %12826 = vmatprep.mubr.msk.f32.mxu0 %vm14620_vm5, %v14618_v2 }
 0x24b   : > { %v12387_v36 = vpop.f32.mrf.mxu1  ;;  %v12526_v51 = vpop.f32.mrf.mxu0  ;;  %13067 = vmatpush3.msra.mxu0 %v10495_v35 }
 0x24c   : > { %v16227_v41 = vadd.f32 %v2782_v48, %v2494_v42  ;;  %v3028_v36 = vld [vmem:[#allocation2 + $0x6b] sm:$0xff]  ;;  %13068 = vmatprep.subr.mxu0 %v14618_v2 }
 0x24d   : > { %v2303_v19 = vpop.f32.mrf.mxu1  ;;  %v2787_v8 = vpop.f32.mrf.mxu0  ;;  %12688 = vmatmul.mubr.msk.f32.gmra.mxu1 %vm1121_vm15, %v3027_v38  ;;  %12827 = vmatmul.mubr.msk.f32.gmra.mxu0 %vm1121_vm15, %v3511_v40  ;;  %v16242_v51 = vld [vmem:[#allocation2 + $0x6c] sm:$0xff] }
 0x24e   : > { %v2495_v3 = vadd.f32 %v2303_v19, %v15829_v30  ;;  %12690 = vmatprep.mubr.msk.f32.mxu1 %vm14620_vm5, %v14618_v2  ;;  %12829 = vmatprep.mubr.msk.f32.mxu0 %vm14620_vm5, %v14618_v2  ;;  %v10494_v30 = vld [vmem:[%s19642_s4 + $0x1d0] sm:$0xff] }
 0x24f   : > { %v12390_v37 = vpop.f32.mrf.mxu1  ;;  %v12529_v48 = vpop.f32.mrf.mxu0  ;;  %13069 = vmatpush3.msra.mxu0 %v10494_v30 }
 0x250   : > { %v16240_v42 = vadd.f32 %v2787_v8, %v2495_v3  ;;  %v3029_v37 = vld [vmem:[#allocation2 + $0x73] sm:$0xff]  ;;  %13070 = vmatprep.subr.mxu0 %v14618_v2 }
 0x251   : > { %v2308_v38 = vpop.f32.mrf.mxu1  ;;  %v2792_v40 = vpop.f32.mrf.mxu0  ;;  %12691 = vmatmul.mubr.msk.f32.gmra.mxu1 %vm1121_vm15, %v3028_v36  ;;  %12830 = vmatmul.mubr.msk.f32.gmra.mxu0 %vm1121_vm15, %v16242_v51  ;;  %v16258_v48 = vld [vmem:[#allocation2 + $0x74] sm:$0xff] }
 0x252   : > { %v2496_v35 = vadd.f32 %v2308_v38, %v15841_v7  ;;  %12693 = vmatprep.mubr.msk.f32.mxu1 %vm14620_vm5, %v14618_v2  ;;  %12832 = vmatprep.mubr.msk.f32.mxu0 %vm14620_vm5, %v14618_v2  ;;  %v10493_v7 = vld [vmem:[%s19642_s4 + $0x1c8] sm:$0xff] }
 0x253   : > { %v12393_v19 = vpop.f32.mrf.mxu1  ;;  %v12532_v8 = vpop.f32.mrf.mxu0  ;;  %13071 = vmatpush3.msra.mxu0 %v10493_v7 }
 0x254   : > { %v16256_v3 = vadd.f32 %v2792_v40, %v2496_v35  ;;  %v3030_v8 = vld [vmem:[#allocation2 + $0x7b] sm:$0xff]  ;;  %13072 = vmatprep.subr.mxu0 %v14618_v2 }
 0x255   : > { %v2313_v36 = vpop.f32.mrf.mxu1  ;;  %v2797_v38 = vpop.f32.mrf.mxu0  ;;  %12694 = vmatmul.mubr.msk.f32.gmra.mxu1 %vm1121_vm15, %v3029_v37  ;;  %12833 = vmatmul.mubr.msk.f32.gmra.mxu0 %vm1121_vm15, %v16258_v48  ;;  %v10492_v37 = vld [vmem:[%s19642_s4 + $0x1c0] sm:$0xff] }
 0x256   : > { %v2497_v30 = vadd.f32 %v2313_v36, %v15853_v22  ;;  %12696 = vmatprep.mubr.msk.f32.mxu1 %vm14620_vm5, %v14618_v2  ;;  %12835 = vmatprep.mubr.msk.f32.mxu0 %vm14620_vm5, %v14618_v2 }
 0x257   : > { %v12396_v40 = vpop.f32.mrf.mxu1  ;;  %v12535_v35 = vpop.f32.mrf.mxu0  ;;  %13073 = vmatpush3.msra.mxu0 %v10492_v37 }
 0x258   : > { %v16272_v19 = vadd.f32 %v2797_v38, %v2497_v30  ;;  %v3031_v35 = vld [vmem:[#allocation2 + $0x83] sm:$0xff]  ;;  %13336 = vmatprep.subr.mxu0 %v14618_v2 }
 0x259   : > { %v2318_v22 = vpop.f32.mrf.mxu1  ;;  %v2802_v36 = vpop.f32.mrf.mxu0  ;;  %12697 = vmatmul.mubr.msk.f32.gmra.mxu1 %vm1121_vm15, %v3030_v8  ;;  %12836 = vmatmul.mubr.msk.f32.gmra.mxu0 %vm1121_vm15, %v3514_v33 }
 0x25a   : > { %v2498_v40 = vadd.f32 %v2318_v22, %v15862_v50  ;;  %12699 = vmatprep.mubr.msk.f32.mxu1 %vm14620_vm5, %v14618_v2  ;;  %12838 = vmatprep.mubr.msk.f32.mxu0 %vm14620_vm5, %v14618_v2 }
 0x25b   : > { %v12399_v7 = vpop.f32.mrf.mxu1  ;;  %v12538_v38 = vpop.f32.mrf.mxu0 }
 0x25c   : > { %v16285_v30 = vadd.f32 %v2802_v36, %v2498_v40  ;;  %v3032_v36 = vld [vmem:[#allocation2 + $0x8b] sm:$0xff] }
 0x25d   : > { %v2323_v8 = vpop.f32.mrf.mxu1  ;;  %v2807_v31 = vpop.f32.mrf.mxu0  ;;  %12700 = vmatmul.mubr.msk.f32.gmra.mxu1 %vm1121_vm15, %v3031_v35  ;;  %12839 = vmatmul.mubr.msk.f32.gmra.mxu0 %vm1121_vm15, %v3515_v32  ;;  %v3516_v40 = vld [vmem:[#allocation2 + $0x8c] sm:$0xff] }
 0x25e   : > { %v2499_v33 = vadd.f32 %v2323_v8, %v15870_v57  ;;  %12702 = vmatprep.mubr.msk.f32.mxu1 %vm14620_vm5, %v14618_v2  ;;  %12841 = vmatprep.mubr.msk.f32.mxu0 %vm14620_vm5, %v14618_v2  ;;  %v3033_v8 = vld [vmem:[#allocation2 + $0x93] sm:$0xff] }
 0x25f   : > { %v12402_v50 = vpop.f32.mrf.mxu1  ;;  %v12541_v37 = vpop.f32.mrf.mxu0 }
 0x260   : > { %v16295_v22 = vadd.f32 %v2807_v31, %v2499_v33  ;;  %v16306_v33 = vld [vmem:[#allocation2 + $0x94] sm:$0xff] }
 0x261   : > { %v2328_v7 = vpop.f32.mrf.mxu1  ;;  %v2812_v38 = vpop.f32.mrf.mxu0  ;;  %12703 = vmatmul.mubr.msk.f32.gmra.mxu1 %vm1121_vm15, %v3032_v36  ;;  %12842 = vmatmul.mubr.msk.f32.gmra.mxu0 %vm1121_vm15, %v3516_v40 }
 0x262   : > { %v2500_v32 = vadd.f32 %v2328_v7, %v15878_v14  ;;  %12705 = vmatprep.mubr.msk.f32.mxu1 %vm14620_vm5, %v14618_v2  ;;  %12844 = vmatprep.mubr.msk.f32.mxu0 %vm14620_vm5, %v14618_v2 }
 0x263   : > { %v12405_v57 = vpop.f32.mrf.mxu1  ;;  %v12544_v35 = vpop.f32.mrf.mxu0 }
 0x264   : > { %v16304_v31 = vadd.f32 %v2812_v38, %v2500_v32  ;;  %v3034_v38 = vld [vmem:[#allocation2 + $0x9b] sm:$0xff] }
 0x265   : > { %v2333_v50 = vpop.f32.mrf.mxu1  ;;  %v2817_v37 = vpop.f32.mrf.mxu0  ;;  %12706 = vmatmul.mubr.msk.f32.gmra.mxu1 %vm1121_vm15, %v3033_v8  ;;  %12845 = vmatmul.mubr.msk.f32.gmra.mxu0 %vm1121_vm15, %v16306_v33  ;;  %v16318_v32 = vld [vmem:[#allocation2 + $0x9c] sm:$0xff] }
 0x266   : > { %v2501_v14 = vadd.f32 %v2333_v50, %v15886_v26  ;;  %12708 = vmatprep.mubr.msk.f32.mxu1 %vm14620_vm5, %v14618_v2  ;;  %12847 = vmatprep.mubr.msk.f32.mxu0 %vm14620_vm5, %v14618_v2 }
 0x267   : > { %v12408_v36 = vpop.f32.mrf.mxu1  ;;  %v12547_v40 = vpop.f32.mrf.mxu0 }
 0x268   : > { %v16316_v7 = vadd.f32 %v2817_v37, %v2501_v14  ;;  %v3035_v14 = vld [vmem:[#allocation2 + $0xa3] sm:$0xff] }
 0x269   : > { %v2338_v57 = vpop.f32.mrf.mxu1  ;;  %v2822_v35 = vpop.f32.mrf.mxu0  ;;  %12709 = vmatmul.mubr.msk.f32.gmra.mxu1 %vm1121_vm15, %v3034_v38  ;;  %12848 = vmatmul.mubr.msk.f32.gmra.mxu0 %vm1121_vm15, %v16318_v32  ;;  %v3519_v36 = vld [vmem:[#allocation2 + $0xa4] sm:$0xff] }
 0x26a   : > { %v2502_v26 = vadd.f32 %v2338_v57, %v15894_v1  ;;  %12711 = vmatprep.mubr.msk.f32.mxu1 %vm14620_vm5, %v14618_v2  ;;  %12850 = vmatprep.mubr.msk.f32.mxu0 %vm14620_vm5, %v14618_v2 }
 0x26b   : > { %v12411_v8 = vpop.f32.mrf.mxu1  ;;  %v12550_v50 = vpop.f32.mrf.mxu0 }
 0x26c   : > { %v16328_v37 = vadd.f32 %v2822_v35, %v2502_v26  ;;  %v3036_v26 = vld [vmem:[#allocation2 + $0xab] sm:$0xff] }
 0x26d   : > { %v2343_v40 = vpop.f32.mrf.mxu1  ;;  %v2827_v28 = vpop.f32.mrf.mxu0  ;;  %12712 = vmatmul.mubr.msk.f32.gmra.mxu1 %vm1121_vm15, %v3035_v14  ;;  %12851 = vmatmul.mubr.msk.f32.gmra.mxu0 %vm1121_vm15, %v3519_v36  ;;  %v3520_v8 = vld [vmem:[#allocation2 + $0xac] sm:$0xff] }
 0x26e   : > { %v2503_v1 = vadd.f32 %v2343_v40, %v15902_v20  ;;  %12714 = vmatprep.mubr.msk.f32.mxu1 %vm14620_vm5, %v14618_v2  ;;  %12853 = vmatprep.mubr.msk.f32.mxu0 %vm14620_vm5, %v14618_v2  ;;  %v3037_v40 = vld [vmem:[#allocation2 + $0xb3] sm:$0xff] }
 0x26f   : > { %v12414_v38 = vpop.f32.mrf.mxu1  ;;  %v12553_v57 = vpop.f32.mrf.mxu0 }
 0x270   : > { %v16337_v35 = vadd.f32 %v2827_v28, %v2503_v1  ;;  %v3521_v1 = vld [vmem:[#allocation2 + $0xb4] sm:$0xff] }
 0x271   : > { %v2348_v50 = vpop.f32.mrf.mxu1  ;;  %v2832_v29 = vpop.f32.mrf.mxu0  ;;  %12715 = vmatmul.mubr.msk.f32.gmra.mxu1 %vm1121_vm15, %v3036_v26  ;;  %12854 = vmatmul.mubr.msk.f32.gmra.mxu0 %vm1121_vm15, %v3520_v8 }
 0x272   : > { %v2504_v20 = vadd.f32 %v2348_v50, %v15910_v62  ;;  %12717 = vmatprep.mubr.msk.f32.mxu1 %vm14620_vm5, %v14618_v2  ;;  %12856 = vmatprep.mubr.msk.f32.mxu0 %vm14620_vm5, %v14618_v2  ;;  %v3038_v50 = vld [vmem:[#allocation2 + $0xbb] sm:$0xff] }
 0x273   : > { %v12417_v14 = vpop.f32.mrf.mxu1  ;;  %v12556_v36 = vpop.f32.mrf.mxu0 }
 0x274   : > { %v16346_v28 = vadd.f32 %v2832_v29, %v2504_v20  ;;  %v16357_v20 = vld [vmem:[#allocation2 + $0xbc] sm:$0xff] }
 0x275   : > { %v2353_v38 = vpop.f32.mrf.mxu1  ;;  %v2837_v57 = vpop.f32.mrf.mxu0  ;;  %12718 = vmatmul.mubr.msk.f32.gmra.mxu1 %vm1121_vm15, %v3037_v40  ;;  %12857 = vmatmul.mubr.msk.f32.gmra.mxu0 %vm1121_vm15, %v3521_v1 }
 0x276   : > { %v2505_v62 = vadd.f32 %v2353_v38, %v15918_v16  ;;  %12720 = vmatprep.mubr.msk.f32.mxu1 %vm14620_vm5, %v14618_v2  ;;  %12859 = vmatprep.mubr.msk.f32.mxu0 %vm14620_vm5, %v14618_v2 }
 0x277   : > { %v12420_v26 = vpop.f32.mrf.mxu1  ;;  %v12559_v8 = vpop.f32.mrf.mxu0 }
 0x278   : > { %v16355_v29 = vadd.f32 %v2837_v57, %v2505_v62  ;;  %v3039_v57 = vld [vmem:[#allocation2 + $0xc3] sm:$0xff] }
 0x279   : > { %v2358_v14 = vpop.f32.mrf.mxu1  ;;  %v2842_v36 = vpop.f32.mrf.mxu0  ;;  %12721 = vmatmul.mubr.msk.f32.gmra.mxu1 %vm1121_vm15, %v3038_v50  ;;  %12860 = vmatmul.mubr.msk.f32.gmra.mxu0 %vm1121_vm15, %v16357_v20  ;;  %v16369_v62 = vld [vmem:[#allocation2 + $0xc4] sm:$0xff] }
 0x27a   : > { %v2506_v16 = vadd.f32 %v2358_v14, %v15926_v0  ;;  %12723 = vmatprep.mubr.msk.f32.mxu1 %vm14620_vm5, %v14618_v2  ;;  %12862 = vmatprep.mubr.msk.f32.mxu0 %vm14620_vm5, %v14618_v2 }
 0x27b   : > { %v12423_v40 = vpop.f32.mrf.mxu1  ;;  %v12562_v1 = vpop.f32.mrf.mxu0 }
 0x27c   : > { %v16367_v38 = vadd.f32 %v2842_v36, %v2506_v16  ;;  %v3040_v16 = vld [vmem:[#allocation2 + $0xcb] sm:$0xff] }
 0x27d   : > { %v2363_v26 = vpop.f32.mrf.mxu1  ;;  %v2847_v8 = vpop.f32.mrf.mxu0  ;;  %12724 = vmatmul.mubr.msk.f32.gmra.mxu1 %vm1121_vm15, %v3039_v57  ;;  %12863 = vmatmul.mubr.msk.f32.gmra.mxu0 %vm1121_vm15, %v16369_v62  ;;  %v3524_v40 = vld [vmem:[#allocation2 + $0xcc] sm:$0xff] }
 0x27e   : > { %v2507_v0 = vadd.f32 %v2363_v26, %v15934_v25  ;;  %12726 = vmatprep.mubr.msk.f32.mxu1 %vm14620_vm5, %v14618_v2  ;;  %12865 = vmatprep.mubr.msk.f32.mxu0 %vm14620_vm5, %v14618_v2 }
 0x27f   : > { %v12426_v50 = vpop.f32.mrf.mxu1  ;;  %v12565_v14 = vpop.f32.mrf.mxu0 }
 0x280   : > { %v16379_v36 = vadd.f32 %v2847_v8, %v2507_v0  ;;  %v3041_v0 = vld [vmem:[#allocation2 + $0xd3] sm:$0xff] }
 0x281   : > { %v2368_v1 = vpop.f32.mrf.mxu1  ;;  %v2852_v27 = vpop.f32.mrf.mxu0  ;;  %12727 = vmatmul.mubr.msk.f32.gmra.mxu1 %vm1121_vm15, %v3040_v16  ;;  %12866 = vmatmul.mubr.msk.f32.gmra.mxu0 %vm1121_vm15, %v3524_v40  ;;  %v3525_v50 = vld [vmem:[#allocation2 + $0xd4] sm:$0xff] }
 0x282   : > { %19800 = vst [vmem:[#allocation45_spill] sm:$0xff] %v16379_v36  ;;  %v2508_v25 = vadd.f32 %v2368_v1, %v15942_v52  ;;  %12729 = vmatprep.mubr.msk.f32.mxu1 %vm14620_vm5, %v14618_v2  ;;  %12868 = vmatprep.mubr.msk.f32.mxu0 %vm14620_vm5, %v14618_v2  ;;  %v3042_v1 = vld [vmem:[#allocation2 + $0xdb] sm:$0xff] }
 0x283   : > { %v12429_v57 = vpop.f32.mrf.mxu1  ;;  %v12568_v26 = vpop.f32.mrf.mxu0 }
 0x284   : > { %v16388_v8 = vadd.f32 %v2852_v27, %v2508_v25  ;;  %v3526_v25 = vld [vmem:[#allocation2 + $0xdc] sm:$0xff] }
 0x285   : > { %v2373_v14 = vpop.f32.mrf.mxu1  ;;  %v2857_v36 = vpop.f32.mrf.mxu0  ;;  %12730 = vmatmul.mubr.msk.f32.gmra.mxu1 %vm1121_vm15, %v3041_v0  ;;  %12869 = vmatmul.mubr.msk.f32.gmra.mxu0 %vm1121_vm15, %v3525_v50 }
 0x286   : > { %v2509_v52 = vadd.f32 %v2373_v14, %v15950_v11  ;;  %12732 = vmatprep.mubr.msk.f32.mxu1 %vm14620_vm5, %v14618_v2  ;;  %12871 = vmatprep.mubr.msk.f32.mxu0 %vm14620_vm5, %v14618_v2  ;;  %v3043_v14 = vld [vmem:[#allocation2 + $0xe3] sm:$0xff] }
 0x287   : > { %v12432_v16 = vpop.f32.mrf.mxu1  ;;  %v12571_v40 = vpop.f32.mrf.mxu0 }
 0x288   : > { %v16397_v27 = vadd.f32 %v2857_v36, %v2509_v52  ;;  %v16408_v52 = vld [vmem:[#allocation2 + $0xe4] sm:$0xff] }
 0x289   : > { %v2378_v57 = vpop.f32.mrf.mxu1  ;;  %v2862_v26 = vpop.f32.mrf.mxu0  ;;  %12733 = vmatmul.mubr.msk.f32.gmra.mxu1 %vm1121_vm15, %v3042_v1  ;;  %12872 = vmatmul.mubr.msk.f32.gmra.mxu0 %vm1121_vm15, %v3526_v25 }
 0x28a   : > { %v2510_v11 = vadd.f32 %v2378_v57, %v15958_v60  ;;  %12735 = vmatprep.mubr.msk.f32.mxu1 %vm14620_vm5, %v14618_v2  ;;  %12874 = vmatprep.mubr.msk.f32.mxu0 %vm14620_vm5, %v14618_v2 }
 0x28b   : > { %v12435_v0 = vpop.f32.mrf.mxu1  ;;  %v12574_v50 = vpop.f32.mrf.mxu0 }
 0x28c   : > { %v16406_v36 = vadd.f32 %v2862_v26, %v2510_v11  ;;  %v3044_v26 = vld [vmem:[#allocation2 + $0xeb] sm:$0xff] }
 0x28d   : > { %v2383_v16 = vpop.f32.mrf.mxu1  ;;  %v2867_v40 = vpop.f32.mrf.mxu0  ;;  %12736 = vmatmul.mubr.msk.f32.gmra.mxu1 %vm1121_vm15, %v3043_v14  ;;  %12875 = vmatmul.mubr.msk.f32.gmra.mxu0 %vm1121_vm15, %v16408_v52  ;;  %v16420_v11 = vld [vmem:[#allocation2 + $0xec] sm:$0xff] }
 0x28e   : > { %v2511_v60 = vadd.f32 %v2383_v16, %v15966_v17  ;;  %12738 = vmatprep.mubr.msk.f32.mxu1 %vm14620_vm5, %v14618_v2  ;;  %12877 = vmatprep.mubr.msk.f32.mxu0 %vm14620_vm5, %v14618_v2 }
 0x28f   : > { %v12438_v1 = vpop.f32.mrf.mxu1  ;;  %v12577_v25 = vpop.f32.mrf.mxu0 }
 0x290   : > { %v16418_v57 = vadd.f32 %v2867_v40, %v2511_v60  ;;  %v3045_v60 = vld [vmem:[#allocation2 + $0xf3] sm:$0xff] }
 0x291   : > { %v2388_v0 = vpop.f32.mrf.mxu1  ;;  %v2872_v50 = vpop.f32.mrf.mxu0  ;;  %12739 = vmatmul.mubr.msk.f32.gmra.mxu1 %vm1121_vm15, %v3044_v26  ;;  %12878 = vmatmul.mubr.msk.f32.gmra.mxu0 %vm1121_vm15, %v16420_v11  ;;  %v3529_v1 = vld [vmem:[#allocation2 + $0xf4] sm:$0xff] }
 0x292   : > { %19801 = vst [vmem:[#allocation46_spill] sm:$0xff] %v16418_v57  ;;  %v2512_v17 = vadd.f32 %v2388_v0, %v15974_v58  ;;  %12741 = vmatprep.mubr.msk.f32.mxu1 %vm14620_vm5, %v14618_v2  ;;  %12880 = vmatprep.mubr.msk.f32.mxu0 %vm14620_vm5, %v14618_v2 }
 0x293   : > { %v12441_v14 = vpop.f32.mrf.mxu1  ;;  %v12580_v16 = vpop.f32.mrf.mxu0 }
 0x294   : > { %v16430_v40 = vadd.f32 %v2872_v50, %v2512_v17  ;;  %v3046_v17 = vld [vmem:[#allocation2 + $0xfb] sm:$0xff] }
 0x295   : > { %v2393_v25 = vpop.f32.mrf.mxu1  ;;  %v2877_v57 = vpop.f32.mrf.mxu0  ;;  %12742 = vmatmul.mubr.msk.f32.gmra.mxu1 %vm1121_vm15, %v3045_v60  ;;  %12881 = vmatmul.mubr.msk.f32.gmra.mxu0 %vm1121_vm15, %v3529_v1  ;;  %v3530_v14 = vld [vmem:[#allocation2 + $0xfc] sm:$0xff] }
 0x296   : > { %19802 = vst [vmem:[#allocation47_spill] sm:$0xff] %v16430_v40  ;;  %v2513_v58 = vadd.f32 %v2393_v25, %v15982_v18  ;;  %12744 = vmatprep.mubr.msk.f32.mxu1 %vm14620_vm5, %v14618_v2  ;;  %12883 = vmatprep.mubr.msk.f32.mxu0 %vm14620_vm5, %v14618_v2  ;;  %v3047_v25 = vld [vmem:[#allocation2 + $0x103] sm:$0xff] }
 0x297   : > { %v12444_v26 = vpop.f32.mrf.mxu1  ;;  %v12583_v0 = vpop.f32.mrf.mxu0 }
 0x298   : > { %v16439_v50 = vadd.f32 %v2877_v57, %v2513_v58  ;;  %v3531_v58 = vld [vmem:[#allocation2 + $0x104] sm:$0xff] }
 0x299   : > { %v2398_v16 = vpop.f32.mrf.mxu1  ;;  %v2882_v40 = vpop.f32.mrf.mxu0  ;;  %12745 = vmatmul.mubr.msk.f32.gmra.mxu1 %vm1121_vm15, %v3046_v17  ;;  %12884 = vmatmul.mubr.msk.f32.gmra.mxu0 %vm1121_vm15, %v3530_v14 }
 0x29a   : > { %v2514_v18 = vadd.f32 %v2398_v16, %v15990_v61  ;;  %12747 = vmatprep.mubr.msk.f32.mxu1 %vm14620_vm5, %v14618_v2  ;;  %12886 = vmatprep.mubr.msk.f32.mxu0 %vm14620_vm5, %v14618_v2  ;;  %v3048_v16 = vld [vmem:[#allocation2 + $0x10b] sm:$0xff] }
 0x29b   : > { %v12447_v60 = vpop.f32.mrf.mxu1  ;;  %v12586_v1 = vpop.f32.mrf.mxu0 }
 0x29c   : > { %v16448_v57 = vadd.f32 %v2882_v40, %v2514_v18  ;;  %v16459_v18 = vld [vmem:[#allocation2 + $0x10c] sm:$0xff] }
 0x29d   : > { %v2403_v26 = vpop.f32.mrf.mxu1  ;;  %v2887_v0 = vpop.f32.mrf.mxu0  ;;  %12748 = vmatmul.mubr.msk.f32.gmra.mxu1 %vm1121_vm15, %v3047_v25  ;;  %12887 = vmatmul.mubr.msk.f32.gmra.mxu0 %vm1121_vm15, %v3531_v58 }
 0x29e   : > { %v2515_v61 = vadd.f32 %v2403_v26, %v15998_v4  ;;  %12750 = vmatprep.mubr.msk.f32.mxu1 %vm14620_vm5, %v14618_v2  ;;  %12889 = vmatprep.mubr.msk.f32.mxu0 %vm14620_vm5, %v14618_v2 }
 0x29f   : > { %v12450_v17 = vpop.f32.mrf.mxu1  ;;  %v12589_v14 = vpop.f32.mrf.mxu0 }
 0x2a0   : > { %v16457_v40 = vadd.f32 %v2887_v0, %v2515_v61  ;;  %v3049_v0 = vld [vmem:[#allocation2 + $0x113] sm:$0xff] }
 0x2a1   : > { %v2408_v60 = vpop.f32.mrf.mxu1  ;;  %v2892_v1 = vpop.f32.mrf.mxu0  ;;  %12751 = vmatmul.mubr.msk.f32.gmra.mxu1 %vm1121_vm15, %v3048_v16  ;;  %12890 = vmatmul.mubr.msk.f32.gmra.mxu0 %vm1121_vm15, %v16459_v18  ;;  %v16471_v61 = vld [vmem:[#allocation2 + $0x114] sm:$0xff] }
 0x2a2   : > { %v2516_v4 = vadd.f32 %v2408_v60, %v16006_v63  ;;  %12753 = vmatprep.mubr.msk.f32.mxu1 %vm14620_vm5, %v14618_v2  ;;  %12892 = vmatprep.mubr.msk.f32.mxu0 %vm14620_vm5, %v14618_v2 }
 0x2a3   : > { %v12453_v25 = vpop.f32.mrf.mxu1  ;;  %v12592_v58 = vpop.f32.mrf.mxu0 }
 0x2a4   : > { %v16469_v26 = vadd.f32 %v2892_v1, %v2516_v4  ;;  %v3050_v4 = vld [vmem:[#allocation2 + $0x11b] sm:$0xff] }
 0x2a5   : > { %v2413_v17 = vpop.f32.mrf.mxu1  ;;  %v2897_v14 = vpop.f32.mrf.mxu0  ;;  %12754 = vmatmul.mubr.msk.f32.gmra.mxu1 %vm1121_vm15, %v3049_v0  ;;  %12893 = vmatmul.mubr.msk.f32.gmra.mxu0 %vm1121_vm15, %v16471_v61  ;;  %v3534_v25 = vld [vmem:[#allocation2 + $0x11c] sm:$0xff] }
 0x2a6   : > { %19803 = vst [vmem:[#allocation48_spill] sm:$0xff] %v16469_v26  ;;  %v2517_v63 = vadd.f32 %v2413_v17, %v16014_v23  ;;  %12756 = vmatprep.mubr.msk.f32.mxu1 %vm14620_vm5, %v14618_v2  ;;  %12895 = vmatprep.mubr.msk.f32.mxu0 %vm14620_vm5, %v14618_v2 }
 0x2a7   : > { %v12456_v16 = vpop.f32.mrf.mxu1  ;;  %v12595_v60 = vpop.f32.mrf.mxu0 }
 0x2a8   : > { %v16481_v1 = vadd.f32 %v2897_v14, %v2517_v63  ;;  %v3051_v63 = vld [vmem:[#allocation2 + $0x123] sm:$0xff] }
 0x2a9   : > { %v2418_v58 = vpop.f32.mrf.mxu1  ;;  %v2902_v26 = vpop.f32.mrf.mxu0  ;;  %12757 = vmatmul.mubr.msk.f32.gmra.mxu1 %vm1121_vm15, %v3050_v4  ;;  %12896 = vmatmul.mubr.msk.f32.gmra.mxu0 %vm1121_vm15, %v3534_v25  ;;  %v3535_v16 = vld [vmem:[#allocation2 + $0x124] sm:$0xff] }
 0x2aa   : > { %19804 = vst [vmem:[#allocation49_spill] sm:$0xff] %v16481_v1  ;;  %v2518_v23 = vadd.f32 %v2418_v58, %v16022_v5  ;;  %12759 = vmatprep.mubr.msk.f32.mxu1 %vm14620_vm5, %v14618_v2  ;;  %12898 = vmatprep.mubr.msk.f32.mxu0 %vm14620_vm5, %v14618_v2  ;;  %v3052_v58 = vld [vmem:[#allocation2 + $0x12b] sm:$0xff] }
 0x2ab   : > { %v12459_v0 = vpop.f32.mrf.mxu1  ;;  %v12598_v17 = vpop.f32.mrf.mxu0 }
 0x2ac   : > { %v16490_v14 = vadd.f32 %v2902_v26, %v2518_v23  ;;  %v3536_v23 = vld [vmem:[#allocation2 + $0x12c] sm:$0xff] }
 0x2ad   : > { %v2423_v60 = vpop.f32.mrf.mxu1  ;;  %v2907_v1 = vpop.f32.mrf.mxu0  ;;  %12760 = vmatmul.mubr.msk.f32.gmra.mxu1 %vm1121_vm15, %v3051_v63  ;;  %12899 = vmatmul.mubr.msk.f32.gmra.mxu0 %vm1121_vm15, %v3535_v16 }
 0x2ae   : > { %v2519_v5 = vadd.f32 %v2423_v60, %v16030_v34  ;;  %12762 = vmatprep.mubr.msk.f32.mxu1 %vm14620_vm5, %v14618_v2  ;;  %12901 = vmatprep.mubr.msk.f32.mxu0 %vm14620_vm5, %v14618_v2  ;;  %v3053_v60 = vld [vmem:[#allocation2 + $0x133] sm:$0xff] }
 0x2af   : > { %v12462_v4 = vpop.f32.mrf.mxu1  ;;  %v12601_v25 = vpop.f32.mrf.mxu0 }
 0x2b0   : > { %v16499_v26 = vadd.f32 %v2907_v1, %v2519_v5  ;;  %v3537_v5 = vld [vmem:[#allocation2 + $0x134] sm:$0xff] }
 0x2b1   : > { %v2428_v0 = vpop.f32.mrf.mxu1  ;;  %v2912_v17 = vpop.f32.mrf.mxu0  ;;  %12763 = vmatmul.mubr.msk.f32.gmra.mxu1 %vm1121_vm15, %v3052_v58  ;;  %12902 = vmatmul.mubr.msk.f32.gmra.mxu0 %vm1121_vm15, %v3536_v23 }
 0x2b2   : > { %v2520_v34 = vadd.f32 %v2428_v0, %v16038_v13  ;;  %12765 = vmatprep.mubr.msk.f32.mxu1 %vm14620_vm5, %v14618_v2  ;;  %12904 = vmatprep.mubr.msk.f32.mxu0 %vm14620_vm5, %v14618_v2 }
 0x2b3   : > { %v12465_v63 = vpop.f32.mrf.mxu1  ;;  %v12604_v16 = vpop.f32.mrf.mxu0 }
 0x2b4   : > { %v16508_v1 = vadd.f32 %v2912_v17, %v2520_v34  ;;  %v3054_v17 = vld [vmem:[#allocation2 + $0x13b] sm:$0xff] }
 0x2b5   : > { %v2433_v4 = vpop.f32.mrf.mxu1  ;;  %v2917_v25 = vpop.f32.mrf.mxu0  ;;  %12766 = vmatmul.mubr.msk.f32.gmra.mxu1 %vm1121_vm15, %v3053_v60  ;;  %12905 = vmatmul.mubr.msk.f32.gmra.mxu0 %vm1121_vm15, %v3537_v5  ;;  %v16519_v34 = vld [vmem:[#allocation2 + $0x13c] sm:$0xff] }
 0x2b6   : > { %v2521_v13 = vadd.f32 %v2433_v4, %v16046_v59  ;;  %12768 = vmatprep.mubr.msk.f32.mxu1 %vm14620_vm5, %v14618_v2  ;;  %12907 = vmatprep.mubr.msk.f32.mxu0 %vm14620_vm5, %v14618_v2 }
 0x2b7   : > { %v12468_v58 = vpop.f32.mrf.mxu1  ;;  %v12607_v23 = vpop.f32.mrf.mxu0 }
 0x2b8   : > { %v16517_v0 = vadd.f32 %v2917_v25, %v2521_v13  ;;  %v3055_v25 = vld [vmem:[#allocation2 + $0x143] sm:$0xff] }
 0x2b9   : > { %v2438_v63 = vpop.f32.mrf.mxu1  ;;  %v2922_v16 = vpop.f32.mrf.mxu0  ;;  %12769 = vmatmul.mubr.msk.f32.gmra.mxu1 %vm1121_vm15, %v3054_v17  ;;  %12908 = vmatmul.mubr.msk.f32.gmra.mxu0 %vm1121_vm15, %v16519_v34  ;;  %v16531_v13 = vld [vmem:[#allocation2 + $0x144] sm:$0xff] }
 0x2ba   : > { %v2522_v59 = vadd.f32 %v2438_v63, %v16054_v21  ;;  %12771 = vmatprep.mubr.msk.f32.mxu1 %vm14620_vm5, %v14618_v2  ;;  %12910 = vmatprep.mubr.msk.f32.mxu0 %vm14620_vm5, %v14618_v2 }
 0x2bb   : > { %v12471_v60 = vpop.f32.mrf.mxu1  ;;  %v12610_v5 = vpop.f32.mrf.mxu0 }
 0x2bc   : > { %v16529_v4 = vadd.f32 %v2922_v16, %v2522_v59  ;;  %v3056_v59 = vld [vmem:[#allocation2 + $0x14b] sm:$0xff] }
 0x2bd   : > { %v2443_v58 = vpop.f32.mrf.mxu1  ;;  %v2927_v23 = vpop.f32.mrf.mxu0  ;;  %12772 = vmatmul.mubr.msk.f32.gmra.mxu1 %vm1121_vm15, %v3055_v25  ;;  %12911 = vmatmul.mubr.msk.f32.gmra.mxu0 %vm1121_vm15, %v16531_v13  ;;  %v16543_v60 = vld [vmem:[#allocation2 + $0x14c] sm:$0xff] }
 0x2be   : > { %19805 = vst [vmem:[#allocation50_spill] sm:$0xff] %v16529_v4  ;;  %v2523_v21 = vadd.f32 %v2443_v58, %v16062_v6  ;;  %12774 = vmatprep.mubr.msk.f32.mxu1 %vm14620_vm5, %v14618_v2  ;;  %12913 = vmatprep.mubr.msk.f32.mxu0 %vm14620_vm5, %v14618_v2 }
 0x2bf   : > { %v12474_v17 = vpop.f32.mrf.mxu1  ;;  %v12613_v63 = vpop.f32.mrf.mxu0 }
 0x2c0   : > { %v16541_v16 = vadd.f32 %v2927_v23, %v2523_v21  ;;  %v3057_v17 = vld [vmem:[#allocation2 + $0x153] sm:$0xf] }
 0x2c1   : > { %v2448_v5 = vpop.f32.mrf.mxu1  ;;  %v2932_v25 = vpop.f32.mrf.mxu0  ;;  %12775 = vmatmul.mubr.msk.f32.gmra.mxu1 %vm1121_vm15, %v3056_v59  ;;  %12914 = vmatmul.mubr.msk.f32.gmra.mxu0 %vm1121_vm15, %v16543_v60  ;;  %v3541_v63 = vld [vmem:[#allocation2 + $0x154] sm:$0xf] }
 0x2c2   : > { %19806 = vst [vmem:[#allocation51_spill] sm:$0xff] %v16541_v16  ;;  %v2524_v6 = vadd.f32 %v2448_v5, %v16070_v54  ;;  %12777 = vmatprep.mubr.msk.f32.mxu1 %vm14620_vm5, %v14618_v2  ;;  %12916 = vmatprep.mubr.msk.f32.mxu0 %vm14620_vm5, %v14618_v2 }
 0x2c3   : > { %v12477_v58 = vpop.f32.mrf.mxu1  ;;  %v12616_v23 = vpop.f32.mrf.mxu0 }
 0x2c4   : > { %v16553_v21 = vadd.f32 %v2932_v25, %v2524_v6  ;;  %v10548_v25 = vld [vmem:[%s19642_s4 + $0x238] sm:$0xff]  ;;  %v4469_v58 = vld [vmem:[#allocation2 + $0x25] sm:$0xff] }
 0x2c5   : > { %v2453_v16 = vpop.f32.mrf.mxu1  ;;  %v2937_v4 = vpop.f32.mrf.mxu0  ;;  %12778 = vmatmul.mubr.msk.f32.gmra.mxu1 %vm1121_vm15, %v3057_v17  ;;  %12917 = vmatmul.mubr.msk.f32.gmra.mxu0 %vm1121_vm15, %v3541_v63 }
 0x2c6   : > { %v2525_v54 = vadd.f32 %v2453_v16, %v16078_v15  ;;  %12935 = vmatprep.mubr.msk.f32.mxu1 %vm14620_vm5, %v14618_v2  ;;  %13074 = vmatprep.mubr.msk.f32.mxu0 %vm14620_vm5, %v14618_v2  ;;  %v10547_v15 = vld [vmem:[%s19642_s4 + $0x230] sm:$0xff] }
 0x2c7   : > { %v12480_v59 = vpop.f32.mrf.mxu1  ;;  %v12619_v5 = vpop.f32.mrf.mxu0 }
 0x2c8   : > { %v16565_v6 = vadd.f32 %v2937_v4, %v2525_v54  ;;  %v4470_v54 = vld [vmem:[#allocation2 + $0x2d] sm:$0xff] }
 0x2c9   : > { %v2458_v23 = vpop.f32.mrf.mxu1  ;;  %v2942_v17 = vpop.f32.mrf.mxu0  ;;  %12936 = vmatmul.mubr.msk.f32.vlgmr.msra.gmra.mxu1 %vm1121_vm15, %v16111_v56  ;;  %13075 = vmatmul.mubr.msk.f32.vlgmr.msra.gmra.mxu0 %vm1121_vm15, %v4469_v58 }
 0x2ca   : > { %v2526_v16 = vadd.f32 %v2458_v23, %v16092_v43  ;;  %13198 = vmatpush3.msra.mxu1 %v10548_v25  ;;  %12938 = vmatprep.mubr.msk.f32.mxu1 %vm14620_vm5, %v14618_v2  ;;  %v10546_v43 = vld [vmem:[%s19642_s4 + $0x228] sm:$0xff] }
 0x2cb   : > { %v12483_v4 = vpop.f32.mrf.mxu1  ;;  %v12622_v63 = vpop.f32.mrf.mxu0  ;;  %13077 = vmatprep.mubr.msk.f32.mxu0 %vm14620_vm5, %v14618_v2  ;;  %13199 = vmatprep.subr.mxu1 %v14618_v2 }
 0x2cc   : > { %v16579_v56 = vadd.f32 %v2942_v17, %v2526_v16  ;;  %13200 = vmatpush3.msra.mxu1 %v10547_v15 }
 0x2cd   : > { %v2463_v59 = vpop.f32.mrf.mxu1  ;;  %v2947_v5 = vpop.f32.mrf.mxu0  ;;  %12939 = vmatmul.mubr.msk.f32.gmra.mxu1 %vm1121_vm15, %v16126_v55  ;;  %13078 = vmatmul.mubr.msk.f32.gmra.mxu0 %vm1121_vm15, %v4470_v54  ;;  %v4471_v55 = vld [vmem:[#allocation2 + $0x35] sm:$0xff] }
 0x2ce   : > { %v2527_v25 = vadd.f32 %v2463_v59, %v16104_v12  ;;  %12941 = vmatprep.mubr.msk.f32.mxu1 %vm14620_vm5, %v14618_v2  ;;  %13080 = vmatprep.mubr.msk.f32.mxu0 %vm14620_vm5, %v14618_v2  ;;  %v10545_v12 = vld [vmem:[%s19642_s4 + $0x220] sm:$0xff] }
 0x2cf   : > { %v12486_v58 = vpop.f32.mrf.mxu1  ;;  %v12625_v23 = vpop.f32.mrf.mxu0  ;;  %13201 = vmatprep.subr.mxu1 %v14618_v2 }
 0x2d0   : > { %v16593_v17 = vadd.f32 %v2947_v5, %v2527_v25  ;;  %13202 = vmatpush3.msra.mxu1 %v10546_v43  ;;  %v4472_v5 = vld [vmem:[#allocation2 + $0x3d] sm:$0xff] }
 0x2d1   : > { %v2468_v15 = vpop.f32.mrf.mxu1  ;;  %v2952_v16 = vpop.f32.mrf.mxu0  ;;  %12942 = vmatmul.mubr.msk.f32.gmra.mxu1 %vm1121_vm15, %v16141_v53  ;;  %13081 = vmatmul.mubr.msk.f32.gmra.mxu0 %vm1121_vm15, %v4471_v55  ;;  %v3988_v53 = vld [vmem:[#allocation2 + $0x3c] sm:$0xff] }
 0x2d2   : > { %v2528_v4 = vadd.f32 %v2468_v15, %v16119_v10  ;;  %12944 = vmatprep.mubr.msk.f32.mxu1 %vm14620_vm5, %v14618_v2  ;;  %13083 = vmatprep.mubr.msk.f32.mxu0 %vm14620_vm5, %v14618_v2  ;;  %v10544_v10 = vld [vmem:[%s19642_s4 + $0x218] sm:$0xff] }
 0x2d3   : > { %v12489_v63 = vpop.f32.mrf.mxu1  ;;  %v12628_v54 = vpop.f32.mrf.mxu0  ;;  %13203 = vmatprep.subr.mxu1 %v14618_v2 }
 0x2d4   : > { %v16607_v59 = vadd.f32 %v2952_v16, %v2528_v4  ;;  %13204 = vmatpush3.msra.mxu1 %v10545_v12  ;;  %v4473_v16 = vld [vmem:[#allocation2 + $0x45] sm:$0xff] }
 0x2d5   : > { %v2473_v43 = vpop.f32.mrf.mxu1  ;;  %v2957_v25 = vpop.f32.mrf.mxu0  ;;  %12945 = vmatmul.mubr.msk.f32.gmra.mxu1 %vm1121_vm15, %v3988_v53  ;;  %13084 = vmatmul.mubr.msk.f32.gmra.mxu0 %vm1121_vm15, %v4472_v5 }
 0x2d6   : > { %v2529_v58 = vadd.f32 %v2473_v43, %v16134_v9  ;;  %12947 = vmatprep.mubr.msk.f32.mxu1 %vm14620_vm5, %v14618_v2  ;;  %13086 = vmatprep.mubr.msk.f32.mxu0 %vm14620_vm5, %v14618_v2  ;;  %v10543_v9 = vld [vmem:[%s19642_s4 + $0x210] sm:$0xff] }
 0x2d7   : > { %v12492_v23 = vpop.f32.mrf.mxu1  ;;  %v12631_v55 = vpop.f32.mrf.mxu0  ;;  %13205 = vmatprep.subr.mxu1 %v14618_v2 }
 0x2d8   : > { %v16620_v15 = vadd.f32 %v2957_v25, %v2529_v58  ;;  %13206 = vmatpush3.msra.mxu1 %v10544_v10 }
 0x2d9   : > { %v2478_v12 = vpop.f32.mrf.mxu1  ;;  %v2962_v4 = vpop.f32.mrf.mxu0  ;;  %12948 = vmatmul.mubr.msk.f32.gmra.mxu1 %vm1121_vm15, %v16168_v49  ;;  %13087 = vmatmul.mubr.msk.f32.gmra.mxu0 %vm1121_vm15, %v4473_v16  ;;  %v4474_v49 = vld [vmem:[#allocation2 + $0x4d] sm:$0xff]  ;;  %v4475_v16 = vld [vmem:[#allocation2 + $0x55] sm:$0xff] }
 0x2da   : > { %v2530_v63 = vadd.f32 %v2478_v12, %v16149_v47  ;;  %12950 = vmatprep.mubr.msk.f32.mxu1 %vm14620_vm5, %v14618_v2  ;;  %13089 = vmatprep.mubr.msk.f32.mxu0 %vm14620_vm5, %v14618_v2  ;;  %v10542_v47 = vld [vmem:[%s19642_s4 + $0x208] sm:$0xff] }
 0x2db   : > { %v12495_v54 = vpop.f32.mrf.mxu1  ;;  %v12634_v53 = vpop.f32.mrf.mxu0  ;;  %13207 = vmatprep.subr.mxu1 %v14618_v2 }
 0x2dc   : > { %v16634_v5 = vadd.f32 %v2962_v4, %v2530_v63  ;;  %13208 = vmatpush3.msra.mxu1 %v10543_v9 }
 0x2dd   : > { %v2483_v43 = vpop.f32.mrf.mxu1  ;;  %v2967_v25 = vpop.f32.mrf.mxu0  ;;  %12951 = vmatmul.mubr.msk.f32.gmra.mxu1 %vm1121_vm15, %v16186_v39  ;;  %13090 = vmatmul.mubr.msk.f32.gmra.mxu0 %vm1121_vm15, %v4474_v49  ;;  %v3991_v39 = vld [vmem:[#allocation2 + $0x54] sm:$0xff]  ;;  %v3992_v49 = vld [vmem:[#allocation2 + $0x5c] sm:$0xff] }
 0x2de   : > { %v2531_v10 = vadd.f32 %v2483_v43, %v16161_v45  ;;  %12953 = vmatprep.mubr.msk.f32.mxu1 %vm14620_vm5, %v14618_v2  ;;  %13092 = vmatprep.mubr.msk.f32.mxu0 %vm14620_vm5, %v14618_v2  ;;  %v10541_v45 = vld [vmem:[%s19642_s4 + $0x200] sm:$0xff] }
 0x2df   : > { %v12498_v58 = vpop.f32.mrf.mxu1  ;;  %v12637_v23 = vpop.f32.mrf.mxu0  ;;  %13209 = vmatprep.subr.mxu1 %v14618_v2  ;;  %v4476_v43 = vld [vmem:[#allocation2 + $0x5d] sm:$0xff] }
 0x2e0   : > { %v16648_v55 = vadd.f32 %v2967_v25, %v2531_v10  ;;  %13210 = vmatpush3.msra.mxu1 %v10542_v47 }
 0x2e1   : > { %v2488_v12 = vpop.f32.mrf.mxu1  ;;  %v2972_v4 = vpop.f32.mrf.mxu0  ;;  %12954 = vmatmul.mubr.msk.f32.gmra.mxu1 %vm1121_vm15, %v3991_v39  ;;  %13093 = vmatmul.mubr.msk.f32.gmra.mxu0 %vm1121_vm15, %v4475_v16  ;;  %v3993_v39 = vld [vmem:[#allocation2 + $0x64] sm:$0xff] }
 0x2e2   : > { %v2532_v9 = vadd.f32 %v2488_v12, %v16179_v46  ;;  %12956 = vmatprep.mubr.msk.f32.mxu1 %vm14620_vm5, %v14618_v2  ;;  %13095 = vmatprep.mubr.msk.f32.mxu0 %vm14620_vm5, %v14618_v2  ;;  %v4477_v16 = vld [vmem:[#allocation2 + $0x65] sm:$0xff] }
 0x2e3   : > { %v12501_v63 = vpop.f32.mrf.mxu1  ;;  %v12640_v54 = vpop.f32.mrf.mxu0  ;;  %13211 = vmatprep.subr.mxu1 %v14618_v2 }
 0x2e4   : > { %v16661_v53 = vadd.f32 %v2972_v4, %v2532_v9  ;;  %13212 = vmatpush3.msra.mxu1 %v10541_v45  ;;  %v4478_v54 = vld [vmem:[#allocation2 + $0x6d] sm:$0xff] }
 0x2e5   : > { %v3256_v25 = vpop.f32.mrf.mxu1  ;;  %v3740_v47 = vpop.f32.mrf.mxu0  ;;  %12957 = vmatmul.mubr.msk.f32.gmra.mxu1 %vm1121_vm15, %v3992_v49  ;;  %13096 = vmatmul.mubr.msk.f32.gmra.mxu0 %vm1121_vm15, %v4476_v43 }
 0x2e6   : > { %v3460_v46 = vadd.f32 %v3256_v25, %v16201_v44  ;;  %12959 = vmatprep.mubr.msk.f32.mxu1 %vm14620_vm5, %v14618_v2  ;;  %13098 = vmatprep.mubr.msk.f32.mxu0 %vm14620_vm5, %v14618_v2 }
 0x2e7   : > { %v12659_v10 = vpop.f32.mrf.mxu1  ;;  %v12798_v58 = vpop.f32.mrf.mxu0  ;;  %13475 = vmatprep.subr.mxu1 %v14618_v2 }
 0x2e8   : > { %v16671_v23 = vadd.f32 %v3740_v47, %v3460_v46  ;;  %v4479_v10 = vld [vmem:[#allocation2 + $0x75] sm:$0xff] }
 0x2e9   : > { %v3261_v12 = vpop.f32.mrf.mxu1  ;;  %v3745_v4 = vpop.f32.mrf.mxu0  ;;  %12960 = vmatmul.mubr.msk.f32.gmra.mxu1 %vm1121_vm15, %v3993_v39  ;;  %13099 = vmatmul.mubr.msk.f32.gmra.mxu0 %vm1121_vm15, %v4477_v16 }
 0x2ea   : > { %v3461_v44 = vadd.f32 %v3261_v12, %v16214_v24  ;;  %12962 = vmatprep.mubr.msk.f32.mxu1 %vm14620_vm5, %v14618_v2  ;;  %13101 = vmatprep.mubr.msk.f32.mxu0 %vm14620_vm5, %v14618_v2 }
 0x2eb   : > { %v12662_v45 = vpop.f32.mrf.mxu1  ;;  %v12801_v9 = vpop.f32.mrf.mxu0 }
 0x2ec   : > { %v16680_v63 = vadd.f32 %v3745_v4, %v3461_v44  ;;  %v3996_v4 = vld [vmem:[#allocation2 + $0x7c] sm:$0xff] }
 0x2ed   : > { %v3266_v49 = vpop.f32.mrf.mxu1  ;;  %v3750_v43 = vpop.f32.mrf.mxu0  ;;  %12963 = vmatmul.mubr.msk.f32.gmra.mxu1 %vm1121_vm15, %v16242_v51  ;;  %13102 = vmatmul.mubr.msk.f32.gmra.mxu0 %vm1121_vm15, %v4478_v54  ;;  %v4480_v44 = vld [vmem:[#allocation2 + $0x7d] sm:$0xff] }
 0x2ee   : > { %v3462_v24 = vadd.f32 %v3266_v49, %v16227_v41  ;;  %12965 = vmatprep.mubr.msk.f32.mxu1 %vm14620_vm5, %v14618_v2  ;;  %13104 = vmatprep.mubr.msk.f32.mxu0 %vm14620_vm5, %v14618_v2 }
 0x2ef   : > { %v12665_v25 = vpop.f32.mrf.mxu1  ;;  %v12804_v47 = vpop.f32.mrf.mxu0 }
 0x2f0   : > { %v16690_v46 = vadd.f32 %v3750_v43, %v3462_v24  ;;  %v3997_v43 = vld [vmem:[#allocation2 + $0x84] sm:$0xff] }
 0x2f1   : > { %v3271_v58 = vpop.f32.mrf.mxu1  ;;  %v3755_v39 = vpop.f32.mrf.mxu0  ;;  %12966 = vmatmul.mubr.msk.f32.gmra.mxu1 %vm1121_vm15, %v16258_v48  ;;  %13105 = vmatmul.mubr.msk.f32.gmra.mxu0 %vm1121_vm15, %v4479_v10  ;;  %v4481_v24 = vld [vmem:[#allocation2 + $0x85] sm:$0xff] }
 0x2f2   : > { %v3463_v41 = vadd.f32 %v3271_v58, %v16240_v42  ;;  %12968 = vmatprep.mubr.msk.f32.mxu1 %vm14620_vm5, %v14618_v2  ;;  %13107 = vmatprep.mubr.msk.f32.mxu0 %vm14620_vm5, %v14618_v2 }
 0x2f3   : > { %v12668_v51 = vpop.f32.mrf.mxu1  ;;  %v12807_v16 = vpop.f32.mrf.mxu0 }
 0x2f4   : > { %v16700_v12 = vadd.f32 %v3755_v39, %v3463_v41  ;;  %v3998_v41 = vld [vmem:[#allocation2 + $0x8c] sm:$0xff] }
 0x2f5   : > { %v3276_v45 = vpop.f32.mrf.mxu1  ;;  %v3760_v9 = vpop.f32.mrf.mxu0  ;;  %12969 = vmatmul.mubr.msk.f32.gmra.mxu1 %vm1121_vm15, %v3996_v4  ;;  %13108 = vmatmul.mubr.msk.f32.gmra.mxu0 %vm1121_vm15, %v4480_v44  ;;  %v4482_v51 = vld [vmem:[#allocation2 + $0x8d] sm:$0xff] }
 0x2f6   : > { %v3464_v42 = vadd.f32 %v3276_v45, %v16256_v3  ;;  %12971 = vmatprep.mubr.msk.f32.mxu1 %vm14620_vm5, %v14618_v2  ;;  %13110 = vmatprep.mubr.msk.f32.mxu0 %vm14620_vm5, %v14618_v2 }
 0x2f7   : > { %v12671_v48 = vpop.f32.mrf.mxu1  ;;  %v12810_v54 = vpop.f32.mrf.mxu0 }
 0x2f8   : > { %v16709_v49 = vadd.f32 %v3760_v9, %v3464_v42  ;;  %v4483_v42 = vld [vmem:[#allocation2 + $0x95] sm:$0xff] }
 0x2f9   : > { %v3281_v25 = vpop.f32.mrf.mxu1  ;;  %v3765_v47 = vpop.f32.mrf.mxu0  ;;  %12972 = vmatmul.mubr.msk.f32.gmra.mxu1 %vm1121_vm15, %v3997_v43  ;;  %13111 = vmatmul.mubr.msk.f32.gmra.mxu0 %vm1121_vm15, %v4481_v24 }
 0x2fa   : > { %v3465_v3 = vadd.f32 %v3281_v25, %v16272_v19  ;;  %12974 = vmatprep.mubr.msk.f32.mxu1 %vm14620_vm5, %v14618_v2  ;;  %13113 = vmatprep.mubr.msk.f32.mxu0 %vm14620_vm5, %v14618_v2 }
 0x2fb   : > { %v12674_v10 = vpop.f32.mrf.mxu1  ;;  %v12813_v58 = vpop.f32.mrf.mxu0 }
 0x2fc   : > { %v16718_v39 = vadd.f32 %v3765_v47, %v3465_v3  ;;  %v4484_v47 = vld [vmem:[#allocation2 + $0x9d] sm:$0xff] }
 0x2fd   : > { %v3286_v16 = vpop.f32.mrf.mxu1  ;;  %v3770_v4 = vpop.f32.mrf.mxu0  ;;  %12975 = vmatmul.mubr.msk.f32.gmra.mxu1 %vm1121_vm15, %v3998_v41  ;;  %13114 = vmatmul.mubr.msk.f32.gmra.mxu0 %vm1121_vm15, %v4482_v51  ;;  %v4001_v51 = vld [vmem:[#allocation2 + $0xa4] sm:$0xff] }
 0x2fe   : > { %v3466_v19 = vadd.f32 %v3286_v16, %v16285_v30  ;;  %12977 = vmatprep.mubr.msk.f32.mxu1 %vm14620_vm5, %v14618_v2  ;;  %13116 = vmatprep.mubr.msk.f32.mxu0 %vm14620_vm5, %v14618_v2  ;;  %v4485_v16 = vld [vmem:[#allocation2 + $0xa5] sm:$0xff] }
 0x2ff   : > { %v12677_v44 = vpop.f32.mrf.mxu1  ;;  %v12816_v45 = vpop.f32.mrf.mxu0 }
 0x300   : > { %v16727_v9 = vadd.f32 %v3770_v4, %v3466_v19 }
 0x301   : > { %v3291_v48 = vpop.f32.mrf.mxu1  ;;  %v3775_v54 = vpop.f32.mrf.mxu0  ;;  %12978 = vmatmul.mubr.msk.f32.gmra.mxu1 %vm1121_vm15, %v16306_v33  ;;  %13117 = vmatmul.mubr.msk.f32.gmra.mxu0 %vm1121_vm15, %v4483_v42  ;;  %v4002_v42 = vld [vmem:[#allocation2 + $0xac] sm:$0xff] }
 0x302   : > { %v3467_v30 = vadd.f32 %v3291_v48, %v16295_v22  ;;  %12980 = vmatprep.mubr.msk.f32.mxu1 %vm14620_vm5, %v14618_v2  ;;  %13119 = vmatprep.mubr.msk.f32.mxu0 %vm14620_vm5, %v14618_v2  ;;  %v4486_v48 = vld [vmem:[#allocation2 + $0xad] sm:$0xff] }
 0x303   : > { %v12680_v43 = vpop.f32.mrf.mxu1  ;;  %v12819_v24 = vpop.f32.mrf.mxu0 }
 0x304   : > { %v16737_v25 = vadd.f32 %v3775_v54, %v3467_v30 }
 0x305   : > { %v3296_v3 = vpop.f32.mrf.mxu1  ;;  %v3780_v10 = vpop.f32.mrf.mxu0  ;;  %12981 = vmatmul.mubr.msk.f32.gmra.mxu1 %vm1121_vm15, %v16318_v32  ;;  %13120 = vmatmul.mubr.msk.f32.gmra.mxu0 %vm1121_vm15, %v4484_v47 }
 0x306   : > { %v3468_v22 = vadd.f32 %v3296_v3, %v16304_v31  ;;  %12983 = vmatprep.mubr.msk.f32.mxu1 %vm14620_vm5, %v14618_v2  ;;  %13122 = vmatprep.mubr.msk.f32.mxu0 %vm14620_vm5, %v14618_v2  ;;  %v4003_v3 = vld [vmem:[#allocation2 + $0xb4] sm:$0xff] }
 0x307   : > { %v12683_v33 = vpop.f32.mrf.mxu1  ;;  %v12822_v58 = vpop.f32.mrf.mxu0 }
 0x308   : > { %v16747_v41 = vadd.f32 %v3780_v10, %v3468_v22  ;;  %v4487_v10 = vld [vmem:[#allocation2 + $0xb5] sm:$0xff] }
 0x309   : > { %v3301_v4 = vpop.f32.mrf.mxu1  ;;  %v3785_v19 = vpop.f32.mrf.mxu0  ;;  %12984 = vmatmul.mubr.msk.f32.gmra.mxu1 %vm1121_vm15, %v4001_v51  ;;  %13123 = vmatmul.mubr.msk.f32.gmra.mxu0 %vm1121_vm15, %v4485_v16 }
 0x30a   : > { %v3469_v31 = vadd.f32 %v3301_v4, %v16316_v7  ;;  %12986 = vmatprep.mubr.msk.f32.mxu1 %vm14620_vm5, %v14618_v2  ;;  %13125 = vmatprep.mubr.msk.f32.mxu0 %vm14620_vm5, %v14618_v2  ;;  %v4488_v4 = vld [vmem:[#allocation2 + $0xbd] sm:$0xff] }
 0x30b   : > { %v12686_v32 = vpop.f32.mrf.mxu1  ;;  %v12825_v44 = vpop.f32.mrf.mxu0 }
 0x30c   : > { %v16756_v45 = vadd.f32 %v3785_v19, %v3469_v31  ;;  %v10598_v19 = vld [vmem:[%s19644_s6 + $0x78] sm:$0xff] }
 0x30d   : > { %v3306_v54 = vpop.f32.mrf.mxu1  ;;  %v3790_v30 = vpop.f32.mrf.mxu0  ;;  %12987 = vmatmul.mubr.msk.f32.gmra.mxu1 %vm1121_vm15, %v4002_v42  ;;  %13126 = vmatmul.mubr.msk.f32.gmra.mxu0 %vm1121_vm15, %v4486_v48 }
 0x30e   : > { %v3470_v7 = vadd.f32 %v3306_v54, %v16328_v37  ;;  %12989 = vmatprep.mubr.msk.f32.mxu1 %vm14620_vm5, %v14618_v2  ;;  %13128 = vmatprep.mubr.msk.f32.mxu0 %vm14620_vm5, %v14618_v2  ;;  %v4489_v54 = vld [vmem:[#allocation2 + $0xc5] sm:$0xff] }
 0x30f   : > { %v12689_v43 = vpop.f32.mrf.mxu1  ;;  %v12828_v24 = vpop.f32.mrf.mxu0  ;;  %13337 = vmatpush3.msra.mxu0 %v10598_v19 }
 0x310   : > { %v16765_v47 = vadd.f32 %v3790_v30, %v3470_v7  ;;  %13338 = vmatprep.subr.mxu0 %v14618_v2 }
 0x311   : > { %v3311_v22 = vpop.f32.mrf.mxu1  ;;  %v3795_v33 = vpop.f32.mrf.mxu0  ;;  %12990 = vmatmul.mubr.msk.f32.gmra.mxu1 %vm1121_vm15, %v4003_v3  ;;  %13129 = vmatmul.mubr.msk.f32.gmra.mxu0 %vm1121_vm15, %v4487_v10  ;;  %v4006_v3 = vld [vmem:[#allocation2 + $0xcc] sm:$0xff] }
 0x312   : > { %v3471_v37 = vadd.f32 %v3311_v22, %v16337_v35  ;;  %12992 = vmatprep.mubr.msk.f32.mxu1 %vm14620_vm5, %v14618_v2  ;;  %13131 = vmatprep.mubr.msk.f32.mxu0 %vm14620_vm5, %v14618_v2  ;;  %v4490_v10 = vld [vmem:[#allocation2 + $0xcd] sm:$0xff] }
 0x313   : > { %v12692_v58 = vpop.f32.mrf.mxu1  ;;  %v12831_v51 = vpop.f32.mrf.mxu0 }
 0x314   : > { %v16774_v16 = vadd.f32 %v3795_v33, %v3471_v37  ;;  %v4007_v51 = vld [vmem:[#allocation2 + $0xd4] sm:$0xff] }
 0x315   : > { %v3316_v31 = vpop.f32.mrf.mxu1  ;;  %v3800_v32 = vpop.f32.mrf.mxu0  ;;  %12993 = vmatmul.mubr.msk.f32.gmra.mxu1 %vm1121_vm15, %v16357_v20  ;;  %13132 = vmatmul.mubr.msk.f32.gmra.mxu0 %vm1121_vm15, %v4488_v4  ;;  %v4491_v4 = vld [vmem:[#allocation2 + $0xd5] sm:$0xff] }
 0x316   : > { %v3472_v35 = vadd.f32 %v3316_v31, %v16346_v28  ;;  %12995 = vmatprep.mubr.msk.f32.mxu1 %vm14620_vm5, %v14618_v2  ;;  %13134 = vmatprep.mubr.msk.f32.mxu0 %vm14620_vm5, %v14618_v2 }
 0x317   : > { %v12695_v44 = vpop.f32.mrf.mxu1  ;;  %v12834_v42 = vpop.f32.mrf.mxu0 }
 0x318   : > { %v16787_v48 = vadd.f32 %v3800_v32, %v3472_v35  ;;  %v19807_v32 = vld [vmem:[#allocation45_spill] sm:$0xff] }
 0x319   : > { %v3321_v30 = vpop.f32.mrf.mxu1  ;;  %v3805_v20 = vpop.f32.mrf.mxu0  ;;  %12996 = vmatmul.mubr.msk.f32.gmra.mxu1 %vm1121_vm15, %v16369_v62  ;;  %13135 = vmatmul.mubr.msk.f32.gmra.mxu0 %vm1121_vm15, %v4489_v54  ;;  %v4008_v54 = vld [vmem:[#allocation2 + $0xdc] sm:$0xff] }
 0x31a   : > { %v3473_v28 = vadd.f32 %v3321_v30, %v16355_v29  ;;  %12998 = vmatprep.mubr.msk.f32.mxu1 %vm14620_vm5, %v14618_v2  ;;  %13137 = vmatprep.mubr.msk.f32.mxu0 %vm14620_vm5, %v14618_v2  ;;  %v4492_v30 = vld [vmem:[#allocation2 + $0xdd] sm:$0xff] }
 0x31b   : > { %v12698_v7 = vpop.f32.mrf.mxu1  ;;  %v12837_v43 = vpop.f32.mrf.mxu0 }
 0x31c   : > { %v16798_v24 = vadd.f32 %v3805_v20, %v3473_v28 }
 0x31d   : > { %v3326_v22 = vpop.f32.mrf.mxu1  ;;  %v3810_v33 = vpop.f32.mrf.mxu0  ;;  %12999 = vmatmul.mubr.msk.f32.gmra.mxu1 %vm1121_vm15, %v4006_v3  ;;  %13138 = vmatmul.mubr.msk.f32.gmra.mxu0 %vm1121_vm15, %v4490_v10 }
 0x31e   : > { %v3474_v29 = vadd.f32 %v3326_v22, %v16367_v38  ;;  %13001 = vmatprep.mubr.msk.f32.mxu1 %vm14620_vm5, %v14618_v2  ;;  %13140 = vmatprep.mubr.msk.f32.mxu0 %vm14620_vm5, %v14618_v2  ;;  %v4493_v22 = vld [vmem:[#allocation2 + $0xe5] sm:$0xff] }
 0x31f   : > { %v12701_v62 = vpop.f32.mrf.mxu1  ;;  %v12840_v37 = vpop.f32.mrf.mxu0 }
 0x320   : > { %v16807_v58 = vadd.f32 %v3810_v33, %v3474_v29  ;;  %v10597_v33 = vld [vmem:[%s19644_s6 + $0x70] sm:$0xff] }
 0x321   : > { %v3331_v19 = vpop.f32.mrf.mxu1  ;;  %v3815_v31 = vpop.f32.mrf.mxu0  ;;  %13002 = vmatmul.mubr.msk.f32.gmra.mxu1 %vm1121_vm15, %v4007_v51  ;;  %13141 = vmatmul.mubr.msk.f32.gmra.mxu0 %vm1121_vm15, %v4491_v4 }
 0x322   : > { %v3475_v38 = vadd.f32 %v3331_v19, %v19807_v32  ;;  %13004 = vmatprep.mubr.msk.f32.mxu1 %vm14620_vm5, %v14618_v2  ;;  %13143 = vmatprep.mubr.msk.f32.mxu0 %vm14620_vm5, %v14618_v2  ;;  %v4494_v19 = vld [vmem:[#allocation2 + $0xed] sm:$0xff] }
 0x323   : > { %v12704_v35 = vpop.f32.mrf.mxu1  ;;  %v12843_v44 = vpop.f32.mrf.mxu0  ;;  %13339 = vmatpush3.msra.mxu0 %v10597_v33 }
 0x324   : > { %v16816_v42 = vadd.f32 %v3815_v31, %v3475_v38  ;;  %13340 = vmatprep.subr.mxu0 %v14618_v2  ;;  %v4011_v44 = vld [vmem:[#allocation2 + $0xf4] sm:$0xff] }
 0x325   : > { %v3336_v20 = vpop.f32.mrf.mxu1  ;;  %v3820_v28 = vpop.f32.mrf.mxu0  ;;  %13005 = vmatmul.mubr.msk.f32.gmra.mxu1 %vm1121_vm15, %v4008_v54  ;;  %13144 = vmatmul.mubr.msk.f32.gmra.mxu0 %vm1121_vm15, %v4492_v30  ;;  %v4495_v54 = vld [vmem:[#allocation2 + $0xf5] sm:$0xff] }
 0x326   : > { %v3476_v7 = vadd.f32 %v3336_v20, %v16388_v8  ;;  %13007 = vmatprep.mubr.msk.f32.mxu1 %vm14620_vm5, %v14618_v2  ;;  %13146 = vmatprep.mubr.msk.f32.mxu0 %vm14620_vm5, %v14618_v2 }
 0x327   : > { %v12707_v43 = vpop.f32.mrf.mxu1  ;;  %v12846_v3 = vpop.f32.mrf.mxu0 }
 0x328   : > { %v16825_v10 = vadd.f32 %v3820_v28, %v3476_v7  ;;  %v4012_v3 = vld [vmem:[#allocation2 + $0xfc] sm:$0xff] }
 0x329   : > { %v3341_v29 = vpop.f32.mrf.mxu1  ;;  %v3825_v62 = vpop.f32.mrf.mxu0  ;;  %13008 = vmatmul.mubr.msk.f32.gmra.mxu1 %vm1121_vm15, %v16408_v52  ;;  %13147 = vmatmul.mubr.msk.f32.gmra.mxu0 %vm1121_vm15, %v4493_v22  ;;  %v4496_v22 = vld [vmem:[#allocation2 + $0xfd] sm:$0xff] }
 0x32a   : > { %v3477_v8 = vadd.f32 %v3341_v29, %v16397_v27  ;;  %13010 = vmatprep.mubr.msk.f32.mxu1 %vm14620_vm5, %v14618_v2  ;;  %13149 = vmatprep.mubr.msk.f32.mxu0 %vm14620_vm5, %v14618_v2 }
 0x32b   : > { %v12710_v37 = vpop.f32.mrf.mxu1  ;;  %v12849_v51 = vpop.f32.mrf.mxu0 }
 0x32c   : > { %v16838_v4 = vadd.f32 %v3825_v62, %v3477_v8  ;;  %v19809_v62 = vld [vmem:[#allocation47_spill] sm:$0xff] }
 0x32d   : > { %v3346_v31 = vpop.f32.mrf.mxu1  ;;  %v3830_v52 = vpop.f32.mrf.mxu0  ;;  %13011 = vmatmul.mubr.msk.f32.gmra.mxu1 %vm1121_vm15, %v16420_v11  ;;  %13150 = vmatmul.mubr.msk.f32.gmra.mxu0 %vm1121_vm15, %v4494_v19  ;;  %v19808_v11 = vld [vmem:[#allocation46_spill] sm:$0xff] }
 0x32e   : > { %v3478_v27 = vadd.f32 %v3346_v31, %v16406_v36  ;;  %13013 = vmatprep.mubr.msk.f32.mxu1 %vm14620_vm5, %v14618_v2  ;;  %13152 = vmatprep.mubr.msk.f32.mxu0 %vm14620_vm5, %v14618_v2  ;;  %v4013_v31 = vld [vmem:[#allocation2 + $0x104] sm:$0xff] }
 0x32f   : > { %v12713_v32 = vpop.f32.mrf.mxu1  ;;  %v12852_v38 = vpop.f32.mrf.mxu0 }
 0x330   : > { %v16849_v35 = vadd.f32 %v3830_v52, %v3478_v27  ;;  %v4497_v52 = vld [vmem:[#allocation2 + $0x105] sm:$0xff] }
 0x331   : > { %v3351_v30 = vpop.f32.mrf.mxu1  ;;  %v3835_v20 = vpop.f32.mrf.mxu0  ;;  %13014 = vmatmul.mubr.msk.f32.gmra.mxu1 %vm1121_vm15, %v4011_v44  ;;  %13153 = vmatmul.mubr.msk.f32.gmra.mxu0 %vm1121_vm15, %v4495_v54 }
 0x332   : > { %v3479_v36 = vadd.f32 %v3351_v30, %v19808_v11  ;;  %13016 = vmatprep.mubr.msk.f32.mxu1 %vm14620_vm5, %v14618_v2  ;;  %13155 = vmatprep.mubr.msk.f32.mxu0 %vm14620_vm5, %v14618_v2  ;;  %v10596_v11 = vld [vmem:[%s19644_s6 + $0x68] sm:$0xff] }
 0x333   : > { %v12716_v28 = vpop.f32.mrf.mxu1  ;;  %v12855_v7 = vpop.f32.mrf.mxu0  ;;  %13341 = vmatpush3.msra.mxu0 %v10596_v11 }
 0x334   : > { %v16858_v43 = vadd.f32 %v3835_v20, %v3479_v36  ;;  %v4498_v20 = vld [vmem:[#allocation2 + $0x10d] sm:$0xff]  ;;  %13342 = vmatprep.subr.mxu0 %v14618_v2 }
 0x335   : > { %v3356_v33 = vpop.f32.mrf.mxu1  ;;  %v3840_v29 = vpop.f32.mrf.mxu0  ;;  %13017 = vmatmul.mubr.msk.f32.gmra.mxu1 %vm1121_vm15, %v4012_v3  ;;  %13156 = vmatmul.mubr.msk.f32.gmra.mxu0 %vm1121_vm15, %v4496_v22 }
 0x336   : > { %v3480_v8 = vadd.f32 %v3356_v33, %v19809_v62  ;;  %13019 = vmatprep.mubr.msk.f32.mxu1 %vm14620_vm5, %v14618_v2  ;;  %13158 = vmatprep.mubr.msk.f32.mxu0 %vm14620_vm5, %v14618_v2  ;;  %v4499_v33 = vld [vmem:[#allocation2 + $0x115] sm:$0xff] }
 0x337   : > { %v12719_v37 = vpop.f32.mrf.mxu1  ;;  %v12858_v51 = vpop.f32.mrf.mxu0 }
 0x338   : > { %v16867_v19 = vadd.f32 %v3840_v29, %v3480_v8  ;;  %v4016_v51 = vld [vmem:[#allocation2 + $0x11c] sm:$0xff] }
 0x339   : > { %v3361_v27 = vpop.f32.mrf.mxu1  ;;  %v3845_v32 = vpop.f32.mrf.mxu0  ;;  %13020 = vmatmul.mubr.msk.f32.gmra.mxu1 %vm1121_vm15, %v4013_v31  ;;  %13159 = vmatmul.mubr.msk.f32.gmra.mxu0 %vm1121_vm15, %v4497_v52  ;;  %v4500_v31 = vld [vmem:[#allocation2 + $0x11d] sm:$0xff] }
 0x33a   : > { %v3481_v38 = vadd.f32 %v3361_v27, %v16439_v50  ;;  %13022 = vmatprep.mubr.msk.f32.mxu1 %vm14620_vm5, %v14618_v2  ;;  %13161 = vmatprep.mubr.msk.f32.mxu0 %vm14620_vm5, %v14618_v2 }
 0x33b   : > { %v12722_v44 = vpop.f32.mrf.mxu1  ;;  %v12861_v54 = vpop.f32.mrf.mxu0 }
 0x33c   : > { %v16876_v30 = vadd.f32 %v3845_v32, %v3481_v38  ;;  %v4017_v54 = vld [vmem:[#allocation2 + $0x124] sm:$0xff] }
 0x33d   : > { %v3366_v36 = vpop.f32.mrf.mxu1  ;;  %v3850_v28 = vpop.f32.mrf.mxu0  ;;  %13023 = vmatmul.mubr.msk.f32.gmra.mxu1 %vm1121_vm15, %v16459_v18  ;;  %13162 = vmatmul.mubr.msk.f32.gmra.mxu0 %vm1121_vm15, %v4498_v20  ;;  %v4501_v20 = vld [vmem:[#allocation2 + $0x125] sm:$0xff] }
 0x33e   : > { %v3482_v50 = vadd.f32 %v3366_v36, %v16448_v57  ;;  %13025 = vmatprep.mubr.msk.f32.mxu1 %vm14620_vm5, %v14618_v2  ;;  %13164 = vmatprep.mubr.msk.f32.mxu0 %vm14620_vm5, %v14618_v2 }
 0x33f   : > { %v12725_v7 = vpop.f32.mrf.mxu1  ;;  %v12864_v3 = vpop.f32.mrf.mxu0 }
 0x340   : > { %v16889_v22 = vadd.f32 %v3850_v28, %v3482_v50  ;;  %v19811_v28 = vld [vmem:[#allocation49_spill] sm:$0xff] }
 0x341   : > { %v3371_v29 = vpop.f32.mrf.mxu1  ;;  %v3855_v18 = vpop.f32.mrf.mxu0  ;;  %13026 = vmatmul.mubr.msk.f32.gmra.mxu1 %vm1121_vm15, %v16471_v61  ;;  %13165 = vmatmul.mubr.msk.f32.gmra.mxu0 %vm1121_vm15, %v4499_v33  ;;  %v19810_v61 = vld [vmem:[#allocation48_spill] sm:$0xff] }
 0x342   : > { %v3483_v57 = vadd.f32 %v3371_v29, %v16457_v40  ;;  %13028 = vmatprep.mubr.msk.f32.mxu1 %vm14620_vm5, %v14618_v2  ;;  %13167 = vmatprep.mubr.msk.f32.mxu0 %vm14620_vm5, %v14618_v2  ;;  %v4018_v29 = vld [vmem:[#allocation2 + $0x12c] sm:$0xff] }
 0x343   : > { %v12728_v62 = vpop.f32.mrf.mxu1  ;;  %v12867_v8 = vpop.f32.mrf.mxu0 }
 0x344   : > { %v16900_v37 = vadd.f32 %v3855_v18, %v3483_v57  ;;  %v4502_v18 = vld [vmem:[#allocation2 + $0x12d] sm:$0xff] }
 0x345   : > { %v3376_v52 = vpop.f32.mrf.mxu1  ;;  %v3860_v27 = vpop.f32.mrf.mxu0  ;;  %13029 = vmatmul.mubr.msk.f32.gmra.mxu1 %vm1121_vm15, %v4016_v51  ;;  %13168 = vmatmul.mubr.msk.f32.gmra.mxu0 %vm1121_vm15, %v4500_v31 }
 0x346   : > { %v3484_v40 = vadd.f32 %v3376_v52, %v19810_v61  ;;  %13031 = vmatprep.mubr.msk.f32.mxu1 %vm14620_vm5, %v14618_v2  ;;  %13170 = vmatprep.mubr.msk.f32.mxu0 %vm14620_vm5, %v14618_v2  ;;  %v4503_v61 = vld [vmem:[#allocation2 + $0x135] sm:$0xff] }
 0x347   : > { %v12731_v32 = vpop.f32.mrf.mxu1  ;;  %v12870_v38 = vpop.f32.mrf.mxu0 }
 0x348   : > { %v16909_v44 = vadd.f32 %v3860_v27, %v3484_v40  ;;  %v4019_v27 = vld [vmem:[#allocation2 + $0x134] sm:$0xff]  ;;  %v10595_v40 = vld [vmem:[%s19644_s6 + $0x60] sm:$0xff] }
 0x349   : > { %v3381_v11 = vpop.f32.mrf.mxu1  ;;  %v3865_v36 = vpop.f32.mrf.mxu0  ;;  %13032 = vmatmul.mubr.msk.f32.gmra.mxu1 %vm1121_vm15, %v4017_v54  ;;  %13171 = vmatmul.mubr.msk.f32.gmra.mxu0 %vm1121_vm15, %v4501_v20 }
 0x34a   : > { %v3485_v50 = vadd.f32 %v3381_v11, %v19811_v28  ;;  %13034 = vmatprep.mubr.msk.f32.mxu1 %vm14620_vm5, %v14618_v2  ;;  %13173 = vmatprep.mubr.msk.f32.mxu0 %vm14620_vm5, %v14618_v2 }
 0x34b   : > { %v12734_v7 = vpop.f32.mrf.mxu1  ;;  %v12873_v3 = vpop.f32.mrf.mxu0  ;;  %13343 = vmatpush3.msra.mxu0 %v10595_v40 }
 0x34c   : > { %v16918_v33 = vadd.f32 %v3865_v36, %v3485_v50  ;;  %v4504_v36 = vld [vmem:[#allocation2 + $0x13d] sm:$0xff]  ;;  %13344 = vmatprep.subr.mxu0 %v14618_v2 }
 0x34d   : > { %v3386_v57 = vpop.f32.mrf.mxu1  ;;  %v3870_v62 = vpop.f32.mrf.mxu0  ;;  %13035 = vmatmul.mubr.msk.f32.gmra.mxu1 %vm1121_vm15, %v4018_v29  ;;  %13174 = vmatmul.mubr.msk.f32.gmra.mxu0 %vm1121_vm15, %v4502_v18  ;;  %v4505_v18 = vld [vmem:[#allocation2 + $0x145] sm:$0xff] }
 0x34e   : > { %v3486_v8 = vadd.f32 %v3386_v57, %v16490_v14  ;;  %13037 = vmatprep.mubr.msk.f32.mxu1 %vm14620_vm5, %v14618_v2  ;;  %13176 = vmatprep.mubr.msk.f32.mxu0 %vm14620_vm5, %v14618_v2 }
 0x34f   : > { %v12737_v51 = vpop.f32.mrf.mxu1  ;;  %v12876_v31 = vpop.f32.mrf.mxu0 }
 0x350   : > { %v16927_v52 = vadd.f32 %v3870_v62, %v3486_v8  ;;  %v4506_v31 = vld [vmem:[#allocation2 + $0x14d] sm:$0xff] }
 0x351   : > { %v3391_v32 = vpop.f32.mrf.mxu1  ;;  %v3875_v38 = vpop.f32.mrf.mxu0  ;;  %13038 = vmatmul.mubr.msk.f32.gmra.mxu1 %vm1121_vm15, %v4019_v27  ;;  %13177 = vmatmul.mubr.msk.f32.gmra.mxu0 %vm1121_vm15, %v4503_v61 }
 0x352   : > { %v3487_v14 = vadd.f32 %v3391_v32, %v16499_v26  ;;  %13040 = vmatprep.mubr.msk.f32.mxu1 %vm14620_vm5, %v14618_v2  ;;  %13179 = vmatprep.mubr.msk.f32.mxu0 %vm14620_vm5, %v14618_v2 }
 0x353   : > { %v12740_v54 = vpop.f32.mrf.mxu1  ;;  %v12879_v20 = vpop.f32.mrf.mxu0 }
 0x354   : > { %v16939_v11 = vadd.f32 %v3875_v38, %v3487_v14  ;;  %v4023_v14 = vld [vmem:[#allocation2 + $0x154] sm:$0xff] }
 0x355   : > { %v3396_v28 = vpop.f32.mrf.mxu1  ;;  %v3880_v50 = vpop.f32.mrf.mxu0  ;;  %13041 = vmatmul.mubr.msk.f32.gmra.mxu1 %vm1121_vm15, %v16519_v34  ;;  %13180 = vmatmul.mubr.msk.f32.gmra.mxu0 %vm1121_vm15, %v4504_v36  ;;  %v4507_v54 = vld [vmem:[#allocation2 + $0x155] sm:$0xff] }
 0x356   : > { %v3488_v26 = vadd.f32 %v3396_v28, %v16508_v1  ;;  %13043 = vmatprep.mubr.msk.f32.mxu1 %vm14620_vm5, %v14618_v2  ;;  %13182 = vmatprep.mubr.msk.f32.mxu0 %vm14620_vm5, %v14618_v2 }
 0x357   : > { %v12743_v7 = vpop.f32.mrf.mxu1  ;;  %v12882_v3 = vpop.f32.mrf.mxu0 }
 0x358   : > { %v16950_v29 = vadd.f32 %v3880_v50, %v3488_v26  ;;  %v4024_v50 = vld [vmem:[#allocation2 + $0x15c] sm:$0xff] }
 0x359   : > { %v3401_v57 = vpop.f32.mrf.mxu1  ;;  %v3885_v62 = vpop.f32.mrf.mxu0  ;;  %13044 = vmatmul.mubr.msk.f32.gmra.mxu1 %vm1121_vm15, %v16531_v13  ;;  %13183 = vmatmul.mubr.msk.f32.gmra.mxu0 %vm1121_vm15, %v4505_v18  ;;  %v19812_v13 = vld [vmem:[#allocation50_spill] sm:$0xff]  ;;  %v4508_v26 = vld [vmem:[#allocation2 + $0x15d] sm:$0xff] }
 0x35a   : > { %v3489_v1 = vadd.f32 %v3401_v57, %v16517_v0  ;;  %13046 = vmatprep.mubr.msk.f32.mxu1 %vm14620_vm5, %v14618_v2  ;;  %13185 = vmatprep.mubr.msk.f32.mxu0 %vm14620_vm5, %v14618_v2  ;;  %v10594_v57 = vld [vmem:[%s19644_s6 + $0x58] sm:$0xff] }
 0x35b   : > { %v12746_v34 = vpop.f32.mrf.mxu1  ;;  %v12885_v8 = vpop.f32.mrf.mxu0  ;;  %13345 = vmatpush3.msra.mxu0 %v10594_v57 }
 0x35c   : > { %v16960_v51 = vadd.f32 %v3885_v62, %v3489_v1  ;;  %v4025_v8 = vld [vmem:[#allocation2 + $0x164] sm:$0xf]  ;;  %13346 = vmatprep.subr.mxu0 %v14618_v2 }
 0x35d   : > { %v3406_v27 = vpop.f32.mrf.mxu1  ;;  %v3890_v61 = vpop.f32.mrf.mxu0  ;;  %13047 = vmatmul.mubr.msk.f32.gmra.mxu1 %vm1121_vm15, %v16543_v60  ;;  %13186 = vmatmul.mubr.msk.f32.gmra.mxu0 %vm1121_vm15, %v4506_v31  ;;  %v19813_v60 = vld [vmem:[#allocation51_spill] sm:$0xff]  ;;  %v4509_v31 = vld [vmem:[#allocation2 + $0x165] sm:$0xf] }
 0x35e   : > { %v3490_v0 = vadd.f32 %v3406_v27, %v19812_v13  ;;  %13049 = vmatprep.mubr.msk.f32.mxu1 %vm14620_vm5, %v14618_v2  ;;  %13188 = vmatprep.mubr.msk.f32.mxu0 %vm14620_vm5, %v14618_v2 }
 0x35f   : > { %v12749_v40 = vpop.f32.mrf.mxu1  ;;  %v12888_v32 = vpop.f32.mrf.mxu0 }
 0x360   : > { %v16970_v38 = vadd.f32 %v3890_v61, %v3490_v0 }
 0x361   : > { %v3411_v20 = vpop.f32.mrf.mxu1  ;;  %v3895_v36 = vpop.f32.mrf.mxu0  ;;  %13050 = vmatmul.mubr.msk.f32.gmra.mxu1 %vm1121_vm15, %v4023_v14  ;;  %13189 = vmatmul.mubr.msk.f32.gmra.mxu0 %vm1121_vm15, %v4507_v54 }
 0x362   : > { %v3491_v28 = vadd.f32 %v3411_v20, %v19813_v60  ;;  %13052 = vmatprep.mubr.msk.f32.mxu1 %vm14620_vm5, %v14618_v2  ;;  %13191 = vmatprep.mubr.msk.f32.mxu0 %vm14620_vm5, %v14618_v2  ;;  %v4953_v20 = vld [vmem:[#allocation2 + $0x26] sm:$0xff] }
 0x363   : > { %v12752_v7 = vpop.f32.mrf.mxu1  ;;  %v12891_v3 = vpop.f32.mrf.mxu0 }
 0x364   : > { %v16979_v18 = vadd.f32 %v3895_v36, %v3491_v28  ;;  %v4954_v7 = vld [vmem:[#allocation2 + $0x2e] sm:$0xff] }
 0x365   : > { %v3416_v62 = vpop.f32.mrf.mxu1  ;;  %v3900_v1 = vpop.f32.mrf.mxu0  ;;  %13053 = vmatmul.mubr.msk.f32.gmra.mxu1 %vm1121_vm15, %v4024_v50  ;;  %13192 = vmatmul.mubr.msk.f32.gmra.mxu0 %vm1121_vm15, %v4508_v26 }
 0x366   : > { %v3492_v34 = vadd.f32 %v3416_v62, %v16553_v21  ;;  %13055 = vmatprep.mubr.msk.f32.mxu1 %vm14620_vm5, %v14618_v2  ;;  %13194 = vmatprep.mubr.msk.f32.mxu0 %vm14620_vm5, %v14618_v2 }
 0x367   : > { %v12755_v27 = vpop.f32.mrf.mxu1  ;;  %v12894_v61 = vpop.f32.mrf.mxu0 }
 0x368   : > { %v16991_v13 = vadd.f32 %v3900_v1, %v3492_v34 }
 0x369   : > { %v3421_v0 = vpop.f32.mrf.mxu1  ;;  %v3905_v40 = vpop.f32.mrf.mxu0  ;;  %13056 = vmatmul.mubr.msk.f32.gmra.mxu1 %vm1121_vm15, %v4025_v8  ;;  %13195 = vmatmul.mubr.msk.f32.gmra.mxu0 %vm1121_vm15, %v4509_v31  ;;  %v4955_v8 = vld [vmem:[#allocation2 + $0x36] sm:$0xff] }
 0x36a   : > { %v3493_v21 = vadd.f32 %v3421_v0, %v16565_v6  ;;  %13213 = vmatprep.mubr.msk.f32.mxu1 %vm14620_vm5, %v14618_v2  ;;  %13352 = vmatprep.mubr.msk.f32.mxu0 %vm14620_vm5, %v14618_v2 }
 0x36b   : > { %v12758_v32 = vpop.f32.mrf.mxu1  ;;  %v12897_v14 = vpop.f32.mrf.mxu0 }
 0x36c   : > { %v17001_v54 = vadd.f32 %v3905_v40, %v3493_v21  ;;  %v4956_v21 = vld [vmem:[#allocation2 + $0x3e] sm:$0xff]  ;;  %v10593_v32 = vld [vmem:[%s19644_s6 + $0x50] sm:$0xff] }
 0x36d   : > { %v3426_v36 = vpop.f32.mrf.mxu1  ;;  %v3910_v60 = vpop.f32.mrf.mxu0  ;;  %13214 = vmatmul.mubr.msk.f32.vlgmr.msra.gmra.mxu1 %vm1121_vm15, %v4953_v20  ;;  %13347 = vmatpush3.msra.mxu0 %v10593_v32 }
 0x36e   : > { %v3494_v28 = vadd.f32 %v3426_v36, %v16579_v56  ;;  %13216 = vmatprep.mubr.msk.f32.mxu1 %vm14620_vm5, %v14618_v2  ;;  %13348 = vmatprep.subr.mxu0 %v14618_v2 }
 0x36f   : > { %v12761_v6 = vpop.f32.mrf.mxu1  ;;  %v12900_v50 = vpop.f32.mrf.mxu0 }
 0x370   : > { %v17007_v26 = vadd.f32 %v3910_v60, %v3494_v28  ;;  %v4957_v6 = vld [vmem:[#allocation2 + $0x46] sm:$0xff] }
 0x371   : > { %v3431_v3 = vpop.f32.mrf.mxu1  ;;  %v3915_v57 = vpop.f32.mrf.mxu0  ;;  %13217 = vmatmul.mubr.msk.f32.gmra.mxu1 %vm1121_vm15, %v4954_v7 }
 0x372   : > { %v3495_v62 = vadd.f32 %v3431_v3, %v16593_v17  ;;  %13219 = vmatprep.mubr.msk.f32.mxu1 %vm14620_vm5, %v14618_v2 }
 0x373   : > { %v12764_v1 = vpop.f32.mrf.mxu1  ;;  %v12903_v34 = vpop.f32.mrf.mxu0 }
 0x374   : > { %v17013_v56 = vadd.f32 %v3915_v57, %v3495_v62  ;;  %v4958_v1 = vld [vmem:[#allocation2 + $0x4e] sm:$0xff] }
 0x375   : > { %v3436_v31 = vpop.f32.mrf.mxu1  ;;  %v3920_v27 = vpop.f32.mrf.mxu0  ;;  %13220 = vmatmul.mubr.msk.f32.gmra.mxu1 %vm1121_vm15, %v4955_v8 }
 0x376   : > { %v3496_v61 = vadd.f32 %v3436_v31, %v16607_v59  ;;  %13222 = vmatprep.mubr.msk.f32.mxu1 %vm14620_vm5, %v14618_v2 }
 0x377   : > { %v12767_v0 = vpop.f32.mrf.mxu1  ;;  %v12906_v40 = vpop.f32.mrf.mxu0 }
 0x378   : > { %v17019_v17 = vadd.f32 %v3920_v27, %v3496_v61  ;;  %v4959_v0 = vld [vmem:[#allocation2 + $0x56] sm:$0xff] }
 0x379   : > { %v3441_v14 = vpop.f32.mrf.mxu1  ;;  %v3925_v20 = vpop.f32.mrf.mxu0  ;;  %13223 = vmatmul.mubr.msk.f32.gmra.mxu1 %vm1121_vm15, %v4956_v21 }
 0x37a   : > { %v3497_v36 = vadd.f32 %v3441_v14, %v16620_v15  ;;  %13225 = vmatprep.mubr.msk.f32.mxu1 %vm14620_vm5, %v14618_v2 }
 0x37b   : > { %v12770_v59 = vpop.f32.mrf.mxu1  ;;  %v12909_v60 = vpop.f32.mrf.mxu0 }
 0x37c   : > { %v17029_v28 = vadd.f32 %v3925_v20, %v3497_v36  ;;  %v4960_v36 = vld [vmem:[#allocation2 + $0x5e] sm:$0xff] }
 0x37d   : > { %v3446_v50 = vpop.f32.mrf.mxu1  ;;  %v3930_v7 = vpop.f32.mrf.mxu0  ;;  %13226 = vmatmul.mubr.msk.f32.gmra.mxu1 %vm1121_vm15, %v4957_v6 }
 0x37e   : > { %v3498_v3 = vadd.f32 %v3446_v50, %v16634_v5  ;;  %13228 = vmatprep.mubr.msk.f32.mxu1 %vm14620_vm5, %v14618_v2 }
 0x37f   : > { %v12773_v15 = vpop.f32.mrf.mxu1  ;;  %v12912_v57 = vpop.f32.mrf.mxu0 }
 0x380   : > { %v17035_v62 = vadd.f32 %v3930_v7, %v3498_v3  ;;  %v4961_v3 = vld [vmem:[#allocation2 + $0x66] sm:$0xff] }
 0x381   : > { %v3451_v34 = vpop.f32.mrf.mxu1  ;;  %v3935_v8 = vpop.f32.mrf.mxu0  ;;  %13229 = vmatmul.mubr.msk.f32.gmra.mxu1 %vm1121_vm15, %v4958_v1  ;;  %v10592_v15 = vld [vmem:[%s19644_s6 + $0x48] sm:$0xff] }
 0x382   : > { %v3499_v31 = vadd.f32 %v3451_v34, %v16648_v55  ;;  %13231 = vmatprep.mubr.msk.f32.mxu1 %vm14620_vm5, %v14618_v2  ;;  %13349 = vmatpush3.msra.mxu0 %v10592_v15 }
 0x383   : > { %v12776_v27 = vpop.f32.mrf.mxu1  ;;  %v12915_v61 = vpop.f32.mrf.mxu0  ;;  %13350 = vmatprep.subr.mxu0 %v14618_v2 }
 0x384   : > { %v17041_v5 = vadd.f32 %v3935_v8, %v3499_v31  ;;  %v4962_v27 = vld [vmem:[#allocation2 + $0x6e] sm:$0xff] }
 0x385   : > { %v3456_v40 = vpop.f32.mrf.mxu1  ;;  %v3940_v21 = vpop.f32.mrf.mxu0  ;;  %13232 = vmatmul.mubr.msk.f32.gmra.mxu1 %vm1121_vm15, %v4959_v0 }
 0x386   : > { %v3500_v32 = vadd.f32 %v3456_v40, %v16661_v53  ;;  %13234 = vmatprep.mubr.msk.f32.mxu1 %vm14620_vm5, %v14618_v2 }
 0x387   : > { %v12779_v14 = vpop.f32.mrf.mxu1  ;;  %v12918_v20 = vpop.f32.mrf.mxu0 }
 0x388   : > { %v17047_v55 = vadd.f32 %v3940_v21, %v3500_v32  ;;  %v4963_v14 = vld [vmem:[#allocation2 + $0x76] sm:$0xff] }
 0x389   : > { %v4224_v59 = vpop.f32.mrf.mxu1  ;;  %v4708_v60 = vpop.f32.mrf.mxu0  ;;  %13235 = vmatmul.mubr.msk.f32.gmra.mxu1 %vm1121_vm15, %v4960_v36 }
 0x38a   : > { %v4428_v6 = vadd.f32 %v4224_v59, %v16671_v23  ;;  %13237 = vmatprep.mubr.msk.f32.mxu1 %vm14620_vm5, %v14618_v2 }
 0x38b   : > { %v12937_v50 = vpop.f32.mrf.mxu1  ;;  %v13076_v7 = vpop.f32.mrf.mxu0 }
 0x38c   : > { %v17053_v53 = vadd.f32 %v4708_v60, %v4428_v6  ;;  %v4964_v50 = vld [vmem:[#allocation2 + $0x7e] sm:$0xff] }
 0x38d   : > { %v4229_v57 = vpop.f32.mrf.mxu1  ;;  %v4713_v1 = vpop.f32.mrf.mxu0  ;;  %13238 = vmatmul.mubr.msk.f32.gmra.mxu1 %vm1121_vm15, %v4961_v3 }
 0x38e   : > { %v4429_v34 = vadd.f32 %v4229_v57, %v16680_v63  ;;  %13240 = vmatprep.mubr.msk.f32.mxu1 %vm14620_vm5, %v14618_v2 }
 0x38f   : > { %v12940_v23 = vpop.f32.mrf.mxu1  ;;  %v13079_v8 = vpop.f32.mrf.mxu0 }
 0x390   : > { %v17063_v31 = vadd.f32 %v4713_v1, %v4429_v34  ;;  %v4965_v34 = vld [vmem:[#allocation2 + $0x86] sm:$0xff] }
 0x391   : > { %v4234_v61 = vpop.f32.mrf.mxu1  ;;  %v4718_v0 = vpop.f32.mrf.mxu0  ;;  %13241 = vmatmul.mubr.msk.f32.gmra.mxu1 %vm1121_vm15, %v4962_v27 }
 0x392   : > { %v4430_v40 = vadd.f32 %v4234_v61, %v16690_v46  ;;  %13243 = vmatprep.mubr.msk.f32.mxu1 %vm14620_vm5, %v14618_v2 }
 0x393   : > { %v12943_v63 = vpop.f32.mrf.mxu1  ;;  %v13082_v21 = vpop.f32.mrf.mxu0 }
 0x394   : > { %v17069_v32 = vadd.f32 %v4718_v0, %v4430_v40  ;;  %v4966_v40 = vld [vmem:[#allocation2 + $0x8e] sm:$0xff] }
 0x395   : > { %v4239_v20 = vpop.f32.mrf.mxu1  ;;  %v4723_v36 = vpop.f32.mrf.mxu0  ;;  %13244 = vmatmul.mubr.msk.f32.gmra.mxu1 %vm1121_vm15, %v4963_v14 }
 0x396   : > { %v4431_v59 = vadd.f32 %v4239_v20, %v16700_v12  ;;  %13246 = vmatprep.mubr.msk.f32.mxu1 %vm14620_vm5, %v14618_v2 }
 0x397   : > { %v12946_v60 = vpop.f32.mrf.mxu1  ;;  %v13085_v6 = vpop.f32.mrf.mxu0 }
 0x398   : > { %v17075_v46 = vadd.f32 %v4723_v36, %v4431_v59  ;;  %v4967_v59 = vld [vmem:[#allocation2 + $0x96] sm:$0xff]  ;;  %v10591_v60 = vld [vmem:[%s19644_s6 + $0x40] sm:$0xff] }
 0x399   : > { %v4244_v7 = vpop.f32.mrf.mxu1  ;;  %v4728_v3 = vpop.f32.mrf.mxu0  ;;  %13247 = vmatmul.mubr.msk.f32.gmra.mxu1 %vm1121_vm15, %v4964_v50  ;;  %13351 = vmatpush3.msra.mxu0 %v10591_v60 }
 0x39a   : > { %v4432_v15 = vadd.f32 %v4244_v7, %v16709_v49  ;;  %13249 = vmatprep.mubr.msk.f32.mxu1 %vm14620_vm5, %v14618_v2  ;;  %13614 = vmatprep.subr.mxu0 %v14618_v2 }
 0x39b   : > { %v12949_v57 = vpop.f32.mrf.mxu1  ;;  %v13088_v1 = vpop.f32.mrf.mxu0 }
 0x39c   : > { %v17081_v12 = vadd.f32 %v4728_v3, %v4432_v15  ;;  %v4968_v1 = vld [vmem:[#allocation2 + $0x9e] sm:$0xff] }
 0x39d   : > { %v4249_v23 = vpop.f32.mrf.mxu1  ;;  %v4733_v8 = vpop.f32.mrf.mxu0  ;;  %13250 = vmatmul.mubr.msk.f32.gmra.mxu1 %vm1121_vm15, %v4965_v34 }
 0x39e   : > { %v4433_v27 = vadd.f32 %v4249_v23, %v16718_v39  ;;  %13252 = vmatprep.mubr.msk.f32.mxu1 %vm14620_vm5, %v14618_v2 }
 0x39f   : > { %v12952_v61 = vpop.f32.mrf.mxu1  ;;  %v13091_v0 = vpop.f32.mrf.mxu0 }
 0x3a0   : > { %v17087_v49 = vadd.f32 %v4733_v8, %v4433_v27  ;;  %v5654_v27 = vld [vmem:[%s19644_s6 + $0x28] sm:$0xff] }
 0x3a1   : > { %v4254_v63 = vpop.f32.mrf.mxu1  ;;  %v4738_v21 = vpop.f32.mrf.mxu0  ;;  %13253 = vmatmul.mubr.msk.f32.gmra.mxu1 %vm1121_vm15, %v4966_v40 }
 0x3a2   : > { %v4434_v14 = vadd.f32 %v4254_v63, %v16727_v9  ;;  %13255 = vmatprep.mubr.msk.f32.mxu1 %vm14620_vm5, %v14618_v2  ;;  %v5656_v9 = vld [vmem:[%s19644_s6 + $0x38] sm:$0xff]  ;;  %v4969_v63 = vld [vmem:[#allocation2 + $0xa6] sm:$0xff] }
 0x3a3   : > { %v12955_v20 = vpop.f32.mrf.mxu1  ;;  %v13094_v36 = vpop.f32.mrf.mxu0  ;;  %13476 = vmatpush3.msra.mxu1 %v5656_v9 }
 0x3a4   : > { %v17093_v39 = vadd.f32 %v4738_v21, %v4434_v14  ;;  %13477 = vmatprep.subr.mxu1 %v14618_v2 }
 0x3a5   : > { %v4259_v6 = vpop.f32.mrf.mxu1  ;;  %v4743_v50 = vpop.f32.mrf.mxu0  ;;  %13256 = vmatmul.mubr.msk.f32.gmra.mxu1 %vm1121_vm15, %v4967_v59 }
 0x3a6   : > { %v4435_v7 = vadd.f32 %v4259_v6, %v16737_v25  ;;  %13258 = vmatprep.mubr.msk.f32.mxu1 %vm14620_vm5, %v14618_v2  ;;  %v5655_v25 = vld [vmem:[%s19644_s6 + $0x30] sm:$0xff] }
 0x3a7   : > { %v12958_v3 = vpop.f32.mrf.mxu1  ;;  %v13097_v15 = vpop.f32.mrf.mxu0  ;;  %13478 = vmatpush3.msra.mxu1 %v5655_v25  ;;  %v4970_v6 = vld [vmem:[#allocation2 + $0xae] sm:$0xff] }
 0x3a8   : > { %v17106_v57 = vadd.f32 %v4743_v50, %v4435_v7  ;;  %13479 = vmatprep.subr.mxu1 %v14618_v2 }
 0x3a9   : > { %v4264_v34 = vpop.f32.mrf.mxu1  ;;  %v4748_v23 = vpop.f32.mrf.mxu0  ;;  %13259 = vmatmul.mubr.msk.f32.gmra.mxu1 %vm1121_vm15, %v4968_v1  ;;  %v4971_v1 = vld [vmem:[#allocation2 + $0xb6] sm:$0xff] }
 0x3aa   : > { %v4436_v8 = vadd.f32 %v4264_v34, %v16747_v41  ;;  %13261 = vmatprep.mubr.msk.f32.mxu1 %vm14620_vm5, %v14618_v2  ;;  %13480 = vmatpush3.msra.mxu1 %v5654_v27  ;;  %v5653_v41 = vld [vmem:[%s19644_s6 + $0x20] sm:$0xff] }
 0x3ab   : > { %v12961_v61 = vpop.f32.mrf.mxu1  ;;  %v13100_v0 = vpop.f32.mrf.mxu0  ;;  %13481 = vmatprep.subr.mxu1 %v14618_v2 }
 0x3ac   : > { %v17120_v40 = vadd.f32 %v4748_v23, %v4436_v8  ;;  %13482 = vmatpush3.msra.mxu1 %v5653_v41  ;;  %v5652_v23 = vld [vmem:[%s19644_s6 + $0x18] sm:$0xff] }
 0x3ad   : > { %v4269_v21 = vpop.f32.mrf.mxu1  ;;  %v4753_v14 = vpop.f32.mrf.mxu0  ;;  %13262 = vmatmul.mubr.msk.f32.gmra.mxu1 %vm1121_vm15, %v4969_v63  ;;  %13483 = vmatprep.subr.mxu1 %v14618_v2  ;;  %v4972_v63 = vld [vmem:[#allocation2 + $0xbe] sm:$0xff] }
 0x3ae   : > { %v4437_v20 = vadd.f32 %v4269_v21, %v16756_v45  ;;  %13264 = vmatprep.mubr.msk.f32.mxu1 %vm14620_vm5, %v14618_v2  ;;  %13484 = vmatpush3.msra.mxu1 %v5652_v23 }
 0x3af   : > { %v12964_v36 = vpop.f32.mrf.mxu1  ;;  %v13103_v59 = vpop.f32.mrf.mxu0  ;;  %13485 = vmatprep.subr.mxu1 %v14618_v2 }
 0x3b0   : > { %v17131_v60 = vadd.f32 %v4753_v14, %v4437_v20  ;;  %v5657_v14 = vld [vmem:[#allocation3 + $0x1] sm:$0xff]  ;;  %v5649_v20 = vld [vmem:[%s19644_s6] sm:$0xff] }
 0x3b1   : > { %v4274_v50 = vpop.f32.mrf.mxu1  ;;  %v4758_v7 = vpop.f32.mrf.mxu0  ;;  %13265 = vmatmul.mubr.msk.f32.gmra.mxu1 %vm1121_vm15, %v4970_v6  ;;  %13353 = vmatmul.mubr.msk.f32.vlgmr.msra.gmra.mxu0 %vm1121_vm15, %v5657_v14 }
 0x3b2   : > { %v4438_v9 = vadd.f32 %v4274_v50, %v16765_v47  ;;  %13267 = vmatprep.mubr.msk.f32.mxu1 %vm14620_vm5, %v14618_v2  ;;  %v5651_v47 = vld [vmem:[%s19644_s6 + $0x10] sm:$0xff]  ;;  %13355 = vmatprep.mubr.msk.f32.mxu0 %vm14620_vm5, %v14618_v2 }
 0x3b3   : > { %v12967_v45 = vpop.f32.mrf.mxu1  ;;  %v13106_v3 = vpop.f32.mrf.mxu0  ;;  %13486 = vmatpush3.msra.mxu1 %v5651_v47  ;;  %v4974_v47 = vld [vmem:[#allocation2 + $0xce] sm:$0xff] }
 0x3b4   : > { %v17137_v15 = vadd.f32 %v4758_v7, %v4438_v9  ;;  %13487 = vmatprep.subr.mxu1 %v14618_v2  ;;  %v4973_v7 = vld [vmem:[#allocation2 + $0xc6] sm:$0xff]  ;;  %v5658_v3 = vld [vmem:[#allocation3 + $0x9] sm:$0xff] }
 0x3b5   : > { %v4279_v25 = vpop.f32.mrf.mxu1  ;;  %v4763_v34 = vpop.f32.mrf.mxu0  ;;  %13268 = vmatmul.mubr.msk.f32.gmra.mxu1 %vm1121_vm15, %v4971_v1  ;;  %13356 = vmatmul.mubr.msk.f32.gmra.mxu0 %vm1121_vm15, %v5658_v3 }
 0x3b6   : > { %v4439_v8 = vadd.f32 %v4279_v25, %v16774_v16  ;;  %13270 = vmatprep.mubr.msk.f32.mxu1 %vm14620_vm5, %v14618_v2  ;;  %v5650_v16 = vld [vmem:[%s19644_s6 + $0x8] sm:$0xff]  ;;  %13358 = vmatprep.mubr.msk.f32.mxu0 %vm14620_vm5, %v14618_v2 }
 0x3b7   : > { %v12970_v27 = vpop.f32.mrf.mxu1  ;;  %v13109_v61 = vpop.f32.mrf.mxu0  ;;  %13488 = vmatpush3.msra.mxu1 %v5650_v16 }
 0x3b8   : > { %v17150_v0 = vadd.f32 %v4763_v34, %v4439_v8  ;;  %13489 = vmatprep.subr.mxu1 %v14618_v2 }
 0x3b9   : > { %v4284_v41 = vpop.f32.mrf.mxu1  ;;  %v4768_v21 = vpop.f32.mrf.mxu0  ;;  %13271 = vmatmul.mubr.msk.f32.gmra.mxu1 %vm1121_vm15, %v4972_v63 }
 0x3ba   : > { %v4440_v36 = vadd.f32 %v4284_v41, %v16787_v48  ;;  %13273 = vmatprep.mubr.msk.f32.mxu1 %vm14620_vm5, %v14618_v2  ;;  %13490 = vmatpush3.msra.mxu1 %v5649_v20  ;;  %v10688_v48 = vld [vmem:[%s19644_s6 + $0xb8] sm:$0xff] }
 0x3bb   : > { %v12973_v59 = vpop.f32.mrf.mxu1  ;;  %v13112_v6 = vpop.f32.mrf.mxu0  ;;  %13753 = vmatprep.subr.mxu1 %v14618_v2  ;;  %13615 = vmatpush3.msra.mxu0 %v10688_v48 }
 0x3bc   : > { %v17165_v50 = vadd.f32 %v4768_v21, %v4440_v36  ;;  %13616 = vmatprep.subr.mxu0 %v14618_v2  ;;  %v4975_v21 = vld [vmem:[#allocation2 + $0xd6] sm:$0xff]  ;;  %v4976_v6 = vld [vmem:[#allocation2 + $0xde] sm:$0xff] }
 0x3bd   : > { %v4289_v9 = vpop.f32.mrf.mxu1  ;;  %v4773_v45 = vpop.f32.mrf.mxu0  ;;  %13274 = vmatmul.mubr.msk.f32.gmra.mxu1 %vm1121_vm15, %v4973_v7 }
 0x3be   : > { %v4441_v1 = vadd.f32 %v4289_v9, %v16798_v24  ;;  %13276 = vmatprep.mubr.msk.f32.mxu1 %vm14620_vm5, %v14618_v2 }
 0x3bf   : > { %v12976_v25 = vpop.f32.mrf.mxu1  ;;  %v13115_v34 = vpop.f32.mrf.mxu0 }
 0x3c0   : > { %v17179_v23 = vadd.f32 %v4773_v45, %v4441_v1  ;;  %v4977_v1 = vld [vmem:[#allocation2 + $0xe6] sm:$0xff] }
 0x3c1   : > { %v4294_v8 = vpop.f32.mrf.mxu1  ;;  %v4778_v27 = vpop.f32.mrf.mxu0  ;;  %13277 = vmatmul.mubr.msk.f32.gmra.mxu1 %vm1121_vm15, %v4974_v47 }
 0x3c2   : > { %v4442_v24 = vadd.f32 %v4294_v8, %v16807_v58  ;;  %13279 = vmatprep.mubr.msk.f32.mxu1 %vm14620_vm5, %v14618_v2 }
 0x3c3   : > { %v12979_v61 = vpop.f32.mrf.mxu1  ;;  %v13118_v63 = vpop.f32.mrf.mxu0 }
 0x3c4   : > { %v17187_v41 = vadd.f32 %v4778_v27, %v4442_v24  ;;  %v4978_v24 = vld [vmem:[#allocation2 + $0xee] sm:$0xff] }
 0x3c5   : > { %v4299_v16 = vpop.f32.mrf.mxu1  ;;  %v4783_v14 = vpop.f32.mrf.mxu0  ;;  %13280 = vmatmul.mubr.msk.f32.gmra.mxu1 %vm1121_vm15, %v4975_v21  ;;  %v10687_v21 = vld [vmem:[%s19644_s6 + $0xb0] sm:$0xff] }
 0x3c6   : > { %v4443_v20 = vadd.f32 %v4299_v16, %v16816_v42  ;;  %13282 = vmatprep.mubr.msk.f32.mxu1 %vm14620_vm5, %v14618_v2  ;;  %13617 = vmatpush3.msra.mxu0 %v10687_v21 }
 0x3c7   : > { %v12982_v36 = vpop.f32.mrf.mxu1  ;;  %v13121_v59 = vpop.f32.mrf.mxu0  ;;  %13618 = vmatprep.subr.mxu0 %v14618_v2 }
 0x3c8   : > { %v17193_v58 = vadd.f32 %v4783_v14, %v4443_v20  ;;  %v4979_v36 = vld [vmem:[#allocation2 + $0xf6] sm:$0xff] }
 0x3c9   : > { %v4304_v7 = vpop.f32.mrf.mxu1  ;;  %v4788_v9 = vpop.f32.mrf.mxu0  ;;  %13283 = vmatmul.mubr.msk.f32.gmra.mxu1 %vm1121_vm15, %v4976_v6 }
 0x3ca   : > { %v4444_v45 = vadd.f32 %v4304_v7, %v16825_v10  ;;  %13285 = vmatprep.mubr.msk.f32.mxu1 %vm14620_vm5, %v14618_v2 }
 0x3cb   : > { %v12985_v48 = vpop.f32.mrf.mxu1  ;;  %v13124_v3 = vpop.f32.mrf.mxu0 }
 0x3cc   : > { %v17199_v42 = vadd.f32 %v4788_v9, %v4444_v45  ;;  %v4980_v48 = vld [vmem:[#allocation2 + $0xfe] sm:$0xff] }
 0x3cd   : > { %v4309_v25 = vpop.f32.mrf.mxu1  ;;  %v4793_v34 = vpop.f32.mrf.mxu0  ;;  %13286 = vmatmul.mubr.msk.f32.gmra.mxu1 %vm1121_vm15, %v4977_v1 }
 0x3ce   : > { %v4445_v47 = vadd.f32 %v4309_v25, %v16838_v4  ;;  %13288 = vmatprep.mubr.msk.f32.mxu1 %vm14620_vm5, %v14618_v2 }
 0x3cf   : > { %v12988_v8 = vpop.f32.mrf.mxu1  ;;  %v13127_v27 = vpop.f32.mrf.mxu0 }
 0x3d0   : > { %v17205_v10 = vadd.f32 %v4793_v34, %v4445_v47  ;;  %v4981_v8 = vld [vmem:[#allocation2 + $0x106] sm:$0xff] }
 0x3d1   : > { %v4314_v61 = vpop.f32.mrf.mxu1  ;;  %v4798_v63 = vpop.f32.mrf.mxu0  ;;  %13289 = vmatmul.mubr.msk.f32.gmra.mxu1 %vm1121_vm15, %v4978_v24 }
 0x3d2   : > { %v4446_v16 = vadd.f32 %v4314_v61, %v16849_v35  ;;  %13291 = vmatprep.mubr.msk.f32.mxu1 %vm14620_vm5, %v14618_v2 }
 0x3d3   : > { %v12991_v4 = vpop.f32.mrf.mxu1  ;;  %v13130_v14 = vpop.f32.mrf.mxu0 }
 0x3d4   : > { %v17215_v20 = vadd.f32 %v4798_v63, %v4446_v16  ;;  %v4982_v16 = vld [vmem:[#allocation2 + $0x10e] sm:$0xff] }
 0x3d5   : > { %v4319_v59 = vpop.f32.mrf.mxu1  ;;  %v4803_v6 = vpop.f32.mrf.mxu0  ;;  %13292 = vmatmul.mubr.msk.f32.gmra.mxu1 %vm1121_vm15, %v4979_v36 }
 0x3d6   : > { %v4447_v7 = vadd.f32 %v4319_v59, %v16858_v43  ;;  %13294 = vmatprep.mubr.msk.f32.mxu1 %vm14620_vm5, %v14618_v2 }
 0x3d7   : > { %v12994_v35 = vpop.f32.mrf.mxu1  ;;  %v13133_v9 = vpop.f32.mrf.mxu0 }
 0x3d8   : > { %v17221_v45 = vadd.f32 %v4803_v6, %v4447_v7  ;;  %v4983_v7 = vld [vmem:[#allocation2 + $0x116] sm:$0xff] }
 0x3d9   : > { %v4324_v3 = vpop.f32.mrf.mxu1  ;;  %v4808_v1 = vpop.f32.mrf.mxu0  ;;  %13295 = vmatmul.mubr.msk.f32.gmra.mxu1 %vm1121_vm15, %v4980_v48  ;;  %v10686_v48 = vld [vmem:[%s19644_s6 + $0xa8] sm:$0xff] }
 0x3da   : > { %v4448_v25 = vadd.f32 %v4324_v3, %v16867_v19  ;;  %13297 = vmatprep.mubr.msk.f32.mxu1 %vm14620_vm5, %v14618_v2  ;;  %13619 = vmatpush3.msra.mxu0 %v10686_v48 }
 0x3db   : > { %v12997_v34 = vpop.f32.mrf.mxu1  ;;  %v13136_v47 = vpop.f32.mrf.mxu0  ;;  %13620 = vmatprep.subr.mxu0 %v14618_v2 }
 0x3dc   : > { %v17227_v43 = vadd.f32 %v4808_v1, %v4448_v25  ;;  %v4984_v34 = vld [vmem:[#allocation2 + $0x11e] sm:$0xff] }
 0x3dd   : > { %v4329_v27 = vpop.f32.mrf.mxu1  ;;  %v4813_v24 = vpop.f32.mrf.mxu0  ;;  %13298 = vmatmul.mubr.msk.f32.gmra.mxu1 %vm1121_vm15, %v4981_v8 }
 0x3de   : > { %v4449_v61 = vadd.f32 %v4329_v27, %v16876_v30  ;;  %13300 = vmatprep.mubr.msk.f32.mxu1 %vm14620_vm5, %v14618_v2 }
 0x3df   : > { %v13000_v63 = vpop.f32.mrf.mxu1  ;;  %v13139_v21 = vpop.f32.mrf.mxu0 }
 0x3e0   : > { %v17233_v19 = vadd.f32 %v4813_v24, %v4449_v61  ;;  %v4985_v63 = vld [vmem:[#allocation2 + $0x126] sm:$0xff] }
 0x3e1   : > { %v4334_v4 = vpop.f32.mrf.mxu1  ;;  %v4818_v14 = vpop.f32.mrf.mxu0  ;;  %13301 = vmatmul.mubr.msk.f32.gmra.mxu1 %vm1121_vm15, %v4982_v16 }
 0x3e2   : > { %v4450_v36 = vadd.f32 %v4334_v4, %v16889_v22  ;;  %13303 = vmatprep.mubr.msk.f32.mxu1 %vm14620_vm5, %v14618_v2 }
 0x3e3   : > { %v13003_v59 = vpop.f32.mrf.mxu1  ;;  %v13142_v6 = vpop.f32.mrf.mxu0 }
 0x3e4   : > { %v17239_v30 = vadd.f32 %v4818_v14, %v4450_v36  ;;  %v4986_v59 = vld [vmem:[#allocation2 + $0x12e] sm:$0xff] }
 0x3e5   : > { %v4339_v35 = vpop.f32.mrf.mxu1  ;;  %v4823_v9 = vpop.f32.mrf.mxu0  ;;  %13304 = vmatmul.mubr.msk.f32.gmra.mxu1 %vm1121_vm15, %v4983_v7 }
 0x3e6   : > { %v4451_v3 = vadd.f32 %v4339_v35, %v16900_v37  ;;  %13306 = vmatprep.mubr.msk.f32.mxu1 %vm14620_vm5, %v14618_v2 }
 0x3e7   : > { %v13006_v22 = vpop.f32.mrf.mxu1  ;;  %v13145_v1 = vpop.f32.mrf.mxu0 }
 0x3e8   : > { %v17249_v25 = vadd.f32 %v4823_v9, %v4451_v3  ;;  %v4987_v3 = vld [vmem:[#allocation2 + $0x136] sm:$0xff] }
 0x3e9   : > { %v4344_v47 = vpop.f32.mrf.mxu1  ;;  %v4828_v8 = vpop.f32.mrf.mxu0  ;;  %13307 = vmatmul.mubr.msk.f32.gmra.mxu1 %vm1121_vm15, %v4984_v34 }
 0x3ea   : > { %v4452_v27 = vadd.f32 %v4344_v47, %v16909_v44  ;;  %13309 = vmatprep.mubr.msk.f32.mxu1 %vm14620_vm5, %v14618_v2 }
 0x3eb   : > { %v13009_v37 = vpop.f32.mrf.mxu1  ;;  %v13148_v24 = vpop.f32.mrf.mxu0 }
 0x3ec   : > { %v17255_v61 = vadd.f32 %v4828_v8, %v4452_v27  ;;  %v4988_v27 = vld [vmem:[#allocation2 + $0x13e] sm:$0xff] }
 0x3ed   : > { %v4349_v21 = vpop.f32.mrf.mxu1  ;;  %v4833_v16 = vpop.f32.mrf.mxu0  ;;  %13310 = vmatmul.mubr.msk.f32.gmra.mxu1 %vm1121_vm15, %v4985_v63  ;;  %v10685_v63 = vld [vmem:[%s19644_s6 + $0xa0] sm:$0xff] }
 0x3ee   : > { %v4453_v4 = vadd.f32 %v4349_v21, %v16918_v33  ;;  %13312 = vmatprep.mubr.msk.f32.mxu1 %vm14620_vm5, %v14618_v2  ;;  %13621 = vmatpush3.msra.mxu0 %v10685_v63 }
 0x3ef   : > { %v13012_v14 = vpop.f32.mrf.mxu1  ;;  %v13151_v36 = vpop.f32.mrf.mxu0  ;;  %13622 = vmatprep.subr.mxu0 %v14618_v2 }
 0x3f0   : > { %v17261_v44 = vadd.f32 %v4833_v16, %v4453_v4  ;;  %v4989_v14 = vld [vmem:[#allocation2 + $0x146] sm:$0xff] }
 0x3f1   : > { %v4354_v6 = vpop.f32.mrf.mxu1  ;;  %v4838_v7 = vpop.f32.mrf.mxu0  ;;  %13313 = vmatmul.mubr.msk.f32.gmra.mxu1 %vm1121_vm15, %v4986_v59 }
 0x3f2   : > { %v4454_v35 = vadd.f32 %v4354_v6, %v16927_v52  ;;  %13315 = vmatprep.mubr.msk.f32.mxu1 %vm14620_vm5, %v14618_v2 }
 0x3f3   : > { %v13015_v9 = vpop.f32.mrf.mxu1  ;;  %v13154_v48 = vpop.f32.mrf.mxu0 }
 0x3f4   : > { %v17267_v33 = vadd.f32 %v4838_v7, %v4454_v35  ;;  %v4990_v9 = vld [vmem:[#allocation2 + $0x14e] sm:$0xff] }
 0x3f5   : > { %v4359_v22 = vpop.f32.mrf.mxu1  ;;  %v4843_v1 = vpop.f32.mrf.mxu0  ;;  %13316 = vmatmul.mubr.msk.f32.gmra.mxu1 %vm1121_vm15, %v4987_v3 }
 0x3f6   : > { %v4455_v34 = vadd.f32 %v4359_v22, %v16939_v11  ;;  %13318 = vmatprep.mubr.msk.f32.mxu1 %vm14620_vm5, %v14618_v2 }
 0x3f7   : > { %v13018_v47 = vpop.f32.mrf.mxu1  ;;  %v13157_v8 = vpop.f32.mrf.mxu0 }
 0x3f8   : > { %v17273_v52 = vadd.f32 %v4843_v1, %v4455_v34  ;;  %v4991_v47 = vld [vmem:[#allocation2 + $0x156] sm:$0xff] }
 0x3f9   : > { %v4364_v37 = vpop.f32.mrf.mxu1  ;;  %v4848_v24 = vpop.f32.mrf.mxu0  ;;  %13319 = vmatmul.mubr.msk.f32.gmra.mxu1 %vm1121_vm15, %v4988_v27 }
 0x3fa   : > { %v4456_v21 = vadd.f32 %v4364_v37, %v16950_v29  ;;  %13321 = vmatprep.mubr.msk.f32.mxu1 %vm14620_vm5, %v14618_v2 }
 0x3fb   : > { %v13021_v11 = vpop.f32.mrf.mxu1  ;;  %v13160_v16 = vpop.f32.mrf.mxu0 }
 0x3fc   : > { %v17283_v4 = vadd.f32 %v4848_v24, %v4456_v21  ;;  %v4992_v24 = vld [vmem:[#allocation2 + $0x15e] sm:$0xff] }
 0x3fd   : > { %v4369_v36 = vpop.f32.mrf.mxu1  ;;  %v4853_v59 = vpop.f32.mrf.mxu0  ;;  %13322 = vmatmul.mubr.msk.f32.gmra.mxu1 %vm1121_vm15, %v4989_v14 }
 0x3fe   : > { %v4457_v6 = vadd.f32 %v4369_v36, %v16960_v51  ;;  %13324 = vmatprep.mubr.msk.f32.mxu1 %vm14620_vm5, %v14618_v2  ;;  %v4993_v36 = vld [vmem:[#allocation2 + $0x166] sm:$0xf] }
 0x3ff   : > { %v13024_v29 = vpop.f32.mrf.mxu1  ;;  %v13163_v7 = vpop.f32.mrf.mxu0 }
 0x400   : > { %v17289_v35 = vadd.f32 %v4853_v59, %v4457_v6 }
 0x401   : > { %v4374_v48 = vpop.f32.mrf.mxu1  ;;  %v4858_v3 = vpop.f32.mrf.mxu0  ;;  %13325 = vmatmul.mubr.msk.f32.gmra.mxu1 %vm1121_vm15, %v4990_v9  ;;  %v10684_v9 = vld [vmem:[%s19644_s6 + $0x98] sm:$0xff] }
 0x402   : > { %v4458_v22 = vadd.f32 %v4374_v48, %v16970_v38  ;;  %13327 = vmatprep.mubr.msk.f32.mxu1 %vm14620_vm5, %v14618_v2  ;;  %13623 = vmatpush3.msra.mxu0 %v10684_v9 }
 0x403   : > { %v13027_v1 = vpop.f32.mrf.mxu1  ;;  %v13166_v34 = vpop.f32.mrf.mxu0  ;;  %13624 = vmatprep.subr.mxu0 %v14618_v2 }
 0x404   : > { %v17295_v51 = vadd.f32 %v4858_v3, %v4458_v22 }
 0x405   : > { %v4379_v8 = vpop.f32.mrf.mxu1  ;;  %v4863_v27 = vpop.f32.mrf.mxu0  ;;  %13328 = vmatmul.mubr.msk.f32.gmra.mxu1 %vm1121_vm15, %v4991_v47 }
 0x406   : > { %v4459_v37 = vadd.f32 %v4379_v8, %v16979_v18  ;;  %13330 = vmatprep.mubr.msk.f32.mxu1 %vm14620_vm5, %v14618_v2 }
 0x407   : > { %v13030_v63 = vpop.f32.mrf.mxu1  ;;  %v13169_v38 = vpop.f32.mrf.mxu0 }
 0x408   : > { %v17301_v21 = vadd.f32 %v4863_v27, %v4459_v37 }
 0x409   : > { %v4384_v11 = vpop.f32.mrf.mxu1  ;;  %v4868_v16 = vpop.f32.mrf.mxu0  ;;  %13331 = vmatmul.mubr.msk.f32.gmra.mxu1 %vm1121_vm15, %v4992_v24 }
 0x40a   : > { %v4460_v14 = vadd.f32 %v4384_v11, %v16991_v13  ;;  %13333 = vmatprep.mubr.msk.f32.mxu1 %vm14620_vm5, %v14618_v2  ;;  %v5608_v13 = vld [vmem:[#allocation3] sm:$0xff] }
 0x40b   : > { %v13033_v59 = vpop.f32.mrf.mxu1  ;;  %v13172_v18 = vpop.f32.mrf.mxu0 }
 0x40c   : > { %v17307_v6 = vadd.f32 %v4868_v16, %v4460_v14 }
 0x40d   : > { %v4389_v29 = vpop.f32.mrf.mxu1  ;;  %v4873_v7 = vpop.f32.mrf.mxu0  ;;  %13334 = vmatmul.mubr.msk.f32.gmra.mxu1 %vm1121_vm15, %v4993_v36 }
 0x40e   : > { %v4461_v48 = vadd.f32 %v4389_v29, %v17001_v54  ;;  %13491 = vmatprep.mubr.msk.f32.mxu1 %vm14620_vm5, %v14618_v2  ;;  %v5609_v54 = vld [vmem:[#allocation3 + $0x8] sm:$0xff] }
 0x40f   : > { %v13036_v3 = vpop.f32.mrf.mxu1  ;;  %v13175_v22 = vpop.f32.mrf.mxu0 }
 0x410   : > { %v17317_v1 = vadd.f32 %v4873_v7, %v4461_v48 }
 0x411   : > { %v4394_v34 = vpop.f32.mrf.mxu1  ;;  %v4878_v47 = vpop.f32.mrf.mxu0  ;;  %13492 = vmatmul.mubr.msk.f32.vlgmr.msra.gmra.mxu1 %vm1121_vm15, %v5608_v13 }
 0x412   : > { %v4462_v8 = vadd.f32 %v4394_v34, %v17007_v26  ;;  %13494 = vmatprep.mubr.msk.f32.mxu1 %vm14620_vm5, %v14618_v2 }
 0x413   : > { %v13039_v27 = vpop.f32.mrf.mxu1  ;;  %v13178_v37 = vpop.f32.mrf.mxu0 }
 0x414   : > { %v17323_v24 = vadd.f32 %v4878_v47, %v4462_v8 }
 0x415   : > { %v4399_v63 = vpop.f32.mrf.mxu1  ;;  %v4883_v38 = vpop.f32.mrf.mxu0  ;;  %13495 = vmatmul.mubr.msk.f32.gmra.mxu1 %vm1121_vm15, %v5609_v54  ;;  %v10683_v54 = vld [vmem:[%s19644_s6 + $0x90] sm:$0xff] }
 0x416   : > { %v4463_v11 = vadd.f32 %v4399_v63, %v17013_v56  ;;  %13497 = vmatprep.mubr.msk.f32.mxu1 %vm14620_vm5, %v14618_v2  ;;  %13625 = vmatpush3.msra.mxu0 %v10683_v54 }
 0x417   : > { %v13042_v16 = vpop.f32.mrf.mxu1  ;;  %v13181_v14 = vpop.f32.mrf.mxu0  ;;  %13626 = vmatprep.subr.mxu0 %v14618_v2 }
 0x418   : > { %v17329_v26 = vadd.f32 %v4883_v38, %v4463_v11 }
 0x419   : > { %v4404_v36 = vpop.f32.mrf.mxu1  ;;  %v4888_v59 = vpop.f32.mrf.mxu0 }
 0x41a   : > { %v4464_v18 = vadd.f32 %v4404_v36, %v17019_v17 }
 0x41b   : > { %v13045_v29 = vpop.f32.mrf.mxu1  ;;  %v13184_v7 = vpop.f32.mrf.mxu0 }
 0x41c   : > { %v17332_v9 = vadd.f32 %v4888_v59, %v4464_v18 }
 0x41d   : > { %v4409_v48 = vpop.f32.mrf.mxu1  ;;  %v4893_v13 = vpop.f32.mrf.mxu0 }
 0x41e   : > { %v4465_v3 = vadd.f32 %v4409_v48, %v17029_v28 }
 0x41f   : > { %v13048_v56 = vpop.f32.mrf.mxu1  ;;  %v13187_v22 = vpop.f32.mrf.mxu0 }
 0x420   : > { %v17335_v34 = vadd.f32 %v4893_v13, %v4465_v3  ;;  %v17353_v3 = vld [vmem:[%s19643_s5] ss:$0 sm:$0xff] }
 0x421   : > { %v4414_v47 = vpop.f32.mrf.mxu1  ;;  %v4898_v8 = vpop.f32.mrf.mxu0 }
 0x422   : > { %v4466_v17 = vadd.f32 %v4414_v47, %v17035_v62 }
 0x423   : > { %v13051_v27 = vpop.f32.mrf.mxu1  ;;  %v13190_v37 = vpop.f32.mrf.mxu0 }
 0x424   : > { %v17342_v63 = vadd.f32 %v4898_v8, %v4466_v17 }
 0x425   : > { %v4419_v28 = vpop.f32.mrf.mxu1  ;;  %v4903_v38 = vpop.f32.mrf.mxu0 }
 0x426   : > { %v4467_v11 = vadd.f32 %v4419_v28, %v17041_v5 }
 0x427   : > { %v13054_v16 = vpop.f32.mrf.mxu1  ;;  %v13193_v14 = vpop.f32.mrf.mxu0 }
 0x428   : > { %v17345_v36 = vadd.f32 %v4903_v38, %v4467_v11 }
 0x429   : > { %v4424_v59 = vpop.f32.mrf.mxu1  ;;  %v4908_v18 = vpop.f32.mrf.mxu0 }
 0x42a   : > { %v4468_v29 = vadd.f32 %v4424_v59, %v17047_v55 }
 0x42b   : > { %v13057_v62 = vpop.f32.mrf.mxu1  ;;  %v13196_v7 = vpop.f32.mrf.mxu0 }
 0x42c   : > { %v17348_v48 = vadd.f32 %v4908_v18, %v4468_v29 }
 0x42d   : > { %v5192_v13 = vpop.f32.mrf.mxu1 }
 0x42e   : > { %v5396_v5 = vadd.f32 %v5192_v13, %v17053_v53  ;;  %v10682_v53 = vld [vmem:[%s19644_s6 + $0x88] sm:$0xff] }
 0x42f   : > { %v13215_v56 = vpop.f32.mrf.mxu1  ;;  %13627 = vmatpush3.msra.mxu0 %v10682_v53 }
 0x430   : > { %v5444_v22 = vadd.f32 %v17353_v3, %v5396_v5  ;;  %13628 = vmatprep.subr.mxu0 %v14618_v2 }
 0x431   : > { %v5197_v47 = vpop.f32.mrf.mxu1 }
 0x432   : > { %v5485_v8 = vmax.f32 %v5444_v22, 0.0  ;;  %v5397_v54 = vadd.f32 %v5197_v47, %v17063_v31 }
 0x433   : > { %v13218_v55 = vpop.f32.mrf.mxu1 }
 0x434   : > { %v5526_v27 = vsel %vm1039_vm0, %v5485_v8, 0.0  ;;  %v5445_v37 = vadd.f32 %v17353_v3, %v5397_v54 }
 0x435   : > { %5567 = vst.msk [vmem:[#allocation3 + $0x13] sm:$0xff] %vm1121_vm15, %v5526_v27  ;;  %v5202_v28 = vpop.f32.mrf.mxu1 }
 0x436   : > { %v5486_v38 = vmax.f32 %v5445_v37, 0.0  ;;  %v5398_v11 = vadd.f32 %v5202_v28, %v17069_v32 }
 0x437   : > { %v13221_v16 = vpop.f32.mrf.mxu1 }
 0x438   : > { %v5527_v14 = vsel %vm1040_vm2, %v5486_v38, 0.0  ;;  %v5446_v59 = vadd.f32 %v17353_v3, %v5398_v11 }
 0x439   : > { %5568 = vst.msk [vmem:[#allocation3 + $0x1b] sm:$0xff] %vm1121_vm15, %v5527_v14  ;;  %v5207_v18 = vpop.f32.mrf.mxu1 }
 0x43a   : > { %v5487_v29 = vmax.f32 %v5446_v59, 0.0  ;;  %v5399_v62 = vadd.f32 %v5207_v18, %v17075_v46 }
 0x43b   : > { %v13224_v7 = vpop.f32.mrf.mxu1 }
 0x43c   : > { %v5528_v5 = vsel %vm1041_vm6, %v5487_v29, 0.0  ;;  %v5447_v32 = vadd.f32 %v17353_v3, %v5399_v62  ;;  %v5659_v56 = vld [vmem:[#allocation3 + $0x11] sm:$0xff] }
 0x43d   : > { %v5610_v22 = vld [vmem:[#allocation3 + $0x10] sm:$0xff]  ;;  %5569 = vst.msk [vmem:[#allocation3 + $0x23] sm:$0xff] %vm1121_vm15, %v5528_v5  ;;  %v5212_v47 = vpop.f32.mrf.mxu1  ;;  %13359 = vmatmul.mubr.msk.f32.gmra.mxu0 %vm1121_vm15, %v5659_v56 }
 0x43e   : > { %13498 = vmatmul.mubr.msk.f32.gmra.mxu1 %vm1121_vm15, %v5610_v22  ;;  %v5488_v8 = vmax.f32 %v5447_v32, 0.0  ;;  %v5400_v54 = vadd.f32 %v5212_v47, %v17081_v12  ;;  %13361 = vmatprep.mubr.msk.f32.mxu0 %vm14620_vm5, %v14618_v2 }
 0x43f   : > { %13500 = vmatprep.mubr.msk.f32.mxu1 %vm14620_vm5, %v14618_v2  ;;  %v13227_v46 = vpop.f32.mrf.mxu1 }
 0x440   : > { %v5529_v27 = vsel %vm1042_vm8, %v5488_v8, 0.0  ;;  %v5448_v37 = vadd.f32 %v17353_v3, %v5400_v54  ;;  %v5660_v28 = vld [vmem:[#allocation3 + $0x19] sm:$0xff] }
 0x441   : > { %v5611_v53 = vld [vmem:[#allocation3 + $0x18] sm:$0xff]  ;;  %5570 = vst.msk [vmem:[#allocation3 + $0x2b] sm:$0xff] %vm1121_vm15, %v5529_v27  ;;  %v5217_v38 = vpop.f32.mrf.mxu1  ;;  %13362 = vmatmul.mubr.msk.f32.gmra.mxu0 %vm1121_vm15, %v5660_v28 }
 0x442   : > { %13501 = vmatmul.mubr.msk.f32.gmra.mxu1 %vm1121_vm15, %v5611_v53  ;;  %v5489_v12 = vmax.f32 %v5448_v37, 0.0  ;;  %v5401_v11 = vadd.f32 %v5217_v38, %v17087_v49  ;;  %13364 = vmatprep.mubr.msk.f32.mxu0 %vm14620_vm5, %v14618_v2 }
 0x443   : > { %13503 = vmatprep.mubr.msk.f32.mxu1 %vm14620_vm5, %v14618_v2  ;;  %v13230_v16 = vpop.f32.mrf.mxu1 }
 0x444   : > { %v5530_v59 = vsel %vm1043_vm10, %v5489_v12, 0.0  ;;  %v5449_v18 = vadd.f32 %v17353_v3, %v5401_v11  ;;  %v5661_v29 = vld [vmem:[#allocation3 + $0x21] sm:$0xff] }
 0x445   : > { %v5612_v62 = vld [vmem:[#allocation3 + $0x20] sm:$0xff]  ;;  %5571 = vst.msk [vmem:[#allocation3 + $0x33] sm:$0xff] %vm1121_vm15, %v5530_v59  ;;  %v5222_v7 = vpop.f32.mrf.mxu1  ;;  %13365 = vmatmul.mubr.msk.f32.gmra.mxu0 %vm1121_vm15, %v5661_v29 }
 0x446   : > { %13504 = vmatmul.mubr.msk.f32.gmra.mxu1 %vm1121_vm15, %v5612_v62  ;;  %v5490_v49 = vmax.f32 %v5449_v18, 0.0  ;;  %v5402_v5 = vadd.f32 %v5222_v7, %v17093_v39  ;;  %13367 = vmatprep.mubr.msk.f32.mxu0 %vm14620_vm5, %v14618_v2 }
 0x447   : > { %13506 = vmatprep.mubr.msk.f32.mxu1 %vm14620_vm5, %v14618_v2  ;;  %v13233_v32 = vpop.f32.mrf.mxu1 }
 0x448   : > { %v5531_v22 = vsel %vm1044_vm12, %v5490_v49, 0.0  ;;  %v5450_v47 = vadd.f32 %v17353_v3, %v5402_v5  ;;  %v5662_v8 = vld [vmem:[#allocation3 + $0x29] sm:$0xff] }
 0x449   : > { %v5613_v54 = vld [vmem:[#allocation3 + $0x28] sm:$0xff]  ;;  %5572 = vst.msk [vmem:[#allocation3 + $0x3b] sm:$0xff] %vm1121_vm15, %v5531_v22  ;;  %v5227_v46 = vpop.f32.mrf.mxu1  ;;  %13368 = vmatmul.mubr.msk.f32.gmra.mxu0 %vm1121_vm15, %v5662_v8 }
 0x44a   : > { %13507 = vmatmul.mubr.msk.f32.gmra.mxu1 %vm1121_vm15, %v5613_v54  ;;  %v5491_v39 = vmax.f32 %v5450_v47, 0.0  ;;  %v5403_v27 = vadd.f32 %v5227_v46, %v17106_v57  ;;  %13370 = vmatprep.mubr.msk.f32.mxu0 %vm14620_vm5, %v14618_v2  ;;  %v10681_v57 = vld [vmem:[%s19644_s6 + $0x80] sm:$0xff]  ;;  %v10737_v22 = vld [vmem:[%s19644_s6 + $0xf8] sm:$0xff] }
 0x44b   : > { %13509 = vmatprep.mubr.msk.f32.mxu1 %vm14620_vm5, %v14618_v2  ;;  %v13236_v37 = vpop.f32.mrf.mxu1  ;;  %13629 = vmatpush3.msra.mxu0 %v10681_v57 }
 0x44c   : > { %v5532_v53 = vsel %vm1045_vm14, %v5491_v39, 0.0  ;;  %v5451_v38 = vadd.f32 %v17353_v3, %v5403_v27  ;;  %v5663_v12 = vld [vmem:[#allocation3 + $0x31] sm:$0xff]  ;;  %13892 = vmatprep.subr.mxu0 %v14618_v2  ;;  %13754 = vmatpush3.msra.mxu1 %v10737_v22 }
 0x44d   : > { %v5614_v11 = vld [vmem:[#allocation3 + $0x30] sm:$0xff]  ;;  %5573 = vst.msk [vmem:[#allocation3 + $0x43] sm:$0xff] %vm1121_vm15, %v5532_v53  ;;  %v5232_v16 = vpop.f32.mrf.mxu1  ;;  %13371 = vmatmul.mubr.msk.f32.gmra.mxu0 %vm1121_vm15, %v5663_v12  ;;  %13755 = vmatprep.subr.mxu1 %v14618_v2 }
 0x44e   : > { %13510 = vmatmul.mubr.msk.f32.gmra.mxu1 %vm1121_vm15, %v5614_v11  ;;  %v5492_v59 = vmax.f32 %v5451_v38, 0.0  ;;  %v5404_v18 = vadd.f32 %v5232_v16, %v17120_v40  ;;  %13373 = vmatprep.mubr.msk.f32.mxu0 %vm14620_vm5, %v14618_v2 }
 0x44f   : > { %13512 = vmatprep.mubr.msk.f32.mxu1 %vm14620_vm5, %v14618_v2  ;;  %v13239_v29 = vpop.f32.mrf.mxu1 }
 0x450   : > { %v5533_v7 = vsel %vm1046_vm13, %v5492_v59, 0.0  ;;  %v5452_v49 = vadd.f32 %v17353_v3, %v5404_v18  ;;  %v5664_v5 = vld [vmem:[#allocation3 + $0x39] sm:$0xff] }
 0x451   : > { %v5615_v32 = vld [vmem:[#allocation3 + $0x38] sm:$0xff]  ;;  %5574 = vst.msk [vmem:[#allocation3 + $0x4b] sm:$0xff] %vm1121_vm15, %v5533_v7  ;;  %v5237_v40 = vpop.f32.mrf.mxu1  ;;  %13374 = vmatmul.mubr.msk.f32.gmra.mxu0 %vm1121_vm15, %v5664_v5 }
 0x452   : > { %13513 = vmatmul.mubr.msk.f32.gmra.mxu1 %vm1121_vm15, %v5615_v32  ;;  %v5493_v47 = vmax.f32 %v5452_v49, 0.0  ;;  %v5405_v8 = vadd.f32 %v5237_v40, %v17131_v60  ;;  %13376 = vmatprep.mubr.msk.f32.mxu0 %vm14620_vm5, %v14618_v2  ;;  %v10736_v60 = vld [vmem:[%s19644_s6 + $0xf0] sm:$0xff] }
 0x453   : > { %13515 = vmatprep.mubr.msk.f32.mxu1 %vm14620_vm5, %v14618_v2  ;;  %v13242_v54 = vpop.f32.mrf.mxu1  ;;  %13756 = vmatpush3.msra.mxu1 %v10736_v60 }
 0x454   : > { %v5534_v39 = vsel %vm1047_vm11, %v5493_v47, 0.0  ;;  %v5453_v27 = vadd.f32 %v17353_v3, %v5405_v8  ;;  %v5665_v37 = vld [vmem:[#allocation3 + $0x41] sm:$0xff]  ;;  %13757 = vmatprep.subr.mxu1 %v14618_v2 }
 0x455   : > { %v5616_v53 = vld [vmem:[#allocation3 + $0x40] sm:$0xff]  ;;  %5575 = vst.msk [vmem:[#allocation3 + $0x53] sm:$0xff] %vm1121_vm15, %v5534_v39  ;;  %v5242_v38 = vpop.f32.mrf.mxu1  ;;  %13377 = vmatmul.mubr.msk.f32.gmra.mxu0 %vm1121_vm15, %v5665_v37 }
 0x456   : > { %13516 = vmatmul.mubr.msk.f32.gmra.mxu1 %vm1121_vm15, %v5616_v53  ;;  %v5494_v12 = vmax.f32 %v5453_v27, 0.0  ;;  %v5406_v11 = vadd.f32 %v5242_v38, %v17137_v15  ;;  %13379 = vmatprep.mubr.msk.f32.mxu0 %vm14620_vm5, %v14618_v2  ;;  %v10735_v15 = vld [vmem:[%s19644_s6 + $0xe8] sm:$0xff]  ;;  %v19825_v38 = vld [vmem:[#allocation15_spill] sm:$0xff] }
 0x457   : > { %13518 = vmatprep.mubr.msk.f32.mxu1 %vm14620_vm5, %v14618_v2  ;;  %v13245_v16 = vpop.f32.mrf.mxu1  ;;  %13758 = vmatpush3.msra.mxu1 %v10735_v15 }
 0x458   : > { %v5535_v59 = vsel %vm1048_vm9, %v5494_v12, 0.0  ;;  %v5454_v18 = vadd.f32 %v17353_v3, %v5406_v11  ;;  %v5666_v29 = vld [vmem:[#allocation3 + $0x49] sm:$0xff]  ;;  %13759 = vmatprep.subr.mxu1 %v14618_v2 }
 0x459   : > { %v5617_v7 = vld [vmem:[#allocation3 + $0x48] sm:$0xff]  ;;  %5576 = vst.msk [vmem:[#allocation3 + $0x5b] sm:$0xff] %vm1121_vm15, %v5535_v59  ;;  %v5247_v49 = vpop.f32.mrf.mxu1  ;;  %13380 = vmatmul.mubr.msk.f32.gmra.mxu0 %vm1121_vm15, %v5666_v29 }
 0x45a   : > { %13519 = vmatmul.mubr.msk.f32.gmra.mxu1 %vm1121_vm15, %v5617_v7  ;;  %v5495_v5 = vmax.f32 %v5454_v18, 0.0  ;;  %v5407_v32 = vadd.f32 %v5247_v49, %v17150_v0  ;;  %13382 = vmatprep.mubr.msk.f32.mxu0 %vm14620_vm5, %v14618_v2  ;;  %v10734_v0 = vld [vmem:[%s19644_s6 + $0xe0] sm:$0xff] }
 0x45b   : > { %13521 = vmatprep.mubr.msk.f32.mxu1 %vm14620_vm5, %v14618_v2  ;;  %v13248_v40 = vpop.f32.mrf.mxu1  ;;  %13760 = vmatpush3.msra.mxu1 %v10734_v0  ;;  %v19827_v49 = vld [vmem:[#allocation16_spill] sm:$0xff] }
 0x45c   : > { %v5536_v47 = vsel %vm19758_vm7, %v5495_v5, 0.0  ;;  %v5455_v8 = vadd.f32 %v17353_v3, %v5407_v32  ;;  %v5667_v54 = vld [vmem:[#allocation3 + $0x51] sm:$0xff]  ;;  %vm19826_vm7 = vcmp.eq.s32.totalorder %v19825_v38, 1  ;;  %13761 = vmatprep.subr.mxu1 %v14618_v2 }
 0x45d   : > { %v5618_v39 = vld [vmem:[#allocation3 + $0x50] sm:$0xff]  ;;  %5577 = vst.msk [vmem:[#allocation3 + $0x63] sm:$0xff] %vm1121_vm15, %v5536_v47  ;;  %v5252_v27 = vpop.f32.mrf.mxu1  ;;  %13383 = vmatmul.mubr.msk.f32.gmra.mxu0 %vm1121_vm15, %v5667_v54 }
 0x45e   : > { %13522 = vmatmul.mubr.msk.f32.gmra.mxu1 %vm1121_vm15, %v5618_v39  ;;  %v5496_v37 = vmax.f32 %v5455_v8, 0.0  ;;  %v5408_v53 = vadd.f32 %v5252_v27, %v17165_v50  ;;  %13385 = vmatprep.mubr.msk.f32.mxu0 %vm14620_vm5, %v14618_v2  ;;  %v10733_v50 = vld [vmem:[%s19644_s6 + $0xd8] sm:$0xff]  ;;  %v19829_v27 = vld [vmem:[#allocation17_spill] sm:$0xff] }
 0x45f   : > { %13524 = vmatprep.mubr.msk.f32.mxu1 %vm14620_vm5, %v14618_v2  ;;  %v13251_v60 = vpop.f32.mrf.mxu1  ;;  %13762 = vmatpush3.msra.mxu1 %v10733_v50  ;;  %v7468_v46 = vld [vmem:[#allocation3 + $0x4b] sm:$0xff] }
 0x460   : > { %v5537_v12 = vsel %vm19826_vm7, %v5496_v37, 0.0  ;;  %v5456_v11 = vadd.f32 %v17353_v3, %v5408_v53  ;;  %v5668_v16 = vld [vmem:[#allocation3 + $0x59] sm:$0xff]  ;;  %vm19828_vm7 = vcmp.eq.s32.totalorder %v19827_v49, 1  ;;  %13763 = vmatprep.subr.mxu1 %v14618_v2  ;;  %v18320_v62 = vld [vmem:[#allocation3 + $0x4c] sm:$0xff] }
 0x461   : > { %v5619_v59 = vld [vmem:[#allocation3 + $0x58] sm:$0xff]  ;;  %5578 = vst.msk [vmem:[#allocation3 + $0x6b] sm:$0xff] %vm1121_vm15, %v5537_v12  ;;  %v5257_v18 = vpop.f32.mrf.mxu1  ;;  %13386 = vmatmul.mubr.msk.f32.gmra.mxu0 %vm1121_vm15, %v5668_v16 }
 0x462   : > { %13525 = vmatmul.mubr.msk.f32.gmra.mxu1 %vm1121_vm15, %v5619_v59  ;;  %v5497_v29 = vmax.f32 %v5456_v11, 0.0  ;;  %v5409_v7 = vadd.f32 %v5257_v18, %v17179_v23  ;;  %13388 = vmatprep.mubr.msk.f32.mxu0 %vm14620_vm5, %v14618_v2  ;;  %v10732_v23 = vld [vmem:[%s19644_s6 + $0xd0] sm:$0xff] }
 0x463   : > { %13527 = vmatprep.mubr.msk.f32.mxu1 %vm14620_vm5, %v14618_v2  ;;  %v13254_v15 = vpop.f32.mrf.mxu1  ;;  %13764 = vmatpush3.msra.mxu1 %v10732_v23  ;;  %v19831_v18 = vld [vmem:[#allocation18_spill] sm:$0xff] }
 0x464   : > { %v5538_v5 = vsel %vm19828_vm7, %v5497_v29, 0.0  ;;  %v5457_v32 = vadd.f32 %v17353_v3, %v5409_v7  ;;  %v5669_v40 = vld [vmem:[#allocation3 + $0x61] sm:$0xff]  ;;  %vm19830_vm7 = vcmp.eq.s32.totalorder %v19829_v27, 1  ;;  %13765 = vmatprep.subr.mxu1 %v14618_v2 }
 0x465   : > { %v5620_v47 = vld [vmem:[#allocation3 + $0x60] sm:$0xff]  ;;  %5579 = vst.msk [vmem:[#allocation3 + $0x73] sm:$0xff] %vm1121_vm15, %v5538_v5  ;;  %v5262_v8 = vpop.f32.mrf.mxu1  ;;  %13389 = vmatmul.mubr.msk.f32.gmra.mxu0 %vm1121_vm15, %v5669_v40 }
 0x466   : > { %13528 = vmatmul.mubr.msk.f32.gmra.mxu1 %vm1121_vm15, %v5620_v47  ;;  %v5498_v54 = vmax.f32 %v5457_v32, 0.0  ;;  %v5410_v39 = vadd.f32 %v5262_v8, %v17187_v41  ;;  %13391 = vmatprep.mubr.msk.f32.mxu0 %vm14620_vm5, %v14618_v2  ;;  %v10731_v41 = vld [vmem:[%s19644_s6 + $0xc8] sm:$0xff]  ;;  %v19833_v8 = vld [vmem:[#allocation19_spill] sm:$0xff] }
 0x467   : > { %13530 = vmatprep.mubr.msk.f32.mxu1 %vm14620_vm5, %v14618_v2  ;;  %v13257_v0 = vpop.f32.mrf.mxu1  ;;  %13766 = vmatpush3.msra.mxu1 %v10731_v41  ;;  %v19835_v41 = vld [vmem:[#allocation20_spill] sm:$0xff] }
 0x468   : > { %v5539_v37 = vsel %vm19830_vm7, %v5498_v54, 0.0  ;;  %v5458_v53 = vadd.f32 %v17353_v3, %v5410_v39  ;;  %v5670_v60 = vld [vmem:[#allocation3 + $0x69] sm:$0xff]  ;;  %vm19832_vm7 = vcmp.eq.s32.totalorder %v19831_v18, 1  ;;  %13767 = vmatprep.subr.mxu1 %v14618_v2 }
 0x469   : > { %v5621_v12 = vld [vmem:[#allocation3 + $0x68] sm:$0xff]  ;;  %5580 = vst.msk [vmem:[#allocation3 + $0x7b] sm:$0xff] %vm1121_vm15, %v5539_v37  ;;  %v5267_v11 = vpop.f32.mrf.mxu1  ;;  %13392 = vmatmul.mubr.msk.f32.gmra.mxu0 %vm1121_vm15, %v5670_v60 }
 0x46a   : > { %13531 = vmatmul.mubr.msk.f32.gmra.mxu1 %vm1121_vm15, %v5621_v12  ;;  %v5499_v16 = vmax.f32 %v5458_v53, 0.0  ;;  %v5411_v59 = vadd.f32 %v5267_v11, %v17193_v58  ;;  %13394 = vmatprep.mubr.msk.f32.mxu0 %vm14620_vm5, %v14618_v2  ;;  %v10730_v58 = vld [vmem:[%s19644_s6 + $0xc0] sm:$0xff] }
 0x46b   : > { %13533 = vmatprep.mubr.msk.f32.mxu1 %vm14620_vm5, %v14618_v2  ;;  %v13260_v50 = vpop.f32.mrf.mxu1  ;;  %13768 = vmatpush3.msra.mxu1 %v10730_v58 }
 0x46c   : > { %v5540_v29 = vsel %vm19832_vm7, %v5499_v16, 0.0  ;;  %v5459_v7 = vadd.f32 %v17353_v3, %v5411_v59  ;;  %v5671_v15 = vld [vmem:[#allocation3 + $0x71] sm:$0xff]  ;;  %vm19834_vm7 = vcmp.eq.s32.totalorder %v19833_v8, 1  ;;  %14031 = vmatprep.subr.mxu1 %v14618_v2 }
 0x46d   : > { %v5622_v5 = vld [vmem:[#allocation3 + $0x70] sm:$0xff]  ;;  %5581 = vst.msk [vmem:[#allocation3 + $0x83] sm:$0xff] %vm1121_vm15, %v5540_v29  ;;  %v5272_v32 = vpop.f32.mrf.mxu1  ;;  %13395 = vmatmul.mubr.msk.f32.gmra.mxu0 %vm1121_vm15, %v5671_v15 }
 0x46e   : > { %13534 = vmatmul.mubr.msk.f32.gmra.mxu1 %vm1121_vm15, %v5622_v5  ;;  %v5500_v40 = vmax.f32 %v5459_v7, 0.0  ;;  %v5412_v47 = vadd.f32 %v5272_v32, %v17199_v42  ;;  %13397 = vmatprep.mubr.msk.f32.mxu0 %vm14620_vm5, %v14618_v2  ;;  %v19837_v5 = vld [vmem:[#allocation21_spill] sm:$0xff] }
 0x46f   : > { %13536 = vmatprep.mubr.msk.f32.mxu1 %vm14620_vm5, %v14618_v2  ;;  %v13263_v23 = vpop.f32.mrf.mxu1 }
 0x470   : > { %v5541_v54 = vsel %vm19834_vm7, %v5500_v40, 0.0  ;;  %v5460_v39 = vadd.f32 %v17353_v3, %v5412_v47  ;;  %v5672_v0 = vld [vmem:[#allocation3 + $0x79] sm:$0xff]  ;;  %vm19836_vm7 = vcmp.eq.s32.totalorder %v19835_v41, 1 }
 0x471   : > { %v5623_v37 = vld [vmem:[#allocation3 + $0x78] sm:$0xff]  ;;  %5582 = vst.msk [vmem:[#allocation3 + $0x8b] sm:$0xff] %vm1121_vm15, %v5541_v54  ;;  %v5277_v42 = vpop.f32.mrf.mxu1  ;;  %13398 = vmatmul.mubr.msk.f32.gmra.mxu0 %vm1121_vm15, %v5672_v0  ;;  %v17584_v0 = vpop.f32.mrf.mxu0 }
 0x472   : > { %13537 = vmatmul.mubr.msk.f32.gmra.mxu1 %vm1121_vm15, %v5623_v37  ;;  %v5501_v53 = vmax.f32 %v5460_v39, 0.0  ;;  %v5413_v60 = vadd.f32 %v5277_v42, %v17205_v10  ;;  %13400 = vmatprep.mubr.msk.f32.mxu0 %vm14620_vm5, %v14618_v2  ;;  %v19839_v37 = vld [vmem:[#allocation22_spill] sm:$0xff] }
 0x473   : > { %13539 = vmatprep.mubr.msk.f32.mxu1 %vm14620_vm5, %v14618_v2  ;;  %v13266_v12 = vpop.f32.mrf.mxu1 }
 0x474   : > { %v5542_v11 = vsel %vm19836_vm7, %v5501_v53, 0.0  ;;  %v5461_v16 = vadd.f32 %v17353_v3, %v5413_v60  ;;  %v5673_v59 = vld [vmem:[#allocation3 + $0x81] sm:$0xff]  ;;  %vm19838_vm7 = vcmp.eq.s32.totalorder %v19837_v5, 1 }
 0x475   : > { %v5624_v50 = vld [vmem:[#allocation3 + $0x80] sm:$0xff]  ;;  %5583 = vst.msk [vmem:[#allocation3 + $0x93] sm:$0xff] %vm1121_vm15, %v5542_v11  ;;  %v5282_v29 = vpop.f32.mrf.mxu1  ;;  %13401 = vmatmul.mubr.msk.f32.gmra.mxu0 %vm1121_vm15, %v5673_v59 }
 0x476   : > { %13540 = vmatmul.mubr.msk.f32.gmra.mxu1 %vm1121_vm15, %v5624_v50  ;;  %v5502_v10 = vmax.f32 %v5461_v16, 0.0  ;;  %v5414_v7 = vadd.f32 %v5282_v29, %v17215_v20  ;;  %13403 = vmatprep.mubr.msk.f32.mxu0 %vm14620_vm5, %v14618_v2 }
 0x477   : > { %13542 = vmatprep.mubr.msk.f32.mxu1 %vm14620_vm5, %v14618_v2  ;;  %v13269_v15 = vpop.f32.mrf.mxu1 }
 0x478   : > { %v5543_v58 = vsel %vm19838_vm7, %v5502_v10, 0.0  ;;  %v5462_v32 = vadd.f32 %v17353_v3, %v5414_v7  ;;  %v5674_v40 = vld [vmem:[#allocation3 + $0x89] sm:$0xff]  ;;  %vm19840_vm7 = vcmp.eq.s32.totalorder %v19839_v37, 1 }
 0x479   : > { %v5625_v47 = vld [vmem:[#allocation3 + $0x88] sm:$0xff]  ;;  %5584 = vst.msk [vmem:[#allocation3 + $0x9b] sm:$0xff] %vm1121_vm15, %v5543_v58  ;;  %v5287_v23 = vpop.f32.mrf.mxu1  ;;  %13404 = vmatmul.mubr.msk.f32.gmra.mxu0 %vm1121_vm15, %v5674_v40 }
 0x47a   : > { %13543 = vmatmul.mubr.msk.f32.gmra.mxu1 %vm1121_vm15, %v5625_v47  ;;  %v5503_v20 = vmax.f32 %v5462_v32, 0.0  ;;  %v5415_v54 = vadd.f32 %v5287_v23, %v17221_v45  ;;  %13406 = vmatprep.mubr.msk.f32.mxu0 %vm14620_vm5, %v14618_v2  ;;  %v13354_v45 = vpop.f32.mrf.mxu0  ;;  %v19841_v10 = vld [vmem:[#allocation23_spill] sm:$0xff] }
 0x47b   : > { %13545 = vmatprep.mubr.msk.f32.mxu1 %vm14620_vm5, %v14618_v2  ;;  %v13272_v39 = vpop.f32.mrf.mxu1  ;;  %v7959_v14 = vld [vmem:[#allocation3 + $0x84] sm:$0xff] }
 0x47c   : > { %v5544_v42 = vsel %vm19840_vm7, %v5503_v20, 0.0  ;;  %v5463_v53 = vadd.f32 %v17353_v3, %v5415_v54  ;;  %v5675_v60 = vld [vmem:[#allocation3 + $0x91] sm:$0xff]  ;;  %v17597_v29 = vpop.f32.mrf.mxu0  ;;  %vm19842_vm7 = vcmp.eq.s32.totalorder %v19841_v10, 1 }
 0x47d   : > { %v5626_v12 = vld [vmem:[#allocation3 + $0x90] sm:$0xff]  ;;  %5585 = vst.msk [vmem:[#allocation3 + $0xa3] sm:$0xff] %vm1121_vm15, %v5544_v42  ;;  %v5292_v11 = vpop.f32.mrf.mxu1  ;;  %13407 = vmatmul.mubr.msk.f32.gmra.mxu0 %vm1121_vm15, %v5675_v60 }
 0x47e   : > { %13546 = vmatmul.mubr.msk.f32.gmra.mxu1 %vm1121_vm15, %v5626_v12  ;;  %v5504_v16 = vmax.f32 %v5463_v53, 0.0  ;;  %v5416_v59 = vadd.f32 %v5292_v11, %v17227_v43  ;;  %13409 = vmatprep.mubr.msk.f32.mxu0 %vm14620_vm5, %v14618_v2  ;;  %v13357_v43 = vpop.f32.mrf.mxu0 }
 0x47f   : > { %13548 = vmatprep.mubr.msk.f32.mxu1 %vm14620_vm5, %v14618_v2  ;;  %v13275_v50 = vpop.f32.mrf.mxu1  ;;  %v19846_v43 = vld [vmem:[#allocation26_spill] sm:$0xff] }
 0x480   : > { %v5545_v7 = vsel %vm19842_vm7, %v5504_v16, 0.0  ;;  %v5464_v15 = vadd.f32 %v17353_v3, %v5416_v59  ;;  %v5676_v58 = vld [vmem:[#allocation3 + $0x99] sm:$0xff] }
 0x481   : > { %v5627_v32 = vld [vmem:[#allocation3 + $0x98] sm:$0xff]  ;;  %5586 = vst.msk [vmem:[#allocation3 + $0xab] sm:$0xff] %vm1121_vm15, %v5545_v7  ;;  %v5297_v40 = vpop.f32.mrf.mxu1  ;;  %13410 = vmatmul.mubr.msk.f32.gmra.mxu0 %vm1121_vm15, %v5676_v58 }
 0x482   : > { %13549 = vmatmul.mubr.msk.f32.gmra.mxu1 %vm1121_vm15, %v5627_v32  ;;  %v5505_v47 = vmax.f32 %v5464_v15, 0.0  ;;  %v5417_v23 = vadd.f32 %v5297_v40, %v17233_v19  ;;  %13412 = vmatprep.mubr.msk.f32.mxu0 %vm14620_vm5, %v14618_v2  ;;  %v19844_v16 = vld [vmem:[#allocation25_spill] sm:$0xff] }
 0x483   : > { %13551 = vmatprep.mubr.msk.f32.mxu1 %vm14620_vm5, %v14618_v2  ;;  %v13278_v20 = vpop.f32.mrf.mxu1  ;;  %vm19845_vm7 = vcmp.eq.s32.totalorder %v19844_v16, 1 }
 0x484   : > { %v5546_v39 = vsel %vm1059_vm1, %v5505_v47, 0.0  ;;  %v5465_v42 = vadd.f32 %v17353_v3, %v5417_v23  ;;  %v5677_v53 = vld [vmem:[#allocation3 + $0xa1] sm:$0xff] }
 0x485   : > { %v5628_v60 = vld [vmem:[#allocation3 + $0xa0] sm:$0xff]  ;;  %5587 = vst.msk [vmem:[#allocation3 + $0xb3] sm:$0xff] %vm1121_vm15, %v5546_v39  ;;  %v5302_v12 = vpop.f32.mrf.mxu1  ;;  %13413 = vmatmul.mubr.msk.f32.gmra.mxu0 %vm1121_vm15, %v5677_v53 }
 0x486   : > { %13552 = vmatmul.mubr.msk.f32.gmra.mxu1 %vm1121_vm15, %v5628_v60  ;;  %v5506_v19 = vmax.f32 %v5465_v42, 0.0  ;;  %v5418_v11 = vadd.f32 %v5302_v12, %v17239_v30  ;;  %13415 = vmatprep.mubr.msk.f32.mxu0 %vm14620_vm5, %v14618_v2  ;;  %v19848_v12 = vld [vmem:[#allocation27_spill] sm:$0xff] }
 0x487   : > { %13554 = vmatprep.mubr.msk.f32.mxu1 %vm14620_vm5, %v14618_v2  ;;  %v13281_v45 = vpop.f32.mrf.mxu1 }
 0x488   : > { %v5547_v59 = vsel %vm19845_vm7, %v5506_v19, 0.0  ;;  %v5466_v50 = vadd.f32 %v17353_v3, %v5418_v11  ;;  %v5678_v7 = vld [vmem:[#allocation3 + $0xa9] sm:$0xff]  ;;  %vm19847_vm7 = vcmp.eq.s32.totalorder %v19846_v43, 1 }
 0x489   : > { %v5629_v15 = vld [vmem:[#allocation3 + $0xa8] sm:$0xff]  ;;  %5588 = vst.msk [vmem:[#allocation3 + $0xbb] sm:$0xff] %vm1121_vm15, %v5547_v59  ;;  %v5307_v58 = vpop.f32.mrf.mxu1  ;;  %13416 = vmatmul.mubr.msk.f32.gmra.mxu0 %vm1121_vm15, %v5678_v7 }
 0x48a   : > { %13555 = vmatmul.mubr.msk.f32.gmra.mxu1 %vm1121_vm15, %v5629_v15  ;;  %v5507_v30 = vmax.f32 %v5466_v50, 0.0  ;;  %v5419_v32 = vadd.f32 %v5307_v58, %v17249_v25  ;;  %13418 = vmatprep.mubr.msk.f32.mxu0 %vm14620_vm5, %v14618_v2  ;;  %v19850_v58 = vld [vmem:[#allocation28_spill] sm:$0xff] }
 0x48b   : > { %13557 = vmatprep.mubr.msk.f32.mxu1 %vm14620_vm5, %v14618_v2  ;;  %v13284_v40 = vpop.f32.mrf.mxu1 }
 0x48c   : > { %v5548_v47 = vsel %vm19847_vm7, %v5507_v30, 0.0  ;;  %v5467_v23 = vadd.f32 %v17353_v3, %v5419_v32  ;;  %v5679_v20 = vld [vmem:[#allocation3 + $0xb1] sm:$0xff]  ;;  %vm19849_vm7 = vcmp.eq.s32.totalorder %v19848_v12, 1 }
 0x48d   : > { %v5630_v39 = vld [vmem:[#allocation3 + $0xb0] sm:$0xff]  ;;  %5589 = vst.msk [vmem:[#allocation3 + $0xc3] sm:$0xff] %vm1121_vm15, %v5548_v47  ;;  %v5312_v42 = vpop.f32.mrf.mxu1  ;;  %13419 = vmatmul.mubr.msk.f32.gmra.mxu0 %vm1121_vm15, %v5679_v20 }
 0x48e   : > { %13558 = vmatmul.mubr.msk.f32.gmra.mxu1 %vm1121_vm15, %v5630_v39  ;;  %v5508_v25 = vmax.f32 %v5467_v23, 0.0  ;;  %v5420_v53 = vadd.f32 %v5312_v42, %v17255_v61  ;;  %13421 = vmatprep.mubr.msk.f32.mxu0 %vm14620_vm5, %v14618_v2  ;;  %v19852_v42 = vld [vmem:[#allocation29_spill] sm:$0xff] }
 0x48f   : > { %13560 = vmatprep.mubr.msk.f32.mxu1 %vm14620_vm5, %v14618_v2  ;;  %v13287_v60 = vpop.f32.mrf.mxu1 }
 0x490   : > { %v5549_v19 = vsel %vm19849_vm7, %v5508_v25, 0.0  ;;  %v5468_v11 = vadd.f32 %v17353_v3, %v5420_v53  ;;  %v5680_v45 = vld [vmem:[#allocation3 + $0xb9] sm:$0xff]  ;;  %vm19851_vm7 = vcmp.eq.s32.totalorder %v19850_v58, 1 }
 0x491   : > { %v5631_v59 = vld [vmem:[#allocation3 + $0xb8] sm:$0xff]  ;;  %5590 = vst.msk [vmem:[#allocation3 + $0xcb] sm:$0xff] %vm1121_vm15, %v5549_v19  ;;  %v5317_v50 = vpop.f32.mrf.mxu1  ;;  %13422 = vmatmul.mubr.msk.f32.gmra.mxu0 %vm1121_vm15, %v5680_v45 }
 0x492   : > { %13561 = vmatmul.mubr.msk.f32.gmra.mxu1 %vm1121_vm15, %v5631_v59  ;;  %v5509_v61 = vmax.f32 %v5468_v11, 0.0  ;;  %v5421_v7 = vadd.f32 %v5317_v50, %v17261_v44  ;;  %13424 = vmatprep.mubr.msk.f32.mxu0 %vm14620_vm5, %v14618_v2  ;;  %v19854_v50 = vld [vmem:[#allocation30_spill] sm:$0xff] }
 0x493   : > { %13563 = vmatprep.mubr.msk.f32.mxu1 %vm14620_vm5, %v14618_v2  ;;  %v13290_v15 = vpop.f32.mrf.mxu1 }
 0x494   : > { %v5550_v30 = vsel %vm19851_vm7, %v5509_v61, 0.0  ;;  %v5469_v32 = vadd.f32 %v17353_v3, %v5421_v7  ;;  %v5681_v40 = vld [vmem:[#allocation3 + $0xc1] sm:$0xff]  ;;  %vm19853_vm7 = vcmp.eq.s32.totalorder %v19852_v42, 1 }
 0x495   : > { %v5632_v47 = vld [vmem:[#allocation3 + $0xc0] sm:$0xff]  ;;  %5591 = vst.msk [vmem:[#allocation3 + $0xd3] sm:$0xff] %vm1121_vm15, %v5550_v30  ;;  %v5322_v23 = vpop.f32.mrf.mxu1  ;;  %13425 = vmatmul.mubr.msk.f32.gmra.mxu0 %vm1121_vm15, %v5681_v40 }
 0x496   : > { %13564 = vmatmul.mubr.msk.f32.gmra.mxu1 %vm1121_vm15, %v5632_v47  ;;  %v5510_v44 = vmax.f32 %v5469_v32, 0.0  ;;  %v5422_v20 = vadd.f32 %v5322_v23, %v17267_v33  ;;  %13427 = vmatprep.mubr.msk.f32.mxu0 %vm14620_vm5, %v14618_v2  ;;  %v19856_v23 = vld [vmem:[#allocation31_spill] sm:$0xff] }
 0x497   : > { %13566 = vmatprep.mubr.msk.f32.mxu1 %vm14620_vm5, %v14618_v2  ;;  %v13293_v39 = vpop.f32.mrf.mxu1 }
 0x498   : > { %v5551_v25 = vsel %vm19853_vm7, %v5510_v44, 0.0  ;;  %v5470_v53 = vadd.f32 %v17353_v3, %v5422_v20  ;;  %v5682_v60 = vld [vmem:[#allocation3 + $0xc9] sm:$0xff]  ;;  %vm19855_vm7 = vcmp.eq.s32.totalorder %v19854_v50, 1 }
 0x499   : > { %v5633_v19 = vld [vmem:[#allocation3 + $0xc8] sm:$0xff]  ;;  %5592 = vst.msk [vmem:[#allocation3 + $0xdb] sm:$0xff] %vm1121_vm15, %v5551_v25  ;;  %v5327_v11 = vpop.f32.mrf.mxu1  ;;  %13428 = vmatmul.mubr.msk.f32.gmra.mxu0 %vm1121_vm15, %v5682_v60 }
 0x49a   : > { %13567 = vmatmul.mubr.msk.f32.gmra.mxu1 %vm1121_vm15, %v5633_v19  ;;  %v5511_v33 = vmax.f32 %v5470_v53, 0.0  ;;  %v5423_v45 = vadd.f32 %v5327_v11, %v17273_v52  ;;  %13430 = vmatprep.mubr.msk.f32.mxu0 %vm14620_vm5, %v14618_v2  ;;  %v19858_v11 = vld [vmem:[#allocation32_spill] sm:$0xff] }
 0x49b   : > { %13569 = vmatprep.mubr.msk.f32.mxu1 %vm14620_vm5, %v14618_v2  ;;  %v13296_v59 = vpop.f32.mrf.mxu1 }
 0x49c   : > { %v5552_v61 = vsel %vm19855_vm7, %v5511_v33, 0.0  ;;  %v5471_v7 = vadd.f32 %v17353_v3, %v5423_v45  ;;  %v5683_v15 = vld [vmem:[#allocation3 + $0xd1] sm:$0xff]  ;;  %vm19857_vm7 = vcmp.eq.s32.totalorder %v19856_v23, 1 }
 0x49d   : > { %v5634_v30 = vld [vmem:[#allocation3 + $0xd0] sm:$0xff]  ;;  %5593 = vst.msk [vmem:[#allocation3 + $0xe3] sm:$0xff] %vm1121_vm15, %v5552_v61  ;;  %v5332_v32 = vpop.f32.mrf.mxu1  ;;  %13431 = vmatmul.mubr.msk.f32.gmra.mxu0 %vm1121_vm15, %v5683_v15 }
 0x49e   : > { %13570 = vmatmul.mubr.msk.f32.gmra.mxu1 %vm1121_vm15, %v5634_v30  ;;  %v5512_v52 = vmax.f32 %v5471_v7, 0.0  ;;  %v5424_v40 = vadd.f32 %v5332_v32, %v17283_v4  ;;  %13433 = vmatprep.mubr.msk.f32.mxu0 %vm14620_vm5, %v14618_v2  ;;  %v19860_v32 = vld [vmem:[#allocation33_spill] sm:$0xff] }
 0x49f   : > { %13572 = vmatprep.mubr.msk.f32.mxu1 %vm14620_vm5, %v14618_v2  ;;  %v13299_v47 = vpop.f32.mrf.mxu1 }
 0x4a0   : > { %v5553_v44 = vsel %vm19857_vm7, %v5512_v52, 0.0  ;;  %v5472_v20 = vadd.f32 %v17353_v3, %v5424_v40  ;;  %v5684_v39 = vld [vmem:[#allocation3 + $0xd9] sm:$0xff]  ;;  %vm19859_vm7 = vcmp.eq.s32.totalorder %v19858_v11, 1 }
 0x4a1   : > { %v5635_v25 = vld [vmem:[#allocation3 + $0xd8] sm:$0xff]  ;;  %5594 = vst.msk [vmem:[#allocation3 + $0xeb] sm:$0xff] %vm1121_vm15, %v5553_v44  ;;  %v5337_v53 = vpop.f32.mrf.mxu1  ;;  %13434 = vmatmul.mubr.msk.f32.gmra.mxu0 %vm1121_vm15, %v5684_v39 }
 0x4a2   : > { %13573 = vmatmul.mubr.msk.f32.gmra.mxu1 %vm1121_vm15, %v5635_v25  ;;  %v5513_v4 = vmax.f32 %v5472_v20, 0.0  ;;  %v5425_v60 = vadd.f32 %v5337_v53, %v17289_v35  ;;  %13436 = vmatprep.mubr.msk.f32.mxu0 %vm14620_vm5, %v14618_v2  ;;  %v19862_v53 = vld [vmem:[#allocation34_spill] sm:$0xff] }
 0x4a3   : > { %13575 = vmatprep.mubr.msk.f32.mxu1 %vm14620_vm5, %v14618_v2  ;;  %v13302_v19 = vpop.f32.mrf.mxu1 }
 0x4a4   : > { %v5554_v33 = vsel %vm19859_vm7, %v5513_v4, 0.0  ;;  %v5473_v45 = vadd.f32 %v17353_v3, %v5425_v60  ;;  %v5685_v59 = vld [vmem:[#allocation3 + $0xe1] sm:$0xff]  ;;  %vm19861_vm7 = vcmp.eq.s32.totalorder %v19860_v32, 1 }
 0x4a5   : > { %v5636_v61 = vld [vmem:[#allocation3 + $0xe0] sm:$0xff]  ;;  %5595 = vst.msk [vmem:[#allocation3 + $0xf3] sm:$0xff] %vm1121_vm15, %v5554_v33  ;;  %v5342_v7 = vpop.f32.mrf.mxu1  ;;  %13437 = vmatmul.mubr.msk.f32.gmra.mxu0 %vm1121_vm15, %v5685_v59 }
 0x4a6   : > { %13576 = vmatmul.mubr.msk.f32.gmra.mxu1 %vm1121_vm15, %v5636_v61  ;;  %v5514_v35 = vmax.f32 %v5473_v45, 0.0  ;;  %v5426_v15 = vadd.f32 %v5342_v7, %v17295_v51  ;;  %13439 = vmatprep.mubr.msk.f32.mxu0 %vm14620_vm5, %v14618_v2  ;;  %v19864_v7 = vld [vmem:[#allocation35_spill] sm:$0xff] }
 0x4a7   : > { %13578 = vmatprep.mubr.msk.f32.mxu1 %vm14620_vm5, %v14618_v2  ;;  %v13305_v30 = vpop.f32.mrf.mxu1 }
 0x4a8   : > { %v5555_v52 = vsel %vm19861_vm7, %v5514_v35, 0.0  ;;  %v5474_v40 = vadd.f32 %v17353_v3, %v5426_v15  ;;  %v5686_v47 = vld [vmem:[#allocation3 + $0xe9] sm:$0xff]  ;;  %vm19863_vm7 = vcmp.eq.s32.totalorder %v19862_v53, 1 }
 0x4a9   : > { %v5637_v44 = vld [vmem:[#allocation3 + $0xe8] sm:$0xff]  ;;  %5596 = vst.msk [vmem:[#allocation3 + $0xfb] sm:$0xff] %vm1121_vm15, %v5555_v52  ;;  %v5347_v20 = vpop.f32.mrf.mxu1  ;;  %13440 = vmatmul.mubr.msk.f32.gmra.mxu0 %vm1121_vm15, %v5686_v47 }
 0x4aa   : > { %13579 = vmatmul.mubr.msk.f32.gmra.mxu1 %vm1121_vm15, %v5637_v44  ;;  %v5515_v51 = vmax.f32 %v5474_v40, 0.0  ;;  %v5427_v39 = vadd.f32 %v5347_v20, %v17301_v21  ;;  %13442 = vmatprep.mubr.msk.f32.mxu0 %vm14620_vm5, %v14618_v2  ;;  %v19866_v20 = vld [vmem:[#allocation36_spill] sm:$0xff] }
 0x4ab   : > { %13581 = vmatprep.mubr.msk.f32.mxu1 %vm14620_vm5, %v14618_v2  ;;  %v13308_v25 = vpop.f32.mrf.mxu1 }
 0x4ac   : > { %v5556_v4 = vsel %vm19863_vm7, %v5515_v51, 0.0  ;;  %v5475_v60 = vadd.f32 %v17353_v3, %v5427_v39  ;;  %v5687_v19 = vld [vmem:[#allocation3 + $0xf1] sm:$0xff]  ;;  %vm19865_vm7 = vcmp.eq.s32.totalorder %v19864_v7, 1 }
 0x4ad   : > { %v5638_v33 = vld [vmem:[#allocation3 + $0xf0] sm:$0xff]  ;;  %5597 = vst.msk [vmem:[#allocation3 + $0x103] sm:$0xff] %vm1121_vm15, %v5556_v4  ;;  %v5352_v45 = vpop.f32.mrf.mxu1  ;;  %13443 = vmatmul.mubr.msk.f32.gmra.mxu0 %vm1121_vm15, %v5687_v19 }
 0x4ae   : > { %13582 = vmatmul.mubr.msk.f32.gmra.mxu1 %vm1121_vm15, %v5638_v33  ;;  %v5516_v21 = vmax.f32 %v5475_v60, 0.0  ;;  %v5428_v59 = vadd.f32 %v5352_v45, %v17307_v6  ;;  %13445 = vmatprep.mubr.msk.f32.mxu0 %vm14620_vm5, %v14618_v2  ;;  %v19868_v45 = vld [vmem:[#allocation37_spill] sm:$0xff]  ;;  %v7004_v7 = vld [vmem:[#allocation3 + $0xea] sm:$0xff] }
 0x4af   : > { %13584 = vmatprep.mubr.msk.f32.mxu1 %vm14620_vm5, %v14618_v2  ;;  %v13311_v61 = vpop.f32.mrf.mxu1  ;;  %v7005_v53 = vld [vmem:[#allocation3 + $0xf2] sm:$0xff] }
 0x4b0   : > { %v5557_v35 = vsel %vm19865_vm7, %v5516_v21, 0.0  ;;  %v5476_v15 = vadd.f32 %v17353_v3, %v5428_v59  ;;  %v5688_v30 = vld [vmem:[#allocation3 + $0xf9] sm:$0xff]  ;;  %vm19867_vm7 = vcmp.eq.s32.totalorder %v19866_v20, 1  ;;  %v7003_v20 = vld [vmem:[#allocation3 + $0xe2] sm:$0xff] }
 0x4b1   : > { %v5639_v52 = vld [vmem:[#allocation3 + $0xf8] sm:$0xff]  ;;  %5598 = vst.msk [vmem:[#allocation3 + $0x10b] sm:$0xff] %vm1121_vm15, %v5557_v35  ;;  %v5357_v40 = vpop.f32.mrf.mxu1  ;;  %13446 = vmatmul.mubr.msk.f32.gmra.mxu0 %vm1121_vm15, %v5688_v30 }
 0x4b2   : > { %13585 = vmatmul.mubr.msk.f32.gmra.mxu1 %vm1121_vm15, %v5639_v52  ;;  %v5517_v6 = vmax.f32 %v5476_v15, 0.0  ;;  %v5429_v47 = vadd.f32 %v5357_v40, %v17317_v1  ;;  %13448 = vmatprep.mubr.msk.f32.mxu0 %vm14620_vm5, %v14618_v2  ;;  %v19870_v40 = vld [vmem:[#allocation38_spill] sm:$0xff] }
 0x4b3   : > { %13587 = vmatprep.mubr.msk.f32.mxu1 %vm14620_vm5, %v14618_v2  ;;  %v13314_v44 = vpop.f32.mrf.mxu1  ;;  %v7006_v32 = vld [vmem:[#allocation3 + $0xfa] sm:$0xff] }
 0x4b4   : > { %v5558_v51 = vsel %vm19867_vm7, %v5517_v6, 0.0  ;;  %v5477_v39 = vadd.f32 %v17353_v3, %v5429_v47  ;;  %v5689_v25 = vld [vmem:[#allocation3 + $0x101] sm:$0xff]  ;;  %vm19869_vm7 = vcmp.eq.s32.totalorder %v19868_v45, 1 }
 0x4b5   : > { %v5640_v4 = vld [vmem:[#allocation3 + $0x100] sm:$0xff]  ;;  %5599 = vst.msk [vmem:[#allocation3 + $0x113] sm:$0xff] %vm1121_vm15, %v5558_v51  ;;  %v5362_v60 = vpop.f32.mrf.mxu1  ;;  %13449 = vmatmul.mubr.msk.f32.gmra.mxu0 %vm1121_vm15, %v5689_v25 }
 0x4b6   : > { %13588 = vmatmul.mubr.msk.f32.gmra.mxu1 %vm1121_vm15, %v5640_v4  ;;  %v5518_v1 = vmax.f32 %v5477_v39, 0.0  ;;  %v5430_v19 = vadd.f32 %v5362_v60, %v17323_v24  ;;  %13451 = vmatprep.mubr.msk.f32.mxu0 %vm14620_vm5, %v14618_v2  ;;  %v19872_v60 = vld [vmem:[#allocation39_spill] sm:$0xff]  ;;  %v7002_v45 = vld [vmem:[#allocation3 + $0xda] sm:$0xff] }
 0x4b7   : > { %13590 = vmatprep.mubr.msk.f32.mxu1 %vm14620_vm5, %v14618_v2  ;;  %v13317_v33 = vpop.f32.mrf.mxu1  ;;  %v7007_v11 = vld [vmem:[#allocation3 + $0x102] sm:$0xff] }
 0x4b8   : > { %v5559_v21 = vsel %vm19869_vm7, %v5518_v1, 0.0  ;;  %v5478_v59 = vadd.f32 %v17353_v3, %v5430_v19  ;;  %v5690_v61 = vld [vmem:[#allocation3 + $0x109] sm:$0xff]  ;;  %vm19871_vm7 = vcmp.eq.s32.totalorder %v19870_v40, 1  ;;  %v7001_v40 = vld [vmem:[#allocation3 + $0xd2] sm:$0xff] }
 0x4b9   : > { %v5641_v35 = vld [vmem:[#allocation3 + $0x108] sm:$0xff]  ;;  %5600 = vst.msk [vmem:[#allocation3 + $0x11b] sm:$0xff] %vm1121_vm15, %v5559_v21  ;;  %v5367_v15 = vpop.f32.mrf.mxu1  ;;  %13452 = vmatmul.mubr.msk.f32.gmra.mxu0 %vm1121_vm15, %v5690_v61 }
 0x4ba   : > { %13591 = vmatmul.mubr.msk.f32.gmra.mxu1 %vm1121_vm15, %v5641_v35  ;;  %v5519_v24 = vmax.f32 %v5478_v59, 0.0  ;;  %v5431_v30 = vadd.f32 %v5367_v15, %v17329_v26  ;;  %13454 = vmatprep.mubr.msk.f32.mxu0 %vm14620_vm5, %v14618_v2  ;;  %v19874_v15 = vld [vmem:[#allocation40_spill] sm:$0xff] }
 0x4bb   : > { %13593 = vmatprep.mubr.msk.f32.mxu1 %vm14620_vm5, %v14618_v2  ;;  %v13320_v52 = vpop.f32.mrf.mxu1  ;;  %v7008_v23 = vld [vmem:[#allocation3 + $0x10a] sm:$0xff] }
 0x4bc   : > { %v5560_v6 = vsel %vm19871_vm7, %v5519_v24, 0.0  ;;  %v5479_v47 = vadd.f32 %v17353_v3, %v5431_v30  ;;  %v5691_v44 = vld [vmem:[#allocation3 + $0x111] sm:$0xff]  ;;  %vm19873_vm7 = vcmp.eq.s32.totalorder %v19872_v60, 1 }
 0x4bd   : > { %v5642_v51 = vld [vmem:[#allocation3 + $0x110] sm:$0xff]  ;;  %5601 = vst.msk [vmem:[#allocation3 + $0x123] sm:$0xff] %vm1121_vm15, %v5560_v6  ;;  %v5372_v39 = vpop.f32.mrf.mxu1  ;;  %13455 = vmatmul.mubr.msk.f32.gmra.mxu0 %vm1121_vm15, %v5691_v44 }
 0x4be   : > { %13594 = vmatmul.mubr.msk.f32.gmra.mxu1 %vm1121_vm15, %v5642_v51  ;;  %v5520_v26 = vmax.f32 %v5479_v47, 0.0  ;;  %v5432_v25 = vadd.f32 %v5372_v39, %v17332_v9  ;;  %13457 = vmatprep.mubr.msk.f32.mxu0 %vm14620_vm5, %v14618_v2  ;;  %v7000_v60 = vld [vmem:[#allocation3 + $0xca] sm:$0xff]  ;;  %v7009_v50 = vld [vmem:[#allocation3 + $0x112] sm:$0xff] }
 0x4bf   : > { %13596 = vmatprep.mubr.msk.f32.mxu1 %vm14620_vm5, %v14618_v2  ;;  %v13323_v4 = vpop.f32.mrf.mxu1 }
 0x4c0   : > { %v5561_v1 = vsel %vm19873_vm7, %v5520_v26, 0.0  ;;  %v5480_v19 = vadd.f32 %v17353_v3, %v5432_v25  ;;  %v5692_v33 = vld [vmem:[#allocation3 + $0x119] sm:$0xff]  ;;  %vm19875_vm7 = vcmp.eq.s32.totalorder %v19874_v15, 1  ;;  %v14609_v26 = vld [vmem:[%s19643_s5] ss:$0 sm:$0xff]  ;;  %v6999_v15 = vld [vmem:[#allocation3 + $0xc2] sm:$0xff] }
 0x4c1   : > { %v5643_v21 = vld [vmem:[#allocation3 + $0x118] sm:$0xff]  ;;  %5602 = vst.msk [vmem:[#allocation3 + $0x12b] sm:$0xff] %vm1121_vm15, %v5561_v1  ;;  %v5377_v59 = vpop.f32.mrf.mxu1  ;;  %13458 = vmatmul.mubr.msk.f32.gmra.mxu0 %vm1121_vm15, %v5692_v33 }
 0x4c2   : > { %13597 = vmatmul.mubr.msk.f32.gmra.mxu1 %vm1121_vm15, %v5643_v21  ;;  %v5521_v9 = vmax.f32 %v5480_v19, 0.0  ;;  %v5433_v61 = vadd.f32 %v5377_v59, %v17335_v34  ;;  %13460 = vmatprep.mubr.msk.f32.mxu0 %vm14620_vm5, %v14618_v2  ;;  %v19878_v59 = vld [vmem:[#allocation42_spill] sm:$0xff] }
 0x4c3   : > { %13599 = vmatprep.mubr.msk.f32.mxu1 %vm14620_vm5, %v14618_v2  ;;  %v13326_v35 = vpop.f32.mrf.mxu1  ;;  %v7010_v42 = vld [vmem:[#allocation3 + $0x11a] sm:$0xff] }
 0x4c4   : > { %v5562_v24 = vsel %vm19875_vm7, %v5521_v9, 0.0  ;;  %v5481_v30 = vadd.f32 %v17353_v3, %v5433_v61  ;;  %v5693_v52 = vld [vmem:[#allocation3 + $0x121] sm:$0xff]  ;;  %v19876_v3 = vld [vmem:[#allocation41_spill] sm:$0xff] }
 0x4c5   : > { %v5644_v6 = vld [vmem:[#allocation3 + $0x120] sm:$0xff]  ;;  %5603 = vst.msk [vmem:[#allocation3 + $0x133] sm:$0xff] %vm1121_vm15, %v5562_v24  ;;  %v5382_v47 = vpop.f32.mrf.mxu1  ;;  %13461 = vmatmul.mubr.msk.f32.gmra.mxu0 %vm1121_vm15, %v5693_v52  ;;  %vm19877_vm7 = vcmp.eq.s32.totalorder %v19876_v3, 1 }
 0x4c6   : > { %13600 = vmatmul.mubr.msk.f32.gmra.mxu1 %vm1121_vm15, %v5644_v6  ;;  %v5522_v34 = vmax.f32 %v5481_v30, 0.0  ;;  %v5434_v44 = vadd.f32 %v5382_v47, %v17342_v63  ;;  %13463 = vmatprep.mubr.msk.f32.mxu0 %vm14620_vm5, %v14618_v2  ;;  %v19880_v47 = vld [vmem:[#allocation43_spill] sm:$0xff]  ;;  %v6998_v3 = vld [vmem:[#allocation3 + $0xba] sm:$0xff] }
 0x4c7   : > { %13602 = vmatprep.mubr.msk.f32.mxu1 %vm14620_vm5, %v14618_v2  ;;  %v13329_v51 = vpop.f32.mrf.mxu1  ;;  %v7011_v58 = vld [vmem:[#allocation3 + $0x122] sm:$0xff] }
 0x4c8   : > { %v5563_v39 = vsel %vm19877_vm7, %v5522_v34, 0.0  ;;  %v5482_v25 = vadd.f32 %v14609_v26, %v5434_v44  ;;  %v5694_v4 = vld [vmem:[#allocation3 + $0x129] sm:$0xff]  ;;  %vm19879_vm7 = vcmp.eq.s32.totalorder %v19878_v59, 1  ;;  %v6997_v59 = vld [vmem:[#allocation3 + $0xb2] sm:$0xff] }
 0x4c9   : > { %v5645_v1 = vld [vmem:[#allocation3 + $0x128] sm:$0xff]  ;;  %5604 = vst.msk [vmem:[#allocation3 + $0x13b] sm:$0xff] %vm1121_vm15, %v5563_v39  ;;  %v5387_v63 = vpop.f32.mrf.mxu1  ;;  %13464 = vmatmul.mubr.msk.f32.gmra.mxu0 %vm1121_vm15, %v5694_v4 }
 0x4ca   : > { %13603 = vmatmul.mubr.msk.f32.gmra.mxu1 %vm1121_vm15, %v5645_v1  ;;  %v5523_v19 = vmax.f32 %v5482_v25, 0.0  ;;  %v5435_v33 = vadd.f32 %v5387_v63, %v17345_v36  ;;  %13466 = vmatprep.mubr.msk.f32.mxu0 %vm14620_vm5, %v14618_v2  ;;  %v6995_v1 = vld [vmem:[#allocation3 + $0xa2] sm:$0xff]  ;;  %v7012_v12 = vld [vmem:[#allocation3 + $0x12a] sm:$0xff] }
 0x4cb   : > { %13605 = vmatprep.mubr.msk.f32.mxu1 %vm14620_vm5, %v14618_v2  ;;  %v13332_v21 = vpop.f32.mrf.mxu1 }
 0x4cc   : > { %v5564_v9 = vsel %vm19879_vm7, %v5523_v19, 0.0  ;;  %v5483_v61 = vadd.f32 %v14609_v26, %v5435_v33  ;;  %v5695_v35 = vld [vmem:[#allocation3 + $0x131] sm:$0xff]  ;;  %vm19881_vm7 = vcmp.eq.s32.totalorder %v19880_v47, 1  ;;  %v6493_v21 = vld [vmem:[#allocation3 + $0x2] sm:$0xff] }
 0x4cd   : > { %v5646_v24 = vld [vmem:[#allocation3 + $0x130] sm:$0xff]  ;;  %5605 = vst.msk [vmem:[#allocation3 + $0x143] sm:$0xff] %vm1121_vm15, %v5564_v9  ;;  %v5392_v30 = vpop.f32.mrf.mxu1  ;;  %13467 = vmatmul.mubr.msk.f32.gmra.mxu0 %vm1121_vm15, %v5695_v35  ;;  %v10786_v9 = vld [vmem:[%s19644_s6 + $0x138] sm:$0xff] }
 0x4ce   : > { %13606 = vmatmul.mubr.msk.f32.gmra.mxu1 %vm1121_vm15, %v5646_v24  ;;  %v5524_v36 = vmax.f32 %v5483_v61, 0.0  ;;  %v5436_v52 = vadd.f32 %v5392_v30, %v17348_v48  ;;  %13469 = vmatprep.mubr.msk.f32.mxu0 %vm14620_vm5, %v14618_v2  ;;  %v6977_v35 = vld [vmem:[#allocation3 + $0x12] sm:$0xff]  ;;  %v10785_v24 = vld [vmem:[%s19644_s6 + $0x130] sm:$0xff]  ;;  %v6494_v30 = vld [vmem:[#allocation3 + $0xa] sm:$0xff] }
 0x4cf   : > { %13608 = vmatprep.mubr.msk.f32.mxu1 %vm14620_vm5, %v14618_v2  ;;  %v13335_v6 = vpop.f32.mrf.mxu1  ;;  %v6996_v47 = vld [vmem:[#allocation3 + $0xaa] sm:$0xff]  ;;  %v7013_v43 = vld [vmem:[#allocation3 + $0x132] sm:$0xff] }
 0x4d0   : > { %v5565_v34 = vsel %vm19881_vm7, %v5524_v36, 0.0  ;;  %v5484_v44 = vadd.f32 %v14609_v26, %v5436_v52  ;;  %v5696_v51 = vld [vmem:[#allocation3 + $0x139] sm:$0xff]  ;;  %v6979_v6 = vld [vmem:[#allocation3 + $0x22] sm:$0xff] }
 0x4d1   : > { %v5647_v39 = vld [vmem:[#allocation3 + $0x138] sm:$0xff]  ;;  %5606 = vst.msk [vmem:[#allocation3 + $0x14b] sm:$0xff] %vm1121_vm15, %v5565_v34  ;;  %13470 = vmatmul.mubr.msk.f32.gmra.mxu0 %vm1121_vm15, %v5696_v51  ;;  %v17825_v48 = vpop.f32.mrf.mxu1  ;;  %v10783_v34 = vld [vmem:[%s19644_s6 + $0x120] sm:$0xff]  ;;  %v10782_v51 = vld [vmem:[%s19644_s6 + $0x118] sm:$0xff] }
 0x4d2   : > { %13609 = vmatmul.mubr.msk.f32.gmra.mxu1 %vm1121_vm15, %v5647_v39  ;;  %v5525_v25 = vmax.f32 %v5484_v44, 0.0  ;;  %13472 = vmatprep.mubr.msk.f32.mxu0 %vm14620_vm5, %v14618_v2  ;;  %v6978_v36 = vld [vmem:[#allocation3 + $0x1a] sm:$0xff]  ;;  %v6980_v44 = vld [vmem:[#allocation3 + $0x2a] sm:$0xff]  ;;  %v6981_v39 = vld [vmem:[#allocation3 + $0x32] sm:$0xff] }
 0x4d3   : > { %13611 = vmatprep.mubr.msk.f32.mxu1 %vm14620_vm5, %v14618_v2  ;;  %v13493_v4 = vpop.f32.mrf.mxu1  ;;  %v10784_v52 = vld [vmem:[%s19644_s6 + $0x128] sm:$0xff] }
 0x4d4   : > { %v5566_v26 = vsel %vm1079_vm4, %v5525_v25, 0.0  ;;  %v5697_v63 = vld [vmem:[#allocation3 + $0x141] sm:$0xf] }
 0x4d5   : > { %v5648_v19 = vld [vmem:[#allocation3 + $0x140] sm:$0xf]  ;;  %5607 = vst.msk [vmem:[#allocation3 + $0x153] sm:$0xf] %vm1162_vm3, %v5566_v26  ;;  %13473 = vmatmul.mubr.msk.f32.gmra.mxu0 %vm1121_vm15, %v5697_v63  ;;  %v17836_v33 = vpop.f32.mrf.mxu1  ;;  %v10780_v26 = vld [vmem:[%s19644_s6 + $0x108] sm:$0xff]  ;;  %v10835_v63 = vld [vmem:[%s19644_s6 + $0x178] sm:$0xff] }
 0x4d6   : > { %13612 = vmatmul.mubr.msk.f32.gmra.mxu1 %vm1121_vm15, %v5648_v19  ;;  %13630 = vmatprep.mubr.msk.f32.mxu0 %vm14620_vm5, %v14618_v2  ;;  %v10781_v25 = vld [vmem:[%s19644_s6 + $0x110] sm:$0xff]  ;;  %vm19898_vm3 = vcmask 261120  }
 0x4d7   : > { %13769 = vmatprep.mubr.msk.f32.mxu1 %vm14620_vm5, %v14618_v2  ;;  %v13496_v61 = vpop.f32.mrf.mxu1  ;;  %v6982_v4 = vld [vmem:[#allocation3 + $0x3a] sm:$0xff]  ;;  %v6983_v19 = vld [vmem:[#allocation3 + $0x42] sm:$0xff] }
 0x4d8   : > { %v6984_v61 = vld [vmem:[#allocation3 + $0x4a] sm:$0xff]  ;;  %v7014_v16 = vld [vmem:[#allocation3 + $0x13a] sm:$0xff]  ;;  %v7015_v54 = vld [vmem:[#allocation3 + $0x142] sm:$0xff] }
 0x4d9   : > { %13631 = vmatmul.mubr.msk.f32.vlgmr.msra.gmra.mxu0 %vm1121_vm15, %v6493_v21  ;;  %v10834_v21 = vld [vmem:[%s19644_s6 + $0x170] sm:$0xff]  ;;  %v7016_v10 = vld [vmem:[#allocation3 + $0x14a] sm:$0xff] }
 0x4da   : > { %13770 = vmatmul.mubr.msk.f32.vlgmr.msra.gmra.mxu1 %vm1121_vm15, %v6977_v35  ;;  %13893 = vmatpush3.msra.mxu0 %v10786_v9  ;;  %v10779_v9 = vld [vmem:[%s19644_s6 + $0x100] sm:$0xff] }
 0x4db   : > { %13633 = vmatprep.mubr.msk.f32.mxu0 %vm14620_vm5, %v14618_v2  ;;  %13772 = vmatprep.mubr.msk.f32.mxu1 %vm14620_vm5, %v14618_v2 }
 0x4dc   : > { %13894 = vmatprep.subr.mxu0 %v14618_v2  ;;  %14032 = vmatpush3.msra.mxu1 %v10835_v63 }
 0x4dd   : > { %13895 = vmatpush3.msra.mxu0 %v10785_v24  ;;  %14033 = vmatprep.subr.mxu1 %v14618_v2  ;;  %v6985_v24 = vld [vmem:[#allocation3 + $0x52] sm:$0xff] }
 0x4de   : > { %13634 = vmatmul.mubr.msk.f32.gmra.mxu0 %vm1121_vm15, %v6494_v30  ;;  %13773 = vmatmul.mubr.msk.f32.gmra.mxu1 %vm1121_vm15, %v6978_v36  ;;  %v10832_v30 = vld [vmem:[%s19644_s6 + $0x160] sm:$0xff] }
 0x4df   : > { %13636 = vmatprep.mubr.msk.f32.mxu0 %vm14620_vm5, %v14618_v2  ;;  %13775 = vmatprep.mubr.msk.f32.mxu1 %vm14620_vm5, %v14618_v2 }
 0x4e0   : > { %13896 = vmatprep.subr.mxu0 %v14618_v2  ;;  %14034 = vmatpush3.msra.mxu1 %v10834_v21 }
 0x4e1   : > { %13897 = vmatpush3.msra.mxu0 %v10784_v52  ;;  %14035 = vmatprep.subr.mxu1 %v14618_v2  ;;  %v10831_v52 = vld [vmem:[%s19644_s6 + $0x158] sm:$0xff] }
 0x4e2   : > { %13637 = vmatmul.mubr.msk.f32.gmra.mxu0 %vm1121_vm15, %v6977_v35  ;;  %13776 = vmatmul.mubr.msk.f32.gmra.mxu1 %vm1121_vm15, %v6979_v6  ;;  %v10833_v35 = vld [vmem:[%s19644_s6 + $0x168] sm:$0xff] }
 0x4e3   : > { %13639 = vmatprep.mubr.msk.f32.mxu0 %vm14620_vm5, %v14618_v2  ;;  %13778 = vmatprep.mubr.msk.f32.mxu1 %vm14620_vm5, %v14618_v2 }
 0x4e4   : > { %13898 = vmatprep.subr.mxu0 %v14618_v2  ;;  %14036 = vmatpush3.msra.mxu1 %v10833_v35  ;;  %v10829_v35 = vld [vmem:[%s19644_s6 + $0x148] sm:$0xff] }
 0x4e5   : > { %13899 = vmatpush3.msra.mxu0 %v10783_v34  ;;  %14037 = vmatprep.subr.mxu1 %v14618_v2 }
 0x4e6   : > { %13640 = vmatmul.mubr.msk.f32.gmra.mxu0 %vm1121_vm15, %v6978_v36  ;;  %13779 = vmatmul.mubr.msk.f32.gmra.mxu1 %vm1121_vm15, %v6980_v44  ;;  %v6986_v36 = vld [vmem:[#allocation3 + $0x5a] sm:$0xff] }
 0x4e7   : > { %13642 = vmatprep.mubr.msk.f32.mxu0 %vm14620_vm5, %v14618_v2  ;;  %13781 = vmatprep.mubr.msk.f32.mxu1 %vm14620_vm5, %v14618_v2 }
 0x4e8   : > { %13900 = vmatprep.subr.mxu0 %v14618_v2  ;;  %14038 = vmatpush3.msra.mxu1 %v10832_v30 }
 0x4e9   : > { %13901 = vmatpush3.msra.mxu0 %v10782_v51  ;;  %14039 = vmatprep.subr.mxu1 %v14618_v2 }
 0x4ea   : > { %13643 = vmatmul.mubr.msk.f32.gmra.mxu0 %vm1121_vm15, %v6979_v6  ;;  %13782 = vmatmul.mubr.msk.f32.gmra.mxu1 %vm1121_vm15, %v6981_v39 }
 0x4eb   : > { %13645 = vmatprep.mubr.msk.f32.mxu0 %vm14620_vm5, %v14618_v2  ;;  %13784 = vmatprep.mubr.msk.f32.mxu1 %vm14620_vm5, %v14618_v2 }
 0x4ec   : > { %13902 = vmatprep.subr.mxu0 %v14618_v2  ;;  %14040 = vmatpush3.msra.mxu1 %v10831_v52 }
 0x4ed   : > { %13903 = vmatpush3.msra.mxu0 %v10781_v25  ;;  %v6987_v25 = vld [vmem:[#allocation3 + $0x62] sm:$0xff]  ;;  %14041 = vmatprep.subr.mxu1 %v14618_v2 }
 0x4ee   : > { %13646 = vmatmul.mubr.msk.f32.gmra.mxu0 %vm1121_vm15, %v6980_v44  ;;  %13785 = vmatmul.mubr.msk.f32.gmra.mxu1 %vm1121_vm15, %v6982_v4 }
 0x4ef   : > { %13648 = vmatprep.mubr.msk.f32.mxu0 %vm14620_vm5, %v14618_v2  ;;  %13787 = vmatprep.mubr.msk.f32.mxu1 %vm14620_vm5, %v14618_v2 }
 0x4f0   : > { %13904 = vmatprep.subr.mxu0 %v14618_v2 }
 0x4f1   : > { %13905 = vmatpush3.msra.mxu0 %v10780_v26 }
 0x4f2   : > { %13649 = vmatmul.mubr.msk.f32.gmra.mxu0 %vm1121_vm15, %v6981_v39  ;;  %13788 = vmatmul.mubr.msk.f32.gmra.mxu1 %vm1121_vm15, %v6983_v19 }
 0x4f3   : > { %13651 = vmatprep.mubr.msk.f32.mxu0 %vm14620_vm5, %v14618_v2  ;;  %13790 = vmatprep.mubr.msk.f32.mxu1 %vm14620_vm5, %v14618_v2 }
 0x4f4   : > { %13906 = vmatprep.subr.mxu0 %v14618_v2 }
 0x4f5   : > { %13907 = vmatpush3.msra.mxu0 %v10779_v9 }
 0x4f6   : > { %13652 = vmatmul.mubr.msk.f32.gmra.mxu0 %vm1121_vm15, %v6982_v4  ;;  %13791 = vmatmul.mubr.msk.f32.gmra.mxu1 %vm1121_vm15, %v6984_v61  ;;  %v10830_v4 = vld [vmem:[%s19644_s6 + $0x150] sm:$0xff] }
 0x4f7   : > { %13654 = vmatprep.mubr.msk.f32.mxu0 %vm14620_vm5, %v14618_v2  ;;  %13793 = vmatprep.mubr.msk.f32.mxu1 %vm14620_vm5, %v14618_v2 }
 0x4f8   : > { %14170 = vmatprep.subr.mxu0 %v14618_v2  ;;  %14042 = vmatpush3.msra.mxu1 %v10830_v4 }
 0x4f9   : > { %14043 = vmatprep.subr.mxu1 %v14618_v2 }
 0x4fa   : > { %13655 = vmatmul.mubr.msk.f32.gmra.mxu0 %vm1121_vm15, %v6983_v19  ;;  %13794 = vmatmul.mubr.msk.f32.gmra.mxu1 %vm1121_vm15, %v6985_v24 }
 0x4fb   : > { %13657 = vmatprep.mubr.msk.f32.mxu0 %vm14620_vm5, %v14618_v2  ;;  %13796 = vmatprep.mubr.msk.f32.mxu1 %vm14620_vm5, %v14618_v2 }
 0x4fc   : > { %14044 = vmatpush3.msra.mxu1 %v10829_v35 }
 0x4fd   : > { %v5906_v6 = vpop.f32.mrf.mxu0  ;;  %14045 = vmatprep.subr.mxu1 %v14618_v2 }
 0x4fe   : > { %v6299_v34 = vpop.f32.mrf.mxu1  ;;  %13658 = vmatmul.mubr.msk.f32.gmra.mxu0 %vm1121_vm15, %v6984_v61  ;;  %13797 = vmatmul.mubr.msk.f32.gmra.mxu1 %vm1121_vm15, %v6986_v36  ;;  %v6988_v61 = vld [vmem:[#allocation3 + $0x6a] sm:$0xff] }
 0x4ff   : > { %v17949_v44 = vadd.f32 %v6299_v34, %v5906_v6  ;;  %13660 = vmatprep.mubr.msk.f32.mxu0 %vm14620_vm5, %v14618_v2  ;;  %13799 = vmatprep.mubr.msk.f32.mxu1 %vm14620_vm5, %v14618_v2  ;;  %v13360_v51 = vpop.f32.mrf.mxu0 }
 0x500   : > { %v13499_v39 = vpop.f32.mrf.mxu1  ;;  %v6989_v51 = vld [vmem:[#allocation3 + $0x72] sm:$0xff] }
 0x501   : > { %v5911_v26 = vpop.f32.mrf.mxu0 }
 0x502   : > { %v6304_v63 = vpop.f32.mrf.mxu1  ;;  %13661 = vmatmul.mubr.msk.f32.gmra.mxu0 %vm1121_vm15, %v6985_v24  ;;  %13800 = vmatmul.mubr.msk.f32.gmra.mxu1 %vm1121_vm15, %v6987_v25 }
 0x503   : > { %v17961_v19 = vadd.f32 %v6304_v63, %v5911_v26  ;;  %13663 = vmatprep.mubr.msk.f32.mxu0 %vm14620_vm5, %v14618_v2  ;;  %13802 = vmatprep.mubr.msk.f32.mxu1 %vm14620_vm5, %v14618_v2  ;;  %v13363_v21 = vpop.f32.mrf.mxu0 }
 0x504   : > { %v13502_v9 = vpop.f32.mrf.mxu1 }
 0x505   : > { %v5916_v24 = vpop.f32.mrf.mxu0  ;;  %v6990_v9 = vld [vmem:[#allocation3 + $0x7a] sm:$0xff] }
 0x506   : > { %v6309_v30 = vpop.f32.mrf.mxu1  ;;  %13664 = vmatmul.mubr.msk.f32.gmra.mxu0 %vm1121_vm15, %v6986_v36  ;;  %13803 = vmatmul.mubr.msk.f32.gmra.mxu1 %vm1121_vm15, %v6988_v61  ;;  %v10828_v36 = vld [vmem:[%s19644_s6 + $0x140] sm:$0xff] }
 0x507   : > { %v17973_v52 = vadd.f32 %v6309_v30, %v5916_v24  ;;  %13666 = vmatprep.mubr.msk.f32.mxu0 %vm14620_vm5, %v14618_v2  ;;  %13805 = vmatprep.mubr.msk.f32.mxu1 %vm14620_vm5, %v14618_v2  ;;  %v13366_v6 = vpop.f32.mrf.mxu0 }
 0x508   : > { %v13505_v34 = vpop.f32.mrf.mxu1  ;;  %14046 = vmatpush3.msra.mxu1 %v10828_v36 }
 0x509   : > { %v5921_v39 = vpop.f32.mrf.mxu0  ;;  %14309 = vmatprep.subr.mxu1 %v14618_v2  ;;  %v6991_v34 = vld [vmem:[#allocation3 + $0x82] sm:$0xff] }
 0x50a   : > { %v6314_v4 = vpop.f32.mrf.mxu1  ;;  %13667 = vmatmul.mubr.msk.f32.gmra.mxu0 %vm1121_vm15, %v6987_v25  ;;  %13806 = vmatmul.mubr.msk.f32.gmra.mxu1 %vm1121_vm15, %v6989_v51 }
 0x50b   : > { %v17985_v26 = vadd.f32 %v6314_v4, %v5921_v39  ;;  %13669 = vmatprep.mubr.msk.f32.mxu0 %vm14620_vm5, %v14618_v2  ;;  %13808 = vmatprep.mubr.msk.f32.mxu1 %vm14620_vm5, %v14618_v2  ;;  %v13369_v63 = vpop.f32.mrf.mxu0 }
 0x50c   : > { %v13508_v21 = vpop.f32.mrf.mxu1 }
 0x50d   : > { %v5926_v35 = vpop.f32.mrf.mxu0  ;;  %v6992_v21 = vld [vmem:[#allocation3 + $0x8a] sm:$0xff] }
 0x50e   : > { %v6319_v24 = vpop.f32.mrf.mxu1  ;;  %13670 = vmatmul.mubr.msk.f32.gmra.mxu0 %vm1121_vm15, %v6988_v61  ;;  %13809 = vmatmul.mubr.msk.f32.gmra.mxu1 %vm1121_vm15, %v6990_v9 }
 0x50f   : > { %v17994_v25 = vadd.f32 %v6319_v24, %v5926_v35  ;;  %13672 = vmatprep.mubr.msk.f32.mxu0 %vm14620_vm5, %v14618_v2  ;;  %13811 = vmatprep.mubr.msk.f32.mxu1 %vm14620_vm5, %v14618_v2  ;;  %v13372_v30 = vpop.f32.mrf.mxu0 }
 0x510   : > { %v13511_v6 = vpop.f32.mrf.mxu1 }
 0x511   : > { %v5931_v36 = vpop.f32.mrf.mxu0 }
 0x512   : > { %v6324_v39 = vpop.f32.mrf.mxu1  ;;  %13673 = vmatmul.mubr.msk.f32.gmra.mxu0 %vm1121_vm15, %v6989_v51  ;;  %13812 = vmatmul.mubr.msk.f32.gmra.mxu1 %vm1121_vm15, %v6991_v34 }
 0x513   : > { %v18002_v61 = vadd.f32 %v6324_v39, %v5931_v36  ;;  %13675 = vmatprep.mubr.msk.f32.mxu0 %vm14620_vm5, %v14618_v2  ;;  %13814 = vmatprep.mubr.msk.f32.mxu1 %vm14620_vm5, %v14618_v2  ;;  %v13375_v4 = vpop.f32.mrf.mxu0  ;;  %v6993_v36 = vld [vmem:[#allocation3 + $0x92] sm:$0xff] }
 0x514   : > { %v13514_v63 = vpop.f32.mrf.mxu1 }
 0x515   : > { %v5936_v35 = vpop.f32.mrf.mxu0 }
 0x516   : > { %v6329_v24 = vpop.f32.mrf.mxu1  ;;  %13676 = vmatmul.mubr.msk.f32.gmra.mxu0 %vm1121_vm15, %v6990_v9  ;;  %13815 = vmatmul.mubr.msk.f32.gmra.mxu1 %vm1121_vm15, %v6992_v21 }
 0x517   : > { %v18010_v51 = vadd.f32 %v6329_v24, %v5936_v35  ;;  %13678 = vmatprep.mubr.msk.f32.mxu0 %vm14620_vm5, %v14618_v2  ;;  %13817 = vmatprep.mubr.msk.f32.mxu1 %vm14620_vm5, %v14618_v2  ;;  %v13378_v30 = vpop.f32.mrf.mxu0  ;;  %v6994_v24 = vld [vmem:[#allocation3 + $0x9a] sm:$0xff] }
 0x518   : > { %v13517_v6 = vpop.f32.mrf.mxu1 }
 0x519   : > { %v5941_v39 = vpop.f32.mrf.mxu0 }
 0x51a   : > { %v6334_v4 = vpop.f32.mrf.mxu1  ;;  %13679 = vmatmul.mubr.msk.f32.gmra.mxu0 %vm1121_vm15, %v6991_v34  ;;  %13818 = vmatmul.mubr.msk.f32.gmra.mxu1 %vm1121_vm15, %v6993_v36 }
 0x51b   : > { %v18018_v9 = vadd.f32 %v6334_v4, %v5941_v39  ;;  %13681 = vmatprep.mubr.msk.f32.mxu0 %vm14620_vm5, %v14618_v2  ;;  %13820 = vmatprep.mubr.msk.f32.mxu1 %vm14620_vm5, %v14618_v2  ;;  %v13381_v63 = vpop.f32.mrf.mxu0 }
 0x51c   : > { %v13520_v35 = vpop.f32.mrf.mxu1 }
 0x51d   : > { %v5946_v30 = vpop.f32.mrf.mxu0 }
 0x51e   : > { %v6339_v6 = vpop.f32.mrf.mxu1  ;;  %13682 = vmatmul.mubr.msk.f32.gmra.mxu0 %vm1121_vm15, %v6992_v21  ;;  %13821 = vmatmul.mubr.msk.f32.gmra.mxu1 %vm1121_vm15, %v6994_v24 }
 0x51f   : > { %v18026_v34 = vadd.f32 %v6339_v6, %v5946_v30  ;;  %13684 = vmatprep.mubr.msk.f32.mxu0 %vm14620_vm5, %v14618_v2  ;;  %13823 = vmatprep.mubr.msk.f32.mxu1 %vm14620_vm5, %v14618_v2  ;;  %v13384_v39 = vpop.f32.mrf.mxu0 }
 0x520   : > { %v13523_v4 = vpop.f32.mrf.mxu1 }
 0x521   : > { %v5951_v63 = vpop.f32.mrf.mxu0 }
 0x522   : > { %v6344_v35 = vpop.f32.mrf.mxu1  ;;  %13685 = vmatmul.mubr.msk.f32.gmra.mxu0 %vm1121_vm15, %v6993_v36  ;;  %13824 = vmatmul.mubr.msk.f32.gmra.mxu1 %vm1121_vm15, %v6995_v1 }
 0x523   : > { %v18034_v21 = vadd.f32 %v6344_v35, %v5951_v63  ;;  %13687 = vmatprep.mubr.msk.f32.mxu0 %vm14620_vm5, %v14618_v2  ;;  %13826 = vmatprep.mubr.msk.f32.mxu1 %vm14620_vm5, %v14618_v2  ;;  %v13387_v30 = vpop.f32.mrf.mxu0 }
 0x524   : > { %v13526_v6 = vpop.f32.mrf.mxu1 }
 0x525   : > { %v5956_v39 = vpop.f32.mrf.mxu0 }
 0x526   : > { %v6349_v4 = vpop.f32.mrf.mxu1  ;;  %13688 = vmatmul.mubr.msk.f32.gmra.mxu0 %vm1121_vm15, %v6994_v24  ;;  %13827 = vmatmul.mubr.msk.f32.gmra.mxu1 %vm1121_vm15, %v6996_v47 }
 0x527   : > { %v18042_v36 = vadd.f32 %v6349_v4, %v5956_v39  ;;  %13690 = vmatprep.mubr.msk.f32.mxu0 %vm14620_vm5, %v14618_v2  ;;  %13829 = vmatprep.mubr.msk.f32.mxu1 %vm14620_vm5, %v14618_v2  ;;  %v13390_v63 = vpop.f32.mrf.mxu0 }
 0x528   : > { %v13529_v35 = vpop.f32.mrf.mxu1 }
 0x529   : > { %v5961_v30 = vpop.f32.mrf.mxu0 }
 0x52a   : > { %v6354_v6 = vpop.f32.mrf.mxu1  ;;  %13691 = vmatmul.mubr.msk.f32.gmra.mxu0 %vm1121_vm15, %v6995_v1  ;;  %13830 = vmatmul.mubr.msk.f32.gmra.mxu1 %vm1121_vm15, %v6997_v59 }
 0x52b   : > { %v18050_v24 = vadd.f32 %v6354_v6, %v5961_v30  ;;  %13693 = vmatprep.mubr.msk.f32.mxu0 %vm14620_vm5, %v14618_v2  ;;  %13832 = vmatprep.mubr.msk.f32.mxu1 %vm14620_vm5, %v14618_v2  ;;  %v13393_v39 = vpop.f32.mrf.mxu0 }
 0x52c   : > { %v13532_v4 = vpop.f32.mrf.mxu1 }
 0x52d   : > { %v5966_v63 = vpop.f32.mrf.mxu0 }
 0x52e   : > { %v6359_v35 = vpop.f32.mrf.mxu1  ;;  %13694 = vmatmul.mubr.msk.f32.gmra.mxu0 %vm1121_vm15, %v6996_v47  ;;  %13833 = vmatmul.mubr.msk.f32.gmra.mxu1 %vm1121_vm15, %v6998_v3 }
 0x52f   : > { %v18058_v1 = vadd.f32 %v6359_v35, %v5966_v63  ;;  %13696 = vmatprep.mubr.msk.f32.mxu0 %vm14620_vm5, %v14618_v2  ;;  %13835 = vmatprep.mubr.msk.f32.mxu1 %vm14620_vm5, %v14618_v2  ;;  %v13396_v30 = vpop.f32.mrf.mxu0 }
 0x530   : > { %v13535_v6 = vpop.f32.mrf.mxu1 }
 0x531   : > { %v5971_v39 = vpop.f32.mrf.mxu0 }
 0x532   : > { %v6364_v4 = vpop.f32.mrf.mxu1  ;;  %13697 = vmatmul.mubr.msk.f32.gmra.mxu0 %vm1121_vm15, %v6997_v59  ;;  %13836 = vmatmul.mubr.msk.f32.gmra.mxu1 %vm1121_vm15, %v6999_v15 }
 0x533   : > { %v18066_v47 = vadd.f32 %v6364_v4, %v5971_v39  ;;  %13699 = vmatprep.mubr.msk.f32.mxu0 %vm14620_vm5, %v14618_v2  ;;  %13838 = vmatprep.mubr.msk.f32.mxu1 %vm14620_vm5, %v14618_v2  ;;  %v13399_v63 = vpop.f32.mrf.mxu0 }
 0x534   : > { %v13538_v35 = vpop.f32.mrf.mxu1 }
 0x535   : > { %v5976_v30 = vpop.f32.mrf.mxu0 }
 0x536   : > { %v6369_v6 = vpop.f32.mrf.mxu1  ;;  %13700 = vmatmul.mubr.msk.f32.gmra.mxu0 %vm1121_vm15, %v6998_v3  ;;  %13839 = vmatmul.mubr.msk.f32.gmra.mxu1 %vm1121_vm15, %v7000_v60 }
 0x537   : > { %v18074_v59 = vadd.f32 %v6369_v6, %v5976_v30  ;;  %13702 = vmatprep.mubr.msk.f32.mxu0 %vm14620_vm5, %v14618_v2  ;;  %13841 = vmatprep.mubr.msk.f32.mxu1 %vm14620_vm5, %v14618_v2  ;;  %v13402_v39 = vpop.f32.mrf.mxu0 }
 0x538   : > { %v13541_v4 = vpop.f32.mrf.mxu1 }
 0x539   : > { %v5981_v63 = vpop.f32.mrf.mxu0 }
 0x53a   : > { %v6374_v35 = vpop.f32.mrf.mxu1  ;;  %13703 = vmatmul.mubr.msk.f32.gmra.mxu0 %vm1121_vm15, %v6999_v15  ;;  %13842 = vmatmul.mubr.msk.f32.gmra.mxu1 %vm1121_vm15, %v7001_v40 }
 0x53b   : > { %v18082_v3 = vadd.f32 %v6374_v35, %v5981_v63  ;;  %13705 = vmatprep.mubr.msk.f32.mxu0 %vm14620_vm5, %v14618_v2  ;;  %13844 = vmatprep.mubr.msk.f32.mxu1 %vm14620_vm5, %v14618_v2  ;;  %v13405_v30 = vpop.f32.mrf.mxu0 }
 0x53c   : > { %v13544_v6 = vpop.f32.mrf.mxu1 }
 0x53d   : > { %v5986_v39 = vpop.f32.mrf.mxu0 }
 0x53e   : > { %v6379_v4 = vpop.f32.mrf.mxu1  ;;  %13706 = vmatmul.mubr.msk.f32.gmra.mxu0 %vm1121_vm15, %v7000_v60  ;;  %13845 = vmatmul.mubr.msk.f32.gmra.mxu1 %vm1121_vm15, %v7002_v45 }
 0x53f   : > { %v18090_v15 = vadd.f32 %v6379_v4, %v5986_v39  ;;  %13708 = vmatprep.mubr.msk.f32.mxu0 %vm14620_vm5, %v14618_v2  ;;  %13847 = vmatprep.mubr.msk.f32.mxu1 %vm14620_vm5, %v14618_v2  ;;  %v13408_v63 = vpop.f32.mrf.mxu0 }
 0x540   : > { %v13547_v35 = vpop.f32.mrf.mxu1 }
 0x541   : > { %v5991_v30 = vpop.f32.mrf.mxu0 }
 0x542   : > { %v6384_v6 = vpop.f32.mrf.mxu1  ;;  %13709 = vmatmul.mubr.msk.f32.gmra.mxu0 %vm1121_vm15, %v7001_v40  ;;  %13848 = vmatmul.mubr.msk.f32.gmra.mxu1 %vm1121_vm15, %v7003_v20 }
 0x543   : > { %v18098_v60 = vadd.f32 %v6384_v6, %v5991_v30  ;;  %13711 = vmatprep.mubr.msk.f32.mxu0 %vm14620_vm5, %v14618_v2  ;;  %13850 = vmatprep.mubr.msk.f32.mxu1 %vm14620_vm5, %v14618_v2  ;;  %v13411_v39 = vpop.f32.mrf.mxu0 }
 0x544   : > { %v13550_v4 = vpop.f32.mrf.mxu1 }
 0x545   : > { %v5996_v63 = vpop.f32.mrf.mxu0 }
 0x546   : > { %v6389_v35 = vpop.f32.mrf.mxu1  ;;  %13712 = vmatmul.mubr.msk.f32.gmra.mxu0 %vm1121_vm15, %v7002_v45  ;;  %13851 = vmatmul.mubr.msk.f32.gmra.mxu1 %vm1121_vm15, %v7004_v7 }
 0x547   : > { %v18106_v40 = vadd.f32 %v6389_v35, %v5996_v63  ;;  %13714 = vmatprep.mubr.msk.f32.mxu0 %vm14620_vm5, %v14618_v2  ;;  %13853 = vmatprep.mubr.msk.f32.mxu1 %vm14620_vm5, %v14618_v2  ;;  %v13414_v30 = vpop.f32.mrf.mxu0 }
 0x548   : > { %v13553_v6 = vpop.f32.mrf.mxu1 }
 0x549   : > { %v6001_v39 = vpop.f32.mrf.mxu0 }
 0x54a   : > { %v6394_v4 = vpop.f32.mrf.mxu1  ;;  %13715 = vmatmul.mubr.msk.f32.gmra.mxu0 %vm1121_vm15, %v7003_v20  ;;  %13854 = vmatmul.mubr.msk.f32.gmra.mxu1 %vm1121_vm15, %v7005_v53 }
 0x54b   : > { %v18114_v45 = vadd.f32 %v6394_v4, %v6001_v39  ;;  %13717 = vmatprep.mubr.msk.f32.mxu0 %vm14620_vm5, %v14618_v2  ;;  %13856 = vmatprep.mubr.msk.f32.mxu1 %vm14620_vm5, %v14618_v2  ;;  %v13417_v63 = vpop.f32.mrf.mxu0 }
 0x54c   : > { %v13556_v35 = vpop.f32.mrf.mxu1 }
 0x54d   : > { %v6006_v30 = vpop.f32.mrf.mxu0 }
 0x54e   : > { %v6399_v6 = vpop.f32.mrf.mxu1  ;;  %13718 = vmatmul.mubr.msk.f32.gmra.mxu0 %vm1121_vm15, %v7004_v7  ;;  %13857 = vmatmul.mubr.msk.f32.gmra.mxu1 %vm1121_vm15, %v7006_v32 }
 0x54f   : > { %v18122_v20 = vadd.f32 %v6399_v6, %v6006_v30  ;;  %13720 = vmatprep.mubr.msk.f32.mxu0 %vm14620_vm5, %v14618_v2  ;;  %13859 = vmatprep.mubr.msk.f32.mxu1 %vm14620_vm5, %v14618_v2  ;;  %v13420_v39 = vpop.f32.mrf.mxu0 }
 0x550   : > { %v13559_v4 = vpop.f32.mrf.mxu1 }
 0x551   : > { %v6011_v63 = vpop.f32.mrf.mxu0 }
 0x552   : > { %v6404_v35 = vpop.f32.mrf.mxu1  ;;  %13721 = vmatmul.mubr.msk.f32.gmra.mxu0 %vm1121_vm15, %v7005_v53  ;;  %13860 = vmatmul.mubr.msk.f32.gmra.mxu1 %vm1121_vm15, %v7007_v11 }
 0x553   : > { %v18130_v7 = vadd.f32 %v6404_v35, %v6011_v63  ;;  %13723 = vmatprep.mubr.msk.f32.mxu0 %vm14620_vm5, %v14618_v2  ;;  %13862 = vmatprep.mubr.msk.f32.mxu1 %vm14620_vm5, %v14618_v2  ;;  %v13423_v30 = vpop.f32.mrf.mxu0 }
 0x554   : > { %v13562_v6 = vpop.f32.mrf.mxu1 }
 0x555   : > { %v6016_v39 = vpop.f32.mrf.mxu0 }
 0x556   : > { %v6409_v4 = vpop.f32.mrf.mxu1  ;;  %13724 = vmatmul.mubr.msk.f32.gmra.mxu0 %vm1121_vm15, %v7006_v32  ;;  %13863 = vmatmul.mubr.msk.f32.gmra.mxu1 %vm1121_vm15, %v7008_v23 }
 0x557   : > { %v18138_v53 = vadd.f32 %v6409_v4, %v6016_v39  ;;  %13726 = vmatprep.mubr.msk.f32.mxu0 %vm14620_vm5, %v14618_v2  ;;  %13865 = vmatprep.mubr.msk.f32.mxu1 %vm14620_vm5, %v14618_v2  ;;  %v13426_v63 = vpop.f32.mrf.mxu0 }
 0x558   : > { %v13565_v35 = vpop.f32.mrf.mxu1 }
 0x559   : > { %v6021_v30 = vpop.f32.mrf.mxu0 }
 0x55a   : > { %v6414_v6 = vpop.f32.mrf.mxu1  ;;  %13727 = vmatmul.mubr.msk.f32.gmra.mxu0 %vm1121_vm15, %v7007_v11  ;;  %13866 = vmatmul.mubr.msk.f32.gmra.mxu1 %vm1121_vm15, %v7009_v50 }
 0x55b   : > { %v18146_v32 = vadd.f32 %v6414_v6, %v6021_v30  ;;  %13729 = vmatprep.mubr.msk.f32.mxu0 %vm14620_vm5, %v14618_v2  ;;  %13868 = vmatprep.mubr.msk.f32.mxu1 %vm14620_vm5, %v14618_v2  ;;  %v13429_v39 = vpop.f32.mrf.mxu0 }
 0x55c   : > { %v13568_v4 = vpop.f32.mrf.mxu1 }
 0x55d   : > { %v6026_v63 = vpop.f32.mrf.mxu0 }
 0x55e   : > { %v6419_v35 = vpop.f32.mrf.mxu1  ;;  %13730 = vmatmul.mubr.msk.f32.gmra.mxu0 %vm1121_vm15, %v7008_v23  ;;  %13869 = vmatmul.mubr.msk.f32.gmra.mxu1 %vm1121_vm15, %v7010_v42 }
 0x55f   : > { %v18154_v11 = vadd.f32 %v6419_v35, %v6026_v63  ;;  %13732 = vmatprep.mubr.msk.f32.mxu0 %vm14620_vm5, %v14618_v2  ;;  %13871 = vmatprep.mubr.msk.f32.mxu1 %vm14620_vm5, %v14618_v2  ;;  %v13432_v30 = vpop.f32.mrf.mxu0 }
 0x560   : > { %v13571_v6 = vpop.f32.mrf.mxu1 }
 0x561   : > { %v6031_v39 = vpop.f32.mrf.mxu0 }
 0x562   : > { %v6424_v4 = vpop.f32.mrf.mxu1  ;;  %13733 = vmatmul.mubr.msk.f32.gmra.mxu0 %vm1121_vm15, %v7009_v50  ;;  %13872 = vmatmul.mubr.msk.f32.gmra.mxu1 %vm1121_vm15, %v7011_v58 }
 0x563   : > { %v18162_v23 = vadd.f32 %v6424_v4, %v6031_v39  ;;  %13735 = vmatprep.mubr.msk.f32.mxu0 %vm14620_vm5, %v14618_v2  ;;  %13874 = vmatprep.mubr.msk.f32.mxu1 %vm14620_vm5, %v14618_v2  ;;  %v13435_v63 = vpop.f32.mrf.mxu0 }
 0x564   : > { %v13574_v35 = vpop.f32.mrf.mxu1 }
 0x565   : > { %v6036_v30 = vpop.f32.mrf.mxu0 }
 0x566   : > { %v6429_v6 = vpop.f32.mrf.mxu1  ;;  %13736 = vmatmul.mubr.msk.f32.gmra.mxu0 %vm1121_vm15, %v7010_v42  ;;  %13875 = vmatmul.mubr.msk.f32.gmra.mxu1 %vm1121_vm15, %v7012_v12 }
 0x567   : > { %v18170_v50 = vadd.f32 %v6429_v6, %v6036_v30  ;;  %13738 = vmatprep.mubr.msk.f32.mxu0 %vm14620_vm5, %v14618_v2  ;;  %13877 = vmatprep.mubr.msk.f32.mxu1 %vm14620_vm5, %v14618_v2  ;;  %v13438_v39 = vpop.f32.mrf.mxu0 }
 0x568   : > { %v13577_v4 = vpop.f32.mrf.mxu1 }
 0x569   : > { %v6041_v63 = vpop.f32.mrf.mxu0 }
 0x56a   : > { %v6434_v35 = vpop.f32.mrf.mxu1  ;;  %13739 = vmatmul.mubr.msk.f32.gmra.mxu0 %vm1121_vm15, %v7011_v58  ;;  %13878 = vmatmul.mubr.msk.f32.gmra.mxu1 %vm1121_vm15, %v7013_v43 }
 0x56b   : > { %v18178_v42 = vadd.f32 %v6434_v35, %v6041_v63  ;;  %13741 = vmatprep.mubr.msk.f32.mxu0 %vm14620_vm5, %v14618_v2  ;;  %13880 = vmatprep.mubr.msk.f32.mxu1 %vm14620_vm5, %v14618_v2  ;;  %v13441_v30 = vpop.f32.mrf.mxu0 }
 0x56c   : > { %v13580_v6 = vpop.f32.mrf.mxu1 }
 0x56d   : > { %v6046_v39 = vpop.f32.mrf.mxu0 }
 0x56e   : > { %v6439_v4 = vpop.f32.mrf.mxu1  ;;  %13742 = vmatmul.mubr.msk.f32.gmra.mxu0 %vm1121_vm15, %v7012_v12  ;;  %13881 = vmatmul.mubr.msk.f32.gmra.mxu1 %vm1121_vm15, %v7014_v16 }
 0x56f   : > { %v18186_v58 = vadd.f32 %v6439_v4, %v6046_v39  ;;  %13744 = vmatprep.mubr.msk.f32.mxu0 %vm14620_vm5, %v14618_v2  ;;  %13883 = vmatprep.mubr.msk.f32.mxu1 %vm14620_vm5, %v14618_v2  ;;  %v13444_v63 = vpop.f32.mrf.mxu0 }
 0x570   : > { %v13583_v35 = vpop.f32.mrf.mxu1 }
 0x571   : > { %v6051_v30 = vpop.f32.mrf.mxu0 }
 0x572   : > { %v6444_v6 = vpop.f32.mrf.mxu1  ;;  %13745 = vmatmul.mubr.msk.f32.gmra.mxu0 %vm1121_vm15, %v7013_v43  ;;  %13884 = vmatmul.mubr.msk.f32.gmra.mxu1 %vm1121_vm15, %v7015_v54 }
 0x573   : > { %v18194_v12 = vadd.f32 %v6444_v6, %v6051_v30  ;;  %13747 = vmatprep.mubr.msk.f32.mxu0 %vm14620_vm5, %v14618_v2  ;;  %13886 = vmatprep.mubr.msk.f32.mxu1 %vm14620_vm5, %v14618_v2  ;;  %v13447_v39 = vpop.f32.mrf.mxu0  ;;  %v6533_v6 = vld [vmem:[#allocation3 + $0x142] sm:$0xf] }
 0x574   : > { %v13586_v4 = vpop.f32.mrf.mxu1  ;;  %v7017_v39 = vld [vmem:[#allocation3 + $0x152] sm:$0xf] }
 0x575   : > { %v6056_v63 = vpop.f32.mrf.mxu0 }
 0x576   : > { %v6449_v35 = vpop.f32.mrf.mxu1  ;;  %13748 = vmatmul.mubr.msk.f32.gmra.mxu0 %vm1121_vm15, %v7014_v16  ;;  %13887 = vmatmul.mubr.msk.f32.gmra.mxu1 %vm1121_vm15, %v7016_v10 }
 0x577   : > { %v18202_v43 = vadd.f32 %v6449_v35, %v6056_v63  ;;  %13750 = vmatprep.mubr.msk.f32.mxu0 %vm14620_vm5, %v14618_v2  ;;  %13889 = vmatprep.mubr.msk.f32.mxu1 %vm14620_vm5, %v14618_v2  ;;  %v13450_v54 = vpop.f32.mrf.mxu0  ;;  %v10884_v35 = vld [vmem:[%s19644_s6 + $0x1b8] sm:$0xff] }
 0x578   : > { %v13589_v30 = vpop.f32.mrf.mxu1  ;;  %v7461_v54 = vld [vmem:[#allocation3 + $0x13] sm:$0xff] }
 0x579   : > { %v6061_v4 = vpop.f32.mrf.mxu0  ;;  %v7945_v30 = vld [vmem:[#allocation3 + $0x14] sm:$0xff] }
 0x57a   : > { %v6454_v37 = vpop.f32.mrf.mxu1  ;;  %13751 = vmatmul.mubr.msk.f32.gmra.mxu0 %vm1121_vm15, %v6533_v6  ;;  %13890 = vmatmul.mubr.msk.f32.gmra.mxu1 %vm1121_vm15, %v7017_v39 }
 0x57b   : > { %v18210_v16 = vadd.f32 %v6454_v37, %v6061_v4  ;;  %13908 = vmatprep.mubr.msk.f32.mxu0 %vm14620_vm5, %v14618_v2  ;;  %14047 = vmatprep.mubr.msk.f32.mxu1 %vm14620_vm5, %v14618_v2  ;;  %v13453_v10 = vpop.f32.mrf.mxu0  ;;  %v10883_v37 = vld [vmem:[%s19644_s6 + $0x1b0] sm:$0xff] }
 0x57c   : > { %v13592_v63 = vpop.f32.mrf.mxu1 }
 0x57d   : > { %v6066_v5 = vpop.f32.mrf.mxu0  ;;  %v7462_v63 = vld [vmem:[#allocation3 + $0x1b] sm:$0xff] }
 0x57e   : > { %v6459_v6 = vpop.f32.mrf.mxu1  ;;  %13909 = vmatmul.mubr.msk.f32.vlgmr.msra.gmra.mxu0 %vm1121_vm15, %v7461_v54  ;;  %14048 = vmatmul.mubr.msk.f32.vlgmr.msra.gmra.mxu1 %vm1121_vm15, %v7945_v30  ;;  %v7946_v54 = vld [vmem:[#allocation3 + $0x1c] sm:$0xff] }
 0x57f   : > { %v18224_v39 = vadd.f32 %v6459_v6, %v6066_v5  ;;  %14171 = vmatpush3.msra.mxu0 %v10884_v35  ;;  %13911 = vmatprep.mubr.msk.f32.mxu0 %vm14620_vm5, %v14618_v2  ;;  %v13456_v4 = vpop.f32.mrf.mxu0  ;;  %v10882_v5 = vld [vmem:[%s19644_s6 + $0x1a8] sm:$0xff] }
 0x580   : > { %v13595_v10 = vpop.f32.mrf.mxu1  ;;  %14050 = vmatprep.mubr.msk.f32.mxu1 %vm14620_vm5, %v14618_v2  ;;  %14172 = vmatprep.subr.mxu0 %v14618_v2  ;;  %v7463_v4 = vld [vmem:[#allocation3 + $0x23] sm:$0xff] }
 0x581   : > { %14173 = vmatpush3.msra.mxu0 %v10883_v37  ;;  %v6071_v30 = vpop.f32.mrf.mxu0  ;;  %v18243_v10 = vld [vmem:[#allocation3 + $0x24] sm:$0xff] }
 0x582   : > { %v6464_v41 = vpop.f32.mrf.mxu1  ;;  %13912 = vmatmul.mubr.msk.f32.gmra.mxu0 %vm1121_vm15, %v7462_v63  ;;  %14051 = vmatmul.mubr.msk.f32.gmra.mxu1 %vm1121_vm15, %v7946_v54 }
 0x583   : > { %v18236_v35 = vadd.f32 %v6464_v41, %v6071_v30  ;;  %13914 = vmatprep.mubr.msk.f32.mxu0 %vm14620_vm5, %v14618_v2  ;;  %14053 = vmatprep.mubr.msk.f32.mxu1 %vm14620_vm5, %v14618_v2  ;;  %v13459_v6 = vpop.f32.mrf.mxu0  ;;  %v10881_v41 = vld [vmem:[%s19644_s6 + $0x1a0] sm:$0xff] }
 0x584   : > { %v13598_v37 = vpop.f32.mrf.mxu1  ;;  %14174 = vmatprep.subr.mxu0 %v14618_v2 }
 0x585   : > { %14175 = vmatpush3.msra.mxu0 %v10882_v5  ;;  %v6076_v63 = vpop.f32.mrf.mxu0  ;;  %v7464_v37 = vld [vmem:[#allocation3 + $0x2b] sm:$0xff] }
 0x586   : > { %v6469_v54 = vpop.f32.mrf.mxu1  ;;  %13915 = vmatmul.mubr.msk.f32.gmra.mxu0 %vm1121_vm15, %v7463_v4  ;;  %14054 = vmatmul.mubr.msk.f32.gmra.mxu1 %vm1121_vm15, %v18243_v10  ;;  %v18258_v4 = vld [vmem:[#allocation3 + $0x2c] sm:$0xff] }
 0x587   : > { %v18251_v30 = vadd.f32 %v6469_v54, %v6076_v63  ;;  %13917 = vmatprep.mubr.msk.f32.mxu0 %vm14620_vm5, %v14618_v2  ;;  %14056 = vmatprep.mubr.msk.f32.mxu1 %vm14620_vm5, %v14618_v2  ;;  %v13462_v5 = vpop.f32.mrf.mxu0  ;;  %v10880_v63 = vld [vmem:[%s19644_s6 + $0x198] sm:$0xff] }
 0x588   : > { %v13601_v6 = vpop.f32.mrf.mxu1  ;;  %14176 = vmatprep.subr.mxu0 %v14618_v2 }
 0x589   : > { %14177 = vmatpush3.msra.mxu0 %v10881_v41  ;;  %v6081_v8 = vpop.f32.mrf.mxu0  ;;  %v7465_v6 = vld [vmem:[#allocation3 + $0x33] sm:$0xff] }
 0x58a   : > { %v6474_v18 = vpop.f32.mrf.mxu1  ;;  %13918 = vmatmul.mubr.msk.f32.gmra.mxu0 %vm1121_vm15, %v7464_v37  ;;  %14057 = vmatmul.mubr.msk.f32.gmra.mxu1 %vm1121_vm15, %v18258_v4  ;;  %v18273_v37 = vld [vmem:[#allocation3 + $0x34] sm:$0xff] }
 0x58b   : > { %v18266_v54 = vadd.f32 %v6474_v18, %v6081_v8  ;;  %13920 = vmatprep.mubr.msk.f32.mxu0 %vm14620_vm5, %v14618_v2  ;;  %14059 = vmatprep.mubr.msk.f32.mxu1 %vm14620_vm5, %v14618_v2  ;;  %v13465_v41 = vpop.f32.mrf.mxu0  ;;  %v10879_v18 = vld [vmem:[%s19644_s6 + $0x190] sm:$0xff] }
 0x58c   : > { %v13604_v5 = vpop.f32.mrf.mxu1  ;;  %14178 = vmatprep.subr.mxu0 %v14618_v2 }
 0x58d   : > { %14179 = vmatpush3.msra.mxu0 %v10880_v63  ;;  %v6086_v27 = vpop.f32.mrf.mxu0  ;;  %v7466_v5 = vld [vmem:[#allocation3 + $0x3b] sm:$0xff] }
 0x58e   : > { %v6479_v49 = vpop.f32.mrf.mxu1  ;;  %13921 = vmatmul.mubr.msk.f32.gmra.mxu0 %vm1121_vm15, %v7465_v6  ;;  %14060 = vmatmul.mubr.msk.f32.gmra.mxu1 %vm1121_vm15, %v18273_v37  ;;  %v7950_v6 = vld [vmem:[#allocation3 + $0x3c] sm:$0xff] }
 0x58f   : > { %v18281_v8 = vadd.f32 %v6479_v49, %v6086_v27  ;;  %13923 = vmatprep.mubr.msk.f32.mxu0 %vm14620_vm5, %v14618_v2  ;;  %14062 = vmatprep.mubr.msk.f32.mxu1 %vm14620_vm5, %v14618_v2  ;;  %v13468_v63 = vpop.f32.mrf.mxu0  ;;  %v10878_v49 = vld [vmem:[%s19644_s6 + $0x188] sm:$0xff] }
 0x590   : > { %v13607_v41 = vpop.f32.mrf.mxu1  ;;  %14180 = vmatprep.subr.mxu0 %v14618_v2 }
 0x591   : > { %14181 = vmatpush3.msra.mxu0 %v10879_v18  ;;  %v6091_v38 = vpop.f32.mrf.mxu0  ;;  %v7467_v41 = vld [vmem:[#allocation3 + $0x43] sm:$0xff] }
 0x592   : > { %v6484_v22 = vpop.f32.mrf.mxu1  ;;  %13924 = vmatmul.mubr.msk.f32.gmra.mxu0 %vm1121_vm15, %v7466_v5  ;;  %14063 = vmatmul.mubr.msk.f32.gmra.mxu1 %vm1121_vm15, %v7950_v6  ;;  %v18300_v5 = vld [vmem:[#allocation3 + $0x44] sm:$0xff] }
 0x593   : > { %v18293_v27 = vadd.f32 %v6484_v22, %v6091_v38  ;;  %13926 = vmatprep.mubr.msk.f32.mxu0 %vm14620_vm5, %v14618_v2  ;;  %14065 = vmatprep.mubr.msk.f32.mxu1 %vm14620_vm5, %v14618_v2  ;;  %v13471_v63 = vpop.f32.mrf.mxu0  ;;  %v10933_v6 = vld [vmem:[%s19644_s6 + $0x1f8] sm:$0xff] }
 0x594   : > { %v13610_v18 = vpop.f32.mrf.mxu1  ;;  %14182 = vmatprep.subr.mxu0 %v14618_v2  ;;  %v10877_v63 = vld [vmem:[%s19644_s6 + $0x180] sm:$0xff]  ;;  %14310 = vmatpush3.msra.mxu1 %v10933_v6  ;;  %v6295_v6 = vadd.f32 %v17836_v33, %v17597_v29 }
 0x595   : > { %14183 = vmatpush3.msra.mxu0 %v10878_v49  ;;  %v6096_v22 = vpop.f32.mrf.mxu0  ;;  %14311 = vmatprep.subr.mxu1 %v14618_v2 }
 0x596   : > { %v6489_v38 = vpop.f32.mrf.mxu1  ;;  %13927 = vmatmul.mubr.msk.f32.gmra.mxu0 %vm1121_vm15, %v7467_v41  ;;  %14066 = vmatmul.mubr.msk.f32.gmra.mxu1 %vm1121_vm15, %v18300_v5  ;;  %v6290_v41 = vadd.f32 %v17825_v48, %v17584_v0 }
 0x597   : > { %v18311_v18 = vadd.f32 %v6489_v38, %v6096_v22  ;;  %13929 = vmatprep.mubr.msk.f32.mxu0 %vm14620_vm5, %v14618_v2  ;;  %14068 = vmatprep.mubr.msk.f32.mxu1 %vm14620_vm5, %v14618_v2  ;;  %v13474_v49 = vpop.f32.mrf.mxu0  ;;  %v10932_v22 = vld [vmem:[%s19644_s6 + $0x1f0] sm:$0xff] }
 0x598   : > { %v13613_v57 = vpop.f32.mrf.mxu1  ;;  %14184 = vmatprep.subr.mxu0 %v14618_v2  ;;  %14312 = vmatpush3.msra.mxu1 %v10932_v22  ;;  %v7953_v49 = vld [vmem:[#allocation3 + $0x54] sm:$0xff] }
 0x599   : > { %14185 = vmatpush3.msra.mxu0 %v10877_v63  ;;  %v6732_v38 = vpop.f32.mrf.mxu0  ;;  %14313 = vmatprep.subr.mxu1 %v14618_v2 }
 0x59a   : > { %v7216_v28 = vpop.f32.mrf.mxu1  ;;  %13930 = vmatmul.mubr.msk.f32.gmra.mxu0 %vm1121_vm15, %v7468_v46  ;;  %14069 = vmatmul.mubr.msk.f32.gmra.mxu1 %vm1121_vm15, %v18320_v62  ;;  %v6936_v57 = vadd.f32 %v6732_v38, %v6290_v41  ;;  %v7469_v46 = vld [vmem:[#allocation3 + $0x53] sm:$0xff] }
 0x59b   : > { %13932 = vmatprep.mubr.msk.f32.mxu0 %vm14620_vm5, %v14618_v2  ;;  %14071 = vmatprep.mubr.msk.f32.mxu1 %vm14620_vm5, %v14618_v2  ;;  %v13632_v0 = vpop.f32.mrf.mxu0  ;;  %v10931_v41 = vld [vmem:[%s19644_s6 + $0x1e8] sm:$0xff] }
 0x59c   : > { %v13771_v48 = vpop.f32.mrf.mxu1  ;;  %14448 = vmatprep.subr.mxu0 %v14618_v2  ;;  %v18336_v63 = vadd.f32 %v7216_v28, %v6936_v57  ;;  %14314 = vmatpush3.msra.mxu1 %v10931_v41  ;;  %v7470_v57 = vld [vmem:[#allocation3 + $0x5b] sm:$0xff] }
 0x59d   : > { %v7954_v0 = vld [vmem:[#allocation3 + $0x5c] sm:$0xff]  ;;  %14315 = vmatprep.subr.mxu1 %v14618_v2  ;;  %v10930_v48 = vld [vmem:[%s19644_s6 + $0x1e0] sm:$0xff] }
 0x59e   : > { %v6737_v38 = vpop.f32.mrf.mxu0  ;;  %v7221_v56 = vpop.f32.mrf.mxu1  ;;  %13933 = vmatmul.mubr.msk.f32.gmra.mxu0 %vm1121_vm15, %v7469_v46  ;;  %14072 = vmatmul.mubr.msk.f32.gmra.mxu1 %vm1121_vm15, %v7953_v49 }
 0x59f   : > { %v6937_v22 = vadd.f32 %v6737_v38, %v6295_v6  ;;  %13935 = vmatprep.mubr.msk.f32.mxu0 %vm14620_vm5, %v14618_v2  ;;  %14074 = vmatprep.mubr.msk.f32.mxu1 %vm14620_vm5, %v14618_v2 }
 0x5a0   : > { %v13635_v28 = vpop.f32.mrf.mxu0  ;;  %v13774_v29 = vpop.f32.mrf.mxu1  ;;  %14316 = vmatpush3.msra.mxu1 %v10930_v48 }
 0x5a1   : > { %v18348_v33 = vadd.f32 %v7221_v56, %v6937_v22  ;;  %v7471_v22 = vld [vmem:[#allocation3 + $0x63] sm:$0xff]  ;;  %14317 = vmatprep.subr.mxu1 %v14618_v2 }
 0x5a2   : > { %v6742_v6 = vpop.f32.mrf.mxu0  ;;  %v7226_v46 = vpop.f32.mrf.mxu1  ;;  %13936 = vmatmul.mubr.msk.f32.gmra.mxu0 %vm1121_vm15, %v7470_v57  ;;  %14075 = vmatmul.mubr.msk.f32.gmra.mxu1 %vm1121_vm15, %v7954_v0  ;;  %v7955_v28 = vld [vmem:[#allocation3 + $0x64] sm:$0xff] }
 0x5a3   : > { %v6938_v49 = vadd.f32 %v6742_v6, %v17949_v44  ;;  %13938 = vmatprep.mubr.msk.f32.mxu0 %vm14620_vm5, %v14618_v2  ;;  %14077 = vmatprep.mubr.msk.f32.mxu1 %vm14620_vm5, %v14618_v2  ;;  %v10929_v29 = vld [vmem:[%s19644_s6 + $0x1d8] sm:$0xff] }
 0x5a4   : > { %v13638_v56 = vpop.f32.mrf.mxu0  ;;  %v13777_v41 = vpop.f32.mrf.mxu1  ;;  %14318 = vmatpush3.msra.mxu1 %v10929_v29 }
 0x5a5   : > { %v18361_v38 = vadd.f32 %v7226_v46, %v6938_v49  ;;  %v7472_v49 = vld [vmem:[#allocation3 + $0x6b] sm:$0xff]  ;;  %14319 = vmatprep.subr.mxu1 %v14618_v2 }
 0x5a6   : > { %v6747_v44 = vpop.f32.mrf.mxu0  ;;  %v7231_v57 = vpop.f32.mrf.mxu1  ;;  %13939 = vmatmul.mubr.msk.f32.gmra.mxu0 %vm1121_vm15, %v7471_v22  ;;  %14078 = vmatmul.mubr.msk.f32.gmra.mxu1 %vm1121_vm15, %v7955_v28  ;;  %v18376_v56 = vld [vmem:[#allocation3 + $0x6c] sm:$0xff] }
 0x5a7   : > { %v6939_v0 = vadd.f32 %v6747_v44, %v17961_v19  ;;  %13941 = vmatprep.mubr.msk.f32.mxu0 %vm14620_vm5, %v14618_v2  ;;  %14080 = vmatprep.mubr.msk.f32.mxu1 %vm14620_vm5, %v14618_v2  ;;  %v10928_v19 = vld [vmem:[%s19644_s6 + $0x1d0] sm:$0xff] }
 0x5a8   : > { %v13641_v48 = vpop.f32.mrf.mxu0  ;;  %v13780_v6 = vpop.f32.mrf.mxu1  ;;  %14320 = vmatpush3.msra.mxu1 %v10928_v19 }
 0x5a9   : > { %v18374_v46 = vadd.f32 %v7231_v57, %v6939_v0  ;;  %v7473_v0 = vld [vmem:[#allocation3 + $0x73] sm:$0xff]  ;;  %14321 = vmatprep.subr.mxu1 %v14618_v2 }
 0x5aa   : > { %v6752_v41 = vpop.f32.mrf.mxu0  ;;  %v7236_v22 = vpop.f32.mrf.mxu1  ;;  %13942 = vmatmul.mubr.msk.f32.gmra.mxu0 %vm1121_vm15, %v7472_v49  ;;  %14081 = vmatmul.mubr.msk.f32.gmra.mxu1 %vm1121_vm15, %v18376_v56  ;;  %v18392_v48 = vld [vmem:[#allocation3 + $0x74] sm:$0xff] }
 0x5ab   : > { %v6940_v28 = vadd.f32 %v6752_v41, %v17973_v52  ;;  %13944 = vmatprep.mubr.msk.f32.mxu0 %vm14620_vm5, %v14618_v2  ;;  %14083 = vmatprep.mubr.msk.f32.mxu1 %vm14620_vm5, %v14618_v2  ;;  %v10927_v52 = vld [vmem:[%s19644_s6 + $0x1c8] sm:$0xff] }
 0x5ac   : > { %v13644_v29 = vpop.f32.mrf.mxu0  ;;  %v13783_v44 = vpop.f32.mrf.mxu1  ;;  %14322 = vmatpush3.msra.mxu1 %v10927_v52 }
 0x5ad   : > { %v18390_v57 = vadd.f32 %v7236_v22, %v6940_v28  ;;  %v7474_v29 = vld [vmem:[#allocation3 + $0x7b] sm:$0xff]  ;;  %14323 = vmatprep.subr.mxu1 %v14618_v2 }
 0x5ae   : > { %v6757_v6 = vpop.f32.mrf.mxu0  ;;  %v7241_v49 = vpop.f32.mrf.mxu1  ;;  %13945 = vmatmul.mubr.msk.f32.gmra.mxu0 %vm1121_vm15, %v7473_v0  ;;  %14084 = vmatmul.mubr.msk.f32.gmra.mxu1 %vm1121_vm15, %v18392_v48  ;;  %v7958_v44 = vld [vmem:[#allocation3 + $0x7c] sm:$0xff]  ;;  %v10926_v0 = vld [vmem:[%s19644_s6 + $0x1c0] sm:$0xff] }
 0x5af   : > { %v6941_v19 = vadd.f32 %v6757_v6, %v17985_v26  ;;  %13947 = vmatprep.mubr.msk.f32.mxu0 %vm14620_vm5, %v14618_v2  ;;  %14086 = vmatprep.mubr.msk.f32.mxu1 %vm14620_vm5, %v14618_v2 }
 0x5b0   : > { %v13647_v41 = vpop.f32.mrf.mxu0  ;;  %v13786_v22 = vpop.f32.mrf.mxu1  ;;  %14324 = vmatpush3.msra.mxu1 %v10926_v0 }
 0x5b1   : > { %v18406_v28 = vadd.f32 %v7241_v49, %v6941_v19  ;;  %v7475_v22 = vld [vmem:[#allocation3 + $0x83] sm:$0xff] }
 0x5b2   : > { %v6762_v26 = vpop.f32.mrf.mxu0  ;;  %v7246_v6 = vpop.f32.mrf.mxu1  ;;  %13948 = vmatmul.mubr.msk.f32.gmra.mxu0 %vm1121_vm15, %v7474_v29  ;;  %14087 = vmatmul.mubr.msk.f32.gmra.mxu1 %vm1121_vm15, %v7958_v44 }
 0x5b3   : > { %v6942_v41 = vadd.f32 %v6762_v26, %v17994_v25  ;;  %13950 = vmatprep.mubr.msk.f32.mxu0 %vm14620_vm5, %v14618_v2  ;;  %14089 = vmatprep.mubr.msk.f32.mxu1 %vm14620_vm5, %v14618_v2  ;;  %v7476_v26 = vld [vmem:[#allocation3 + $0x8b] sm:$0xff] }
 0x5b4   : > { %v13650_v52 = vpop.f32.mrf.mxu0  ;;  %v13789_v49 = vpop.f32.mrf.mxu1 }
 0x5b5   : > { %v18419_v19 = vadd.f32 %v7246_v6, %v6942_v41  ;;  %v7960_v6 = vld [vmem:[#allocation3 + $0x8c] sm:$0xff] }
 0x5b6   : > { %v6767_v55 = vpop.f32.mrf.mxu0  ;;  %v7251_v13 = vpop.f32.mrf.mxu1  ;;  %13951 = vmatmul.mubr.msk.f32.gmra.mxu0 %vm1121_vm15, %v7475_v22  ;;  %14090 = vmatmul.mubr.msk.f32.gmra.mxu1 %vm1121_vm15, %v7959_v14  ;;  %v7477_v49 = vld [vmem:[#allocation3 + $0x93] sm:$0xff] }
 0x5b7   : > { %v6943_v25 = vadd.f32 %v6767_v55, %v18002_v61  ;;  %13953 = vmatprep.mubr.msk.f32.mxu0 %vm14620_vm5, %v14618_v2  ;;  %14092 = vmatprep.mubr.msk.f32.mxu1 %vm14620_vm5, %v14618_v2  ;;  %v18439_v22 = vld [vmem:[#allocation3 + $0x94] sm:$0xff] }
 0x5b8   : > { %v13653_v29 = vpop.f32.mrf.mxu0  ;;  %v13792_v44 = vpop.f32.mrf.mxu1 }
 0x5b9   : > { %v18428_v0 = vadd.f32 %v7251_v13, %v6943_v25 }
 0x5ba   : > { %v6772_v41 = vpop.f32.mrf.mxu0  ;;  %v7256_v52 = vpop.f32.mrf.mxu1  ;;  %13954 = vmatmul.mubr.msk.f32.gmra.mxu0 %vm1121_vm15, %v7476_v26  ;;  %14093 = vmatmul.mubr.msk.f32.gmra.mxu1 %vm1121_vm15, %v7960_v6 }
 0x5bb   : > { %v6944_v55 = vadd.f32 %v6772_v41, %v18010_v51  ;;  %13956 = vmatprep.mubr.msk.f32.mxu0 %vm14620_vm5, %v14618_v2  ;;  %14095 = vmatprep.mubr.msk.f32.mxu1 %vm14620_vm5, %v14618_v2  ;;  %v7478_v41 = vld [vmem:[#allocation3 + $0x9b] sm:$0xff] }
 0x5bc   : > { %v13656_v14 = vpop.f32.mrf.mxu0  ;;  %v13795_v61 = vpop.f32.mrf.mxu1 }
 0x5bd   : > { %v18437_v13 = vadd.f32 %v7256_v52, %v6944_v55  ;;  %v18451_v52 = vld [vmem:[#allocation3 + $0x9c] sm:$0xff] }
 0x5be   : > { %v6777_v25 = vpop.f32.mrf.mxu0  ;;  %v7261_v29 = vpop.f32.mrf.mxu1  ;;  %13957 = vmatmul.mubr.msk.f32.gmra.mxu0 %vm1121_vm15, %v7477_v49  ;;  %14096 = vmatmul.mubr.msk.f32.gmra.mxu1 %vm1121_vm15, %v18439_v22 }
 0x5bf   : > { %v6945_v51 = vadd.f32 %v6777_v25, %v18018_v9  ;;  %13959 = vmatprep.mubr.msk.f32.mxu0 %vm14620_vm5, %v14618_v2  ;;  %14098 = vmatprep.mubr.msk.f32.mxu1 %vm14620_vm5, %v14618_v2 }
 0x5c0   : > { %v13659_v44 = vpop.f32.mrf.mxu0  ;;  %v13798_v26 = vpop.f32.mrf.mxu1 }
 0x5c1   : > { %v18449_v6 = vadd.f32 %v7261_v29, %v6945_v51  ;;  %v7479_v29 = vld [vmem:[#allocation3 + $0xa3] sm:$0xff] }
 0x5c2   : > { %v6782_v55 = vpop.f32.mrf.mxu0  ;;  %v7266_v14 = vpop.f32.mrf.mxu1  ;;  %13960 = vmatmul.mubr.msk.f32.gmra.mxu0 %vm1121_vm15, %v7478_v41  ;;  %14099 = vmatmul.mubr.msk.f32.gmra.mxu1 %vm1121_vm15, %v18451_v52  ;;  %v7963_v51 = vld [vmem:[#allocation3 + $0xa4] sm:$0xff] }
 0x5c3   : > { %v6946_v9 = vadd.f32 %v6782_v55, %v18026_v34  ;;  %13962 = vmatprep.mubr.msk.f32.mxu0 %vm14620_vm5, %v14618_v2  ;;  %14101 = vmatprep.mubr.msk.f32.mxu1 %vm14620_vm5, %v14618_v2 }
 0x5c4   : > { %v13662_v61 = vpop.f32.mrf.mxu0  ;;  %v13801_v49 = vpop.f32.mrf.mxu1 }
 0x5c5   : > { %v18461_v25 = vadd.f32 %v7266_v14, %v6946_v9  ;;  %v7480_v9 = vld [vmem:[#allocation3 + $0xab] sm:$0xff] }
 0x5c6   : > { %v6787_v44 = vpop.f32.mrf.mxu0  ;;  %v7271_v26 = vpop.f32.mrf.mxu1  ;;  %13963 = vmatmul.mubr.msk.f32.gmra.mxu0 %vm1121_vm15, %v7479_v29  ;;  %14102 = vmatmul.mubr.msk.f32.gmra.mxu1 %vm1121_vm15, %v7963_v51  ;;  %v7964_v61 = vld [vmem:[#allocation3 + $0xac] sm:$0xff] }
 0x5c7   : > { %v6947_v34 = vadd.f32 %v6787_v44, %v18034_v21  ;;  %13965 = vmatprep.mubr.msk.f32.mxu0 %vm14620_vm5, %v14618_v2  ;;  %14104 = vmatprep.mubr.msk.f32.mxu1 %vm14620_vm5, %v14618_v2 }
 0x5c8   : > { %v13665_v41 = vpop.f32.mrf.mxu0  ;;  %v13804_v55 = vpop.f32.mrf.mxu1 }
 0x5c9   : > { %v18470_v14 = vadd.f32 %v7271_v26, %v6947_v34  ;;  %v7481_v26 = vld [vmem:[#allocation3 + $0xb3] sm:$0xff] }
 0x5ca   : > { %v6792_v49 = vpop.f32.mrf.mxu0  ;;  %v7276_v31 = vpop.f32.mrf.mxu1  ;;  %13966 = vmatmul.mubr.msk.f32.gmra.mxu0 %vm1121_vm15, %v7480_v9  ;;  %14105 = vmatmul.mubr.msk.f32.gmra.mxu1 %vm1121_vm15, %v7964_v61  ;;  %v7965_v34 = vld [vmem:[#allocation3 + $0xb4] sm:$0xff] }
 0x5cb   : > { %v6948_v21 = vadd.f32 %v6792_v49, %v18042_v36  ;;  %13968 = vmatprep.mubr.msk.f32.mxu0 %vm14620_vm5, %v14618_v2  ;;  %14107 = vmatprep.mubr.msk.f32.mxu1 %vm14620_vm5, %v14618_v2  ;;  %v7482_v49 = vld [vmem:[#allocation3 + $0xbb] sm:$0xff] }
 0x5cc   : > { %v13668_v29 = vpop.f32.mrf.mxu0  ;;  %v13807_v51 = vpop.f32.mrf.mxu1 }
 0x5cd   : > { %v18479_v44 = vadd.f32 %v7276_v31, %v6948_v21  ;;  %v18490_v21 = vld [vmem:[#allocation3 + $0xbc] sm:$0xff] }
 0x5ce   : > { %v6797_v41 = vpop.f32.mrf.mxu0  ;;  %v7281_v55 = vpop.f32.mrf.mxu1  ;;  %13969 = vmatmul.mubr.msk.f32.gmra.mxu0 %vm1121_vm15, %v7481_v26  ;;  %14108 = vmatmul.mubr.msk.f32.gmra.mxu1 %vm1121_vm15, %v7965_v34 }
 0x5cf   : > { %v6949_v36 = vadd.f32 %v6797_v41, %v18050_v24  ;;  %13971 = vmatprep.mubr.msk.f32.mxu0 %vm14620_vm5, %v14618_v2  ;;  %14110 = vmatprep.mubr.msk.f32.mxu1 %vm14620_vm5, %v14618_v2 }
 0x5d0   : > { %v13671_v9 = vpop.f32.mrf.mxu0  ;;  %v13810_v61 = vpop.f32.mrf.mxu1 }
 0x5d1   : > { %v18488_v31 = vadd.f32 %v7281_v55, %v6949_v36  ;;  %v7483_v55 = vld [vmem:[#allocation3 + $0xc3] sm:$0xff] }
 0x5d2   : > { %v6802_v29 = vpop.f32.mrf.mxu0  ;;  %v7286_v51 = vpop.f32.mrf.mxu1  ;;  %13972 = vmatmul.mubr.msk.f32.gmra.mxu0 %vm1121_vm15, %v7482_v49  ;;  %14111 = vmatmul.mubr.msk.f32.gmra.mxu1 %vm1121_vm15, %v18490_v21  ;;  %v18502_v36 = vld [vmem:[#allocation3 + $0xc4] sm:$0xff] }
 0x5d3   : > { %v6950_v24 = vadd.f32 %v6802_v29, %v18058_v1  ;;  %13974 = vmatprep.mubr.msk.f32.mxu0 %vm14620_vm5, %v14618_v2  ;;  %14113 = vmatprep.mubr.msk.f32.mxu1 %vm14620_vm5, %v14618_v2 }
 0x5d4   : > { %v13674_v26 = vpop.f32.mrf.mxu0  ;;  %v13813_v34 = vpop.f32.mrf.mxu1 }
 0x5d5   : > { %v18500_v41 = vadd.f32 %v7286_v51, %v6950_v24  ;;  %v7484_v24 = vld [vmem:[#allocation3 + $0xcb] sm:$0xff] }
 0x5d6   : > { %v6807_v9 = vpop.f32.mrf.mxu0  ;;  %v7291_v61 = vpop.f32.mrf.mxu1  ;;  %13975 = vmatmul.mubr.msk.f32.gmra.mxu0 %vm1121_vm15, %v7483_v55  ;;  %14114 = vmatmul.mubr.msk.f32.gmra.mxu1 %vm1121_vm15, %v18502_v36  ;;  %v7968_v26 = vld [vmem:[#allocation3 + $0xcc] sm:$0xff] }
 0x5d7   : > { %v6951_v1 = vadd.f32 %v6807_v9, %v18066_v47  ;;  %13977 = vmatprep.mubr.msk.f32.mxu0 %vm14620_vm5, %v14618_v2  ;;  %14116 = vmatprep.mubr.msk.f32.mxu1 %vm14620_vm5, %v14618_v2 }
 0x5d8   : > { %v13677_v49 = vpop.f32.mrf.mxu0  ;;  %v13816_v29 = vpop.f32.mrf.mxu1 }
 0x5d9   : > { %v18512_v51 = vadd.f32 %v7291_v61, %v6951_v1  ;;  %v7485_v1 = vld [vmem:[#allocation3 + $0xd3] sm:$0xff] }
 0x5da   : > { %v6812_v34 = vpop.f32.mrf.mxu0  ;;  %v7296_v17 = vpop.f32.mrf.mxu1  ;;  %13978 = vmatmul.mubr.msk.f32.gmra.mxu0 %vm1121_vm15, %v7484_v24  ;;  %14117 = vmatmul.mubr.msk.f32.gmra.mxu1 %vm1121_vm15, %v7968_v26  ;;  %v7969_v49 = vld [vmem:[#allocation3 + $0xd4] sm:$0xff] }
 0x5db   : > { %19883 = vst [vmem:[#allocation45_spill] sm:$0xff] %v18512_v51  ;;  %v6952_v47 = vadd.f32 %v6812_v34, %v18074_v59  ;;  %13980 = vmatprep.mubr.msk.f32.mxu0 %vm14620_vm5, %v14618_v2  ;;  %14119 = vmatprep.mubr.msk.f32.mxu1 %vm14620_vm5, %v14618_v2  ;;  %v7486_v34 = vld [vmem:[#allocation3 + $0xdb] sm:$0xff] }
 0x5dc   : > { %v13680_v55 = vpop.f32.mrf.mxu0  ;;  %v13819_v9 = vpop.f32.mrf.mxu1 }
 0x5dd   : > { %v18521_v61 = vadd.f32 %v7296_v17, %v6952_v47  ;;  %v7970_v47 = vld [vmem:[#allocation3 + $0xdc] sm:$0xff] }
 0x5de   : > { %v6817_v29 = vpop.f32.mrf.mxu0  ;;  %v7301_v51 = vpop.f32.mrf.mxu1  ;;  %13981 = vmatmul.mubr.msk.f32.gmra.mxu0 %vm1121_vm15, %v7485_v1  ;;  %14120 = vmatmul.mubr.msk.f32.gmra.mxu1 %vm1121_vm15, %v7969_v49 }
 0x5df   : > { %v6953_v59 = vadd.f32 %v6817_v29, %v18082_v3  ;;  %13983 = vmatprep.mubr.msk.f32.mxu0 %vm14620_vm5, %v14618_v2  ;;  %14122 = vmatprep.mubr.msk.f32.mxu1 %vm14620_vm5, %v14618_v2  ;;  %v7487_v29 = vld [vmem:[#allocation3 + $0xe3] sm:$0xff] }
 0x5e0   : > { %v13683_v24 = vpop.f32.mrf.mxu0  ;;  %v13822_v26 = vpop.f32.mrf.mxu1 }
 0x5e1   : > { %v18530_v17 = vadd.f32 %v7301_v51, %v6953_v59  ;;  %v18541_v59 = vld [vmem:[#allocation3 + $0xe4] sm:$0xff] }
 0x5e2   : > { %v6822_v55 = vpop.f32.mrf.mxu0  ;;  %v7306_v9 = vpop.f32.mrf.mxu1  ;;  %13984 = vmatmul.mubr.msk.f32.gmra.mxu0 %vm1121_vm15, %v7486_v34  ;;  %14123 = vmatmul.mubr.msk.f32.gmra.mxu1 %vm1121_vm15, %v7970_v47 }
 0x5e3   : > { %v6954_v3 = vadd.f32 %v6822_v55, %v18090_v15  ;;  %13986 = vmatprep.mubr.msk.f32.mxu0 %vm14620_vm5, %v14618_v2  ;;  %14125 = vmatprep.mubr.msk.f32.mxu1 %vm14620_vm5, %v14618_v2 }
 0x5e4   : > { %v13686_v1 = vpop.f32.mrf.mxu0  ;;  %v13825_v49 = vpop.f32.mrf.mxu1 }
 0x5e5   : > { %v18539_v51 = vadd.f32 %v7306_v9, %v6954_v3  ;;  %v7488_v9 = vld [vmem:[#allocation3 + $0xeb] sm:$0xff] }
 0x5e6   : > { %v6827_v24 = vpop.f32.mrf.mxu0  ;;  %v7311_v26 = vpop.f32.mrf.mxu1  ;;  %13987 = vmatmul.mubr.msk.f32.gmra.mxu0 %vm1121_vm15, %v7487_v29  ;;  %14126 = vmatmul.mubr.msk.f32.gmra.mxu1 %vm1121_vm15, %v18541_v59  ;;  %v18553_v3 = vld [vmem:[#allocation3 + $0xec] sm:$0xff] }
 0x5e7   : > { %v6955_v15 = vadd.f32 %v6827_v24, %v18098_v60  ;;  %13989 = vmatprep.mubr.msk.f32.mxu0 %vm14620_vm5, %v14618_v2  ;;  %14128 = vmatprep.mubr.msk.f32.mxu1 %vm14620_vm5, %v14618_v2 }
 0x5e8   : > { %v13689_v34 = vpop.f32.mrf.mxu0  ;;  %v13828_v47 = vpop.f32.mrf.mxu1 }
 0x5e9   : > { %v18551_v55 = vadd.f32 %v7311_v26, %v6955_v15  ;;  %v7489_v15 = vld [vmem:[#allocation3 + $0xf3] sm:$0xff] }
 0x5ea   : > { %v6832_v1 = vpop.f32.mrf.mxu0  ;;  %v7316_v49 = vpop.f32.mrf.mxu1  ;;  %13990 = vmatmul.mubr.msk.f32.gmra.mxu0 %vm1121_vm15, %v7488_v9  ;;  %14129 = vmatmul.mubr.msk.f32.gmra.mxu1 %vm1121_vm15, %v18553_v3  ;;  %v7973_v34 = vld [vmem:[#allocation3 + $0xf4] sm:$0xff] }
 0x5eb   : > { %19884 = vst [vmem:[#allocation46_spill] sm:$0xff] %v18551_v55  ;;  %v6956_v60 = vadd.f32 %v6832_v1, %v18106_v40  ;;  %13992 = vmatprep.mubr.msk.f32.mxu0 %vm14620_vm5, %v14618_v2  ;;  %14131 = vmatprep.mubr.msk.f32.mxu1 %vm14620_vm5, %v14618_v2 }
 0x5ec   : > { %v13692_v29 = vpop.f32.mrf.mxu0  ;;  %v13831_v24 = vpop.f32.mrf.mxu1 }
 0x5ed   : > { %v18563_v26 = vadd.f32 %v7316_v49, %v6956_v60  ;;  %v7490_v60 = vld [vmem:[#allocation3 + $0xfb] sm:$0xff] }
 0x5ee   : > { %v6837_v47 = vpop.f32.mrf.mxu0  ;;  %v7321_v55 = vpop.f32.mrf.mxu1  ;;  %13993 = vmatmul.mubr.msk.f32.gmra.mxu0 %vm1121_vm15, %v7489_v15  ;;  %14132 = vmatmul.mubr.msk.f32.gmra.mxu1 %vm1121_vm15, %v7973_v34  ;;  %v7974_v29 = vld [vmem:[#allocation3 + $0xfc] sm:$0xff] }
 0x5ef   : > { %19885 = vst [vmem:[#allocation47_spill] sm:$0xff] %v18563_v26  ;;  %v6957_v40 = vadd.f32 %v6837_v47, %v18114_v45  ;;  %13995 = vmatprep.mubr.msk.f32.mxu0 %vm14620_vm5, %v14618_v2  ;;  %14134 = vmatprep.mubr.msk.f32.mxu1 %vm14620_vm5, %v14618_v2  ;;  %v7491_v47 = vld [vmem:[#allocation3 + $0x103] sm:$0xff] }
 0x5f0   : > { %v13695_v9 = vpop.f32.mrf.mxu0  ;;  %v13834_v1 = vpop.f32.mrf.mxu1 }
 0x5f1   : > { %v18572_v49 = vadd.f32 %v7321_v55, %v6957_v40  ;;  %v7975_v40 = vld [vmem:[#allocation3 + $0x104] sm:$0xff] }
 0x5f2   : > { %v6842_v24 = vpop.f32.mrf.mxu0  ;;  %v7326_v26 = vpop.f32.mrf.mxu1  ;;  %13996 = vmatmul.mubr.msk.f32.gmra.mxu0 %vm1121_vm15, %v7490_v60  ;;  %14135 = vmatmul.mubr.msk.f32.gmra.mxu1 %vm1121_vm15, %v7974_v29 }
 0x5f3   : > { %v6958_v45 = vadd.f32 %v6842_v24, %v18122_v20  ;;  %13998 = vmatprep.mubr.msk.f32.mxu0 %vm14620_vm5, %v14618_v2  ;;  %14137 = vmatprep.mubr.msk.f32.mxu1 %vm14620_vm5, %v14618_v2  ;;  %v7492_v24 = vld [vmem:[#allocation3 + $0x10b] sm:$0xff] }
 0x5f4   : > { %v13698_v15 = vpop.f32.mrf.mxu0  ;;  %v13837_v34 = vpop.f32.mrf.mxu1 }
 0x5f5   : > { %v18581_v55 = vadd.f32 %v7326_v26, %v6958_v45  ;;  %v18592_v45 = vld [vmem:[#allocation3 + $0x10c] sm:$0xff] }
 0x5f6   : > { %v6847_v9 = vpop.f32.mrf.mxu0  ;;  %v7331_v1 = vpop.f32.mrf.mxu1  ;;  %13999 = vmatmul.mubr.msk.f32.gmra.mxu0 %vm1121_vm15, %v7491_v47  ;;  %14138 = vmatmul.mubr.msk.f32.gmra.mxu1 %vm1121_vm15, %v7975_v40 }
 0x5f7   : > { %v6959_v20 = vadd.f32 %v6847_v9, %v18130_v7  ;;  %14001 = vmatprep.mubr.msk.f32.mxu0 %vm14620_vm5, %v14618_v2  ;;  %14140 = vmatprep.mubr.msk.f32.mxu1 %vm14620_vm5, %v14618_v2 }
 0x5f8   : > { %v13701_v60 = vpop.f32.mrf.mxu0  ;;  %v13840_v29 = vpop.f32.mrf.mxu1 }
 0x5f9   : > { %v18590_v26 = vadd.f32 %v7331_v1, %v6959_v20  ;;  %v7493_v1 = vld [vmem:[#allocation3 + $0x113] sm:$0xff] }
 0x5fa   : > { %v6852_v15 = vpop.f32.mrf.mxu0  ;;  %v7336_v34 = vpop.f32.mrf.mxu1  ;;  %14002 = vmatmul.mubr.msk.f32.gmra.mxu0 %vm1121_vm15, %v7492_v24  ;;  %14141 = vmatmul.mubr.msk.f32.gmra.mxu1 %vm1121_vm15, %v18592_v45  ;;  %v18604_v20 = vld [vmem:[#allocation3 + $0x114] sm:$0xff] }
 0x5fb   : > { %v6960_v7 = vadd.f32 %v6852_v15, %v18138_v53  ;;  %14004 = vmatprep.mubr.msk.f32.mxu0 %vm14620_vm5, %v14618_v2  ;;  %14143 = vmatprep.mubr.msk.f32.mxu1 %vm14620_vm5, %v14618_v2 }
 0x5fc   : > { %v13704_v47 = vpop.f32.mrf.mxu0  ;;  %v13843_v40 = vpop.f32.mrf.mxu1 }
 0x5fd   : > { %v18602_v9 = vadd.f32 %v7336_v34, %v6960_v7  ;;  %v7494_v7 = vld [vmem:[#allocation3 + $0x11b] sm:$0xff] }
 0x5fe   : > { %v6857_v60 = vpop.f32.mrf.mxu0  ;;  %v7341_v29 = vpop.f32.mrf.mxu1  ;;  %14005 = vmatmul.mubr.msk.f32.gmra.mxu0 %vm1121_vm15, %v7493_v1  ;;  %14144 = vmatmul.mubr.msk.f32.gmra.mxu1 %vm1121_vm15, %v18604_v20  ;;  %v7978_v47 = vld [vmem:[#allocation3 + $0x11c] sm:$0xff] }
 0x5ff   : > { %19886 = vst [vmem:[#allocation48_spill] sm:$0xff] %v18602_v9  ;;  %v6961_v53 = vadd.f32 %v6857_v60, %v18146_v32  ;;  %14007 = vmatprep.mubr.msk.f32.mxu0 %vm14620_vm5, %v14618_v2  ;;  %14146 = vmatprep.mubr.msk.f32.mxu1 %vm14620_vm5, %v14618_v2 }
 0x600   : > { %v13707_v24 = vpop.f32.mrf.mxu0  ;;  %v13846_v15 = vpop.f32.mrf.mxu1 }
 0x601   : > { %v18614_v34 = vadd.f32 %v7341_v29, %v6961_v53  ;;  %v7495_v53 = vld [vmem:[#allocation3 + $0x123] sm:$0xff] }
 0x602   : > { %v6862_v40 = vpop.f32.mrf.mxu0  ;;  %v7346_v9 = vpop.f32.mrf.mxu1  ;;  %14008 = vmatmul.mubr.msk.f32.gmra.mxu0 %vm1121_vm15, %v7494_v7  ;;  %14147 = vmatmul.mubr.msk.f32.gmra.mxu1 %vm1121_vm15, %v7978_v47  ;;  %v7979_v24 = vld [vmem:[#allocation3 + $0x124] sm:$0xff] }
 0x603   : > { %19887 = vst [vmem:[#allocation49_spill] sm:$0xff] %v18614_v34  ;;  %v6962_v32 = vadd.f32 %v6862_v40, %v18154_v11  ;;  %14010 = vmatprep.mubr.msk.f32.mxu0 %vm14620_vm5, %v14618_v2  ;;  %14149 = vmatprep.mubr.msk.f32.mxu1 %vm14620_vm5, %v14618_v2  ;;  %v7496_v40 = vld [vmem:[#allocation3 + $0x12b] sm:$0xff] }
 0x604   : > { %v13710_v1 = vpop.f32.mrf.mxu0  ;;  %v13849_v60 = vpop.f32.mrf.mxu1 }
 0x605   : > { %v18623_v29 = vadd.f32 %v7346_v9, %v6962_v32  ;;  %v7980_v32 = vld [vmem:[#allocation3 + $0x12c] sm:$0xff] }
 0x606   : > { %v6867_v15 = vpop.f32.mrf.mxu0  ;;  %v7351_v34 = vpop.f32.mrf.mxu1  ;;  %14011 = vmatmul.mubr.msk.f32.gmra.mxu0 %vm1121_vm15, %v7495_v53  ;;  %14150 = vmatmul.mubr.msk.f32.gmra.mxu1 %vm1121_vm15, %v7979_v24 }
 0x607   : > { %v6963_v11 = vadd.f32 %v6867_v15, %v18162_v23  ;;  %14013 = vmatprep.mubr.msk.f32.mxu0 %vm14620_vm5, %v14618_v2  ;;  %14152 = vmatprep.mubr.msk.f32.mxu1 %vm14620_vm5, %v14618_v2  ;;  %v7497_v15 = vld [vmem:[#allocation3 + $0x133] sm:$0xff] }
 0x608   : > { %v13713_v7 = vpop.f32.mrf.mxu0  ;;  %v13852_v47 = vpop.f32.mrf.mxu1 }
 0x609   : > { %v18632_v9 = vadd.f32 %v7351_v34, %v6963_v11  ;;  %v7981_v11 = vld [vmem:[#allocation3 + $0x134] sm:$0xff] }
 0x60a   : > { %v6872_v1 = vpop.f32.mrf.mxu0  ;;  %v7356_v60 = vpop.f32.mrf.mxu1  ;;  %14014 = vmatmul.mubr.msk.f32.gmra.mxu0 %vm1121_vm15, %v7496_v40  ;;  %14153 = vmatmul.mubr.msk.f32.gmra.mxu1 %vm1121_vm15, %v7980_v32 }
 0x60b   : > { %v6964_v23 = vadd.f32 %v6872_v1, %v18170_v50  ;;  %14016 = vmatprep.mubr.msk.f32.mxu0 %vm14620_vm5, %v14618_v2  ;;  %14155 = vmatprep.mubr.msk.f32.mxu1 %vm14620_vm5, %v14618_v2 }
 0x60c   : > { %v13716_v53 = vpop.f32.mrf.mxu0  ;;  %v13855_v24 = vpop.f32.mrf.mxu1 }
 0x60d   : > { %v18641_v34 = vadd.f32 %v7356_v60, %v6964_v23  ;;  %v7498_v60 = vld [vmem:[#allocation3 + $0x13b] sm:$0xff] }
 0x60e   : > { %v6877_v7 = vpop.f32.mrf.mxu0  ;;  %v7361_v47 = vpop.f32.mrf.mxu1  ;;  %14017 = vmatmul.mubr.msk.f32.gmra.mxu0 %vm1121_vm15, %v7497_v15  ;;  %14156 = vmatmul.mubr.msk.f32.gmra.mxu1 %vm1121_vm15, %v7981_v11  ;;  %v18652_v23 = vld [vmem:[#allocation3 + $0x13c] sm:$0xff] }
 0x60f   : > { %v6965_v50 = vadd.f32 %v6877_v7, %v18178_v42  ;;  %14019 = vmatprep.mubr.msk.f32.mxu0 %vm14620_vm5, %v14618_v2  ;;  %14158 = vmatprep.mubr.msk.f32.mxu1 %vm14620_vm5, %v14618_v2 }
 0x610   : > { %v13719_v40 = vpop.f32.mrf.mxu0  ;;  %v13858_v32 = vpop.f32.mrf.mxu1 }
 0x611   : > { %v18650_v1 = vadd.f32 %v7361_v47, %v6965_v50  ;;  %v7499_v47 = vld [vmem:[#allocation3 + $0x143] sm:$0xff] }
 0x612   : > { %v6882_v53 = vpop.f32.mrf.mxu0  ;;  %v7366_v24 = vpop.f32.mrf.mxu1  ;;  %14020 = vmatmul.mubr.msk.f32.gmra.mxu0 %vm1121_vm15, %v7498_v60  ;;  %14159 = vmatmul.mubr.msk.f32.gmra.mxu1 %vm1121_vm15, %v18652_v23  ;;  %v18664_v50 = vld [vmem:[#allocation3 + $0x144] sm:$0xff] }
 0x613   : > { %v6966_v42 = vadd.f32 %v6882_v53, %v18186_v58  ;;  %14022 = vmatprep.mubr.msk.f32.mxu0 %vm14620_vm5, %v14618_v2  ;;  %14161 = vmatprep.mubr.msk.f32.mxu1 %vm14620_vm5, %v14618_v2 }
 0x614   : > { %v13722_v15 = vpop.f32.mrf.mxu0  ;;  %v13861_v11 = vpop.f32.mrf.mxu1 }
 0x615   : > { %v18662_v7 = vadd.f32 %v7366_v24, %v6966_v42  ;;  %v7500_v42 = vld [vmem:[#allocation3 + $0x14b] sm:$0xff] }
 0x616   : > { %v6887_v40 = vpop.f32.mrf.mxu0  ;;  %v7371_v32 = vpop.f32.mrf.mxu1  ;;  %14023 = vmatmul.mubr.msk.f32.gmra.mxu0 %vm1121_vm15, %v7499_v47  ;;  %14162 = vmatmul.mubr.msk.f32.gmra.mxu1 %vm1121_vm15, %v18664_v50  ;;  %v18676_v15 = vld [vmem:[#allocation3 + $0x14c] sm:$0xff] }
 0x617   : > { %19888 = vst [vmem:[#allocation50_spill] sm:$0xff] %v18662_v7  ;;  %v6967_v58 = vadd.f32 %v6887_v40, %v18194_v12  ;;  %14025 = vmatprep.mubr.msk.f32.mxu0 %vm14620_vm5, %v14618_v2  ;;  %14164 = vmatprep.mubr.msk.f32.mxu1 %vm14620_vm5, %v14618_v2 }
 0x618   : > { %v13725_v60 = vpop.f32.mrf.mxu0  ;;  %v13864_v53 = vpop.f32.mrf.mxu1 }
 0x619   : > { %v18674_v24 = vadd.f32 %v7371_v32, %v6967_v58  ;;  %v7501_v60 = vld [vmem:[#allocation3 + $0x153] sm:$0xf] }
 0x61a   : > { %v6892_v11 = vpop.f32.mrf.mxu0  ;;  %v7376_v47 = vpop.f32.mrf.mxu1  ;;  %14026 = vmatmul.mubr.msk.f32.gmra.mxu0 %vm1121_vm15, %v7500_v42  ;;  %14165 = vmatmul.mubr.msk.f32.gmra.mxu1 %vm1121_vm15, %v18676_v15  ;;  %v7985_v53 = vld [vmem:[#allocation3 + $0x154] sm:$0xf] }
 0x61b   : > { %19889 = vst [vmem:[#allocation51_spill] sm:$0xff] %v18674_v24  ;;  %v6968_v12 = vadd.f32 %v6892_v11, %v18202_v43  ;;  %14028 = vmatprep.mubr.msk.f32.mxu0 %vm14620_vm5, %v14618_v2  ;;  %14167 = vmatprep.mubr.msk.f32.mxu1 %vm14620_vm5, %v14618_v2 }
 0x61c   : > { %v13728_v40 = vpop.f32.mrf.mxu0  ;;  %v13867_v32 = vpop.f32.mrf.mxu1 }
 0x61d   : > { %v18686_v58 = vadd.f32 %v7376_v47, %v6968_v12  ;;  %v10982_v47 = vld [vmem:[%s19644_s6 + $0x238] sm:$0xff] }
 0x61e   : > { %v6897_v24 = vpop.f32.mrf.mxu0  ;;  %v7381_v7 = vpop.f32.mrf.mxu1  ;;  %14029 = vmatmul.mubr.msk.f32.gmra.mxu0 %vm1121_vm15, %v7501_v60  ;;  %14168 = vmatmul.mubr.msk.f32.gmra.mxu1 %vm1121_vm15, %v7985_v53  ;;  %v8913_v40 = vld [vmem:[#allocation3 + $0x25] sm:$0xff] }
 0x61f   : > { %v6969_v43 = vadd.f32 %v6897_v24, %v18210_v16  ;;  %14186 = vmatprep.mubr.msk.f32.mxu0 %vm14620_vm5, %v14618_v2  ;;  %14325 = vmatprep.mubr.msk.f32.mxu1 %vm14620_vm5, %v14618_v2  ;;  %v10981_v16 = vld [vmem:[%s19644_s6 + $0x230] sm:$0xff] }
 0x620   : > { %v13731_v42 = vpop.f32.mrf.mxu0  ;;  %v13870_v11 = vpop.f32.mrf.mxu1 }
 0x621   : > { %v18698_v12 = vadd.f32 %v7381_v7, %v6969_v43  ;;  %v8914_v43 = vld [vmem:[#allocation3 + $0x2d] sm:$0xff] }
 0x622   : > { %v6902_v32 = vpop.f32.mrf.mxu0  ;;  %v7386_v60 = vpop.f32.mrf.mxu1  ;;  %14187 = vmatmul.mubr.msk.f32.vlgmr.msra.gmra.mxu0 %vm1121_vm15, %v18243_v10  ;;  %14326 = vmatmul.mubr.msk.f32.vlgmr.msra.gmra.mxu1 %vm1121_vm15, %v8913_v40 }
 0x623   : > { %v6970_v24 = vadd.f32 %v6902_v32, %v18224_v39  ;;  %14449 = vmatpush3.msra.mxu0 %v10982_v47  ;;  %14189 = vmatprep.mubr.msk.f32.mxu0 %vm14620_vm5, %v14618_v2  ;;  %v10980_v39 = vld [vmem:[%s19644_s6 + $0x228] sm:$0xff] }
 0x624   : > { %v13734_v7 = vpop.f32.mrf.mxu0  ;;  %v13873_v53 = vpop.f32.mrf.mxu1  ;;  %14328 = vmatprep.mubr.msk.f32.mxu1 %vm14620_vm5, %v14618_v2  ;;  %14450 = vmatprep.subr.mxu0 %v14618_v2 }
 0x625   : > { %v18712_v10 = vadd.f32 %v7386_v60, %v6970_v24  ;;  %14451 = vmatpush3.msra.mxu0 %v10981_v16 }
 0x626   : > { %v6907_v42 = vpop.f32.mrf.mxu0  ;;  %v7391_v11 = vpop.f32.mrf.mxu1  ;;  %14190 = vmatmul.mubr.msk.f32.gmra.mxu0 %vm1121_vm15, %v18258_v4  ;;  %14329 = vmatmul.mubr.msk.f32.gmra.mxu1 %vm1121_vm15, %v8914_v43  ;;  %v8915_v4 = vld [vmem:[#allocation3 + $0x35] sm:$0xff] }
 0x627   : > { %v6971_v47 = vadd.f32 %v6907_v42, %v18236_v35  ;;  %14192 = vmatprep.mubr.msk.f32.mxu0 %vm14620_vm5, %v14618_v2  ;;  %14331 = vmatprep.mubr.msk.f32.mxu1 %vm14620_vm5, %v14618_v2  ;;  %v10979_v35 = vld [vmem:[%s19644_s6 + $0x220] sm:$0xff] }
 0x628   : > { %v13737_v40 = vpop.f32.mrf.mxu0  ;;  %v13876_v32 = vpop.f32.mrf.mxu1  ;;  %14452 = vmatprep.subr.mxu0 %v14618_v2 }
 0x629   : > { %v18726_v60 = vadd.f32 %v7391_v11, %v6971_v47  ;;  %14453 = vmatpush3.msra.mxu0 %v10980_v39  ;;  %v8916_v11 = vld [vmem:[#allocation3 + $0x3d] sm:$0xff] }
 0x62a   : > { %v6912_v16 = vpop.f32.mrf.mxu0  ;;  %v7396_v24 = vpop.f32.mrf.mxu1  ;;  %14193 = vmatmul.mubr.msk.f32.gmra.mxu0 %vm1121_vm15, %v18273_v37  ;;  %14332 = vmatmul.mubr.msk.f32.gmra.mxu1 %vm1121_vm15, %v8915_v4  ;;  %v8432_v37 = vld [vmem:[#allocation3 + $0x3c] sm:$0xff] }
 0x62b   : > { %v6972_v7 = vadd.f32 %v6912_v16, %v18251_v30  ;;  %14195 = vmatprep.mubr.msk.f32.mxu0 %vm14620_vm5, %v14618_v2  ;;  %14334 = vmatprep.mubr.msk.f32.mxu1 %vm14620_vm5, %v14618_v2  ;;  %v10978_v30 = vld [vmem:[%s19644_s6 + $0x218] sm:$0xff] }
 0x62c   : > { %v13740_v53 = vpop.f32.mrf.mxu0  ;;  %v13879_v43 = vpop.f32.mrf.mxu1  ;;  %14454 = vmatprep.subr.mxu0 %v14618_v2 }
 0x62d   : > { %v18740_v42 = vadd.f32 %v7396_v24, %v6972_v7  ;;  %14455 = vmatpush3.msra.mxu0 %v10979_v35  ;;  %v8917_v24 = vld [vmem:[#allocation3 + $0x45] sm:$0xff] }
 0x62e   : > { %v6917_v39 = vpop.f32.mrf.mxu0  ;;  %v7401_v47 = vpop.f32.mrf.mxu1  ;;  %14196 = vmatmul.mubr.msk.f32.gmra.mxu0 %vm1121_vm15, %v8432_v37  ;;  %14335 = vmatmul.mubr.msk.f32.gmra.mxu1 %vm1121_vm15, %v8916_v11 }
 0x62f   : > { %v6973_v40 = vadd.f32 %v6917_v39, %v18266_v54  ;;  %14198 = vmatprep.mubr.msk.f32.mxu0 %vm14620_vm5, %v14618_v2  ;;  %14337 = vmatprep.mubr.msk.f32.mxu1 %vm14620_vm5, %v14618_v2  ;;  %v10977_v54 = vld [vmem:[%s19644_s6 + $0x210] sm:$0xff] }
 0x630   : > { %v13743_v32 = vpop.f32.mrf.mxu0  ;;  %v13882_v4 = vpop.f32.mrf.mxu1  ;;  %14456 = vmatprep.subr.mxu0 %v14618_v2 }
 0x631   : > { %v18753_v16 = vadd.f32 %v7401_v47, %v6973_v40  ;;  %14457 = vmatpush3.msra.mxu0 %v10978_v30 }
 0x632   : > { %v6922_v35 = vpop.f32.mrf.mxu0  ;;  %v7406_v7 = vpop.f32.mrf.mxu1  ;;  %14199 = vmatmul.mubr.msk.f32.gmra.mxu0 %vm1121_vm15, %v18300_v5  ;;  %14338 = vmatmul.mubr.msk.f32.gmra.mxu1 %vm1121_vm15, %v8917_v24  ;;  %v8918_v5 = vld [vmem:[#allocation3 + $0x4d] sm:$0xff]  ;;  %v8919_v24 = vld [vmem:[#allocation3 + $0x55] sm:$0xff] }
 0x633   : > { %v6974_v53 = vadd.f32 %v6922_v35, %v18281_v8  ;;  %14201 = vmatprep.mubr.msk.f32.mxu0 %vm14620_vm5, %v14618_v2  ;;  %14340 = vmatprep.mubr.msk.f32.mxu1 %vm14620_vm5, %v14618_v2  ;;  %v10976_v8 = vld [vmem:[%s19644_s6 + $0x208] sm:$0xff] }
 0x634   : > { %v13746_v43 = vpop.f32.mrf.mxu0  ;;  %v13885_v37 = vpop.f32.mrf.mxu1  ;;  %14458 = vmatprep.subr.mxu0 %v14618_v2 }
 0x635   : > { %v18767_v11 = vadd.f32 %v7406_v7, %v6974_v53  ;;  %14459 = vmatpush3.msra.mxu0 %v10977_v54 }
 0x636   : > { %v6927_v39 = vpop.f32.mrf.mxu0  ;;  %v7411_v47 = vpop.f32.mrf.mxu1  ;;  %14202 = vmatmul.mubr.msk.f32.gmra.mxu0 %vm1121_vm15, %v18320_v62  ;;  %14341 = vmatmul.mubr.msk.f32.gmra.mxu1 %vm1121_vm15, %v8918_v5  ;;  %v8435_v62 = vld [vmem:[#allocation3 + $0x54] sm:$0xff]  ;;  %v8436_v5 = vld [vmem:[#allocation3 + $0x5c] sm:$0xff] }
 0x637   : > { %v6975_v30 = vadd.f32 %v6927_v39, %v18293_v27  ;;  %14204 = vmatprep.mubr.msk.f32.mxu0 %vm14620_vm5, %v14618_v2  ;;  %14343 = vmatprep.mubr.msk.f32.mxu1 %vm14620_vm5, %v14618_v2  ;;  %v10975_v27 = vld [vmem:[%s19644_s6 + $0x200] sm:$0xff]  ;;  %v8920_v39 = vld [vmem:[#allocation3 + $0x5d] sm:$0xff] }
 0x638   : > { %v13749_v40 = vpop.f32.mrf.mxu0  ;;  %v13888_v32 = vpop.f32.mrf.mxu1  ;;  %14460 = vmatprep.subr.mxu0 %v14618_v2 }
 0x639   : > { %v18781_v4 = vadd.f32 %v7411_v47, %v6975_v30  ;;  %14461 = vmatpush3.msra.mxu0 %v10976_v8 }
 0x63a   : > { %v6932_v35 = vpop.f32.mrf.mxu0  ;;  %v7416_v7 = vpop.f32.mrf.mxu1  ;;  %14205 = vmatmul.mubr.msk.f32.gmra.mxu0 %vm1121_vm15, %v8435_v62  ;;  %14344 = vmatmul.mubr.msk.f32.gmra.mxu1 %vm1121_vm15, %v8919_v24  ;;  %v8437_v62 = vld [vmem:[#allocation3 + $0x64] sm:$0xff] }
 0x63b   : > { %v6976_v54 = vadd.f32 %v6932_v35, %v18311_v18  ;;  %14207 = vmatprep.mubr.msk.f32.mxu0 %vm14620_vm5, %v14618_v2  ;;  %14346 = vmatprep.mubr.msk.f32.mxu1 %vm14620_vm5, %v14618_v2  ;;  %v8921_v24 = vld [vmem:[#allocation3 + $0x65] sm:$0xff] }
 0x63c   : > { %v13752_v53 = vpop.f32.mrf.mxu0  ;;  %v13891_v43 = vpop.f32.mrf.mxu1  ;;  %14462 = vmatprep.subr.mxu0 %v14618_v2 }
 0x63d   : > { %v18794_v37 = vadd.f32 %v7416_v7, %v6976_v54  ;;  %14463 = vmatpush3.msra.mxu0 %v10975_v27  ;;  %v8922_v43 = vld [vmem:[#allocation3 + $0x6d] sm:$0xff] }
 0x63e   : > { %v7700_v47 = vpop.f32.mrf.mxu0  ;;  %v8184_v8 = vpop.f32.mrf.mxu1  ;;  %14208 = vmatmul.mubr.msk.f32.gmra.mxu0 %vm1121_vm15, %v8436_v5  ;;  %14347 = vmatmul.mubr.msk.f32.gmra.mxu1 %vm1121_vm15, %v8920_v39 }
 0x63f   : > { %v7904_v18 = vadd.f32 %v7700_v47, %v18336_v63  ;;  %14210 = vmatprep.mubr.msk.f32.mxu0 %vm14620_vm5, %v14618_v2  ;;  %14349 = vmatprep.mubr.msk.f32.mxu1 %vm14620_vm5, %v14618_v2 }
 0x640   : > { %v13910_v30 = vpop.f32.mrf.mxu0  ;;  %v14049_v40 = vpop.f32.mrf.mxu1 }
 0x641   : > { %v18803_v32 = vadd.f32 %v8184_v8, %v7904_v18  ;;  %v8923_v30 = vld [vmem:[#allocation3 + $0x75] sm:$0xff] }
 0x642   : > { %v7705_v35 = vpop.f32.mrf.mxu0  ;;  %v8189_v7 = vpop.f32.mrf.mxu1  ;;  %14211 = vmatmul.mubr.msk.f32.gmra.mxu0 %vm1121_vm15, %v8437_v62  ;;  %14350 = vmatmul.mubr.msk.f32.gmra.mxu1 %vm1121_vm15, %v8921_v24 }
 0x643   : > { %v7905_v63 = vadd.f32 %v7705_v35, %v18348_v33  ;;  %14213 = vmatprep.mubr.msk.f32.mxu0 %vm14620_vm5, %v14618_v2  ;;  %14352 = vmatprep.mubr.msk.f32.mxu1 %vm14620_vm5, %v14618_v2 }
 0x644   : > { %v13913_v27 = vpop.f32.mrf.mxu0  ;;  %v14052_v54 = vpop.f32.mrf.mxu1 }
 0x645   : > { %v18812_v53 = vadd.f32 %v8189_v7, %v7905_v63  ;;  %v8440_v7 = vld [vmem:[#allocation3 + $0x7c] sm:$0xff] }
 0x646   : > { %v7710_v5 = vpop.f32.mrf.mxu0  ;;  %v8194_v39 = vpop.f32.mrf.mxu1  ;;  %14214 = vmatmul.mubr.msk.f32.gmra.mxu0 %vm1121_vm15, %v18376_v56  ;;  %14353 = vmatmul.mubr.msk.f32.gmra.mxu1 %vm1121_vm15, %v8922_v43  ;;  %v8924_v63 = vld [vmem:[#allocation3 + $0x7d] sm:$0xff] }
 0x647   : > { %v7906_v33 = vadd.f32 %v7710_v5, %v18361_v38  ;;  %14216 = vmatprep.mubr.msk.f32.mxu0 %vm14620_vm5, %v14618_v2  ;;  %14355 = vmatprep.mubr.msk.f32.mxu1 %vm14620_vm5, %v14618_v2 }
 0x648   : > { %v13916_v47 = vpop.f32.mrf.mxu0  ;;  %v14055_v8 = vpop.f32.mrf.mxu1 }
 0x649   : > { %v18822_v18 = vadd.f32 %v8194_v39, %v7906_v33  ;;  %v8441_v39 = vld [vmem:[#allocation3 + $0x84] sm:$0xff] }
 0x64a   : > { %v7715_v40 = vpop.f32.mrf.mxu0  ;;  %v8199_v62 = vpop.f32.mrf.mxu1  ;;  %14217 = vmatmul.mubr.msk.f32.gmra.mxu0 %vm1121_vm15, %v18392_v48  ;;  %14356 = vmatmul.mubr.msk.f32.gmra.mxu1 %vm1121_vm15, %v8923_v30  ;;  %v8925_v33 = vld [vmem:[#allocation3 + $0x85] sm:$0xff] }
 0x64b   : > { %v7907_v38 = vadd.f32 %v7715_v40, %v18374_v46  ;;  %14219 = vmatprep.mubr.msk.f32.mxu0 %vm14620_vm5, %v14618_v2  ;;  %14358 = vmatprep.mubr.msk.f32.mxu1 %vm14620_vm5, %v14618_v2 }
 0x64c   : > { %v13919_v56 = vpop.f32.mrf.mxu0  ;;  %v14058_v24 = vpop.f32.mrf.mxu1 }
 0x64d   : > { %v18832_v35 = vadd.f32 %v8199_v62, %v7907_v38  ;;  %v8442_v38 = vld [vmem:[#allocation3 + $0x8c] sm:$0xff] }
 0x64e   : > { %v7720_v27 = vpop.f32.mrf.mxu0  ;;  %v8204_v54 = vpop.f32.mrf.mxu1  ;;  %14220 = vmatmul.mubr.msk.f32.gmra.mxu0 %vm1121_vm15, %v8440_v7  ;;  %14359 = vmatmul.mubr.msk.f32.gmra.mxu1 %vm1121_vm15, %v8924_v63  ;;  %v8926_v56 = vld [vmem:[#allocation3 + $0x8d] sm:$0xff] }
 0x64f   : > { %v7908_v46 = vadd.f32 %v7720_v27, %v18390_v57  ;;  %14222 = vmatprep.mubr.msk.f32.mxu0 %vm14620_vm5, %v14618_v2  ;;  %14361 = vmatprep.mubr.msk.f32.mxu1 %vm14620_vm5, %v14618_v2 }
 0x650   : > { %v13922_v48 = vpop.f32.mrf.mxu0  ;;  %v14061_v43 = vpop.f32.mrf.mxu1 }
 0x651   : > { %v18841_v5 = vadd.f32 %v8204_v54, %v7908_v46  ;;  %v8927_v46 = vld [vmem:[#allocation3 + $0x95] sm:$0xff] }
 0x652   : > { %v7725_v47 = vpop.f32.mrf.mxu0  ;;  %v8209_v8 = vpop.f32.mrf.mxu1  ;;  %14223 = vmatmul.mubr.msk.f32.gmra.mxu0 %vm1121_vm15, %v8441_v39  ;;  %14362 = vmatmul.mubr.msk.f32.gmra.mxu1 %vm1121_vm15, %v8925_v33 }
 0x653   : > { %v7909_v57 = vadd.f32 %v7725_v47, %v18406_v28  ;;  %14225 = vmatprep.mubr.msk.f32.mxu0 %vm14620_vm5, %v14618_v2  ;;  %14364 = vmatprep.mubr.msk.f32.mxu1 %vm14620_vm5, %v14618_v2 }
 0x654   : > { %v13925_v30 = vpop.f32.mrf.mxu0  ;;  %v14064_v40 = vpop.f32.mrf.mxu1 }
 0x655   : > { %v18850_v62 = vadd.f32 %v8209_v8, %v7909_v57  ;;  %v8928_v8 = vld [vmem:[#allocation3 + $0x9d] sm:$0xff] }
 0x656   : > { %v7730_v24 = vpop.f32.mrf.mxu0  ;;  %v8214_v7 = vpop.f32.mrf.mxu1  ;;  %14226 = vmatmul.mubr.msk.f32.gmra.mxu0 %vm1121_vm15, %v8442_v38  ;;  %14365 = vmatmul.mubr.msk.f32.gmra.mxu1 %vm1121_vm15, %v8926_v56  ;;  %v8445_v56 = vld [vmem:[#allocation3 + $0xa4] sm:$0xff] }
 0x657   : > { %v7910_v28 = vadd.f32 %v7730_v24, %v18419_v19  ;;  %14228 = vmatprep.mubr.msk.f32.mxu0 %vm14620_vm5, %v14618_v2  ;;  %14367 = vmatprep.mubr.msk.f32.mxu1 %vm14620_vm5, %v14618_v2  ;;  %v8929_v24 = vld [vmem:[#allocation3 + $0xa5] sm:$0xff] }
 0x658   : > { %v13928_v63 = vpop.f32.mrf.mxu0  ;;  %v14067_v27 = vpop.f32.mrf.mxu1 }
 0x659   : > { %v18859_v54 = vadd.f32 %v8214_v7, %v7910_v28 }
 0x65a   : > { %v7735_v48 = vpop.f32.mrf.mxu0  ;;  %v8219_v43 = vpop.f32.mrf.mxu1  ;;  %14229 = vmatmul.mubr.msk.f32.gmra.mxu0 %vm1121_vm15, %v18439_v22  ;;  %14368 = vmatmul.mubr.msk.f32.gmra.mxu1 %vm1121_vm15, %v8927_v46  ;;  %v8446_v46 = vld [vmem:[#allocation3 + $0xac] sm:$0xff] }
 0x65b   : > { %v7911_v19 = vadd.f32 %v7735_v48, %v18428_v0  ;;  %14231 = vmatprep.mubr.msk.f32.mxu0 %vm14620_vm5, %v14618_v2  ;;  %14370 = vmatprep.mubr.msk.f32.mxu1 %vm14620_vm5, %v14618_v2  ;;  %v8930_v48 = vld [vmem:[#allocation3 + $0xad] sm:$0xff] }
 0x65c   : > { %v13931_v39 = vpop.f32.mrf.mxu0  ;;  %v14070_v33 = vpop.f32.mrf.mxu1 }
 0x65d   : > { %v18869_v47 = vadd.f32 %v8219_v43, %v7911_v19 }
 0x65e   : > { %v7740_v57 = vpop.f32.mrf.mxu0  ;;  %v8224_v30 = vpop.f32.mrf.mxu1  ;;  %14232 = vmatmul.mubr.msk.f32.gmra.mxu0 %vm1121_vm15, %v18451_v52  ;;  %14371 = vmatmul.mubr.msk.f32.gmra.mxu1 %vm1121_vm15, %v8928_v8 }
 0x65f   : > { %v7912_v0 = vadd.f32 %v7740_v57, %v18437_v13  ;;  %14234 = vmatprep.mubr.msk.f32.mxu0 %vm14620_vm5, %v14618_v2  ;;  %14373 = vmatprep.mubr.msk.f32.mxu1 %vm14620_vm5, %v14618_v2  ;;  %v8447_v57 = vld [vmem:[#allocation3 + $0xb4] sm:$0xff] }
 0x660   : > { %v13934_v22 = vpop.f32.mrf.mxu0  ;;  %v14073_v40 = vpop.f32.mrf.mxu1 }
 0x661   : > { %v18879_v38 = vadd.f32 %v8224_v30, %v7912_v0  ;;  %v8931_v30 = vld [vmem:[#allocation3 + $0xb5] sm:$0xff] }
 0x662   : > { %v7745_v7 = vpop.f32.mrf.mxu0  ;;  %v8229_v28 = vpop.f32.mrf.mxu1  ;;  %14235 = vmatmul.mubr.msk.f32.gmra.mxu0 %vm1121_vm15, %v8445_v56  ;;  %14374 = vmatmul.mubr.msk.f32.gmra.mxu1 %vm1121_vm15, %v8929_v24 }
 0x663   : > { %v7913_v13 = vadd.f32 %v7745_v7, %v18449_v6  ;;  %14237 = vmatprep.mubr.msk.f32.mxu0 %vm14620_vm5, %v14618_v2  ;;  %14376 = vmatprep.mubr.msk.f32.mxu1 %vm14620_vm5, %v14618_v2  ;;  %v8932_v7 = vld [vmem:[#allocation3 + $0xbd] sm:$0xff] }
 0x664   : > { %v13937_v52 = vpop.f32.mrf.mxu0  ;;  %v14076_v63 = vpop.f32.mrf.mxu1 }
 0x665   : > { %v18888_v27 = vadd.f32 %v8229_v28, %v7913_v13 }
 0x666   : > { %v7750_v43 = vpop.f32.mrf.mxu0  ;;  %v8234_v19 = vpop.f32.mrf.mxu1  ;;  %14238 = vmatmul.mubr.msk.f32.gmra.mxu0 %vm1121_vm15, %v8446_v46  ;;  %14377 = vmatmul.mubr.msk.f32.gmra.mxu1 %vm1121_vm15, %v8930_v48  ;;  %v8933_v48 = vld [vmem:[#allocation3 + $0xc5] sm:$0xff] }
 0x667   : > { %v7914_v6 = vadd.f32 %v7750_v43, %v18461_v25  ;;  %14240 = vmatprep.mubr.msk.f32.mxu0 %vm14620_vm5, %v14618_v2  ;;  %14379 = vmatprep.mubr.msk.f32.mxu1 %vm14620_vm5, %v14618_v2 }
 0x668   : > { %v13940_v39 = vpop.f32.mrf.mxu0  ;;  %v14079_v33 = vpop.f32.mrf.mxu1 }
 0x669   : > { %v18897_v8 = vadd.f32 %v8234_v19, %v7914_v6  ;;  %v8450_v33 = vld [vmem:[#allocation3 + $0xcc] sm:$0xff] }
 0x66a   : > { %v7755_v0 = vpop.f32.mrf.mxu0  ;;  %v8239_v22 = vpop.f32.mrf.mxu1  ;;  %14241 = vmatmul.mubr.msk.f32.gmra.mxu0 %vm1121_vm15, %v8447_v57  ;;  %14380 = vmatmul.mubr.msk.f32.gmra.mxu1 %vm1121_vm15, %v8931_v30  ;;  %v8934_v57 = vld [vmem:[#allocation3 + $0xcd] sm:$0xff] }
 0x66b   : > { %v7915_v25 = vadd.f32 %v7755_v0, %v18470_v14  ;;  %14243 = vmatprep.mubr.msk.f32.mxu0 %vm14620_vm5, %v14618_v2  ;;  %14382 = vmatprep.mubr.msk.f32.mxu1 %vm14620_vm5, %v14618_v2 }
 0x66c   : > { %v13943_v40 = vpop.f32.mrf.mxu0  ;;  %v14082_v56 = vpop.f32.mrf.mxu1 }
 0x66d   : > { %v18906_v24 = vadd.f32 %v8239_v22, %v7915_v25  ;;  %v8451_v40 = vld [vmem:[#allocation3 + $0xd4] sm:$0xff] }
 0x66e   : > { %v7760_v28 = vpop.f32.mrf.mxu0  ;;  %v8244_v13 = vpop.f32.mrf.mxu1  ;;  %14244 = vmatmul.mubr.msk.f32.gmra.mxu0 %vm1121_vm15, %v18490_v21  ;;  %14383 = vmatmul.mubr.msk.f32.gmra.mxu1 %vm1121_vm15, %v8932_v7  ;;  %v8935_v56 = vld [vmem:[#allocation3 + $0xd5] sm:$0xff] }
 0x66f   : > { %v7916_v14 = vadd.f32 %v7760_v28, %v18479_v44  ;;  %14246 = vmatprep.mubr.msk.f32.mxu0 %vm14620_vm5, %v14618_v2  ;;  %14385 = vmatprep.mubr.msk.f32.mxu1 %vm14620_vm5, %v14618_v2 }
 0x670   : > { %v13946_v52 = vpop.f32.mrf.mxu0  ;;  %v14085_v63 = vpop.f32.mrf.mxu1 }
 0x671   : > { %v18916_v46 = vadd.f32 %v8244_v13, %v7916_v14  ;;  %v19890_v13 = vld [vmem:[#allocation45_spill] sm:$0xff] }
 0x672   : > { %v7765_v43 = vpop.f32.mrf.mxu0  ;;  %v8249_v19 = vpop.f32.mrf.mxu1  ;;  %14247 = vmatmul.mubr.msk.f32.gmra.mxu0 %vm1121_vm15, %v18502_v36  ;;  %14386 = vmatmul.mubr.msk.f32.gmra.mxu1 %vm1121_vm15, %v8933_v48  ;;  %v8452_v48 = vld [vmem:[#allocation3 + $0xdc] sm:$0xff] }
 0x673   : > { %v7917_v44 = vadd.f32 %v7765_v43, %v18488_v31  ;;  %14249 = vmatprep.mubr.msk.f32.mxu0 %vm14620_vm5, %v14618_v2  ;;  %14388 = vmatprep.mubr.msk.f32.mxu1 %vm14620_vm5, %v14618_v2  ;;  %v8936_v43 = vld [vmem:[#allocation3 + $0xdd] sm:$0xff] }
 0x674   : > { %v13949_v21 = vpop.f32.mrf.mxu0  ;;  %v14088_v6 = vpop.f32.mrf.mxu1 }
 0x675   : > { %v18926_v39 = vadd.f32 %v8249_v19, %v7917_v44 }
 0x676   : > { %v7770_v30 = vpop.f32.mrf.mxu0  ;;  %v8254_v0 = vpop.f32.mrf.mxu1  ;;  %14250 = vmatmul.mubr.msk.f32.gmra.mxu0 %vm1121_vm15, %v8450_v33  ;;  %14389 = vmatmul.mubr.msk.f32.gmra.mxu1 %vm1121_vm15, %v8934_v57 }
 0x677   : > { %v7918_v31 = vadd.f32 %v7770_v30, %v18500_v41  ;;  %14252 = vmatprep.mubr.msk.f32.mxu0 %vm14620_vm5, %v14618_v2  ;;  %14391 = vmatprep.mubr.msk.f32.mxu1 %vm14620_vm5, %v14618_v2  ;;  %v8937_v30 = vld [vmem:[#allocation3 + $0xe5] sm:$0xff] }
 0x678   : > { %v13952_v36 = vpop.f32.mrf.mxu0  ;;  %v14091_v22 = vpop.f32.mrf.mxu1 }
 0x679   : > { %v18935_v25 = vadd.f32 %v8254_v0, %v7918_v31 }
 0x67a   : > { %v7775_v7 = vpop.f32.mrf.mxu0  ;;  %v8259_v28 = vpop.f32.mrf.mxu1  ;;  %14253 = vmatmul.mubr.msk.f32.gmra.mxu0 %vm1121_vm15, %v8451_v40  ;;  %14392 = vmatmul.mubr.msk.f32.gmra.mxu1 %vm1121_vm15, %v8935_v56  ;;  %v8938_v56 = vld [vmem:[#allocation3 + $0xed] sm:$0xff] }
 0x67b   : > { %v7919_v41 = vadd.f32 %v7775_v7, %v19890_v13  ;;  %14255 = vmatprep.mubr.msk.f32.mxu0 %vm14620_vm5, %v14618_v2  ;;  %14394 = vmatprep.mubr.msk.f32.mxu1 %vm14620_vm5, %v14618_v2 }
 0x67c   : > { %v13955_v14 = vpop.f32.mrf.mxu0  ;;  %v14094_v52 = vpop.f32.mrf.mxu1 }
 0x67d   : > { %v18944_v63 = vadd.f32 %v8259_v28, %v7919_v41  ;;  %v8455_v14 = vld [vmem:[#allocation3 + $0xf4] sm:$0xff] }
 0x67e   : > { %v7780_v19 = vpop.f32.mrf.mxu0  ;;  %v8264_v44 = vpop.f32.mrf.mxu1  ;;  %14256 = vmatmul.mubr.msk.f32.gmra.mxu0 %vm1121_vm15, %v8452_v48  ;;  %14395 = vmatmul.mubr.msk.f32.gmra.mxu1 %vm1121_vm15, %v8936_v43  ;;  %v8939_v52 = vld [vmem:[#allocation3 + $0xf5] sm:$0xff] }
 0x67f   : > { %v7920_v21 = vadd.f32 %v7780_v19, %v18521_v61  ;;  %14258 = vmatprep.mubr.msk.f32.mxu0 %vm14620_vm5, %v14618_v2  ;;  %14397 = vmatprep.mubr.msk.f32.mxu1 %vm14620_vm5, %v14618_v2 }
 0x680   : > { %v13958_v6 = vpop.f32.mrf.mxu0  ;;  %v14097_v33 = vpop.f32.mrf.mxu1 }
 0x681   : > { %v18953_v57 = vadd.f32 %v8264_v44, %v7920_v21  ;;  %v8456_v6 = vld [vmem:[#allocation3 + $0xfc] sm:$0xff] }
 0x682   : > { %v7785_v0 = vpop.f32.mrf.mxu0  ;;  %v8269_v31 = vpop.f32.mrf.mxu1  ;;  %14259 = vmatmul.mubr.msk.f32.gmra.mxu0 %vm1121_vm15, %v18541_v59  ;;  %14398 = vmatmul.mubr.msk.f32.gmra.mxu1 %vm1121_vm15, %v8937_v30  ;;  %v8940_v33 = vld [vmem:[#allocation3 + $0xfd] sm:$0xff] }
 0x683   : > { %v7921_v61 = vadd.f32 %v7785_v0, %v18530_v17  ;;  %14261 = vmatprep.mubr.msk.f32.mxu0 %vm14620_vm5, %v14618_v2  ;;  %14400 = vmatprep.mubr.msk.f32.mxu1 %vm14620_vm5, %v14618_v2 }
 0x684   : > { %v13961_v36 = vpop.f32.mrf.mxu0  ;;  %v14100_v22 = vpop.f32.mrf.mxu1 }
 0x685   : > { %v18963_v40 = vadd.f32 %v8269_v31, %v7921_v61  ;;  %v19892_v31 = vld [vmem:[#allocation47_spill] sm:$0xff] }
 0x686   : > { %v7790_v7 = vpop.f32.mrf.mxu0  ;;  %v8274_v28 = vpop.f32.mrf.mxu1  ;;  %14262 = vmatmul.mubr.msk.f32.gmra.mxu0 %vm1121_vm15, %v18553_v3  ;;  %14401 = vmatmul.mubr.msk.f32.gmra.mxu1 %vm1121_vm15, %v8938_v56  ;;  %v19891_v3 = vld [vmem:[#allocation46_spill] sm:$0xff] }
 0x687   : > { %v7922_v17 = vadd.f32 %v7790_v7, %v18539_v51  ;;  %14264 = vmatprep.mubr.msk.f32.mxu0 %vm14620_vm5, %v14618_v2  ;;  %14403 = vmatprep.mubr.msk.f32.mxu1 %vm14620_vm5, %v14618_v2  ;;  %v8457_v7 = vld [vmem:[#allocation3 + $0x104] sm:$0xff] }
 0x688   : > { %v13964_v59 = vpop.f32.mrf.mxu0  ;;  %v14103_v13 = vpop.f32.mrf.mxu1 }
 0x689   : > { %v18973_v41 = vadd.f32 %v8274_v28, %v7922_v17  ;;  %v8941_v28 = vld [vmem:[#allocation3 + $0x105] sm:$0xff] }
 0x68a   : > { %v7795_v48 = vpop.f32.mrf.mxu0  ;;  %v8279_v43 = vpop.f32.mrf.mxu1  ;;  %14265 = vmatmul.mubr.msk.f32.gmra.mxu0 %vm1121_vm15, %v8455_v14  ;;  %14404 = vmatmul.mubr.msk.f32.gmra.mxu1 %vm1121_vm15, %v8939_v52 }
 0x68b   : > { %v7923_v51 = vadd.f32 %v7795_v48, %v19891_v3  ;;  %14267 = vmatprep.mubr.msk.f32.mxu0 %vm14620_vm5, %v14618_v2  ;;  %14406 = vmatprep.mubr.msk.f32.mxu1 %vm14620_vm5, %v14618_v2 }
 0x68c   : > { %v13967_v19 = vpop.f32.mrf.mxu0  ;;  %v14106_v44 = vpop.f32.mrf.mxu1 }
 0x68d   : > { %v18982_v21 = vadd.f32 %v8279_v43, %v7923_v51  ;;  %v8942_v43 = vld [vmem:[#allocation3 + $0x10d] sm:$0xff] }
 0x68e   : > { %v7800_v30 = vpop.f32.mrf.mxu0  ;;  %v8284_v0 = vpop.f32.mrf.mxu1  ;;  %14268 = vmatmul.mubr.msk.f32.gmra.mxu0 %vm1121_vm15, %v8456_v6  ;;  %14407 = vmatmul.mubr.msk.f32.gmra.mxu1 %vm1121_vm15, %v8940_v33  ;;  %v8943_v33 = vld [vmem:[#allocation3 + $0x115] sm:$0xff] }
 0x68f   : > { %v7924_v61 = vadd.f32 %v7800_v30, %v19892_v31  ;;  %14270 = vmatprep.mubr.msk.f32.mxu0 %vm14620_vm5, %v14618_v2  ;;  %14409 = vmatprep.mubr.msk.f32.mxu1 %vm14620_vm5, %v14618_v2 }
 0x690   : > { %v13970_v36 = vpop.f32.mrf.mxu0  ;;  %v14109_v22 = vpop.f32.mrf.mxu1 }
 0x691   : > { %v18991_v56 = vadd.f32 %v8284_v0, %v7924_v61  ;;  %v8460_v36 = vld [vmem:[#allocation3 + $0x11c] sm:$0xff] }
 0x692   : > { %v7805_v17 = vpop.f32.mrf.mxu0  ;;  %v8289_v59 = vpop.f32.mrf.mxu1  ;;  %14271 = vmatmul.mubr.msk.f32.gmra.mxu0 %vm1121_vm15, %v8457_v7  ;;  %14410 = vmatmul.mubr.msk.f32.gmra.mxu1 %vm1121_vm15, %v8941_v28  ;;  %v8944_v22 = vld [vmem:[#allocation3 + $0x11d] sm:$0xff] }
 0x693   : > { %v7925_v13 = vadd.f32 %v7805_v17, %v18572_v49  ;;  %14273 = vmatprep.mubr.msk.f32.mxu0 %vm14620_vm5, %v14618_v2  ;;  %14412 = vmatprep.mubr.msk.f32.mxu1 %vm14620_vm5, %v14618_v2 }
 0x694   : > { %v13973_v14 = vpop.f32.mrf.mxu0  ;;  %v14112_v52 = vpop.f32.mrf.mxu1 }
 0x695   : > { %v19000_v48 = vadd.f32 %v8289_v59, %v7925_v13  ;;  %v8461_v14 = vld [vmem:[#allocation3 + $0x124] sm:$0xff] }
 0x696   : > { %v7810_v3 = vpop.f32.mrf.mxu0  ;;  %v8294_v51 = vpop.f32.mrf.mxu1  ;;  %14274 = vmatmul.mubr.msk.f32.gmra.mxu0 %vm1121_vm15, %v18592_v45  ;;  %14413 = vmatmul.mubr.msk.f32.gmra.mxu1 %vm1121_vm15, %v8942_v43  ;;  %v8945_v52 = vld [vmem:[#allocation3 + $0x125] sm:$0xff] }
 0x697   : > { %v7926_v49 = vadd.f32 %v7810_v3, %v18581_v55  ;;  %14276 = vmatprep.mubr.msk.f32.mxu0 %vm14620_vm5, %v14618_v2  ;;  %14415 = vmatprep.mubr.msk.f32.mxu1 %vm14620_vm5, %v14618_v2 }
 0x698   : > { %v13976_v19 = vpop.f32.mrf.mxu0  ;;  %v14115_v44 = vpop.f32.mrf.mxu1 }
 0x699   : > { %v19010_v6 = vadd.f32 %v8294_v51, %v7926_v49  ;;  %v19894_v51 = vld [vmem:[#allocation49_spill] sm:$0xff] }
 0x69a   : > { %v7815_v30 = vpop.f32.mrf.mxu0  ;;  %v8299_v0 = vpop.f32.mrf.mxu1  ;;  %14277 = vmatmul.mubr.msk.f32.gmra.mxu0 %vm1121_vm15, %v18604_v20  ;;  %14416 = vmatmul.mubr.msk.f32.gmra.mxu1 %vm1121_vm15, %v8943_v33  ;;  %v19893_v20 = vld [vmem:[#allocation48_spill] sm:$0xff] }
 0x69b   : > { %v7927_v55 = vadd.f32 %v7815_v30, %v18590_v26  ;;  %14279 = vmatprep.mubr.msk.f32.mxu0 %vm14620_vm5, %v14618_v2  ;;  %14418 = vmatprep.mubr.msk.f32.mxu1 %vm14620_vm5, %v14618_v2  ;;  %v8462_v30 = vld [vmem:[#allocation3 + $0x12c] sm:$0xff] }
 0x69c   : > { %v13979_v45 = vpop.f32.mrf.mxu0  ;;  %v14118_v31 = vpop.f32.mrf.mxu1 }
 0x69d   : > { %v19020_v61 = vadd.f32 %v8299_v0, %v7927_v55  ;;  %v8946_v0 = vld [vmem:[#allocation3 + $0x12d] sm:$0xff] }
 0x69e   : > { %v7820_v7 = vpop.f32.mrf.mxu0  ;;  %v8304_v28 = vpop.f32.mrf.mxu1  ;;  %14280 = vmatmul.mubr.msk.f32.gmra.mxu0 %vm1121_vm15, %v8460_v36  ;;  %14419 = vmatmul.mubr.msk.f32.gmra.mxu1 %vm1121_vm15, %v8944_v22 }
 0x69f   : > { %v7928_v26 = vadd.f32 %v7820_v7, %v19893_v20  ;;  %14282 = vmatprep.mubr.msk.f32.mxu0 %vm14620_vm5, %v14618_v2  ;;  %14421 = vmatprep.mubr.msk.f32.mxu1 %vm14620_vm5, %v14618_v2  ;;  %v8947_v20 = vld [vmem:[#allocation3 + $0x135] sm:$0xff] }
 0x6a0   : > { %v13982_v17 = vpop.f32.mrf.mxu0  ;;  %v14121_v59 = vpop.f32.mrf.mxu1 }
 0x6a1   : > { %v19029_v13 = vadd.f32 %v8304_v28, %v7928_v26  ;;  %v8463_v28 = vld [vmem:[#allocation3 + $0x134] sm:$0xff] }
 0x6a2   : > { %v7825_v43 = vpop.f32.mrf.mxu0  ;;  %v8309_v3 = vpop.f32.mrf.mxu1  ;;  %14283 = vmatmul.mubr.msk.f32.gmra.mxu0 %vm1121_vm15, %v8461_v14  ;;  %14422 = vmatmul.mubr.msk.f32.gmra.mxu1 %vm1121_vm15, %v8945_v52 }
 0x6a3   : > { %v7929_v49 = vadd.f32 %v7825_v43, %v19894_v51  ;;  %14285 = vmatprep.mubr.msk.f32.mxu0 %vm14620_vm5, %v14618_v2  ;;  %14424 = vmatprep.mubr.msk.f32.mxu1 %vm14620_vm5, %v14618_v2  ;;  %v8948_v43 = vld [vmem:[#allocation3 + $0x13d] sm:$0xff] }
 0x6a4   : > { %v13985_v19 = vpop.f32.mrf.mxu0  ;;  %v14124_v44 = vpop.f32.mrf.mxu1 }
 0x6a5   : > { %v19038_v33 = vadd.f32 %v8309_v3, %v7929_v49 }
 0x6a6   : > { %v7830_v55 = vpop.f32.mrf.mxu0  ;;  %v8314_v45 = vpop.f32.mrf.mxu1  ;;  %14286 = vmatmul.mubr.msk.f32.gmra.mxu0 %vm1121_vm15, %v8462_v30  ;;  %14425 = vmatmul.mubr.msk.f32.gmra.mxu1 %vm1121_vm15, %v8946_v0  ;;  %v8949_v30 = vld [vmem:[#allocation3 + $0x145] sm:$0xff] }
 0x6a7   : > { %v7930_v31 = vadd.f32 %v7830_v55, %v18623_v29  ;;  %14288 = vmatprep.mubr.msk.f32.mxu0 %vm14620_vm5, %v14618_v2  ;;  %14427 = vmatprep.mubr.msk.f32.mxu1 %vm14620_vm5, %v14618_v2 }
 0x6a8   : > { %v13988_v36 = vpop.f32.mrf.mxu0  ;;  %v14127_v22 = vpop.f32.mrf.mxu1 }
 0x6a9   : > { %v19047_v7 = vadd.f32 %v8314_v45, %v7930_v31  ;;  %v8950_v36 = vld [vmem:[#allocation3 + $0x14d] sm:$0xff] }
 0x6aa   : > { %v7835_v26 = vpop.f32.mrf.mxu0  ;;  %v8319_v17 = vpop.f32.mrf.mxu1  ;;  %14289 = vmatmul.mubr.msk.f32.gmra.mxu0 %vm1121_vm15, %v8463_v28  ;;  %14428 = vmatmul.mubr.msk.f32.gmra.mxu1 %vm1121_vm15, %v8947_v20 }
 0x6ab   : > { %v7931_v29 = vadd.f32 %v7835_v26, %v18632_v9  ;;  %14291 = vmatprep.mubr.msk.f32.mxu0 %vm14620_vm5, %v14618_v2  ;;  %14430 = vmatprep.mubr.msk.f32.mxu1 %vm14620_vm5, %v14618_v2 }
 0x6ac   : > { %v13991_v59 = vpop.f32.mrf.mxu0  ;;  %v14130_v14 = vpop.f32.mrf.mxu1 }
 0x6ad   : > { %v19056_v52 = vadd.f32 %v8319_v17, %v7931_v29  ;;  %v8467_v29 = vld [vmem:[#allocation3 + $0x154] sm:$0xff] }
 0x6ae   : > { %v7840_v3 = vpop.f32.mrf.mxu0  ;;  %v8324_v51 = vpop.f32.mrf.mxu1  ;;  %14292 = vmatmul.mubr.msk.f32.gmra.mxu0 %vm1121_vm15, %v18652_v23  ;;  %14431 = vmatmul.mubr.msk.f32.gmra.mxu1 %vm1121_vm15, %v8948_v43  ;;  %v8951_v59 = vld [vmem:[#allocation3 + $0x155] sm:$0xff] }
 0x6af   : > { %v7932_v9 = vadd.f32 %v7840_v3, %v18641_v34  ;;  %14294 = vmatprep.mubr.msk.f32.mxu0 %vm14620_vm5, %v14618_v2  ;;  %14433 = vmatprep.mubr.msk.f32.mxu1 %vm14620_vm5, %v14618_v2 }
 0x6b0   : > { %v13994_v49 = vpop.f32.mrf.mxu0  ;;  %v14133_v19 = vpop.f32.mrf.mxu1 }
 0x6b1   : > { %v19066_v44 = vadd.f32 %v8324_v51, %v7932_v9  ;;  %v8468_v51 = vld [vmem:[#allocation3 + $0x15c] sm:$0xff] }
 0x6b2   : > { %v7845_v0 = vpop.f32.mrf.mxu0  ;;  %v8329_v55 = vpop.f32.mrf.mxu1  ;;  %14295 = vmatmul.mubr.msk.f32.gmra.mxu0 %vm1121_vm15, %v18664_v50  ;;  %14434 = vmatmul.mubr.msk.f32.gmra.mxu1 %vm1121_vm15, %v8949_v30  ;;  %v19895_v50 = vld [vmem:[#allocation50_spill] sm:$0xff] }
 0x6b3   : > { %v7933_v34 = vadd.f32 %v7845_v0, %v18650_v1  ;;  %14297 = vmatprep.mubr.msk.f32.mxu0 %vm14620_vm5, %v14618_v2  ;;  %14436 = vmatprep.mubr.msk.f32.mxu1 %vm14620_vm5, %v14618_v2  ;;  %v8952_v9 = vld [vmem:[#allocation3 + $0x15d] sm:$0xff] }
 0x6b4   : > { %v13997_v23 = vpop.f32.mrf.mxu0  ;;  %v14136_v45 = vpop.f32.mrf.mxu1 }
 0x6b5   : > { %v19076_v31 = vadd.f32 %v8329_v55, %v7933_v34  ;;  %v8469_v23 = vld [vmem:[#allocation3 + $0x164] sm:$0xf] }
 0x6b6   : > { %v7850_v22 = vpop.f32.mrf.mxu0  ;;  %v8334_v28 = vpop.f32.mrf.mxu1  ;;  %14298 = vmatmul.mubr.msk.f32.gmra.mxu0 %vm1121_vm15, %v18676_v15  ;;  %14437 = vmatmul.mubr.msk.f32.gmra.mxu1 %vm1121_vm15, %v8950_v36  ;;  %v19896_v15 = vld [vmem:[#allocation51_spill] sm:$0xff] }
 0x6b7   : > { %v7934_v1 = vadd.f32 %v7850_v22, %v19895_v50  ;;  %14300 = vmatprep.mubr.msk.f32.mxu0 %vm14620_vm5, %v14618_v2  ;;  %14439 = vmatprep.mubr.msk.f32.mxu1 %vm14620_vm5, %v14618_v2  ;;  %v8953_v45 = vld [vmem:[#allocation3 + $0x165] sm:$0xf] }
 0x6b8   : > { %v14000_v20 = vpop.f32.mrf.mxu0  ;;  %v14139_v26 = vpop.f32.mrf.mxu1 }
 0x6b9   : > { %v19086_v17 = vadd.f32 %v8334_v28, %v7934_v1 }
 0x6ba   : > { %v7855_v14 = vpop.f32.mrf.mxu0  ;;  %v8339_v43 = vpop.f32.mrf.mxu1  ;;  %14301 = vmatmul.mubr.msk.f32.gmra.mxu0 %vm1121_vm15, %v8467_v29  ;;  %14440 = vmatmul.mubr.msk.f32.gmra.mxu1 %vm1121_vm15, %v8951_v59  ;;  %v9397_v59 = vld [vmem:[#allocation3 + $0x26] sm:$0xff] }
 0x6bb   : > { %v7935_v3 = vadd.f32 %v7855_v14, %v19896_v15  ;;  %14303 = vmatprep.mubr.msk.f32.mxu0 %vm14620_vm5, %v14618_v2  ;;  %14442 = vmatprep.mubr.msk.f32.mxu1 %vm14620_vm5, %v14618_v2 }
 0x6bc   : > { %v14003_v49 = vpop.f32.mrf.mxu0  ;;  %v14142_v19 = vpop.f32.mrf.mxu1 }
 0x6bd   : > { %v19095_v30 = vadd.f32 %v8339_v43, %v7935_v3 }
 0x6be   : > { %v7860_v0 = vpop.f32.mrf.mxu0  ;;  %v8344_v55 = vpop.f32.mrf.mxu1  ;;  %14304 = vmatmul.mubr.msk.f32.gmra.mxu0 %vm1121_vm15, %v8468_v51  ;;  %14443 = vmatmul.mubr.msk.f32.gmra.mxu1 %vm1121_vm15, %v8952_v9  ;;  %v9398_v9 = vld [vmem:[#allocation3 + $0x2e] sm:$0xff] }
 0x6bf   : > { %v7936_v34 = vadd.f32 %v7860_v0, %v18686_v58  ;;  %14306 = vmatprep.mubr.msk.f32.mxu0 %vm14620_vm5, %v14618_v2  ;;  %14445 = vmatprep.mubr.msk.f32.mxu1 %vm14620_vm5, %v14618_v2 }
 0x6c0   : > { %v14006_v36 = vpop.f32.mrf.mxu0  ;;  %v14145_v22 = vpop.f32.mrf.mxu1 }
 0x6c1   : > { %v19104_v28 = vadd.f32 %v8344_v55, %v7936_v34 }
 0x6c2   : > { %v7865_v50 = vpop.f32.mrf.mxu0  ;;  %v8349_v1 = vpop.f32.mrf.mxu1  ;;  %14307 = vmatmul.mubr.msk.f32.gmra.mxu0 %vm1121_vm15, %v8469_v23  ;;  %14446 = vmatmul.mubr.msk.f32.gmra.mxu1 %vm1121_vm15, %v8953_v45  ;;  %v9399_v23 = vld [vmem:[#allocation3 + $0x36] sm:$0xff] }
 0x6c3   : > { %v7937_v58 = vadd.f32 %v7865_v50, %v18698_v12  ;;  %14464 = vmatprep.mubr.msk.f32.mxu0 %vm14620_vm5, %v14618_v2 }
 0x6c4   : > { %v14009_v20 = vpop.f32.mrf.mxu0  ;;  %v14148_v26 = vpop.f32.mrf.mxu1 }
 0x6c5   : > { %v19111_v29 = vadd.f32 %v8349_v1, %v7937_v58  ;;  %v9400_v58 = vld [vmem:[#allocation3 + $0x3e] sm:$0xff] }
 0x6c6   : > { %v7870_v14 = vpop.f32.mrf.mxu0  ;;  %v8354_v43 = vpop.f32.mrf.mxu1  ;;  %14465 = vmatmul.mubr.msk.f32.vlgmr.msra.gmra.mxu0 %vm1121_vm15, %v9397_v59 }
 0x6c7   : > { %v7938_v15 = vadd.f32 %v7870_v14, %v18712_v10  ;;  %14467 = vmatprep.mubr.msk.f32.mxu0 %vm14620_vm5, %v14618_v2 }
 0x6c8   : > { %v14012_v3 = vpop.f32.mrf.mxu0  ;;  %v14151_v51 = vpop.f32.mrf.mxu1 }
 0x6c9   : > { %v19117_v12 = vadd.f32 %v8354_v43, %v7938_v15  ;;  %v9401_v15 = vld [vmem:[#allocation3 + $0x46] sm:$0xff] }
 0x6ca   : > { %v7875_v49 = vpop.f32.mrf.mxu0  ;;  %v8359_v19 = vpop.f32.mrf.mxu1  ;;  %14468 = vmatmul.mubr.msk.f32.gmra.mxu0 %vm1121_vm15, %v9398_v9 }
 0x6cb   : > { %v7939_v0 = vadd.f32 %v7875_v49, %v18726_v60  ;;  %14470 = vmatprep.mubr.msk.f32.mxu0 %vm14620_vm5, %v14618_v2 }
 0x6cc   : > { %v14015_v55 = vpop.f32.mrf.mxu0  ;;  %v14154_v34 = vpop.f32.mrf.mxu1 }
 0x6cd   : > { %v19123_v10 = vadd.f32 %v8359_v19, %v7939_v0  ;;  %v9402_v0 = vld [vmem:[#allocation3 + $0x4e] sm:$0xff] }
 0x6ce   : > { %v7880_v45 = vpop.f32.mrf.mxu0  ;;  %v8364_v36 = vpop.f32.mrf.mxu1  ;;  %14471 = vmatmul.mubr.msk.f32.gmra.mxu0 %vm1121_vm15, %v9399_v23 }
 0x6cf   : > { %v7940_v22 = vadd.f32 %v7880_v45, %v18740_v42  ;;  %14473 = vmatprep.mubr.msk.f32.mxu0 %vm14620_vm5, %v14618_v2 }
 0x6d0   : > { %v14018_v50 = vpop.f32.mrf.mxu0  ;;  %v14157_v1 = vpop.f32.mrf.mxu1 }
 0x6d1   : > { %v19129_v60 = vadd.f32 %v8364_v36, %v7940_v22  ;;  %v9403_v22 = vld [vmem:[#allocation3 + $0x56] sm:$0xff] }
 0x6d2   : > { %v7885_v20 = vpop.f32.mrf.mxu0  ;;  %v8369_v26 = vpop.f32.mrf.mxu1  ;;  %14474 = vmatmul.mubr.msk.f32.gmra.mxu0 %vm1121_vm15, %v9400_v58 }
 0x6d3   : > { %v7941_v59 = vadd.f32 %v7885_v20, %v18753_v16  ;;  %14476 = vmatprep.mubr.msk.f32.mxu0 %vm14620_vm5, %v14618_v2 }
 0x6d4   : > { %v14021_v14 = vpop.f32.mrf.mxu0  ;;  %v14160_v43 = vpop.f32.mrf.mxu1 }
 0x6d5   : > { %v19135_v42 = vadd.f32 %v8369_v26, %v7941_v59  ;;  %v9404_v59 = vld [vmem:[#allocation3 + $0x5e] sm:$0xff] }
 0x6d6   : > { %v7890_v3 = vpop.f32.mrf.mxu0  ;;  %v8374_v51 = vpop.f32.mrf.mxu1  ;;  %14477 = vmatmul.mubr.msk.f32.gmra.mxu0 %vm1121_vm15, %v9401_v15 }
 0x6d7   : > { %v7942_v9 = vadd.f32 %v7890_v3, %v18767_v11  ;;  %14479 = vmatprep.mubr.msk.f32.mxu0 %vm14620_vm5, %v14618_v2 }
 0x6d8   : > { %v14024_v49 = vpop.f32.mrf.mxu0  ;;  %v14163_v19 = vpop.f32.mrf.mxu1 }
 0x6d9   : > { %v19141_v16 = vadd.f32 %v8374_v51, %v7942_v9  ;;  %v9405_v9 = vld [vmem:[#allocation3 + $0x66] sm:$0xff] }
 0x6da   : > { %v7895_v55 = vpop.f32.mrf.mxu0  ;;  %v8379_v34 = vpop.f32.mrf.mxu1  ;;  %14480 = vmatmul.mubr.msk.f32.gmra.mxu0 %vm1121_vm15, %v9402_v0 }
 0x6db   : > { %v7943_v23 = vadd.f32 %v7895_v55, %v18781_v4  ;;  %14482 = vmatprep.mubr.msk.f32.mxu0 %vm14620_vm5, %v14618_v2 }
 0x6dc   : > { %v14027_v45 = vpop.f32.mrf.mxu0  ;;  %v14166_v36 = vpop.f32.mrf.mxu1 }
 0x6dd   : > { %v19147_v11 = vadd.f32 %v8379_v34, %v7943_v23  ;;  %v9406_v23 = vld [vmem:[#allocation3 + $0x6e] sm:$0xff] }
 0x6de   : > { %v7900_v50 = vpop.f32.mrf.mxu0  ;;  %v8384_v1 = vpop.f32.mrf.mxu1  ;;  %14483 = vmatmul.mubr.msk.f32.gmra.mxu0 %vm1121_vm15, %v9403_v22 }
 0x6df   : > { %v7944_v58 = vadd.f32 %v7900_v50, %v18794_v37  ;;  %14485 = vmatprep.mubr.msk.f32.mxu0 %vm14620_vm5, %v14618_v2 }
 0x6e0   : > { %v14030_v20 = vpop.f32.mrf.mxu0  ;;  %v14169_v26 = vpop.f32.mrf.mxu1 }
 0x6e1   : > { %v19153_v4 = vadd.f32 %v8384_v1, %v7944_v58  ;;  %v9407_v58 = vld [vmem:[#allocation3 + $0x76] sm:$0xff] }
 0x6e2   : > { %v8668_v14 = vpop.f32.mrf.mxu0  ;;  %v9152_v43 = vpop.f32.mrf.mxu1  ;;  %14486 = vmatmul.mubr.msk.f32.gmra.mxu0 %vm1121_vm15, %v9404_v59 }
 0x6e3   : > { %v8872_v15 = vadd.f32 %v8668_v14, %v18803_v32  ;;  %14488 = vmatprep.mubr.msk.f32.mxu0 %vm14620_vm5, %v14618_v2 }
 0x6e4   : > { %v14188_v3 = vpop.f32.mrf.mxu0  ;;  %v14327_v51 = vpop.f32.mrf.mxu1 }
 0x6e5   : > { %v19159_v37 = vadd.f32 %v9152_v43, %v8872_v15  ;;  %v9408_v15 = vld [vmem:[#allocation3 + $0x7e] sm:$0xff] }
 0x6e6   : > { %v8673_v49 = vpop.f32.mrf.mxu0  ;;  %v9157_v19 = vpop.f32.mrf.mxu1  ;;  %14489 = vmatmul.mubr.msk.f32.gmra.mxu0 %vm1121_vm15, %v9405_v9 }
 0x6e7   : > { %v8873_v0 = vadd.f32 %v8673_v49, %v18812_v53  ;;  %14491 = vmatprep.mubr.msk.f32.mxu0 %vm14620_vm5, %v14618_v2 }
 0x6e8   : > { %v14191_v55 = vpop.f32.mrf.mxu0  ;;  %v14330_v34 = vpop.f32.mrf.mxu1 }
 0x6e9   : > { %v19165_v32 = vadd.f32 %v9157_v19, %v8873_v0  ;;  %v9409_v0 = vld [vmem:[#allocation3 + $0x86] sm:$0xff] }
 0x6ea   : > { %v8678_v45 = vpop.f32.mrf.mxu0  ;;  %v9162_v36 = vpop.f32.mrf.mxu1  ;;  %14492 = vmatmul.mubr.msk.f32.gmra.mxu0 %vm1121_vm15, %v9406_v23 }
 0x6eb   : > { %v8874_v22 = vadd.f32 %v8678_v45, %v18822_v18  ;;  %14494 = vmatprep.mubr.msk.f32.mxu0 %vm14620_vm5, %v14618_v2 }
 0x6ec   : > { %v14194_v50 = vpop.f32.mrf.mxu0  ;;  %v14333_v1 = vpop.f32.mrf.mxu1 }
 0x6ed   : > { %v19171_v53 = vadd.f32 %v9162_v36, %v8874_v22  ;;  %v9410_v22 = vld [vmem:[#allocation3 + $0x8e] sm:$0xff] }
 0x6ee   : > { %v8683_v20 = vpop.f32.mrf.mxu0  ;;  %v9167_v26 = vpop.f32.mrf.mxu1  ;;  %14495 = vmatmul.mubr.msk.f32.gmra.mxu0 %vm1121_vm15, %v9407_v58 }
 0x6ef   : > { %v8875_v59 = vadd.f32 %v8683_v20, %v18832_v35  ;;  %14497 = vmatprep.mubr.msk.f32.mxu0 %vm14620_vm5, %v14618_v2 }
 0x6f0   : > { %v14197_v14 = vpop.f32.mrf.mxu0  ;;  %v14336_v43 = vpop.f32.mrf.mxu1 }
 0x6f1   : > { %v19177_v18 = vadd.f32 %v9167_v26, %v8875_v59  ;;  %v9411_v59 = vld [vmem:[#allocation3 + $0x96] sm:$0xff] }
 0x6f2   : > { %v8688_v3 = vpop.f32.mrf.mxu0  ;;  %v9172_v51 = vpop.f32.mrf.mxu1  ;;  %14498 = vmatmul.mubr.msk.f32.gmra.mxu0 %vm1121_vm15, %v9408_v15 }
 0x6f3   : > { %v8876_v9 = vadd.f32 %v8688_v3, %v18841_v5  ;;  %14500 = vmatprep.mubr.msk.f32.mxu0 %vm14620_vm5, %v14618_v2 }
 0x6f4   : > { %v14200_v49 = vpop.f32.mrf.mxu0  ;;  %v14339_v19 = vpop.f32.mrf.mxu1 }
 0x6f5   : > { %v19183_v35 = vadd.f32 %v9172_v51, %v8876_v9  ;;  %v9412_v9 = vld [vmem:[#allocation3 + $0x9e] sm:$0xff] }
 0x6f6   : > { %v8693_v55 = vpop.f32.mrf.mxu0  ;;  %v9177_v34 = vpop.f32.mrf.mxu1  ;;  %14501 = vmatmul.mubr.msk.f32.gmra.mxu0 %vm1121_vm15, %v9409_v0 }
 0x6f7   : > { %v8877_v23 = vadd.f32 %v8693_v55, %v18850_v62  ;;  %14503 = vmatprep.mubr.msk.f32.mxu0 %vm14620_vm5, %v14618_v2 }
 0x6f8   : > { %v14203_v45 = vpop.f32.mrf.mxu0  ;;  %v14342_v36 = vpop.f32.mrf.mxu1 }
 0x6f9   : > { %v19189_v5 = vadd.f32 %v9177_v34, %v8877_v23  ;;  %v9413_v23 = vld [vmem:[#allocation3 + $0xa6] sm:$0xff] }
 0x6fa   : > { %v8698_v50 = vpop.f32.mrf.mxu0  ;;  %v9182_v1 = vpop.f32.mrf.mxu1  ;;  %14504 = vmatmul.mubr.msk.f32.gmra.mxu0 %vm1121_vm15, %v9410_v22 }
 0x6fb   : > { %v8878_v58 = vadd.f32 %v8698_v50, %v18859_v54  ;;  %14506 = vmatprep.mubr.msk.f32.mxu0 %vm14620_vm5, %v14618_v2 }
 0x6fc   : > { %v14206_v20 = vpop.f32.mrf.mxu0  ;;  %v14345_v26 = vpop.f32.mrf.mxu1 }
 0x6fd   : > { %v19195_v62 = vadd.f32 %v9182_v1, %v8878_v58  ;;  %v9414_v58 = vld [vmem:[#allocation3 + $0xae] sm:$0xff] }
 0x6fe   : > { %v8703_v14 = vpop.f32.mrf.mxu0  ;;  %v9187_v43 = vpop.f32.mrf.mxu1  ;;  %14507 = vmatmul.mubr.msk.f32.gmra.mxu0 %vm1121_vm15, %v9411_v59 }
 0x6ff   : > { %v8879_v15 = vadd.f32 %v8703_v14, %v18869_v47  ;;  %14509 = vmatprep.mubr.msk.f32.mxu0 %vm14620_vm5, %v14618_v2 }
 0x700   : > { %v14209_v3 = vpop.f32.mrf.mxu0  ;;  %v14348_v51 = vpop.f32.mrf.mxu1 }
 0x701   : > { %v19201_v54 = vadd.f32 %v9187_v43, %v8879_v15  ;;  %v9415_v15 = vld [vmem:[#allocation3 + $0xb6] sm:$0xff] }
 0x702   : > { %v8708_v49 = vpop.f32.mrf.mxu0  ;;  %v9192_v19 = vpop.f32.mrf.mxu1  ;;  %14510 = vmatmul.mubr.msk.f32.gmra.mxu0 %vm1121_vm15, %v9412_v9 }
 0x703   : > { %v8880_v0 = vadd.f32 %v8708_v49, %v18879_v38  ;;  %14512 = vmatprep.mubr.msk.f32.mxu0 %vm14620_vm5, %v14618_v2 }
 0x704   : > { %v14212_v55 = vpop.f32.mrf.mxu0  ;;  %v14351_v34 = vpop.f32.mrf.mxu1 }
 0x705   : > { %v19207_v47 = vadd.f32 %v9192_v19, %v8880_v0  ;;  %v9416_v0 = vld [vmem:[#allocation3 + $0xbe] sm:$0xff] }
 0x706   : > { %v8713_v45 = vpop.f32.mrf.mxu0  ;;  %v9197_v36 = vpop.f32.mrf.mxu1  ;;  %14513 = vmatmul.mubr.msk.f32.gmra.mxu0 %vm1121_vm15, %v9413_v23 }
 0x707   : > { %v8881_v22 = vadd.f32 %v8713_v45, %v18888_v27  ;;  %14515 = vmatprep.mubr.msk.f32.mxu0 %vm14620_vm5, %v14618_v2 }
 0x708   : > { %v14215_v50 = vpop.f32.mrf.mxu0  ;;  %v14354_v1 = vpop.f32.mrf.mxu1 }
 0x709   : > { %v19213_v38 = vadd.f32 %v9197_v36, %v8881_v22  ;;  %v9417_v22 = vld [vmem:[#allocation3 + $0xc6] sm:$0xff] }
 0x70a   : > { %v8718_v20 = vpop.f32.mrf.mxu0  ;;  %v9202_v26 = vpop.f32.mrf.mxu1  ;;  %14516 = vmatmul.mubr.msk.f32.gmra.mxu0 %vm1121_vm15, %v9414_v58 }
 0x70b   : > { %v8882_v59 = vadd.f32 %v8718_v20, %v18897_v8  ;;  %14518 = vmatprep.mubr.msk.f32.mxu0 %vm14620_vm5, %v14618_v2 }
 0x70c   : > { %v14218_v14 = vpop.f32.mrf.mxu0  ;;  %v14357_v43 = vpop.f32.mrf.mxu1 }
 0x70d   : > { %v19219_v27 = vadd.f32 %v9202_v26, %v8882_v59  ;;  %v9418_v59 = vld [vmem:[#allocation3 + $0xce] sm:$0xff] }
 0x70e   : > { %v8723_v3 = vpop.f32.mrf.mxu0  ;;  %v9207_v51 = vpop.f32.mrf.mxu1  ;;  %14519 = vmatmul.mubr.msk.f32.gmra.mxu0 %vm1121_vm15, %v9415_v15 }
 0x70f   : > { %v8883_v9 = vadd.f32 %v8723_v3, %v18906_v24  ;;  %14521 = vmatprep.mubr.msk.f32.mxu0 %vm14620_vm5, %v14618_v2 }
 0x710   : > { %v14221_v49 = vpop.f32.mrf.mxu0  ;;  %v14360_v19 = vpop.f32.mrf.mxu1 }
 0x711   : > { %v19225_v8 = vadd.f32 %v9207_v51, %v8883_v9  ;;  %v9419_v9 = vld [vmem:[#allocation3 + $0xd6] sm:$0xff] }
 0x712   : > { %v8728_v55 = vpop.f32.mrf.mxu0  ;;  %v9212_v34 = vpop.f32.mrf.mxu1  ;;  %14522 = vmatmul.mubr.msk.f32.gmra.mxu0 %vm1121_vm15, %v9416_v0 }
 0x713   : > { %v8884_v23 = vadd.f32 %v8728_v55, %v18916_v46  ;;  %14524 = vmatprep.mubr.msk.f32.mxu0 %vm14620_vm5, %v14618_v2 }
 0x714   : > { %v14224_v45 = vpop.f32.mrf.mxu0  ;;  %v14363_v36 = vpop.f32.mrf.mxu1 }
 0x715   : > { %v19231_v24 = vadd.f32 %v9212_v34, %v8884_v23  ;;  %v9420_v23 = vld [vmem:[#allocation3 + $0xde] sm:$0xff] }
 0x716   : > { %v8733_v50 = vpop.f32.mrf.mxu0  ;;  %v9217_v1 = vpop.f32.mrf.mxu1  ;;  %14525 = vmatmul.mubr.msk.f32.gmra.mxu0 %vm1121_vm15, %v9417_v22 }
 0x717   : > { %v8885_v58 = vadd.f32 %v8733_v50, %v18926_v39  ;;  %14527 = vmatprep.mubr.msk.f32.mxu0 %vm14620_vm5, %v14618_v2 }
 0x718   : > { %v14227_v20 = vpop.f32.mrf.mxu0  ;;  %v14366_v26 = vpop.f32.mrf.mxu1 }
 0x719   : > { %v19237_v46 = vadd.f32 %v9217_v1, %v8885_v58  ;;  %v9421_v58 = vld [vmem:[#allocation3 + $0xe6] sm:$0xff] }
 0x71a   : > { %v8738_v14 = vpop.f32.mrf.mxu0  ;;  %v9222_v43 = vpop.f32.mrf.mxu1  ;;  %14528 = vmatmul.mubr.msk.f32.gmra.mxu0 %vm1121_vm15, %v9418_v59 }
 0x71b   : > { %v8886_v15 = vadd.f32 %v8738_v14, %v18935_v25  ;;  %14530 = vmatprep.mubr.msk.f32.mxu0 %vm14620_vm5, %v14618_v2 }
 0x71c   : > { %v14230_v3 = vpop.f32.mrf.mxu0  ;;  %v14369_v51 = vpop.f32.mrf.mxu1 }
 0x71d   : > { %v19243_v39 = vadd.f32 %v9222_v43, %v8886_v15  ;;  %v9422_v15 = vld [vmem:[#allocation3 + $0xee] sm:$0xff] }
 0x71e   : > { %v8743_v49 = vpop.f32.mrf.mxu0  ;;  %v9227_v19 = vpop.f32.mrf.mxu1  ;;  %14531 = vmatmul.mubr.msk.f32.gmra.mxu0 %vm1121_vm15, %v9419_v9 }
 0x71f   : > { %v8887_v0 = vadd.f32 %v8743_v49, %v18944_v63  ;;  %14533 = vmatprep.mubr.msk.f32.mxu0 %vm14620_vm5, %v14618_v2 }
 0x720   : > { %v14233_v55 = vpop.f32.mrf.mxu0  ;;  %v14372_v34 = vpop.f32.mrf.mxu1 }
 0x721   : > { %v19249_v25 = vadd.f32 %v9227_v19, %v8887_v0  ;;  %v9423_v0 = vld [vmem:[#allocation3 + $0xf6] sm:$0xff] }
 0x722   : > { %v8748_v45 = vpop.f32.mrf.mxu0  ;;  %v9232_v36 = vpop.f32.mrf.mxu1  ;;  %14534 = vmatmul.mubr.msk.f32.gmra.mxu0 %vm1121_vm15, %v9420_v23 }
 0x723   : > { %v8888_v22 = vadd.f32 %v8748_v45, %v18953_v57  ;;  %14536 = vmatprep.mubr.msk.f32.mxu0 %vm14620_vm5, %v14618_v2 }
 0x724   : > { %v14236_v50 = vpop.f32.mrf.mxu0  ;;  %v14375_v1 = vpop.f32.mrf.mxu1 }
 0x725   : > { %v19255_v63 = vadd.f32 %v9232_v36, %v8888_v22  ;;  %v9424_v22 = vld [vmem:[#allocation3 + $0xfe] sm:$0xff] }
 0x726   : > { %v8753_v20 = vpop.f32.mrf.mxu0  ;;  %v9237_v26 = vpop.f32.mrf.mxu1  ;;  %14537 = vmatmul.mubr.msk.f32.gmra.mxu0 %vm1121_vm15, %v9421_v58 }
 0x727   : > { %v8889_v59 = vadd.f32 %v8753_v20, %v18963_v40  ;;  %14539 = vmatprep.mubr.msk.f32.mxu0 %vm14620_vm5, %v14618_v2 }
 0x728   : > { %v14239_v14 = vpop.f32.mrf.mxu0  ;;  %v14378_v43 = vpop.f32.mrf.mxu1 }
 0x729   : > { %v19261_v57 = vadd.f32 %v9237_v26, %v8889_v59  ;;  %v9425_v59 = vld [vmem:[#allocation3 + $0x106] sm:$0xff] }
 0x72a   : > { %v8758_v3 = vpop.f32.mrf.mxu0  ;;  %v9242_v51 = vpop.f32.mrf.mxu1  ;;  %14540 = vmatmul.mubr.msk.f32.gmra.mxu0 %vm1121_vm15, %v9422_v15 }
 0x72b   : > { %v8890_v9 = vadd.f32 %v8758_v3, %v18973_v41  ;;  %14542 = vmatprep.mubr.msk.f32.mxu0 %vm14620_vm5, %v14618_v2 }
 0x72c   : > { %v14242_v49 = vpop.f32.mrf.mxu0  ;;  %v14381_v19 = vpop.f32.mrf.mxu1 }
 0x72d   : > { %v19267_v40 = vadd.f32 %v9242_v51, %v8890_v9  ;;  %v9426_v9 = vld [vmem:[#allocation3 + $0x10e] sm:$0xff] }
 0x72e   : > { %v8763_v55 = vpop.f32.mrf.mxu0  ;;  %v9247_v34 = vpop.f32.mrf.mxu1  ;;  %14543 = vmatmul.mubr.msk.f32.gmra.mxu0 %vm1121_vm15, %v9423_v0 }
 0x72f   : > { %v8891_v23 = vadd.f32 %v8763_v55, %v18982_v21  ;;  %14545 = vmatprep.mubr.msk.f32.mxu0 %vm14620_vm5, %v14618_v2 }
 0x730   : > { %v14245_v45 = vpop.f32.mrf.mxu0  ;;  %v14384_v36 = vpop.f32.mrf.mxu1 }
 0x731   : > { %v19273_v41 = vadd.f32 %v9247_v34, %v8891_v23  ;;  %v9427_v23 = vld [vmem:[#allocation3 + $0x116] sm:$0xff] }
 0x732   : > { %v8768_v50 = vpop.f32.mrf.mxu0  ;;  %v9252_v1 = vpop.f32.mrf.mxu1  ;;  %14546 = vmatmul.mubr.msk.f32.gmra.mxu0 %vm1121_vm15, %v9424_v22 }
 0x733   : > { %v8892_v58 = vadd.f32 %v8768_v50, %v18991_v56  ;;  %14548 = vmatprep.mubr.msk.f32.mxu0 %vm14620_vm5, %v14618_v2 }
 0x734   : > { %v14248_v20 = vpop.f32.mrf.mxu0  ;;  %v14387_v26 = vpop.f32.mrf.mxu1 }
 0x735   : > { %v19279_v21 = vadd.f32 %v9252_v1, %v8892_v58  ;;  %v9428_v58 = vld [vmem:[#allocation3 + $0x11e] sm:$0xff] }
 0x736   : > { %v8773_v14 = vpop.f32.mrf.mxu0  ;;  %v9257_v43 = vpop.f32.mrf.mxu1  ;;  %14549 = vmatmul.mubr.msk.f32.gmra.mxu0 %vm1121_vm15, %v9425_v59 }
 0x737   : > { %v8893_v15 = vadd.f32 %v8773_v14, %v19000_v48  ;;  %14551 = vmatprep.mubr.msk.f32.mxu0 %vm14620_vm5, %v14618_v2 }
 0x738   : > { %v14251_v3 = vpop.f32.mrf.mxu0  ;;  %v14390_v51 = vpop.f32.mrf.mxu1 }
 0x739   : > { %v19285_v56 = vadd.f32 %v9257_v43, %v8893_v15  ;;  %v9429_v15 = vld [vmem:[#allocation3 + $0x126] sm:$0xff] }
 0x73a   : > { %v8778_v49 = vpop.f32.mrf.mxu0  ;;  %v9262_v19 = vpop.f32.mrf.mxu1  ;;  %14552 = vmatmul.mubr.msk.f32.gmra.mxu0 %vm1121_vm15, %v9426_v9 }
 0x73b   : > { %v8894_v0 = vadd.f32 %v8778_v49, %v19010_v6  ;;  %14554 = vmatprep.mubr.msk.f32.mxu0 %vm14620_vm5, %v14618_v2 }
 0x73c   : > { %v14254_v55 = vpop.f32.mrf.mxu0  ;;  %v14393_v34 = vpop.f32.mrf.mxu1 }
 0x73d   : > { %v19291_v48 = vadd.f32 %v9262_v19, %v8894_v0  ;;  %v9430_v0 = vld [vmem:[#allocation3 + $0x12e] sm:$0xff] }
 0x73e   : > { %v8783_v45 = vpop.f32.mrf.mxu0  ;;  %v9267_v36 = vpop.f32.mrf.mxu1  ;;  %14555 = vmatmul.mubr.msk.f32.gmra.mxu0 %vm1121_vm15, %v9427_v23 }
 0x73f   : > { %v8895_v22 = vadd.f32 %v8783_v45, %v19020_v61  ;;  %14557 = vmatprep.mubr.msk.f32.mxu0 %vm14620_vm5, %v14618_v2 }
 0x740   : > { %v14257_v50 = vpop.f32.mrf.mxu0  ;;  %v14396_v1 = vpop.f32.mrf.mxu1 }
 0x741   : > { %v19297_v6 = vadd.f32 %v9267_v36, %v8895_v22  ;;  %v9431_v22 = vld [vmem:[#allocation3 + $0x136] sm:$0xff] }
 0x742   : > { %v8788_v20 = vpop.f32.mrf.mxu0  ;;  %v9272_v26 = vpop.f32.mrf.mxu1  ;;  %14558 = vmatmul.mubr.msk.f32.gmra.mxu0 %vm1121_vm15, %v9428_v58 }
 0x743   : > { %v8896_v59 = vadd.f32 %v8788_v20, %v19029_v13  ;;  %14560 = vmatprep.mubr.msk.f32.mxu0 %vm14620_vm5, %v14618_v2 }
 0x744   : > { %v14260_v14 = vpop.f32.mrf.mxu0  ;;  %v14399_v43 = vpop.f32.mrf.mxu1 }
 0x745   : > { %v19303_v61 = vadd.f32 %v9272_v26, %v8896_v59  ;;  %v9432_v59 = vld [vmem:[#allocation3 + $0x13e] sm:$0xff] }
 0x746   : > { %v8793_v3 = vpop.f32.mrf.mxu0  ;;  %v9277_v51 = vpop.f32.mrf.mxu1  ;;  %14561 = vmatmul.mubr.msk.f32.gmra.mxu0 %vm1121_vm15, %v9429_v15 }
 0x747   : > { %v8897_v9 = vadd.f32 %v8793_v3, %v19038_v33  ;;  %14563 = vmatprep.mubr.msk.f32.mxu0 %vm14620_vm5, %v14618_v2 }
 0x748   : > { %v14263_v49 = vpop.f32.mrf.mxu0  ;;  %v14402_v19 = vpop.f32.mrf.mxu1 }
 0x749   : > { %v19309_v13 = vadd.f32 %v9277_v51, %v8897_v9  ;;  %v9433_v9 = vld [vmem:[#allocation3 + $0x146] sm:$0xff] }
 0x74a   : > { %v8798_v55 = vpop.f32.mrf.mxu0  ;;  %v9282_v34 = vpop.f32.mrf.mxu1  ;;  %14564 = vmatmul.mubr.msk.f32.gmra.mxu0 %vm1121_vm15, %v9430_v0 }
 0x74b   : > { %v8898_v23 = vadd.f32 %v8798_v55, %v19047_v7  ;;  %14566 = vmatprep.mubr.msk.f32.mxu0 %vm14620_vm5, %v14618_v2 }
 0x74c   : > { %v14266_v45 = vpop.f32.mrf.mxu0  ;;  %v14405_v36 = vpop.f32.mrf.mxu1 }
 0x74d   : > { %v19315_v33 = vadd.f32 %v9282_v34, %v8898_v23  ;;  %v9434_v23 = vld [vmem:[#allocation3 + $0x14e] sm:$0xff] }
 0x74e   : > { %v8803_v50 = vpop.f32.mrf.mxu0  ;;  %v9287_v1 = vpop.f32.mrf.mxu1  ;;  %14567 = vmatmul.mubr.msk.f32.gmra.mxu0 %vm1121_vm15, %v9431_v22 }
 0x74f   : > { %v8899_v58 = vadd.f32 %v8803_v50, %v19056_v52  ;;  %14569 = vmatprep.mubr.msk.f32.mxu0 %vm14620_vm5, %v14618_v2 }
 0x750   : > { %v14269_v20 = vpop.f32.mrf.mxu0  ;;  %v14408_v26 = vpop.f32.mrf.mxu1 }
 0x751   : > { %v19321_v7 = vadd.f32 %v9287_v1, %v8899_v58  ;;  %v9435_v58 = vld [vmem:[#allocation3 + $0x156] sm:$0xff] }
 0x752   : > { %v8808_v14 = vpop.f32.mrf.mxu0  ;;  %v9292_v43 = vpop.f32.mrf.mxu1  ;;  %14570 = vmatmul.mubr.msk.f32.gmra.mxu0 %vm1121_vm15, %v9432_v59 }
 0x753   : > { %v8900_v15 = vadd.f32 %v8808_v14, %v19066_v44  ;;  %14572 = vmatprep.mubr.msk.f32.mxu0 %vm14620_vm5, %v14618_v2  ;;  %v9436_v14 = vld [vmem:[#allocation3 + $0x15e] sm:$0xff] }
 0x754   : > { %v14272_v3 = vpop.f32.mrf.mxu0  ;;  %v14411_v51 = vpop.f32.mrf.mxu1 }
 0x755   : > { %v19327_v52 = vadd.f32 %v9292_v43, %v8900_v15 }
 0x756   : > { %v8813_v49 = vpop.f32.mrf.mxu0  ;;  %v9297_v19 = vpop.f32.mrf.mxu1  ;;  %14573 = vmatmul.mubr.msk.f32.gmra.mxu0 %vm1121_vm15, %v9433_v9 }
 0x757   : > { %v8901_v0 = vadd.f32 %v8813_v49, %v19076_v31  ;;  %14575 = vmatprep.mubr.msk.f32.mxu0 %vm14620_vm5, %v14618_v2  ;;  %v9437_v49 = vld [vmem:[#allocation3 + $0x166] sm:$0xf] }
 0x758   : > { %v14275_v55 = vpop.f32.mrf.mxu0  ;;  %v14414_v34 = vpop.f32.mrf.mxu1 }
 0x759   : > { %v19333_v44 = vadd.f32 %v9297_v19, %v8901_v0 }
 0x75a   : > { %v8818_v45 = vpop.f32.mrf.mxu0  ;;  %v9302_v36 = vpop.f32.mrf.mxu1  ;;  %14576 = vmatmul.mubr.msk.f32.gmra.mxu0 %vm1121_vm15, %v9434_v23 }
 0x75b   : > { %v8902_v22 = vadd.f32 %v8818_v45, %v19086_v17  ;;  %14578 = vmatprep.mubr.msk.f32.mxu0 %vm14620_vm5, %v14618_v2 }
 0x75c   : > { %v14278_v50 = vpop.f32.mrf.mxu0  ;;  %v14417_v1 = vpop.f32.mrf.mxu1 }
 0x75d   : > { %v19339_v31 = vadd.f32 %v9302_v36, %v8902_v22 }
 0x75e   : > { %v8823_v20 = vpop.f32.mrf.mxu0  ;;  %v9307_v26 = vpop.f32.mrf.mxu1  ;;  %14579 = vmatmul.mubr.msk.f32.gmra.mxu0 %vm1121_vm15, %v9435_v58 }
 0x75f   : > { %v8903_v59 = vadd.f32 %v8823_v20, %v19095_v30  ;;  %14581 = vmatprep.mubr.msk.f32.mxu0 %vm14620_vm5, %v14618_v2 }
 0x760   : > { %v14281_v43 = vpop.f32.mrf.mxu0  ;;  %v14420_v17 = vpop.f32.mrf.mxu1 }
 0x761   : > { %v19345_v15 = vadd.f32 %v9307_v26, %v8903_v59 }
 0x762   : > { %v8828_v3 = vpop.f32.mrf.mxu0  ;;  %v9312_v51 = vpop.f32.mrf.mxu1  ;;  %14582 = vmatmul.mubr.msk.f32.gmra.mxu0 %vm1121_vm15, %v9436_v14 }
 0x763   : > { %v8904_v9 = vadd.f32 %v8828_v3, %v19104_v28  ;;  %14584 = vmatprep.mubr.msk.f32.mxu0 %vm14620_vm5, %v14618_v2  ;;  %vm19900_vm5 = vmmov %vm19898_vm3 }
 0x764   : > { %v14284_v19 = vpop.f32.mrf.mxu0  ;;  %v14423_v30 = vpop.f32.mrf.mxu1 }
 0x765   : > { %v19351_v0 = vadd.f32 %v9312_v51, %v8904_v9 }
 0x766   : > { %v8833_v55 = vpop.f32.mrf.mxu0  ;;  %v9317_v34 = vpop.f32.mrf.mxu1  ;;  %14585 = vmatmul.mubr.msk.f32.gmra.mxu0 %vm1121_vm15, %v9437_v49  ;;  %vm19902_vm15 = vmmov %vm19898_vm3 }
 0x767   : > { %v8905_v23 = vadd.f32 %v8833_v55, %v19111_v29 }
 0x768   : > { %v14287_v45 = vpop.f32.mrf.mxu0  ;;  %v14426_v36 = vpop.f32.mrf.mxu1 }
 0x769   : > { %v19355_v22 = vadd.f32 %v9317_v34, %v8905_v23 }
 0x76a   : > { %v8838_v50 = vpop.f32.mrf.mxu0  ;;  %v9322_v28 = vpop.f32.mrf.mxu1 }
 0x76b   : > { %v8906_v1 = vadd.f32 %v8838_v50, %v19117_v12 }
 0x76c   : > { %v14290_v2 = vpop.f32.mrf.mxu0  ;;  %v14429_v58 = vpop.f32.mrf.mxu1 }
 0x76d   : > { %v19358_v20 = vadd.f32 %v9322_v28, %v8906_v1 }
 0x76e   : > { %v8843_v26 = vpop.f32.mrf.mxu0  ;;  %v9327_v59 = vpop.f32.mrf.mxu1 }
 0x76f   : > { %v8907_v14 = vadd.f32 %v8843_v26, %v19123_v10 }
 0x770   : > { %v14293_v43 = vpop.f32.mrf.mxu0  ;;  %v14432_v17 = vpop.f32.mrf.mxu1 }
 0x771   : > { %v19361_v3 = vadd.f32 %v9327_v59, %v8907_v14 }
 0x772   : > { %v8848_v29 = vpop.f32.mrf.mxu0  ;;  %v9332_v51 = vpop.f32.mrf.mxu1 }
 0x773   : > { %v8908_v9 = vadd.f32 %v8848_v29, %v19129_v60 }
 0x774   : > { %v14296_v49 = vpop.f32.mrf.mxu0  ;;  %v14435_v19 = vpop.f32.mrf.mxu1 }
 0x775   : > { %v19364_v30 = vadd.f32 %v9332_v51, %v8908_v9 }
 0x776   : > { %v8853_v12 = vpop.f32.mrf.mxu0  ;;  %v9337_v55 = vpop.f32.mrf.mxu1 }
 0x777   : > { %v8909_v34 = vadd.f32 %v8853_v12, %v19135_v42  ;;  %v19381_v12 = vld [vmem:[%s19645_s7] ss:$0 sm:$0xff] }
 0x778   : > { %v14299_v23 = vpop.f32.mrf.mxu0  ;;  %v14438_v45 = vpop.f32.mrf.mxu1 }
 0x779   : > { %v19367_v36 = vadd.f32 %v9337_v55, %v8909_v34 }
 0x77a   : > { %v8858_v10 = vpop.f32.mrf.mxu0  ;;  %v9342_v50 = vpop.f32.mrf.mxu1 }
 0x77b   : > { %v8910_v28 = vadd.f32 %v8858_v10, %v19141_v16 }
 0x77c   : > { %v14302_v1 = vpop.f32.mrf.mxu0  ;;  %v14441_v2 = vpop.f32.mrf.mxu1 }
 0x77d   : > { %v19370_v58 = vadd.f32 %v9342_v50, %v8910_v28 }
 0x77e   : > { %v8863_v60 = vpop.f32.mrf.mxu0  ;;  %v9347_v26 = vpop.f32.mrf.mxu1 }
 0x77f   : > { %v8911_v59 = vadd.f32 %v8863_v60, %v19147_v11 }
 0x780   : > { %v14305_v14 = vpop.f32.mrf.mxu0  ;;  %v14444_v43 = vpop.f32.mrf.mxu1 }
 0x781   : > { %v19373_v42 = vadd.f32 %v9347_v26, %v8911_v59 }
 0x782   : > { %v8868_v17 = vpop.f32.mrf.mxu0  ;;  %v9352_v29 = vpop.f32.mrf.mxu1 }
 0x783   : > { %v8912_v51 = vadd.f32 %v8868_v17, %v19153_v4 }
 0x784   : > { %v14308_v9 = vpop.f32.mrf.mxu0  ;;  %v14447_v49 = vpop.f32.mrf.mxu1 }
 0x785   : > { %v19376_v16 = vadd.f32 %v9352_v29, %v8912_v51 }
 0x786   : > { %v9636_v19 = vpop.f32.mrf.mxu0 }
 0x787   : > { %v9840_v11 = vadd.f32 %v9636_v19, %v19159_v37 }
 0x788   : > { %v14466_v55 = vpop.f32.mrf.mxu0 }
 0x789   : > { %v9888_v34 = vadd.f32 %v19381_v12, %v9840_v11 }
 0x78a   : > { %v9641_v23 = vpop.f32.mrf.mxu0 }
 0x78b   : > { %v9929_v4 = vmax.f32 %v9888_v34, 0.0  ;;  %v9841_v45 = vadd.f32 %v9641_v23, %v19165_v32 }
 0x78c   : > { %v14469_v10 = vpop.f32.mrf.mxu0 }
 0x78d   : > { %v9970_v28 = vsel %vm1039_vm0, %v9929_v4, 0.0  ;;  %v9889_v37 = vadd.f32 %v19381_v12, %v9841_v45  ;;  %vm19904_vm0 = vmmov %vm19898_vm3 }
 0x78e   : > { %10011 = vst.msk [vmem:[%s19390_s23] sm:$0xff] %vm19898_vm3, %v9970_v28  ;;  %v9646_v1 = vpop.f32.mrf.mxu0  ;;  %vm19922_vm7 = vmmov %vm19904_vm0 }
 0x78f   : > { %v9930_v2 = vmax.f32 %v9889_v37, 0.0  ;;  %v9842_v60 = vadd.f32 %v9646_v1, %v19171_v53 }
 0x790   : > { %v14472_v26 = vpop.f32.mrf.mxu0 }
 0x791   : > { %v9971_v14 = vsel %vm1040_vm2, %v9930_v2, 0.0  ;;  %v9890_v32 = vadd.f32 %v19381_v12, %v9842_v60  ;;  %vm19906_vm2 = vmmov %vm19904_vm0 }
 0x792   : > { %10012 = vst.msk [vmem:[%s19390_s23 + $0x8] sm:$0xff] %vm19900_vm5, %v9971_v14  ;;  %v9651_v43 = vpop.f32.mrf.mxu0  ;;  %vm19925_vm5 = vmmov %vm19904_vm0 }
 0x793   : > { %v9931_v17 = vmax.f32 %v9890_v32, 0.0  ;;  %v9843_v29 = vadd.f32 %v9651_v43, %v19177_v18 }
 0x794   : > { %v14475_v51 = vpop.f32.mrf.mxu0 }
 0x795   : > { %v9972_v49 = vsel %vm1041_vm6, %v9931_v17, 0.0  ;;  %v9891_v53 = vadd.f32 %v19381_v12, %v9843_v29  ;;  %vm19908_vm6 = vmmov %vm19904_vm0 }
 0x796   : > { %10013 = vst.msk [vmem:[%s19390_s23 + $0x10] sm:$0xff] %vm19902_vm15, %v9972_v49  ;;  %v9656_v19 = vpop.f32.mrf.mxu0 }
 0x797   : > { %v9932_v11 = vmax.f32 %v9891_v53, 0.0  ;;  %v9844_v55 = vadd.f32 %v9656_v19, %v19183_v35 }
 0x798   : > { %v14478_v34 = vpop.f32.mrf.mxu0 }
 0x799   : > { %v9973_v4 = vsel %vm1042_vm8, %v9932_v11, 0.0  ;;  %v9892_v18 = vadd.f32 %v19381_v12, %v9844_v55  ;;  %vm19910_vm8 = vmmov %vm19904_vm0 }
 0x79a   : > { %10014 = vst.msk [vmem:[%s19390_s23 + $0x18] sm:$0xff] %vm19904_vm0, %v9973_v4  ;;  %v9661_v45 = vpop.f32.mrf.mxu0 }
 0x79b   : > { %v9933_v10 = vmax.f32 %v9892_v18, 0.0  ;;  %v9845_v50 = vadd.f32 %v9661_v45, %v19189_v5 }
 0x79c   : > { %v14481_v28 = vpop.f32.mrf.mxu0 }
 0x79d   : > { %v9974_v1 = vsel %vm1043_vm10, %v9933_v10, 0.0  ;;  %v9893_v35 = vadd.f32 %v19381_v12, %v9845_v50  ;;  %vm19912_vm10 = vmmov %vm19904_vm0  ;;  %v19926_v50 = vld [vmem:[#allocation17_spill] sm:$0xff] }
 0x79e   : > { %10015 = vst.msk [vmem:[%s19390_s23 + $0x20] sm:$0xff] %vm19906_vm2, %v9974_v1  ;;  %v9666_v2 = vpop.f32.mrf.mxu0  ;;  %vm19927_vm15 = vcmp.eq.s32.totalorder %v19926_v50, 1 }
 0x79f   : > { %v9934_v60 = vmax.f32 %v9893_v35, 0.0  ;;  %v9846_v26 = vadd.f32 %v9666_v2, %v19195_v62 }
 0x7a0   : > { %v14484_v59 = vpop.f32.mrf.mxu0 }
 0x7a1   : > { %v9975_v32 = vsel %vm1044_vm12, %v9934_v60, 0.0  ;;  %v9894_v5 = vadd.f32 %v19381_v12, %v9846_v26  ;;  %vm19914_vm12 = vmmov %vm19904_vm0 }
 0x7a2   : > { %10016 = vst.msk [vmem:[%s19390_s23 + $0x28] sm:$0xff] %vm19908_vm6, %v9975_v32  ;;  %v9671_v43 = vpop.f32.mrf.mxu0  ;;  %vm19930_vm6 = vmmov %vm19904_vm0 }
 0x7a3   : > { %v9935_v17 = vmax.f32 %v9894_v5, 0.0  ;;  %v9847_v29 = vadd.f32 %v9671_v43, %v19201_v54  ;;  %v19917_v43 = vld [vmem:[#allocation14_spill] sm:$0xff] }
 0x7a4   : > { %v14487_v51 = vpop.f32.mrf.mxu0 }
 0x7a5   : > { %v9976_v49 = vsel %vm1045_vm14, %v9935_v17, 0.0  ;;  %v9895_v62 = vadd.f32 %v19381_v12, %v9847_v29  ;;  %vm19919_vm14 = vmmov %vm19904_vm0 }
 0x7a6   : > { %10017 = vst.msk [vmem:[%s19390_s23 + $0x30] sm:$0xff] %vm19910_vm8, %v9976_v49  ;;  %v9676_v53 = vpop.f32.mrf.mxu0 }
 0x7a7   : > { %v9936_v19 = vmax.f32 %v9895_v62, 0.0  ;;  %v9848_v11 = vadd.f32 %v9676_v53, %v19207_v47  ;;  %v19920_v62 = vld [vmem:[#allocation15_spill] sm:$0xff] }
 0x7a8   : > { %v14490_v55 = vpop.f32.mrf.mxu0 }
 0x7a9   : > { %v9977_v23 = vsel %vm1046_vm13, %v9936_v19, 0.0  ;;  %v9896_v54 = vadd.f32 %v19381_v12, %v9848_v11  ;;  %vm19916_vm13 = vmmov %vm19904_vm0 }
 0x7aa   : > { %10018 = vst.msk [vmem:[%s19390_s23 + $0x38] sm:$0xff] %vm19912_vm10, %v9977_v23  ;;  %v9681_v4 = vpop.f32.mrf.mxu0  ;;  %v19923_v23 = vld [vmem:[#allocation16_spill] sm:$0xff]  ;;  %vm19933_vm10 = vmmov %vm19904_vm0 }
 0x7ab   : > { %v9937_v18 = vmax.f32 %v9896_v54, 0.0  ;;  %v9849_v45 = vadd.f32 %v9681_v4, %v19213_v38  ;;  %vm19924_vm3 = vcmp.eq.s32.totalorder %v19923_v23, 1 }
 0x7ac   : > { %v14493_v10 = vpop.f32.mrf.mxu0 }
 0x7ad   : > { %v9978_v28 = vsel %vm1047_vm11, %v9937_v18, 0.0  ;;  %v9897_v47 = vadd.f32 %v19381_v12, %v9849_v45  ;;  %vm19918_vm11 = vcmp.eq.s32.totalorder %v19917_v43, 1 }
 0x7ae   : > { %10019 = vst.msk [vmem:[%s19390_s23 + $0x40] sm:$0xff] %vm19914_vm12, %v9978_v28  ;;  %v9686_v37 = vpop.f32.mrf.mxu0 }
 0x7af   : > { %v9938_v1 = vmax.f32 %v9897_v47, 0.0  ;;  %v9850_v35 = vadd.f32 %v9686_v37, %v19219_v27 }
 0x7b0   : > { %v14496_v2 = vpop.f32.mrf.mxu0 }
 0x7b1   : > { %v9979_v26 = vsel %vm1048_vm9, %v9938_v1, 0.0  ;;  %v9898_v38 = vadd.f32 %v19381_v12, %v9850_v35  ;;  %vm19921_vm9 = vcmp.eq.s32.totalorder %v19920_v62, 1  ;;  %v19928_v2 = vld [vmem:[#allocation18_spill] sm:$0xff] }
 0x7b2   : > { %10020 = vst.msk [vmem:[%s19390_s23 + $0x48] sm:$0xff] %vm19916_vm13, %v9979_v26  ;;  %v9691_v59 = vpop.f32.mrf.mxu0  ;;  %vm19929_vm2 = vcmp.eq.s32.totalorder %v19928_v2, 1  ;;  %vm19936_vm13 = vmmov %vm19904_vm0  ;;  %v19966_v2 = vld [vmem:[#allocation31_spill] sm:$0xff] }
 0x7b3   : > { %v9939_v14 = vmax.f32 %v9898_v38, 0.0  ;;  %v9851_v32 = vadd.f32 %v9691_v59, %v19225_v8 }
 0x7b4   : > { %v14499_v5 = vpop.f32.mrf.mxu0 }
 0x7b5   : > { %v9980_v17 = vsel %vm19918_vm11, %v9939_v14, 0.0  ;;  %v9899_v27 = vadd.f32 %v19381_v12, %v9851_v32  ;;  %v19931_v32 = vld [vmem:[#allocation19_spill] sm:$0xff] }
 0x7b6   : > { %10021 = vst.msk [vmem:[%s19390_s23 + $0x50] sm:$0xff] %vm19919_vm14, %v9980_v17  ;;  %v9696_v29 = vpop.f32.mrf.mxu0  ;;  %vm19932_vm8 = vcmp.eq.s32.totalorder %v19931_v32, 1  ;;  %vm19939_vm14 = vmmov %vm19904_vm0 }
 0x7b7   : > { %v9940_v51 = vmax.f32 %v9899_v27, 0.0  ;;  %v9852_v9 = vadd.f32 %v9696_v29, %v19231_v24 }
 0x7b8   : > { %v14502_v49 = vpop.f32.mrf.mxu0 }
 0x7b9   : > { %v9981_v53 = vsel %vm19921_vm9, %v9940_v51, 0.0  ;;  %v9900_v8 = vadd.f32 %v19381_v12, %v9852_v9  ;;  %v19934_v51 = vld [vmem:[#allocation20_spill] sm:$0xff] }
 0x7ba   : > { %10022 = vst.msk [vmem:[%s19390_s23 + $0x58] sm:$0xff] %vm19922_vm7, %v9981_v53  ;;  %v9701_v19 = vpop.f32.mrf.mxu0  ;;  %vm19935_vm12 = vcmp.eq.s32.totalorder %v19934_v51, 1  ;;  %vm19942_vm7 = vmmov %vm19904_vm0 }
 0x7bb   : > { %v9941_v11 = vmax.f32 %v9900_v8, 0.0  ;;  %v9853_v55 = vadd.f32 %v9701_v19, %v19237_v46  ;;  %v19937_v19 = vld [vmem:[#allocation21_spill] sm:$0xff] }
 0x7bc   : > { %v14505_v34 = vpop.f32.mrf.mxu0  ;;  %vm19938_vm11 = vcmp.eq.s32.totalorder %v19937_v19, 1 }
 0x7bd   : > { %v9982_v54 = vsel %vm19924_vm3, %v9941_v11, 0.0  ;;  %v9901_v24 = vadd.f32 %v19381_v12, %v9853_v55 }
 0x7be   : > { %10023 = vst.msk [vmem:[%s19390_s23 + $0x60] sm:$0xff] %vm19925_vm5, %v9982_v54  ;;  %v9706_v4 = vpop.f32.mrf.mxu0  ;;  %vm19945_vm5 = vmmov %vm19904_vm0 }
 0x7bf   : > { %v9942_v18 = vmax.f32 %v9901_v24, 0.0  ;;  %v9854_v45 = vadd.f32 %v9706_v4, %v19243_v39  ;;  %v19940_v24 = vld [vmem:[#allocation22_spill] sm:$0xff] }
 0x7c0   : > { %v14508_v10 = vpop.f32.mrf.mxu0  ;;  %vm19941_vm9 = vcmp.eq.s32.totalorder %v19940_v24, 1 }
 0x7c1   : > { %v9983_v28 = vsel %vm19927_vm15, %v9942_v18, 0.0  ;;  %v9902_v46 = vadd.f32 %v19381_v12, %v9854_v45  ;;  %vm19947_vm15 = vmmov %vm19904_vm0 }
 0x7c2   : > { %10024 = vst.msk [vmem:[%s19390_s23 + $0x68] sm:$0xff] %vm19904_vm0, %v9983_v28  ;;  %v9711_v47 = vpop.f32.mrf.mxu0  ;;  %v19943_v28 = vld [vmem:[#allocation23_spill] sm:$0xff] }
 0x7c3   : > { %v9943_v37 = vmax.f32 %v9902_v46, 0.0  ;;  %v9855_v1 = vadd.f32 %v9711_v47, %v19249_v25  ;;  %vm19944_vm3 = vcmp.eq.s32.totalorder %v19943_v28, 1 }
 0x7c4   : > { %v14511_v35 = vpop.f32.mrf.mxu0 }
 0x7c5   : > { %v9984_v60 = vsel %vm19929_vm2, %v9943_v37, 0.0  ;;  %v9903_v39 = vadd.f32 %v19381_v12, %v9855_v1  ;;  %vm19950_vm2 = vmmov %vm19945_vm5 }
 0x7c6   : > { %10025 = vst.msk [vmem:[%s19390_s23 + $0x70] sm:$0xff] %vm19930_vm6, %v9984_v60  ;;  %v9716_v26 = vpop.f32.mrf.mxu0  ;;  %vm19953_vm6 = vmmov %vm19950_vm2 }
 0x7c7   : > { %v9944_v38 = vmax.f32 %v9903_v39, 0.0  ;;  %v9856_v59 = vadd.f32 %v9716_v26, %v19255_v63 }
 0x7c8   : > { %v14514_v14 = vpop.f32.mrf.mxu0 }
 0x7c9   : > { %v9985_v5 = vsel %vm19932_vm8, %v9944_v38, 0.0  ;;  %v9904_v25 = vadd.f32 %v19381_v12, %v9856_v59  ;;  %v19948_v14 = vld [vmem:[#allocation25_spill] sm:$0xff] }
 0x7ca   : > { %10026 = vst.msk [vmem:[%s19390_s23 + $0x78] sm:$0xff] %vm19933_vm10, %v9985_v5  ;;  %v9721_v43 = vpop.f32.mrf.mxu0  ;;  %vm19949_vm0 = vcmp.eq.s32.totalorder %v19948_v14, 1  ;;  %vm19956_vm10 = vmmov %vm19950_vm2 }
 0x7cb   : > { %v9945_v17 = vmax.f32 %v9904_v25, 0.0  ;;  %v9857_v27 = vadd.f32 %v9721_v43, %v19261_v57 }
 0x7cc   : > { %v14517_v29 = vpop.f32.mrf.mxu0 }
 0x7cd   : > { %v9986_v9 = vsel %vm19935_vm12, %v9945_v17, 0.0  ;;  %v9905_v63 = vadd.f32 %v19381_v12, %v9857_v27  ;;  %v19951_v27 = vld [vmem:[#allocation26_spill] sm:$0xff] }
 0x7ce   : > { %10027 = vst.msk [vmem:[%s19390_s23 + $0x80] sm:$0xff] %vm19936_vm13, %v9986_v9  ;;  %v9726_v49 = vpop.f32.mrf.mxu0  ;;  %vm19959_vm13 = vmmov %vm19950_vm2 }
 0x7cf   : > { %v9946_v62 = vmax.f32 %v9905_v63, 0.0  ;;  %v9858_v53 = vadd.f32 %v9726_v49, %v19267_v40 }
 0x7d0   : > { %v14520_v8 = vpop.f32.mrf.mxu0 }
 0x7d1   : > { %v9987_v11 = vsel %vm19938_vm11, %v9946_v62, 0.0  ;;  %v9906_v57 = vadd.f32 %v19381_v12, %v9858_v53  ;;  %v19954_v62 = vld [vmem:[#allocation27_spill] sm:$0xff] }
 0x7d2   : > { %10028 = vst.msk [vmem:[%s19390_s23 + $0x88] sm:$0xff] %vm19939_vm14, %v9987_v11  ;;  %v9731_v55 = vpop.f32.mrf.mxu0  ;;  %vm19955_vm8 = vcmp.eq.s32.totalorder %v19954_v62, 1  ;;  %vm19962_vm14 = vmmov %vm19950_vm2 }
 0x7d3   : > { %v9947_v34 = vmax.f32 %v9906_v57, 0.0  ;;  %v9859_v23 = vadd.f32 %v9731_v55, %v19273_v41  ;;  %v19957_v55 = vld [vmem:[#allocation28_spill] sm:$0xff] }
 0x7d4   : > { %v14523_v54 = vpop.f32.mrf.mxu0  ;;  %vm19958_vm12 = vcmp.eq.s32.totalorder %v19957_v55, 1 }
 0x7d5   : > { %v9988_v4 = vsel %vm19941_vm9, %v9947_v34, 0.0  ;;  %v9907_v40 = vadd.f32 %v19381_v12, %v9859_v23 }
 0x7d6   : > { %10029 = vst.msk [vmem:[%s19390_s23 + $0x90] sm:$0xff] %vm19942_vm7, %v9988_v4  ;;  %v9736_v18 = vpop.f32.mrf.mxu0  ;;  %vm19965_vm7 = vmmov %vm19950_vm2 }
 0x7d7   : > { %v9948_v45 = vmax.f32 %v9907_v40, 0.0  ;;  %v9860_v10 = vadd.f32 %v9736_v18, %v19279_v21  ;;  %v19960_v40 = vld [vmem:[#allocation29_spill] sm:$0xff] }
 0x7d8   : > { %v14526_v50 = vpop.f32.mrf.mxu0  ;;  %vm19961_vm11 = vcmp.eq.s32.totalorder %v19960_v40, 1 }
 0x7d9   : > { %v9989_v46 = vsel %vm19944_vm3, %v9948_v45, 0.0  ;;  %v9908_v41 = vadd.f32 %v19381_v12, %v9860_v10  ;;  %vm19967_vm3 = vcmp.eq.s32.totalorder %v19966_v2, 1 }
 0x7da   : > { %10030 = vst.msk [vmem:[%s19390_s23 + $0x98] sm:$0xff] %vm19945_vm5, %v9989_v46  ;;  %v9741_v47 = vpop.f32.mrf.mxu0  ;;  %v19963_v46 = vld [vmem:[#allocation30_spill] sm:$0xff]  ;;  %vm19968_vm5 = vmmov %vm19950_vm2 }
 0x7db   : > { %v9949_v37 = vmax.f32 %v9908_v41, 0.0  ;;  %v9861_v1 = vadd.f32 %v9741_v47, %v19285_v56  ;;  %vm19964_vm9 = vcmp.eq.s32.totalorder %v19963_v46, 1  ;;  %v19987_v46 = vld [vmem:[#allocation38_spill] sm:$0xff] }
 0x7dc   : > { %v14529_v35 = vpop.f32.mrf.mxu0 }
 0x7dd   : > { %v9990_v60 = vsel %vm1059_vm1, %v9949_v37, 0.0  ;;  %v9909_v21 = vadd.f32 %v19381_v12, %v9861_v1  ;;  %vm19952_vm1 = vcmp.eq.s32.totalorder %v19951_v27, 1 }
 0x7de   : > { %10031 = vst.msk [vmem:[%s19390_s23 + $0xa0] sm:$0xff] %vm19947_vm15, %v9990_v60  ;;  %v9746_v39 = vpop.f32.mrf.mxu0 }
 0x7df   : > { %v9950_v26 = vmax.f32 %v9909_v21, 0.0  ;;  %v9862_v38 = vadd.f32 %v9746_v39, %v19291_v48 }
 0x7e0   : > { %v14532_v59 = vpop.f32.mrf.mxu0 }
 0x7e1   : > { %v9991_v32 = vsel %vm19949_vm0, %v9950_v26, 0.0  ;;  %v9910_v56 = vadd.f32 %v19381_v12, %v9862_v38  ;;  %v19969_v59 = vld [vmem:[#allocation32_spill] sm:$0xff]  ;;  %vm19971_vm0 = vmmov %vm19950_vm2 }
 0x7e2   : > { %10032 = vst.msk [vmem:[%s19390_s23 + $0xa8] sm:$0xff] %vm19950_vm2, %v9991_v32  ;;  %v9751_v5 = vpop.f32.mrf.mxu0  ;;  %vm19970_vm15 = vcmp.eq.s32.totalorder %v19969_v59, 1 }
 0x7e3   : > { %v9951_v25 = vmax.f32 %v9910_v56, 0.0  ;;  %v9863_v43 = vadd.f32 %v9751_v5, %v19297_v6 }
 0x7e4   : > { %v14535_v17 = vpop.f32.mrf.mxu0 }
 0x7e5   : > { %v9992_v29 = vsel %vm19952_vm1, %v9951_v25, 0.0  ;;  %v9911_v48 = vadd.f32 %v19381_v12, %v9863_v43  ;;  %v19972_v43 = vld [vmem:[#allocation33_spill] sm:$0xff]  ;;  %vm19974_vm1 = vmmov %vm19971_vm0 }
 0x7e6   : > { %10033 = vst.msk [vmem:[%s19390_s23 + $0xb0] sm:$0xff] %vm19953_vm6, %v9992_v29  ;;  %v9756_v51 = vpop.f32.mrf.mxu0  ;;  %vm19973_vm2 = vcmp.eq.s32.totalorder %v19972_v43, 1 }
 0x7e7   : > { %v9952_v9 = vmax.f32 %v9911_v48, 0.0  ;;  %v9864_v63 = vadd.f32 %v9756_v51, %v19303_v61 }
 0x7e8   : > { %v14538_v49 = vpop.f32.mrf.mxu0 }
 0x7e9   : > { %v9993_v53 = vsel %vm19955_vm8, %v9952_v9, 0.0  ;;  %v9912_v6 = vadd.f32 %v19381_v12, %v9864_v63  ;;  %v19975_v9 = vld [vmem:[#allocation34_spill] sm:$0xff]  ;;  %vm19977_vm8 = vmmov %vm19971_vm0 }
 0x7ea   : > { %10034 = vst.msk [vmem:[%s19390_s23 + $0xb8] sm:$0xff] %vm19956_vm10, %v9993_v53  ;;  %v9761_v8 = vpop.f32.mrf.mxu0  ;;  %vm19976_vm6 = vcmp.eq.s32.totalorder %v19975_v9, 1 }
 0x7eb   : > { %v9953_v19 = vmax.f32 %v9912_v6, 0.0  ;;  %v9865_v11 = vadd.f32 %v9761_v8, %v19309_v13  ;;  %v19978_v8 = vld [vmem:[#allocation35_spill] sm:$0xff] }
 0x7ec   : > { %v14541_v57 = vpop.f32.mrf.mxu0  ;;  %vm19979_vm10 = vcmp.eq.s32.totalorder %v19978_v8, 1 }
 0x7ed   : > { %v9994_v34 = vsel %vm19958_vm12, %v9953_v19, 0.0  ;;  %v9913_v61 = vadd.f32 %v19381_v12, %v9865_v11  ;;  %vm19980_vm12 = vmmov %vm19971_vm0 }
 0x7ee   : > { %10035 = vst.msk [vmem:[%s19390_s23 + $0xc0] sm:$0xff] %vm19959_vm13, %v9994_v34  ;;  %v9766_v23 = vpop.f32.mrf.mxu0 }
 0x7ef   : > { %v9954_v54 = vmax.f32 %v9913_v61, 0.0  ;;  %v9866_v24 = vadd.f32 %v9766_v23, %v19315_v33  ;;  %v19981_v61 = vld [vmem:[#allocation36_spill] sm:$0xff] }
 0x7f0   : > { %v14544_v4 = vpop.f32.mrf.mxu0  ;;  %vm19982_vm13 = vcmp.eq.s32.totalorder %v19981_v61, 1 }
 0x7f1   : > { %v9995_v18 = vsel %vm19961_vm11, %v9954_v54, 0.0  ;;  %v9914_v13 = vadd.f32 %v19381_v12, %v9866_v24  ;;  %vm19983_vm11 = vmmov %vm19971_vm0 }
 0x7f2   : > { %10036 = vst.msk [vmem:[%s19390_s23 + $0xc8] sm:$0xff] %vm19962_vm14, %v9995_v18  ;;  %v9771_v45 = vpop.f32.mrf.mxu0  ;;  %v19984_v18 = vld [vmem:[#allocation37_spill] sm:$0xff] }
 0x7f3   : > { %v9955_v10 = vmax.f32 %v9914_v13, 0.0  ;;  %v9867_v50 = vadd.f32 %v9771_v45, %v19321_v7  ;;  %vm19985_vm14 = vcmp.eq.s32.totalorder %v19984_v18, 1 }
 0x7f4   : > { %v14547_v28 = vpop.f32.mrf.mxu0 }
 0x7f5   : > { %v9996_v41 = vsel %vm19964_vm9, %v9955_v10, 0.0  ;;  %v9915_v33 = vadd.f32 %v19381_v12, %v9867_v50  ;;  %vm19986_vm9 = vmmov %vm19971_vm0 }
 0x7f6   : > { %10037 = vst.msk [vmem:[%s19390_s23 + $0xd0] sm:$0xff] %vm19965_vm7, %v9996_v41  ;;  %v9776_v47 = vpop.f32.mrf.mxu0  ;;  %vm19988_vm7 = vcmp.eq.s32.totalorder %v19987_v46, 1 }
 0x7f7   : > { %v9956_v37 = vmax.f32 %v9915_v33, 0.0  ;;  %v9868_v1 = vadd.f32 %v9776_v47, %v19327_v52 }
 0x7f8   : > { %v14550_v35 = vpop.f32.mrf.mxu0 }
 0x7f9   : > { %v9997_v60 = vsel %vm19967_vm3, %v9956_v37, 0.0  ;;  %v9916_v7 = vadd.f32 %v19381_v12, %v9868_v1  ;;  %vm19989_vm3 = vmmov %vm19971_vm0  ;;  %v19990_v35 = vld [vmem:[#allocation39_spill] sm:$0xff] }
 0x7fa   : > { %10038 = vst.msk [vmem:[%s19390_s23 + $0xd8] sm:$0xff] %vm19968_vm5, %v9997_v60  ;;  %v9781_v21 = vpop.f32.mrf.mxu0  ;;  %vm19991_vm5 = vcmp.eq.s32.totalorder %v19990_v35, 1 }
 0x7fb   : > { %v9957_v39 = vmax.f32 %v9916_v7, 0.0  ;;  %v9869_v26 = vadd.f32 %v9781_v21, %v19333_v44 }
 0x7fc   : > { %v14553_v38 = vpop.f32.mrf.mxu0 }
 0x7fd   : > { %v9998_v14 = vsel %vm19970_vm15, %v9957_v39, 0.0  ;;  %v9917_v52 = vadd.f32 %v19381_v12, %v9869_v26  ;;  %vm19992_vm15 = vmmov %vm19971_vm0  ;;  %v19993_v26 = vld [vmem:[#allocation40_spill] sm:$0xff] }
 0x7fe   : > { %10039 = vst.msk [vmem:[%s19390_s23 + $0xe0] sm:$0xff] %vm19971_vm0, %v9998_v14  ;;  %v9786_v32 = vpop.f32.mrf.mxu0  ;;  %vm19994_vm0 = vcmp.eq.s32.totalorder %v19993_v26, 1 }
 0x7ff   : > { %v9958_v56 = vmax.f32 %v9917_v52, 0.0  ;;  %v9870_v5 = vadd.f32 %v9786_v32, %v19339_v31 }
 0x800   : > { %v14556_v25 = vpop.f32.mrf.mxu0 }
 0x801   : > { %v9999_v17 = vsel %vm19973_vm2, %v9958_v56, 0.0  ;;  %v9918_v44 = vadd.f32 %v19381_v12, %v9870_v5  ;;  %vm19995_vm2 = vmmov %vm19974_vm1  ;;  %v19996_v56 = vld [vmem:[#allocation41_spill] sm:$0xff] }
 0x802   : > { %10040 = vst.msk [vmem:[%s19390_s23 + $0xe8] sm:$0xff] %vm19974_vm1, %v9999_v17  ;;  %v9791_v27 = vpop.f32.mrf.mxu0  ;;  %vm19997_vm1 = vcmp.eq.s32.totalorder %v19996_v56, 1 }
 0x803   : > { %v9959_v29 = vmax.f32 %v9918_v44, 0.0  ;;  %v9871_v48 = vadd.f32 %v9791_v27, %v19345_v15  ;;  %v19999_v27 = vld [vmem:[#allocation42_spill] sm:$0xff] }
 0x804   : > { %v14559_v51 = vpop.f32.mrf.mxu0 }
 0x805   : > { %v10000_v63 = vsel %vm19976_vm6, %v9959_v29, 0.0  ;;  %v9919_v31 = vadd.f32 %v19381_v12, %v9871_v48  ;;  %vm19998_vm6 = vmmov %vm19995_vm2 }
 0x806   : > { %10041 = vst.msk [vmem:[%s19390_s23 + $0xf0] sm:$0xff] %vm19977_vm8, %v10000_v63  ;;  %v9796_v49 = vpop.f32.mrf.mxu0  ;;  %vm20000_vm8 = vcmp.eq.s32.totalorder %v19999_v27, 1 }
 0x807   : > { %v9960_v62 = vmax.f32 %v9919_v31, 0.0  ;;  %v9872_v53 = vadd.f32 %v9796_v49, %v19351_v0  ;;  %v20002_v31 = vld [vmem:[#allocation43_spill] sm:$0xff] }
 0x808   : > { %v14562_v6 = vpop.f32.mrf.mxu0 }
 0x809   : > { %v10001_v19 = vsel %vm19979_vm10, %v9960_v62, 0.0  ;;  %v9920_v15 = vadd.f32 %v19381_v12, %v9872_v53  ;;  %vm20001_vm10 = vmmov %vm19995_vm2 }
 0x80a   : > { %10042 = vst.msk [vmem:[%s19390_s23 + $0xf8] sm:$0xff] %vm19980_vm12, %v10001_v19  ;;  %v9801_v11 = vpop.f32.mrf.mxu0  ;;  %vm20003_vm12 = vcmp.eq.s32.totalorder %v20002_v31, 1 }
 0x80b   : > { %v9961_v57 = vmax.f32 %v9920_v15, 0.0  ;;  %v9873_v55 = vadd.f32 %v9801_v11, %v19355_v22 }
 0x80c   : > { %v14565_v34 = vpop.f32.mrf.mxu0 }
 0x80d   : > { %v10002_v23 = vsel %vm19982_vm13, %v9961_v57, 0.0  ;;  %v9921_v0 = vadd.f32 %v19381_v12, %v9873_v55  ;;  %vm20004_vm13 = vmmov %vm19995_vm2 }
 0x80e   : > { %10043 = vst.msk [vmem:[%s19390_s23 + $0x100] sm:$0xff] %vm19983_vm11, %v10002_v23  ;;  %v9806_v54 = vpop.f32.mrf.mxu0  ;;  %vm10051_vm11 = vcmask 257024  }
 0x80f   : > { %v9962_v24 = vmax.f32 %v9921_v0, 0.0  ;;  %v9874_v4 = vadd.f32 %v9806_v54, %v19358_v20 }
 0x810   : > { %v14568_v40 = vpop.f32.mrf.mxu0 }
 0x811   : > { %v10003_v13 = vsel %vm19985_vm14, %v9962_v24, 0.0  ;;  %v9922_v22 = vadd.f32 %v19381_v12, %v9874_v4 }
 0x812   : > { %10044 = vst.msk [vmem:[%s19390_s23 + $0x108] sm:$0xff] %vm19986_vm9, %v10003_v13  ;;  %v9811_v45 = vpop.f32.mrf.mxu0 }
 0x813   : > { %v9963_v10 = vmax.f32 %v9922_v22, 0.0  ;;  %v9875_v50 = vadd.f32 %v9811_v45, %v19361_v3 }
 0x814   : > { %v14571_v28 = vpop.f32.mrf.mxu0 }
 0x815   : > { %v10004_v41 = vsel %vm19988_vm7, %v9963_v10, 0.0  ;;  %v9923_v20 = vadd.f32 %v19381_v12, %v9875_v50 }
 0x816   : > { %10045 = vst.msk [vmem:[%s19390_s23 + $0x110] sm:$0xff] %vm19989_vm3, %v10004_v41  ;;  %v9816_v33 = vpop.f32.mrf.mxu0 }
 0x817   : > { %v9964_v47 = vmax.f32 %v9923_v20, 0.0  ;;  %v9876_v37 = vadd.f32 %v9816_v33, %v19364_v30 }
 0x818   : > { %v14574_v1 = vpop.f32.mrf.mxu0 }
 0x819   : > { %v10005_v2 = vsel %vm19991_vm5, %v9964_v47, 0.0  ;;  %v9924_v3 = vadd.f32 %v19381_v12, %v9876_v37 }
 0x81a   : > { %10046 = vst.msk [vmem:[%s19390_s23 + $0x118] sm:$0xff] %vm19992_vm15, %v10005_v2  ;;  %v9821_v60 = vpop.f32.mrf.mxu0 }
 0x81b   : > { %v9965_v7 = vmax.f32 %v9924_v3, 0.0  ;;  %v9877_v21 = vadd.f32 %v9821_v60, %v19367_v36 }
 0x81c   : > { %v14577_v39 = vpop.f32.mrf.mxu0 }
 0x81d   : > { %v10006_v38 = vsel %vm19994_vm0, %v9965_v7, 0.0  ;;  %v9925_v30 = vadd.f32 %v19381_v12, %v9877_v21 }
 0x81e   : > { %10047 = vst.msk [vmem:[%s19390_s23 + $0x120] sm:$0xff] %vm19995_vm2, %v10006_v38  ;;  %v9826_v59 = vpop.f32.mrf.mxu0 }
 0x81f   : > { %v9966_v14 = vmax.f32 %v9925_v30, 0.0  ;;  %v9878_v52 = vadd.f32 %v9826_v59, %v19370_v58 }
 0x820   : > { %v14580_v32 = vpop.f32.mrf.mxu0 }
 0x821   : > { %v10007_v5 = vsel %vm19997_vm1, %v9966_v14, 0.0  ;;  %v9926_v36 = vadd.f32 %v19381_v12, %v9878_v52 }
 0x822   : > { %10048 = vst.msk [vmem:[%s19390_s23 + $0x128] sm:$0xff] %vm19998_vm6, %v10007_v5  ;;  %v9831_v25 = vpop.f32.mrf.mxu0 }
 0x823   : > { %v9967_v43 = vmax.f32 %v9926_v36, 0.0  ;;  %v9879_v17 = vadd.f32 %v9831_v25, %v19373_v42 }
 0x824   : > { %v14583_v44 = vpop.f32.mrf.mxu0 }
 0x825   : > { %v10008_v29 = vsel %vm20000_vm8, %v9967_v43, 0.0  ;;  %v9927_v58 = vadd.f32 %v19381_v12, %v9879_v17 }
 0x826   : > { %10049 = vst.msk [vmem:[%s19390_s23 + $0x130] sm:$0xff] %vm20001_vm10, %v10008_v29  ;;  %v9836_v48 = vpop.f32.mrf.mxu0 }
 0x827   : > { %v9968_v51 = vmax.f32 %v9927_v58, 0.0  ;;  %v9880_v9 = vadd.f32 %v9836_v48, %v19376_v16 }
 0x828   : > { %v14586_v63 = vpop.f32.mrf.mxu0 }
 0x829   : > { %v10009_v49 = vsel %vm20003_vm12, %v9968_v51, 0.0  ;;  %v9928_v62 = vadd.f32 %v19381_v12, %v9880_v9 }
 0x82a   : > { %10050 = vst.msk [vmem:[%s19390_s23 + $0x138] sm:$0xff] %vm20004_vm13, %v10009_v49 }
 0x82b   : > { %v9969_v42 = vmax.f32 %v9928_v62, 0.0 }
 0x82d   : > { %v10010_v6 = vsel %vm1079_vm4, %v9969_v42, 0.0 }
 0x82e   : > { %10052 = vst.msk [vmem:[%s19390_s23 + $0x140] sm:$0xf] %vm10051_vm11, %v10010_v6 }
 0x82f PF: > { %s18_s27 = sadd.s32 1, %s14616_s27  }
 0x830   : > { %p15_p4 = scmp.ge.s32.totalorder %s18_s27, 4  }
 0x832   :  { %17 = sbr.rel (!%p15_p4) target bundleno = 1 (0x1), region = 98 }

</bundles_post_ra>
